<compile_context>
chip_gen: v7x
topology: tpu7x:2x2x1
jax: 0.10.0
libtpu: 0.0.40
codegen_flags: <defaults>
</compile_context>

<pallas_src>
import functools
import re

import numpy as np
import jax
import jax.numpy as jnp
from jax.experimental import pallas as pl
from jax.experimental.pallas import tpu as pltpu

SELU_ALPHA = 1.6732632423543772
SELU_SCALE = 1.0507009873554805
LEAKY_SLOPE = 0.2
NEG_INF = -1e30


def _selu(x):
    return SELU_SCALE * jnp.where(x > 0, x, SELU_ALPHA * (jnp.exp(x) - 1.0))


# ----------------------------- Pallas kernels ------------------------------

def _attention_head(fs, el_row, er_col, bias_row, mask, ones_col):
    """One (input-slab, head) GAT attention block for a dst tile.

    fs:       [N, F]  projected src features (bf16, sliced from the resident slab)
    el_row:   [1, N]  precomputed src attention scores (f32)
    er_col:   [TD, 1] precomputed dst attention scores (f32)
    bias_row: [1, F]
    mask:     [TD, N] adjacency (dst, src)
    ones_col: [N, 1]  bf16 ones (folds the softmax denominator into the agg matmul)
    returns SELU(aggregation + bias): [TD, F] f32
    """
    e = er_col + el_row                                     # [TD, N] f32
    e = jnp.maximum(e, LEAKY_SLOPE * e)                     # LeakyReLU(0.2), no select
    e = jnp.where(mask, e, NEG_INF)
    # Clamp the row max at 0: all-masked rows get m=0 so exp(NEG_INF - m) == 0 exactly,
    # which replaces the old maskf multiply (and its [TD,N] f32 buffer).
    m = jnp.maximum(jnp.max(e, axis=-1, keepdims=True), 0.0)
    # Row-max subtraction in f32; exp on bf16 input (bf16 EUP path on v6e/v7x).
    p = jnp.exp((e - m).astype(jnp.bfloat16))               # [TD, N] bf16, masked -> exactly 0
    fs_aug = jnp.concatenate([fs, ones_col], axis=-1)       # [N, F+1] bf16
    rd = jnp.dot(p, fs_aug, preferred_element_type=jnp.float32)  # [TD, F+1]: rst | denom
    rst, denom = rd[:, :-1], rd[:, -1:]
    inv = pl.reciprocal(jnp.where(denom == 0.0, 1.0, denom), approx=True)
    return _selu(rst * inv + bias_row)


def gat_layer_kernel(adj_ref, feat_ref, el_ref, er_ref, b_ref, o_ref, *, SH, H, F_out):
    # adj_ref:  [TD, N] int8 (adj_t[dst, src])      feat_ref: [N, SH*F_out] bf16 (resident)
    # el_ref:   [SH, N] f32  (resident)             er_ref:   [TD, SH] f32 (dst tile)
    # b_ref:    [H, F_out]                          o_ref:    [TD, SH*F_out] f32
    mask = adj_ref[...] != 0
    n = adj_ref.shape[1]
    ones_col = jnp.ones((n, 1), jnp.bfloat16)
    er_all = er_ref[...]
    S = SH // H
    for s in range(S):                              # static unroll over input slabs
        heads = []
        for h in range(H):                          # static unroll over output heads
            sh = s * H + h
            heads.append(_attention_head(
                feat_ref[:, sh * F_out:(sh + 1) * F_out],
                el_ref[sh:sh + 1, :],
                er_all[:, sh:sh + 1],
                b_ref[h:h + 1, :],
                mask, ones_col))
        # per-slab lane-dense store (keeps live ranges short; no big end-of-kernel concat)
        o_ref[:, s * H * F_out:(s + 1) * H * F_out] = jnp.concatenate(heads, axis=-1)


def gat_final_kernel(adj_ref, feat_ref, el_ref, er_ref, b_ref, wc_ref, bc_ref, o_ref,
                     *, SH, H, F_out):
    # Last GAT layer fused with head-mean + classifier Linear + Softmax/Sigmoid.
    mask = adj_ref[...] != 0
    n = adj_ref.shape[1]
    td = adj_ref.shape[0]
    ones_col = jnp.ones((n, 1), jnp.bfloat16)
    er_all = er_ref[...]
    acc = jnp.zeros((td, F_out), jnp.float32)
    for sh in range(SH):
        h = sh % H
        acc = acc + _attention_head(
            feat_ref[:, sh * F_out:(sh + 1) * F_out],
            el_ref[sh:sh + 1, :],
            er_all[:, sh:sh + 1],
            b_ref[h:h + 1, :],
            mask, ones_col)
    h_mean = acc * (1.0 / float(SH))                # mean over all head dims
    logits = jnp.dot(h_mean, wc_ref[...], preferred_element_type=jnp.float32) + bc_ref[...]
    if logits.shape[-1] > 1:                        # Softmax(dim=1)
        mx = jnp.max(logits, axis=-1, keepdims=True)
        ex = jnp.exp(logits - mx)
        o_ref[...] = ex / jnp.sum(ex, axis=-1, keepdims=True)
    else:                                           # Sigmoid when n_classes == 1
        o_ref[...] = 1.0 / (1.0 + jnp.exp(-logits))


# ------------------------------ call wrappers -------------------------------

@functools.lru_cache(maxsize=None)
def _tpu_generation():
    try:
        kind = jax.devices()[0].device_kind.lower()
    except Exception:
        return 6
    m = re.search(r"(\d+)", kind)
    return int(m.group(1)) if m else 6


def _pick_dst_tile(n, gen):
    # Keep the f32 [TD, N] attention-map temporaries well inside per-core VMEM:
    # v7x has only 64 MiB/TC -> cap TD at 256 and use a smaller map budget.
    budget = (12 << 20) if gen >= 7 else (24 << 20)
    cap = max(64, min(256 if gen >= 7 else 1024, budget // (4 * n)))
    for td in (1024, 512, 256, 128, 64):
        if td <= cap and n > td and n % td == 0:
            return td
    return n


def _vmem_limit_bytes(n, td, shf, sh, c_out, gen):
    # adjacency (i8, double-buffered) + mask + e (f32) + p (bf16) + resident bf16 feat +
    # el + double-buffered er/out, with headroom.
    est = td * n * 12 + 4 * n * shf + 8 * sh * n + 8 * td * (shf + c_out) + (4 << 20)
    if gen >= 7:
        cap = 48 << 20        # v7x: 64 MiB/TC physical -> leave pipeline headroom
    elif gen >= 4:
        cap = 100 << 20       # v4/v5e/v6e: 128 MiB physical; override the small scoped default
    else:
        cap = 16 << 20
    return int(min(max(int(1.5 * est), min(24 << 20, cap)), cap))


def _layer_precompute(h, W, attn_l, attn_r, *, S, H, F_in, F_out):
    """dst-independent, once-per-layer work (hoisted out of the dst-tile grid): projection and
    per-node attention scores. Plain XLA matmuls (tiny relative to the [N,N] attention maps)."""
    N = h.shape[0]
    h3 = h.reshape(N, S, F_in)
    feat = jnp.einsum('nsi,io->nso', h3, W)                          # [N, S, H*F_out] f32
    feat4 = feat.reshape(N, S, H, F_out)
    el = jnp.einsum('nshf,hf->nsh', feat4, attn_l).reshape(N, S * H)  # src scores
    er = jnp.einsum('nshf,hf->nsh', feat4, attn_r).reshape(N, S * H)  # dst scores
    feat_flat = feat.reshape(N, S * H * F_out).astype(jnp.bfloat16)   # resident agg operand
    return feat_flat, el.T, er                                        # el as [S*H, N]


def _gat_layer_pallas(adj_t, feat, el_t, er, bias, *, SH, H, F_out, final,
                      Wc=None, bc=None, gen=6):
    N = adj_t.shape[0]
    TD = _pick_dst_tile(N, gen)
    D = N // TD
    SHF = SH * F_out
    if final:
        C_out = Wc.shape[1]
        kernel = functools.partial(gat_final_kernel, SH=SH, H=H, F_out=F_out)
    else:
        C_out = SHF
        kernel = functools.partial(gat_layer_kernel, SH=SH, H=H, F_out=F_out)

    in_specs = [
        pl.BlockSpec((TD, N), lambda d: (d, 0)),       # adjacency tile (dst rows, all src)
        pl.BlockSpec((N, SHF), lambda d: (0, 0)),      # projected features (bf16, resident)
        pl.BlockSpec((SH, N), lambda d: (0, 0)),       # el (src scores), resident
        pl.BlockSpec((TD, SH), lambda d: (d, 0)),      # er (dst scores), dst tile
        pl.BlockSpec((H, F_out), lambda d: (0, 0)),    # bias
    ]
    args = [adj_t, feat, el_t, er, bias]
    if final:
        in_specs += [pl.BlockSpec((F_out, C_out), lambda d: (0, 0)),
                     pl.BlockSpec((1, C_out), lambda d: (0, 0))]
        args += [Wc, bc.reshape(1, C_out)]

    return pl.pallas_call(
        kernel,
        grid=(D,),
        in_specs=in_specs,
        out_specs=pl.BlockSpec((TD, C_out), lambda d: (d, 0)),
        out_shape=jax.ShapeDtypeStruct((N, C_out), jnp.float32),
        compiler_params=pltpu.CompilerParams(
            dimension_semantics=("parallel",),
            vmem_limit_bytes=_vmem_limit_bytes(N, TD, SHF, SH, C_out, gen),
        ),
    )(*args)


def prepare_adjacency(adj):
    """One-time preprocessing (hoist out of the jitted forward pass):
    adj[src, dst] (any dtype) -> adj_t[dst, src] int8."""
    return (adj.T != 0).astype(jnp.int8)


def gat_full_forward(adj_t, x, params):
    """adj_t: [N, N] int8 with adj_t[dst, src] != 0 for an edge src->dst (see prepare_adjacency);
    x: [N, in_feats]."""
    layers = params["layers"]
    Wc, bc = params["classifier"]
    n_layers = len(layers)
    gen = _tpu_generation()

    h = x.astype(jnp.float32)           # lane-dense [N, S*F] slab, S = 1 initially
    S = 1
    out = None
    for li, (W, attn_l, attn_r, bias) in enumerate(layers):
        H, F_out = attn_l.shape
        F_in = W.shape[0]
        feat, el_t, er = _layer_precompute(h, W, attn_l, attn_r, S=S, H=H, F_in=F_in, F_out=F_out)
        final = li == n_layers - 1
        if final:
            out = _gat_layer_pallas(adj_t, feat, el_t, er, bias, SH=S * H, H=H, F_out=F_out,
                                    final=True, Wc=Wc, bc=bc, gen=gen)
        else:
            h = _gat_layer_pallas(adj_t, feat, el_t, er, bias, SH=S * H, H=H, F_out=F_out,
                                  final=False, gen=gen)
            S = S * H
    return out


# -------------------------- pure-JAX reference -----------------------------

def gat_full_forward_ref(adj, x, params):
    N = x.shape[0]
    adj_t = adj.T != 0                          # [dst, src]
    h = x.astype(jnp.float32)[:, None, :]       # [N, P, F]
    for (W, attn_l, attn_r, bias) in params["layers"]:
        H, F_out = attn_l.shape
        _, P, F_in = h.shape
        feat = (h.reshape(N * P, F_in) @ W).reshape(N, P, H, F_out)
        el = jnp.sum(feat * attn_l[None, None], axis=-1)              # [N, P, H] src scores
        er = jnp.sum(feat * attn_r[None, None], axis=-1)              # [N, P, H] dst scores
        e = er[:, None] + el[None, :]                                 # [dst, src, P, H]
        e = jnp.where(e > 0, e, LEAKY_SLOPE * e)
        mask = adj_t[:, :, None, None]
        e = jnp.where(mask, e, NEG_INF)
        m = jnp.max(e, axis=1, keepdims=True)
        p = jnp.exp(e - m) * mask.astype(jnp.float32)
        dsum = jnp.sum(p, axis=1, keepdims=True)
        alpha = p / jnp.where(dsum == 0.0, 1.0, dsum)
        rst = jnp.einsum("dsph,spho->dpho", alpha, feat) + bias[None, None]
        h = _selu(rst).reshape(N, P * H, F_out)
    h_mean = jnp.mean(h, axis=1)
    Wc, bc = params["classifier"]
    logits = h_mean @ Wc + bc[None, :]
    if logits.shape[-1] > 1:
        return jax.nn.softmax(logits, axis=1)
    return jax.nn.sigmoid(logits)


# ------------------------------ parameter init ------------------------------

def init_params(key, in_feats, n_hidden, n_classes, n_layers, num_head):
    layers = []
    dims_in = [in_feats] + [n_hidden] * (n_layers - 1)
    for li in range(n_layers):
        key, k1, k2, k3, k4 = jax.random.split(key, 5)
        F_in = dims_in[li]
        W = 0.1 * jax.random.normal(k1, (F_in, num_head * n_hidden), jnp.float32)
        attn_l = 0.1 * jax.random.normal(k2, (num_head, n_hidden), jnp.float32)
        attn_r = 0.1 * jax.random.normal(k3, (num_head, n_hidden), jnp.float32)
        bias = 0.1 * jax.random.normal(k4, (num_head, n_hidden), jnp.float32)
        layers.append((W, attn_l, attn_r, bias))
    key, kc, kb = jax.random.split(key, 3)
    Wc = 0.1 * jax.random.normal(kc, (n_hidden, n_classes), jnp.float32)
    bc = 0.1 * jax.random.normal(kb, (n_classes,), jnp.float32)
    return {"layers": layers, "classifier": (Wc, bc)}


if __name__ == "__main__":
    N = 256          # number of graph nodes (exercises a 2-step dst-tile grid)
    in_feats = 32
    n_hidden = 16
    n_classes = 4
    n_layers = 2
    num_head = 2

    key = jax.random.PRNGKey(0)
    key, kx, ka, kp = jax.random.split(key, 4)
    x = jax.random.normal(kx, (N, in_feats), jnp.float32)
    adj = (jax.random.uniform(ka, (N, N)) < 0.4).astype(jnp.float32)   # adj[src, dst]
    adj = adj.at[:, :2].set(0.0)     # two zero-in-degree dst nodes (allow_zero_in_degree path)
    params = init_params(kp, in_feats, n_hidden, n_classes, n_layers, num_head)

    adj_t = prepare_adjacency(adj)   # one-time prep, hoisted out of the forward pass

    out = jax.jit(gat_full_forward)(adj_t, x, params)
    out = jax.block_until_ready(out)

    ref = jax.jit(gat_full_forward_ref)(adj, x, params)
    ref = jax.block_until_ready(ref)

    # Tolerance reflects the deliberate bf16 aggregation + approx-reciprocal trade vs f32 ref.
    np.testing.assert_allclose(np.asarray(out), np.asarray(ref), rtol=1e-2, atol=5e-3)
    assert out.shape == (N, n_classes)
    print("KERNEL_OK")
</pallas_src>

<mosaic_0001>
module attributes {stable_mosaic.version = 11 : i64} {
  func.func @gat_layer_kernel(%arg0: i32, %arg1: memref<128x256xi8, #tpu.memory_space<vmem>>, %arg2: memref<256x32xbf16, #tpu.memory_space<vmem>>, %arg3: memref<2x256xf32, #tpu.memory_space<vmem>>, %arg4: memref<128x2xf32, #tpu.memory_space<vmem>>, %arg5: memref<2x16xf32, #tpu.memory_space<vmem>>, %arg6: memref<128x32xf32, #tpu.memory_space<vmem>>) attributes {dimension_semantics = [#tpu.dimension_semantics<parallel>], iteration_bounds = array<i64: 2>, scalar_prefetch = 0 : i64, scratch_operands = 0 : i64, tpu.core_type = #tpu.core_type<tc>, window_params = [{transform_indices = @transform_0, window_bounds = array<i64: 128, 256>}, {pipeline_mode = #tpu.pipeline_mode<synchronous>, transform_indices = @transform_1, window_bounds = array<i64: 256, 32>}, {pipeline_mode = #tpu.pipeline_mode<synchronous>, transform_indices = @transform_2, window_bounds = array<i64: 2, 256>}, {transform_indices = @transform_3, window_bounds = array<i64: 128, 2>}, {pipeline_mode = #tpu.pipeline_mode<synchronous>, transform_indices = @transform_4, window_bounds = array<i64: 2, 16>}, {transform_indices = @transform_5, window_bounds = array<i64: 128, 32>}]} {
    %c0 = arith.constant 0 : index
    %c0_0 = arith.constant 0 : index
    %0 = vector.load %arg1[%c0, %c0_0] : memref<128x256xi8, #tpu.memory_space<vmem>>, vector<128x256xi8>
    %c0_i8 = arith.constant 0 : i8
    %1 = vector.broadcast %c0_i8 : i8 to vector<128x256xi8>
    %2 = arith.cmpi ne, %0, %1 : vector<128x256xi8>
    %cst = arith.constant 1.000000e+00 : bf16
    %3 = vector.broadcast %cst : bf16 to vector<256x1xbf16>
    %c0_1 = arith.constant 0 : index
    %c0_2 = arith.constant 0 : index
    %4 = vector.load %arg4[%c0_1, %c0_2] : memref<128x2xf32, #tpu.memory_space<vmem>>, vector<128x2xf32>
    %c0_3 = arith.constant 0 : index
    %c0_4 = arith.constant 0 : index
    %5 = vector.load %arg2[%c0_3, %c0_4] : memref<256x32xbf16, #tpu.memory_space<vmem>>, vector<256x16xbf16>
    %c0_5 = arith.constant 0 : index
    %c0_6 = arith.constant 0 : index
    %6 = vector.load %arg3[%c0_5, %c0_6] : memref<2x256xf32, #tpu.memory_space<vmem>>, vector<1x256xf32>
    %7 = vector.extract_strided_slice %4 {offsets = [0, 0], sizes = [128, 1], strides = [1, 1]} : vector<128x2xf32> to vector<128x1xf32>
    %c0_7 = arith.constant 0 : index
    %c0_8 = arith.constant 0 : index
    %8 = vector.load %arg5[%c0_7, %c0_8] : memref<2x16xf32, #tpu.memory_space<vmem>>, vector<1x16xf32>
    %9 = vector.broadcast %7 : vector<128x1xf32> to vector<128x256xf32>
    %10 = vector.broadcast %6 : vector<1x256xf32> to vector<128x256xf32>
    %11 = arith.addf %9, %10 : vector<128x256xf32>
    %cst_9 = arith.constant 2.000000e-01 : f32
    %12 = vector.broadcast %cst_9 : f32 to vector<128x256xf32>
    %13 = arith.mulf %12, %11 : vector<128x256xf32>
    %14 = arith.maximumf %11, %13 : vector<128x256xf32>
    %cst_10 = arith.constant -1.000000e+30 : f32
    %15 = vector.broadcast %cst_10 : f32 to vector<128x256xf32>
    %16 = arith.select %2, %14, %15 : vector<128x256xi1>, vector<128x256xf32>
    %cst_11 = arith.constant dense<0xFF800000> : vector<128xf32>
    %17 = vector.multi_reduction <maximumf>, %16, %cst_11 [1] : vector<128x256xf32> to vector<128xf32>
    %18 = vector.shape_cast %17 : vector<128xf32> to vector<128x1xf32>
    %cst_12 = arith.constant 0.000000e+00 : f32
    %19 = vector.broadcast %cst_12 : f32 to vector<128x1xf32>
    %20 = arith.maximumf %18, %19 : vector<128x1xf32>
    %21 = vector.broadcast %20 : vector<128x1xf32> to vector<128x256xf32>
    %22 = arith.subf %16, %21 : vector<128x256xf32>
    %23 = arith.truncf %22 : vector<128x256xf32> to vector<128x256xbf16>
    %24 = math.exp %23 : vector<128x256xbf16>
    %25 = tpu.concatenate %5, %3 in 1 : vector<256x16xbf16>, vector<256x1xbf16> -> vector<256x17xbf16>
    %cst_13 = arith.constant dense<0.000000e+00> : vector<128x17xf32>
    %26 = tpu.matmul %24, %25, %cst_13 {dimension_numbers = #tpu.dot_dimension_numbers<[1], [0], [0], [1], [0, 0, 1, 1], [], []>} : vector<128x256xbf16>, vector<256x17xbf16>, vector<128x17xf32> -> vector<128x17xf32>
    %27 = vector.extract_strided_slice %26 {offsets = [0, 0], sizes = [128, 16], strides = [1, 1]} : vector<128x17xf32> to vector<128x16xf32>
    %28 = vector.extract_strided_slice %26 {offsets = [0, 16], sizes = [128, 1], strides = [1, 1]} : vector<128x17xf32> to vector<128x1xf32>
    %cst_14 = arith.constant 0.000000e+00 : f32
    %29 = vector.broadcast %cst_14 : f32 to vector<128x1xf32>
    %30 = arith.cmpf oeq, %28, %29 : vector<128x1xf32>
    %cst_15 = arith.constant 1.000000e+00 : f32
    %31 = vector.broadcast %cst_15 : f32 to vector<128x1xf32>
    %32 = arith.select %30, %31, %28 : vector<128x1xi1>, vector<128x1xf32>
    %33 = tpu.reciprocal %32 {approx = true} : vector<128x1xf32> -> vector<128x1xf32>
    %34 = vector.broadcast %33 : vector<128x1xf32> to vector<128x16xf32>
    %35 = arith.mulf %27, %34 : vector<128x16xf32>
    %36 = vector.broadcast %8 : vector<1x16xf32> to vector<128x16xf32>
    %37 = arith.addf %35, %36 : vector<128x16xf32>
    %cst_16 = arith.constant 0.000000e+00 : f32
    %38 = vector.broadcast %cst_16 : f32 to vector<128x16xf32>
    %39 = arith.cmpf ogt, %37, %38 : vector<128x16xf32>
    %40 = math.exp %37 : vector<128x16xf32>
    %cst_17 = arith.constant 1.000000e+00 : f32
    %41 = vector.broadcast %cst_17 : f32 to vector<128x16xf32>
    %42 = arith.subf %40, %41 : vector<128x16xf32>
    %cst_18 = arith.constant 1.67326319 : f32
    %43 = vector.broadcast %cst_18 : f32 to vector<128x16xf32>
    %44 = arith.mulf %43, %42 : vector<128x16xf32>
    %45 = arith.select %39, %37, %44 : vector<128x16xi1>, vector<128x16xf32>
    %cst_19 = arith.constant 1.05070102 : f32
    %46 = vector.broadcast %cst_19 : f32 to vector<128x16xf32>
    %47 = arith.mulf %46, %45 : vector<128x16xf32>
    %c0_20 = arith.constant 0 : index
    %c16 = arith.constant 16 : index
    %48 = vector.load %arg2[%c0_20, %c16] : memref<256x32xbf16, #tpu.memory_space<vmem>>, vector<256x16xbf16>
    %c1 = arith.constant 1 : index
    %c0_21 = arith.constant 0 : index
    %49 = vector.load %arg3[%c1, %c0_21] : memref<2x256xf32, #tpu.memory_space<vmem>>, vector<1x256xf32>
    %50 = vector.extract_strided_slice %4 {offsets = [0, 1], sizes = [128, 1], strides = [1, 1]} : vector<128x2xf32> to vector<128x1xf32>
    %c1_22 = arith.constant 1 : index
    %c0_23 = arith.constant 0 : index
    %51 = vector.load %arg5[%c1_22, %c0_23] : memref<2x16xf32, #tpu.memory_space<vmem>>, vector<1x16xf32>
    %52 = vector.broadcast %50 : vector<128x1xf32> to vector<128x256xf32>
    %53 = vector.broadcast %49 : vector<1x256xf32> to vector<128x256xf32>
    %54 = arith.addf %52, %53 : vector<128x256xf32>
    %cst_24 = arith.constant 2.000000e-01 : f32
    %55 = vector.broadcast %cst_24 : f32 to vector<128x256xf32>
    %56 = arith.mulf %55, %54 : vector<128x256xf32>
    %57 = arith.maximumf %54, %56 : vector<128x256xf32>
    %cst_25 = arith.constant -1.000000e+30 : f32
    %58 = vector.broadcast %cst_25 : f32 to vector<128x256xf32>
    %59 = arith.select %2, %57, %58 : vector<128x256xi1>, vector<128x256xf32>
    %cst_26 = arith.constant dense<0xFF800000> : vector<128xf32>
    %60 = vector.multi_reduction <maximumf>, %59, %cst_26 [1] : vector<128x256xf32> to vector<128xf32>
    %61 = vector.shape_cast %60 : vector<128xf32> to vector<128x1xf32>
    %cst_27 = arith.constant 0.000000e+00 : f32
    %62 = vector.broadcast %cst_27 : f32 to vector<128x1xf32>
    %63 = arith.maximumf %61, %62 : vector<128x1xf32>
    %64 = vector.broadcast %63 : vector<128x1xf32> to vector<128x256xf32>
    %65 = arith.subf %59, %64 : vector<128x256xf32>
    %66 = arith.truncf %65 : vector<128x256xf32> to vector<128x256xbf16>
    %67 = math.exp %66 : vector<128x256xbf16>
    %68 = tpu.concatenate %48, %3 in 1 : vector<256x16xbf16>, vector<256x1xbf16> -> vector<256x17xbf16>
    %cst_28 = arith.constant dense<0.000000e+00> : vector<128x17xf32>
    %69 = tpu.matmul %67, %68, %cst_28 {dimension_numbers = #tpu.dot_dimension_numbers<[1], [0], [0], [1], [0, 0, 1, 1], [], []>} : vector<128x256xbf16>, vector<256x17xbf16>, vector<128x17xf32> -> vector<128x17xf32>
    %70 = vector.extract_strided_slice %69 {offsets = [0, 0], sizes = [128, 16], strides = [1, 1]} : vector<128x17xf32> to vector<128x16xf32>
    %71 = vector.extract_strided_slice %69 {offsets = [0, 16], sizes = [128, 1], strides = [1, 1]} : vector<128x17xf32> to vector<128x1xf32>
    %cst_29 = arith.constant 0.000000e+00 : f32
    %72 = vector.broadcast %cst_29 : f32 to vector<128x1xf32>
    %73 = arith.cmpf oeq, %71, %72 : vector<128x1xf32>
    %cst_30 = arith.constant 1.000000e+00 : f32
    %74 = vector.broadcast %cst_30 : f32 to vector<128x1xf32>
    %75 = arith.select %73, %74, %71 : vector<128x1xi1>, vector<128x1xf32>
    %76 = tpu.reciprocal %75 {approx = true} : vector<128x1xf32> -> vector<128x1xf32>
    %77 = vector.broadcast %76 : vector<128x1xf32> to vector<128x16xf32>
    %78 = arith.mulf %70, %77 : vector<128x16xf32>
    %79 = vector.broadcast %51 : vector<1x16xf32> to vector<128x16xf32>
    %80 = arith.addf %78, %79 : vector<128x16xf32>
    %cst_31 = arith.constant 0.000000e+00 : f32
    %81 = vector.broadcast %cst_31 : f32 to vector<128x16xf32>
    %82 = arith.cmpf ogt, %80, %81 : vector<128x16xf32>
    %83 = math.exp %80 : vector<128x16xf32>
    %cst_32 = arith.constant 1.000000e+00 : f32
    %84 = vector.broadcast %cst_32 : f32 to vector<128x16xf32>
    %85 = arith.subf %83, %84 : vector<128x16xf32>
    %cst_33 = arith.constant 1.67326319 : f32
    %86 = vector.broadcast %cst_33 : f32 to vector<128x16xf32>
    %87 = arith.mulf %86, %85 : vector<128x16xf32>
    %88 = arith.select %82, %80, %87 : vector<128x16xi1>, vector<128x16xf32>
    %cst_34 = arith.constant 1.05070102 : f32
    %89 = vector.broadcast %cst_34 : f32 to vector<128x16xf32>
    %90 = arith.mulf %89, %88 : vector<128x16xf32>
    %91 = tpu.concatenate %47, %90 in 1 : vector<128x16xf32>, vector<128x16xf32> -> vector<128x32xf32>
    %c0_35 = arith.constant 0 : index
    %c0_36 = arith.constant 0 : index
    %92 = vector.load %arg6[%c0_35, %c0_36] : memref<128x32xf32, #tpu.memory_space<vmem>>, vector<128x32xf32>
    tpu.vector_store %arg6[%c0_35, %c0_36], %91 {strides = array<i32>} : memref<128x32xf32, #tpu.memory_space<vmem>>, vector<128x32xf32>,
    return
  }
  func.func @transform_0(%arg0: i32) -> (i32, i32) {
    %c0_i32 = arith.constant 0 : i32
    %c0_i32_0 = arith.constant 0 : i32
    return %arg0, %c0_i32 : i32, i32
  }
  func.func @transform_1(%arg0: i32) -> (i32, i32) {
    %c0_i32 = arith.constant 0 : i32
    %c0_i32_0 = arith.constant 0 : i32
    %c0_i32_1 = arith.constant 0 : i32
    return %c0_i32, %c0_i32_0 : i32, i32
  }
  func.func @transform_2(%arg0: i32) -> (i32, i32) {
    %c0_i32 = arith.constant 0 : i32
    %c0_i32_0 = arith.constant 0 : i32
    %c0_i32_1 = arith.constant 0 : i32
    return %c0_i32, %c0_i32_0 : i32, i32
  }
  func.func @transform_3(%arg0: i32) -> (i32, i32) {
    %c0_i32 = arith.constant 0 : i32
    %c0_i32_0 = arith.constant 0 : i32
    return %arg0, %c0_i32 : i32, i32
  }
  func.func @transform_4(%arg0: i32) -> (i32, i32) {
    %c0_i32 = arith.constant 0 : i32
    %c0_i32_0 = arith.constant 0 : i32
    %c0_i32_1 = arith.constant 0 : i32
    return %c0_i32, %c0_i32_0 : i32, i32
  }
  func.func @transform_5(%arg0: i32) -> (i32, i32) {
    %c0_i32 = arith.constant 0 : i32
    %c0_i32_0 = arith.constant 0 : i32
    return %arg0, %c0_i32 : i32, i32
  }
}

module attributes {stable_mosaic.version = 11 : i64} {
  func.func @gat_final_kernel(%arg0: i32, %arg1: memref<128x256xi8, #tpu.memory_space<vmem>>, %arg2: memref<256x64xbf16, #tpu.memory_space<vmem>>, %arg3: memref<4x256xf32, #tpu.memory_space<vmem>>, %arg4: memref<128x4xf32, #tpu.memory_space<vmem>>, %arg5: memref<2x16xf32, #tpu.memory_space<vmem>>, %arg6: memref<16x4xf32, #tpu.memory_space<vmem>>, %arg7: memref<1x4xf32, #tpu.memory_space<vmem>>, %arg8: memref<128x4xf32, #tpu.memory_space<vmem>>) attributes {dimension_semantics = [#tpu.dimension_semantics<parallel>], iteration_bounds = array<i64: 2>, scalar_prefetch = 0 : i64, scratch_operands = 0 : i64, tpu.core_type = #tpu.core_type<tc>, window_params = [{transform_indices = @transform_0, window_bounds = array<i64: 128, 256>}, {pipeline_mode = #tpu.pipeline_mode<synchronous>, transform_indices = @transform_1, window_bounds = array<i64: 256, 64>}, {pipeline_mode = #tpu.pipeline_mode<synchronous>, transform_indices = @transform_2, window_bounds = array<i64: 4, 256>}, {transform_indices = @transform_3, window_bounds = array<i64: 128, 4>}, {pipeline_mode = #tpu.pipeline_mode<synchronous>, transform_indices = @transform_4, window_bounds = array<i64: 2, 16>}, {pipeline_mode = #tpu.pipeline_mode<synchronous>, transform_indices = @transform_5, window_bounds = array<i64: 16, 4>}, {pipeline_mode = #tpu.pipeline_mode<synchronous>, transform_indices = @transform_6, window_bounds = array<i64: 1, 4>}, {transform_indices = @transform_7, window_bounds = array<i64: 128, 4>}]} {
    %c0 = arith.constant 0 : index
    %c0_0 = arith.constant 0 : index
    %0 = vector.load %arg1[%c0, %c0_0] : memref<128x256xi8, #tpu.memory_space<vmem>>, vector<128x256xi8>
    %c0_i8 = arith.constant 0 : i8
    %1 = vector.broadcast %c0_i8 : i8 to vector<128x256xi8>
    %2 = arith.cmpi ne, %0, %1 : vector<128x256xi8>
    %cst = arith.constant 1.000000e+00 : bf16
    %3 = vector.broadcast %cst : bf16 to vector<256x1xbf16>
    %c0_1 = arith.constant 0 : index
    %c0_2 = arith.constant 0 : index
    %4 = vector.load %arg4[%c0_1, %c0_2] : memref<128x4xf32, #tpu.memory_space<vmem>>, vector<128x4xf32>
    %cst_3 = arith.constant 0.000000e+00 : f32
    %5 = vector.broadcast %cst_3 : f32 to vector<128x16xf32>
    %c0_4 = arith.constant 0 : index
    %c0_5 = arith.constant 0 : index
    %6 = vector.load %arg2[%c0_4, %c0_5] : memref<256x64xbf16, #tpu.memory_space<vmem>>, vector<256x16xbf16>
    %c0_6 = arith.constant 0 : index
    %c0_7 = arith.constant 0 : index
    %7 = vector.load %arg3[%c0_6, %c0_7] : memref<4x256xf32, #tpu.memory_space<vmem>>, vector<1x256xf32>
    %8 = vector.extract_strided_slice %4 {offsets = [0, 0], sizes = [128, 1], strides = [1, 1]} : vector<128x4xf32> to vector<128x1xf32>
    %c0_8 = arith.constant 0 : index
    %c0_9 = arith.constant 0 : index
    %9 = vector.load %arg5[%c0_8, %c0_9] : memref<2x16xf32, #tpu.memory_space<vmem>>, vector<1x16xf32>
    %10 = vector.broadcast %8 : vector<128x1xf32> to vector<128x256xf32>
    %11 = vector.broadcast %7 : vector<1x256xf32> to vector<128x256xf32>
    %12 = arith.addf %10, %11 : vector<128x256xf32>
    %cst_10 = arith.constant 2.000000e-01 : f32
    %13 = vector.broadcast %cst_10 : f32 to vector<128x256xf32>
    %14 = arith.mulf %13, %12 : vector<128x256xf32>
    %15 = arith.maximumf %12, %14 : vector<128x256xf32>
    %cst_11 = arith.constant -1.000000e+30 : f32
    %16 = vector.broadcast %cst_11 : f32 to vector<128x256xf32>
    %17 = arith.select %2, %15, %16 : vector<128x256xi1>, vector<128x256xf32>
    %cst_12 = arith.constant dense<0xFF800000> : vector<128xf32>
    %18 = vector.multi_reduction <maximumf>, %17, %cst_12 [1] : vector<128x256xf32> to vector<128xf32>
    %19 = vector.shape_cast %18 : vector<128xf32> to vector<128x1xf32>
    %cst_13 = arith.constant 0.000000e+00 : f32
    %20 = vector.broadcast %cst_13 : f32 to vector<128x1xf32>
    %21 = arith.maximumf %19, %20 : vector<128x1xf32>
    %22 = vector.broadcast %21 : vector<128x1xf32> to vector<128x256xf32>
    %23 = arith.subf %17, %22 : vector<128x256xf32>
    %24 = arith.truncf %23 : vector<128x256xf32> to vector<128x256xbf16>
    %25 = math.exp %24 : vector<128x256xbf16>
    %26 = tpu.concatenate %6, %3 in 1 : vector<256x16xbf16>, vector<256x1xbf16> -> vector<256x17xbf16>
    %cst_14 = arith.constant dense<0.000000e+00> : vector<128x17xf32>
    %27 = tpu.matmul %25, %26, %cst_14 {dimension_numbers = #tpu.dot_dimension_numbers<[1], [0], [0], [1], [0, 0, 1, 1], [], []>} : vector<128x256xbf16>, vector<256x17xbf16>, vector<128x17xf32> -> vector<128x17xf32>
    %28 = vector.extract_strided_slice %27 {offsets = [0, 0], sizes = [128, 16], strides = [1, 1]} : vector<128x17xf32> to vector<128x16xf32>
    %29 = vector.extract_strided_slice %27 {offsets = [0, 16], sizes = [128, 1], strides = [1, 1]} : vector<128x17xf32> to vector<128x1xf32>
    %cst_15 = arith.constant 0.000000e+00 : f32
    %30 = vector.broadcast %cst_15 : f32 to vector<128x1xf32>
    %31 = arith.cmpf oeq, %29, %30 : vector<128x1xf32>
    %cst_16 = arith.constant 1.000000e+00 : f32
    %32 = vector.broadcast %cst_16 : f32 to vector<128x1xf32>
    %33 = arith.select %31, %32, %29 : vector<128x1xi1>, vector<128x1xf32>
    %34 = tpu.reciprocal %33 {approx = true} : vector<128x1xf32> -> vector<128x1xf32>
    %35 = vector.broadcast %34 : vector<128x1xf32> to vector<128x16xf32>
    %36 = arith.mulf %28, %35 : vector<128x16xf32>
    %37 = vector.broadcast %9 : vector<1x16xf32> to vector<128x16xf32>
    %38 = arith.addf %36, %37 : vector<128x16xf32>
    %cst_17 = arith.constant 0.000000e+00 : f32
    %39 = vector.broadcast %cst_17 : f32 to vector<128x16xf32>
    %40 = arith.cmpf ogt, %38, %39 : vector<128x16xf32>
    %41 = math.exp %38 : vector<128x16xf32>
    %cst_18 = arith.constant 1.000000e+00 : f32
    %42 = vector.broadcast %cst_18 : f32 to vector<128x16xf32>
    %43 = arith.subf %41, %42 : vector<128x16xf32>
    %cst_19 = arith.constant 1.67326319 : f32
    %44 = vector.broadcast %cst_19 : f32 to vector<128x16xf32>
    %45 = arith.mulf %44, %43 : vector<128x16xf32>
    %46 = arith.select %40, %38, %45 : vector<128x16xi1>, vector<128x16xf32>
    %cst_20 = arith.constant 1.05070102 : f32
    %47 = vector.broadcast %cst_20 : f32 to vector<128x16xf32>
    %48 = arith.mulf %47, %46 : vector<128x16xf32>
    %49 = arith.addf %5, %48 : vector<128x16xf32>
    %c0_21 = arith.constant 0 : index
    %c16 = arith.constant 16 : index
    %50 = vector.load %arg2[%c0_21, %c16] : memref<256x64xbf16, #tpu.memory_space<vmem>>, vector<256x16xbf16>
    %c1 = arith.constant 1 : index
    %c0_22 = arith.constant 0 : index
    %51 = vector.load %arg3[%c1, %c0_22] : memref<4x256xf32, #tpu.memory_space<vmem>>, vector<1x256xf32>
    %52 = vector.extract_strided_slice %4 {offsets = [0, 1], sizes = [128, 1], strides = [1, 1]} : vector<128x4xf32> to vector<128x1xf32>
    %c1_23 = arith.constant 1 : index
    %c0_24 = arith.constant 0 : index
    %53 = vector.load %arg5[%c1_23, %c0_24] : memref<2x16xf32, #tpu.memory_space<vmem>>, vector<1x16xf32>
    %54 = vector.broadcast %52 : vector<128x1xf32> to vector<128x256xf32>
    %55 = vector.broadcast %51 : vector<1x256xf32> to vector<128x256xf32>
    %56 = arith.addf %54, %55 : vector<128x256xf32>
    %cst_25 = arith.constant 2.000000e-01 : f32
    %57 = vector.broadcast %cst_25 : f32 to vector<128x256xf32>
    %58 = arith.mulf %57, %56 : vector<128x256xf32>
    %59 = arith.maximumf %56, %58 : vector<128x256xf32>
    %cst_26 = arith.constant -1.000000e+30 : f32
    %60 = vector.broadcast %cst_26 : f32 to vector<128x256xf32>
    %61 = arith.select %2, %59, %60 : vector<128x256xi1>, vector<128x256xf32>
    %cst_27 = arith.constant dense<0xFF800000> : vector<128xf32>
    %62 = vector.multi_reduction <maximumf>, %61, %cst_27 [1] : vector<128x256xf32> to vector<128xf32>
    %63 = vector.shape_cast %62 : vector<128xf32> to vector<128x1xf32>
    %cst_28 = arith.constant 0.000000e+00 : f32
    %64 = vector.broadcast %cst_28 : f32 to vector<128x1xf32>
    %65 = arith.maximumf %63, %64 : vector<128x1xf32>
    %66 = vector.broadcast %65 : vector<128x1xf32> to vector<128x256xf32>
    %67 = arith.subf %61, %66 : vector<128x256xf32>
    %68 = arith.truncf %67 : vector<128x256xf32> to vector<128x256xbf16>
    %69 = math.exp %68 : vector<128x256xbf16>
    %70 = tpu.concatenate %50, %3 in 1 : vector<256x16xbf16>, vector<256x1xbf16> -> vector<256x17xbf16>
    %cst_29 = arith.constant dense<0.000000e+00> : vector<128x17xf32>
    %71 = tpu.matmul %69, %70, %cst_29 {dimension_numbers = #tpu.dot_dimension_numbers<[1], [0], [0], [1], [0, 0, 1, 1], [], []>} : vector<128x256xbf16>, vector<256x17xbf16>, vector<128x17xf32> -> vector<128x17xf32>
    %72 = vector.extract_strided_slice %71 {offsets = [0, 0], sizes = [128, 16], strides = [1, 1]} : vector<128x17xf32> to vector<128x16xf32>
    %73 = vector.extract_strided_slice %71 {offsets = [0, 16], sizes = [128, 1], strides = [1, 1]} : vector<128x17xf32> to vector<128x1xf32>
    %cst_30 = arith.constant 0.000000e+00 : f32
    %74 = vector.broadcast %cst_30 : f32 to vector<128x1xf32>
    %75 = arith.cmpf oeq, %73, %74 : vector<128x1xf32>
    %cst_31 = arith.constant 1.000000e+00 : f32
    %76 = vector.broadcast %cst_31 : f32 to vector<128x1xf32>
    %77 = arith.select %75, %76, %73 : vector<128x1xi1>, vector<128x1xf32>
    %78 = tpu.reciprocal %77 {approx = true} : vector<128x1xf32> -> vector<128x1xf32>
    %79 = vector.broadcast %78 : vector<128x1xf32> to vector<128x16xf32>
    %80 = arith.mulf %72, %79 : vector<128x16xf32>
    %81 = vector.broadcast %53 : vector<1x16xf32> to vector<128x16xf32>
    %82 = arith.addf %80, %81 : vector<128x16xf32>
    %cst_32 = arith.constant 0.000000e+00 : f32
    %83 = vector.broadcast %cst_32 : f32 to vector<128x16xf32>
    %84 = arith.cmpf ogt, %82, %83 : vector<128x16xf32>
    %85 = math.exp %82 : vector<128x16xf32>
    %cst_33 = arith.constant 1.000000e+00 : f32
    %86 = vector.broadcast %cst_33 : f32 to vector<128x16xf32>
    %87 = arith.subf %85, %86 : vector<128x16xf32>
    %cst_34 = arith.constant 1.67326319 : f32
    %88 = vector.broadcast %cst_34 : f32 to vector<128x16xf32>
    %89 = arith.mulf %88, %87 : vector<128x16xf32>
    %90 = arith.select %84, %82, %89 : vector<128x16xi1>, vector<128x16xf32>
    %cst_35 = arith.constant 1.05070102 : f32
    %91 = vector.broadcast %cst_35 : f32 to vector<128x16xf32>
    %92 = arith.mulf %91, %90 : vector<128x16xf32>
    %93 = arith.addf %49, %92 : vector<128x16xf32>
    %c0_36 = arith.constant 0 : index
    %c32 = arith.constant 32 : index
    %94 = vector.load %arg2[%c0_36, %c32] : memref<256x64xbf16, #tpu.memory_space<vmem>>, vector<256x16xbf16>
    %c2 = arith.constant 2 : index
    %c0_37 = arith.constant 0 : index
    %95 = vector.load %arg3[%c2, %c0_37] : memref<4x256xf32, #tpu.memory_space<vmem>>, vector<1x256xf32>
    %96 = vector.extract_strided_slice %4 {offsets = [0, 2], sizes = [128, 1], strides = [1, 1]} : vector<128x4xf32> to vector<128x1xf32>
    %c0_38 = arith.constant 0 : index
    %c0_39 = arith.constant 0 : index
    %97 = vector.load %arg5[%c0_38, %c0_39] : memref<2x16xf32, #tpu.memory_space<vmem>>, vector<1x16xf32>
    %98 = vector.broadcast %96 : vector<128x1xf32> to vector<128x256xf32>
    %99 = vector.broadcast %95 : vector<1x256xf32> to vector<128x256xf32>
    %100 = arith.addf %98, %99 : vector<128x256xf32>
    %cst_40 = arith.constant 2.000000e-01 : f32
    %101 = vector.broadcast %cst_40 : f32 to vector<128x256xf32>
    %102 = arith.mulf %101, %100 : vector<128x256xf32>
    %103 = arith.maximumf %100, %102 : vector<128x256xf32>
    %cst_41 = arith.constant -1.000000e+30 : f32
    %104 = vector.broadcast %cst_41 : f32 to vector<128x256xf32>
    %105 = arith.select %2, %103, %104 : vector<128x256xi1>, vector<128x256xf32>
    %cst_42 = arith.constant dense<0xFF800000> : vector<128xf32>
    %106 = vector.multi_reduction <maximumf>, %105, %cst_42 [1] : vector<128x256xf32> to vector<128xf32>
    %107 = vector.shape_cast %106 : vector<128xf32> to vector<128x1xf32>
    %cst_43 = arith.constant 0.000000e+00 : f32
    %108 = vector.broadcast %cst_43 : f32 to vector<128x1xf32>
    %109 = arith.maximumf %107, %108 : vector<128x1xf32>
    %110 = vector.broadcast %109 : vector<128x1xf32> to vector<128x256xf32>
    %111 = arith.subf %105, %110 : vector<128x256xf32>
    %112 = arith.truncf %111 : vector<128x256xf32> to vector<128x256xbf16>
    %113 = math.exp %112 : vector<128x256xbf16>
    %114 = tpu.concatenate %94, %3 in 1 : vector<256x16xbf16>, vector<256x1xbf16> -> vector<256x17xbf16>
    %cst_44 = arith.constant dense<0.000000e+00> : vector<128x17xf32>
    %115 = tpu.matmul %113, %114, %cst_44 {dimension_numbers = #tpu.dot_dimension_numbers<[1], [0], [0], [1], [0, 0, 1, 1], [], []>} : vector<128x256xbf16>, vector<256x17xbf16>, vector<128x17xf32> -> vector<128x17xf32>
    %116 = vector.extract_strided_slice %115 {offsets = [0, 0], sizes = [128, 16], strides = [1, 1]} : vector<128x17xf32> to vector<128x16xf32>
    %117 = vector.extract_strided_slice %115 {offsets = [0, 16], sizes = [128, 1], strides = [1, 1]} : vector<128x17xf32> to vector<128x1xf32>
    %cst_45 = arith.constant 0.000000e+00 : f32
    %118 = vector.broadcast %cst_45 : f32 to vector<128x1xf32>
    %119 = arith.cmpf oeq, %117, %118 : vector<128x1xf32>
    %cst_46 = arith.constant 1.000000e+00 : f32
    %120 = vector.broadcast %cst_46 : f32 to vector<128x1xf32>
    %121 = arith.select %119, %120, %117 : vector<128x1xi1>, vector<128x1xf32>
    %122 = tpu.reciprocal %121 {approx = true} : vector<128x1xf32> -> vector<128x1xf32>
    %123 = vector.broadcast %122 : vector<128x1xf32> to vector<128x16xf32>
    %124 = arith.mulf %116, %123 : vector<128x16xf32>
    %125 = vector.broadcast %97 : vector<1x16xf32> to vector<128x16xf32>
    %126 = arith.addf %124, %125 : vector<128x16xf32>
    %cst_47 = arith.constant 0.000000e+00 : f32
    %127 = vector.broadcast %cst_47 : f32 to vector<128x16xf32>
    %128 = arith.cmpf ogt, %126, %127 : vector<128x16xf32>
    %129 = math.exp %126 : vector<128x16xf32>
    %cst_48 = arith.constant 1.000000e+00 : f32
    %130 = vector.broadcast %cst_48 : f32 to vector<128x16xf32>
    %131 = arith.subf %129, %130 : vector<128x16xf32>
    %cst_49 = arith.constant 1.67326319 : f32
    %132 = vector.broadcast %cst_49 : f32 to vector<128x16xf32>
    %133 = arith.mulf %132, %131 : vector<128x16xf32>
    %134 = arith.select %128, %126, %133 : vector<128x16xi1>, vector<128x16xf32>
    %cst_50 = arith.constant 1.05070102 : f32
    %135 = vector.broadcast %cst_50 : f32 to vector<128x16xf32>
    %136 = arith.mulf %135, %134 : vector<128x16xf32>
    %137 = arith.addf %93, %136 : vector<128x16xf32>
    %c0_51 = arith.constant 0 : index
    %c48 = arith.constant 48 : index
    %138 = vector.load %arg2[%c0_51, %c48] : memref<256x64xbf16, #tpu.memory_space<vmem>>, vector<256x16xbf16>
    %c3 = arith.constant 3 : index
    %c0_52 = arith.constant 0 : index
    %139 = vector.load %arg3[%c3, %c0_52] : memref<4x256xf32, #tpu.memory_space<vmem>>, vector<1x256xf32>
    %140 = vector.extract_strided_slice %4 {offsets = [0, 3], sizes = [128, 1], strides = [1, 1]} : vector<128x4xf32> to vector<128x1xf32>
    %c1_53 = arith.constant 1 : index
    %c0_54 = arith.constant 0 : index
    %141 = vector.load %arg5[%c1_53, %c0_54] : memref<2x16xf32, #tpu.memory_space<vmem>>, vector<1x16xf32>
    %142 = vector.broadcast %140 : vector<128x1xf32> to vector<128x256xf32>
    %143 = vector.broadcast %139 : vector<1x256xf32> to vector<128x256xf32>
    %144 = arith.addf %142, %143 : vector<128x256xf32>
    %cst_55 = arith.constant 2.000000e-01 : f32
    %145 = vector.broadcast %cst_55 : f32 to vector<128x256xf32>
    %146 = arith.mulf %145, %144 : vector<128x256xf32>
    %147 = arith.maximumf %144, %146 : vector<128x256xf32>
    %cst_56 = arith.constant -1.000000e+30 : f32
    %148 = vector.broadcast %cst_56 : f32 to vector<128x256xf32>
    %149 = arith.select %2, %147, %148 : vector<128x256xi1>, vector<128x256xf32>
    %cst_57 = arith.constant dense<0xFF800000> : vector<128xf32>
    %150 = vector.multi_reduction <maximumf>, %149, %cst_57 [1] : vector<128x256xf32> to vector<128xf32>
    %151 = vector.shape_cast %150 : vector<128xf32> to vector<128x1xf32>
    %cst_58 = arith.constant 0.000000e+00 : f32
    %152 = vector.broadcast %cst_58 : f32 to vector<128x1xf32>
    %153 = arith.maximumf %151, %152 : vector<128x1xf32>
    %154 = vector.broadcast %153 : vector<128x1xf32> to vector<128x256xf32>
    %155 = arith.subf %149, %154 : vector<128x256xf32>
    %156 = arith.truncf %155 : vector<128x256xf32> to vector<128x256xbf16>
    %157 = math.exp %156 : vector<128x256xbf16>
    %158 = tpu.concatenate %138, %3 in 1 : vector<256x16xbf16>, vector<256x1xbf16> -> vector<256x17xbf16>
    %cst_59 = arith.constant dense<0.000000e+00> : vector<128x17xf32>
    %159 = tpu.matmul %157, %158, %cst_59 {dimension_numbers = #tpu.dot_dimension_numbers<[1], [0], [0], [1], [0, 0, 1, 1], [], []>} : vector<128x256xbf16>, vector<256x17xbf16>, vector<128x17xf32> -> vector<128x17xf32>
    %160 = vector.extract_strided_slice %159 {offsets = [0, 0], sizes = [128, 16], strides = [1, 1]} : vector<128x17xf32> to vector<128x16xf32>
    %161 = vector.extract_strided_slice %159 {offsets = [0, 16], sizes = [128, 1], strides = [1, 1]} : vector<128x17xf32> to vector<128x1xf32>
    %cst_60 = arith.constant 0.000000e+00 : f32
    %162 = vector.broadcast %cst_60 : f32 to vector<128x1xf32>
    %163 = arith.cmpf oeq, %161, %162 : vector<128x1xf32>
    %cst_61 = arith.constant 1.000000e+00 : f32
    %164 = vector.broadcast %cst_61 : f32 to vector<128x1xf32>
    %165 = arith.select %163, %164, %161 : vector<128x1xi1>, vector<128x1xf32>
    %166 = tpu.reciprocal %165 {approx = true} : vector<128x1xf32> -> vector<128x1xf32>
    %167 = vector.broadcast %166 : vector<128x1xf32> to vector<128x16xf32>
    %168 = arith.mulf %160, %167 : vector<128x16xf32>
    %169 = vector.broadcast %141 : vector<1x16xf32> to vector<128x16xf32>
    %170 = arith.addf %168, %169 : vector<128x16xf32>
    %cst_62 = arith.constant 0.000000e+00 : f32
    %171 = vector.broadcast %cst_62 : f32 to vector<128x16xf32>
    %172 = arith.cmpf ogt, %170, %171 : vector<128x16xf32>
    %173 = math.exp %170 : vector<128x16xf32>
    %cst_63 = arith.constant 1.000000e+00 : f32
    %174 = vector.broadcast %cst_63 : f32 to vector<128x16xf32>
    %175 = arith.subf %173, %174 : vector<128x16xf32>
    %cst_64 = arith.constant 1.67326319 : f32
    %176 = vector.broadcast %cst_64 : f32 to vector<128x16xf32>
    %177 = arith.mulf %176, %175 : vector<128x16xf32>
    %178 = arith.select %172, %170, %177 : vector<128x16xi1>, vector<128x16xf32>
    %cst_65 = arith.constant 1.05070102 : f32
    %179 = vector.broadcast %cst_65 : f32 to vector<128x16xf32>
    %180 = arith.mulf %179, %178 : vector<128x16xf32>
    %181 = arith.addf %137, %180 : vector<128x16xf32>
    %cst_66 = arith.constant 2.500000e-01 : f32
    %182 = vector.broadcast %cst_66 : f32 to vector<128x16xf32>
    %183 = arith.mulf %181, %182 : vector<128x16xf32>
    %c0_67 = arith.constant 0 : index
    %c0_68 = arith.constant 0 : index
    %184 = vector.load %arg6[%c0_67, %c0_68] : memref<16x4xf32, #tpu.memory_space<vmem>>, vector<16x4xf32>
    %cst_69 = arith.constant dense<0.000000e+00> : vector<128x4xf32>
    %185 = tpu.matmul %183, %184, %cst_69 {dimension_numbers = #tpu.dot_dimension_numbers<[1], [0], [0], [1], [0, 0, 1, 1], [], []>} : vector<128x16xf32>, vector<16x4xf32>, vector<128x4xf32> -> vector<128x4xf32>
    %c0_70 = arith.constant 0 : index
    %c0_71 = arith.constant 0 : index
    %186 = vector.load %arg7[%c0_70, %c0_71] : memref<1x4xf32, #tpu.memory_space<vmem>>, vector<1x4xf32>
    %187 = vector.broadcast %186 : vector<1x4xf32> to vector<128x4xf32>
    %188 = arith.addf %185, %187 : vector<128x4xf32>
    %cst_72 = arith.constant dense<0xFF800000> : vector<128xf32>
    %189 = vector.multi_reduction <maximumf>, %188, %cst_72 [1] : vector<128x4xf32> to vector<128xf32>
    %190 = vector.shape_cast %189 : vector<128xf32> to vector<128x1xf32>
    %191 = vector.broadcast %190 : vector<128x1xf32> to vector<128x4xf32>
    %192 = arith.subf %188, %191 : vector<128x4xf32>
    %193 = math.exp %192 : vector<128x4xf32>
    %cst_73 = arith.constant dense<0.000000e+00> : vector<128xf32>
    %194 = vector.multi_reduction <add>, %193, %cst_73 [1] : vector<128x4xf32> to vector<128xf32>
    %195 = vector.shape_cast %194 : vector<128xf32> to vector<128x1xf32>
    %196 = vector.broadcast %195 : vector<128x1xf32> to vector<128x4xf32>
    %197 = arith.divf %193, %196 : vector<128x4xf32>
    %c0_74 = arith.constant 0 : index
    %c0_75 = arith.constant 0 : index
    %198 = vector.load %arg8[%c0_74, %c0_75] : memref<128x4xf32, #tpu.memory_space<vmem>>, vector<128x4xf32>
    tpu.vector_store %arg8[%c0_74, %c0_75], %197 {strides = array<i32>} : memref<128x4xf32, #tpu.memory_space<vmem>>, vector<128x4xf32>,
    return
  }
  func.func @transform_0(%arg0: i32) -> (i32, i32) {
    %c0_i32 = arith.constant 0 : i32
    %c0_i32_0 = arith.constant 0 : i32
    return %arg0, %c0_i32 : i32, i32
  }
  func.func @transform_1(%arg0: i32) -> (i32, i32) {
    %c0_i32 = arith.constant 0 : i32
    %c0_i32_0 = arith.constant 0 : i32
    %c0_i32_1 = arith.constant 0 : i32
    return %c0_i32, %c0_i32_0 : i32, i32
  }
  func.func @transform_2(%arg0: i32) -> (i32, i32) {
    %c0_i32 = arith.constant 0 : i32
    %c0_i32_0 = arith.constant 0 : i32
    %c0_i32_1 = arith.constant 0 : i32
    return %c0_i32, %c0_i32_0 : i32, i32
  }
  func.func @transform_3(%arg0: i32) -> (i32, i32) {
    %c0_i32 = arith.constant 0 : i32
    %c0_i32_0 = arith.constant 0 : i32
    return %arg0, %c0_i32 : i32, i32
  }
  func.func @transform_4(%arg0: i32) -> (i32, i32) {
    %c0_i32 = arith.constant 0 : i32
    %c0_i32_0 = arith.constant 0 : i32
    %c0_i32_1 = arith.constant 0 : i32
    return %c0_i32, %c0_i32_0 : i32, i32
  }
  func.func @transform_5(%arg0: i32) -> (i32, i32) {
    %c0_i32 = arith.constant 0 : i32
    %c0_i32_0 = arith.constant 0 : i32
    %c0_i32_1 = arith.constant 0 : i32
    return %c0_i32, %c0_i32_0 : i32, i32
  }
  func.func @transform_6(%arg0: i32) -> (i32, i32) {
    %c0_i32 = arith.constant 0 : i32
    %c0_i32_0 = arith.constant 0 : i32
    %c0_i32_1 = arith.constant 0 : i32
    return %c0_i32, %c0_i32_0 : i32, i32
  }
  func.func @transform_7(%arg0: i32) -> (i32, i32) {
    %c0_i32 = arith.constant 0 : i32
    %c0_i32_0 = arith.constant 0 : i32
    return %arg0, %c0_i32 : i32, i32
  }
}

</mosaic_0001>

<bundles_post_ra>
// kernel: gat_full_forward.2
= control target key start
LH: loop header
LB: loop body
LE: loop exit
PB: predicated region body
PF: predicated region fallthrough
CT: control target
= control target key end

     0   :  { %s2830_s18 = smov 0   ;;  %s4339_s0 = inlined_call_operand.vmem [shape: s8[256,256], index: 0, kind: input, shape index: {}]   ;;  %s4340_s1 = inlined_call_operand.vmem [shape: bf16[256,32], index: 1, kind: input, shape index: {}]   ;;  %s4341_s2 = inlined_call_operand.vmem [shape: f32[2,256], index: 2, kind: input, shape index: {}]   ;;  %s4342_s3 = inlined_call_operand.vmem [shape: f32[256,2], index: 3, kind: input, shape index: {}]   ;;  %s4343_s4 = inlined_call_operand.vmem [shape: f32[2,16], index: 4, kind: input, shape index: {}]   ;;  %s4344_s5 = inlined_call_operand.vmem [shape: f32[256,32], index: 5, kind: output, shape index: {}]  }
   0x1 LB: > { %s2357_s19 = sadd.s32 4294967295, %s2793_s18   ;;  %p2361_p0 = scmp.ge.s32.totalorder %s2793_s18, 1  ;;  %s2793_s18 = sphi %s2830_s18, %s15_s18  }
   0x2   : > { %p200_p1 = scmp.lt.s32.totalorder %s2793_s18, 3 }
   0x4   : > { %p201_p2 = pnand %p2361_p0, %p200_p1 }
   0x6   : > { %204 = sbr.rel (%p201_p2) target bundleno = 1059 (0x423), region = 40 }
   0xd   : > { %s2365_s20 = sshll.u32 %s2357_s19, 4  ;;  %v2795_v0 = vmov 1   ;;  %s2362_s25 = sshll.u32 %s2357_s19, 2  ;;  %v4347_v19 = vmov 0   ;;  %v2570_v22 = vld [vmem:[%s4340_s1] sm:$0xff]   ;;  %v2571_v33 = vld [vmem:[%s4340_s1 + $0x48] sm:$0xff]  }
   0xe   : > { %2565 = vset.pattern.permute.xlu1 %v2795_v0  ;;  %2564 = vset.pattern.permute.xlu0 %v2795_v0  ;;  %p242_p3 = scmp.lt.s32.totalorder %s2365_s20, 31  ;;  %p235_p4 = scmp.lt.s32.totalorder %s2362_s25, 7  ;;  %v2573_v23 = vld [vmem:[%s4340_s1 + $0x40] sm:$0xff]   ;;  %v2575_v34 = vld [vmem:[%s4340_s1 + $0x8] sm:$0xff]   ;;  %v2572_v46 = vld [vmem:[%s4340_s1 + $0x10] sm:$0xff]  }
   0xf   : > { %s2797_s9 = smov 112   ;;  %v2576_v47 = vld [vmem:[%s4340_s1 + $0x50] sm:$0xff]   ;;  %v2574_v55 = vld [vmem:[%s4340_s1 + $0x58] sm:$0xff]  }
  0x10   : > { %s4607_s20 = smov (!%p242_p3, %s2365_s20), 31  ;;  %s4609_s25 = smov (!%p235_p4, %s2362_s25), 7  ;;  %v2577_v56 = vld [vmem:[%s4340_s1 + $0x18] sm:$0xff]  }
  0x11   : > { %s2366_s21 = sshll.u32 %s4607_s20, 3  ;;  %s2422_s26 = sshll.u32 %s4609_s25, 4 }
  0x12   : > { %s2846_s24 = scalar_lea.vmem %s4342_s3, %s2366_s21  ;;  %s2905_s29 = scalar_lea.vmem %s4339_s0, %s2422_s26 }
  0x13   : > { %v2849_v1 = vld [vmem:[%s2846_s24 + $0x10] sm:$0xff]  ;;  %v2852_v2 = vld [vmem:[%s2846_s24] sm:$0xff]  ;;  %v2857_v3 = vld [vmem:[%s2846_s24 + $0x18] sm:$0xff]  ;;  %s4249_s26 = scalar_lea.vmem %s4344_s5, %s2366_s21 }
  0x14   : > { %1385 = vperm.xlu1 %2565, %v2849_v1   ;;  %1377 = vperm.xlu0 %2564, %v2852_v2   ;;  %v2860_v4 = vld [vmem:[%s2846_s24 + $0x8] sm:$0xff]  ;;  %v2868_v6 = vld [vmem:[%s2846_s24 + $0x20] sm:$0xff]  ;;  %v2873_v7 = vld [vmem:[%s2846_s24 + $0x38] sm:$0xff] }
  0x15   : > { %v2865_v5 = vld [vmem:[%s2846_s24 + $0x28] sm:$0xff]  ;;  %v2876_v8 = vld [vmem:[%s2846_s24 + $0x30] sm:$0xff]  ;;  %v2882_v10 = vld [vmem:[%s2846_s24 + $0x40] sm:$0xff] }
  0x16   : > { %v2879_v9 = vld [vmem:[%s2846_s24 + $0x48] sm:$0xff]  ;;  %v2889_v11 = vld [vmem:[%s2846_s24 + $0x58] sm:$0xff]  ;;  %v2892_v12 = vld [vmem:[%s2846_s24 + $0x50] sm:$0xff] }
  0x17   : > { %v2897_v13 = vld [vmem:[%s2846_s24 + $0x68] sm:$0xff]  ;;  %v2900_v14 = vld [vmem:[%s2846_s24 + $0x60] sm:$0xff]  ;;  %v2912_v17 = vld [vmem:[%s2846_s24 + $0x78] sm:$0xff] }
  0x18   : > { %1389 = vperm.xlu1 %2565, %v2857_v3   ;;  %1381 = vperm.xlu0 %2564, %v2860_v4   ;;  %v261_v15 = vld [vmem:[%s2905_s29 + $0x20] sm:$0xff]  ;;  %v262_v16 = vld [vmem:[%s2905_s29 + $0x28] sm:$0xff]  ;;  %v2915_v18 = vld [vmem:[%s2846_s24 + $0x70] sm:$0xff] }
  0x19   : > { %vm269_vm0 = vnez %v261_v15  ;;  %vm270_vm1 = vnez %v262_v16  ;;  %v263_v27 = vld [vmem:[%s2905_s29 + $0x30] sm:$0xff]  ;;  %v264_v30 = vld [vmem:[%s2905_s29 + $0x38] sm:$0xff] }
  0x1a   : > { %v514_v20 = vsel %vm269_vm0, 16843009, %v4347_v19  ;;  %v515_v21 = vsel %vm270_vm1, 16843009, %v4347_v19  ;;  %vm271_vm2 = vnez %v263_v27  ;;  %vm272_vm3 = vnez %v264_v30  ;;  %v257_v27 = vld [vmem:[%s2905_s29] sm:$0xff] }
  0x1b   : > { %v536_v24 = vunpack.c.1.s8 %v514_v20  ;;  %v537_v25 = vunpack.c.1.s8 %v515_v21  ;;  %v534_v26 = vunpack.c.0.s8 %v514_v20  ;;  %v535_v28 = vunpack.c.0.s8 %v515_v21 }
  0x1c   : > { %1397 = vperm.xlu1 %2565, %v2865_v5   ;;  %1393 = vperm.xlu0 %2564, %v2868_v6   ;;  %v538_v29 = vunpack.c.2.s8 %v514_v20  ;;  %v539_v32 = vunpack.c.2.s8 %v515_v21  ;;  %v540_v36 = vunpack.c.3.s8 %v514_v20  ;;  %v541_v37 = vunpack.c.3.s8 %v515_v21 }
  0x1d   : > { %v568_v31 = vpack.c.b16 %v537_v25, %v536_v24  ;;  %v566_v35 = vpack.c.b16 %v535_v28, %v534_v26  ;;  %v516_v40 = vsel %vm271_vm2, 16843009, %v4347_v19  ;;  %v517_v43 = vsel %vm272_vm3, 16843009, %v4347_v19  ;;  %v258_v28 = vld [vmem:[%s2905_s29 + $0x8] sm:$0xff] }
  0x1e   : > { %v570_v39 = vpack.c.b16 %v539_v32, %v538_v29  ;;  %v572_v42 = vpack.c.b16 %v541_v37, %v540_v36  ;;  %v544_v45 = vunpack.c.1.s8 %v516_v40  ;;  %v545_v50 = vunpack.c.1.s8 %v517_v43  ;;  %v260_v36 = vld [vmem:[%s2905_s29 + $0x18] sm:$0xff] }
  0x1f   : > { %v569_v38 = vpack.c.b8 %v568_v31, %v568_v31  ;;  %v567_v41 = vpack.c.b8 %v566_v35, %v566_v35  ;;  %v542_v53 = vunpack.c.0.s8 %v516_v40  ;;  %v543_v54 = vunpack.c.0.s8 %v517_v43  ;;  %v259_v35 = vld [vmem:[%s2905_s29 + $0x10] sm:$0xff] }
  0x20   : > { %1405 = vperm.xlu1 %2565, %v2873_v7   ;;  %1401 = vperm.xlu0 %2564, %v2876_v8   ;;  %v571_v44 = vpack.c.b8 %v570_v39, %v570_v39  ;;  %v573_v49 = vpack.c.b8 %v572_v42, %v572_v42  ;;  %v576_v58 = vpack.c.b16 %v545_v50, %v544_v45  ;;  %v548_v61 = vunpack.c.3.s8 %v516_v40 }
  0x21   : > { %vm591_vm4 = vnez %v569_v38  ;;  %vm590_vm5 = vnez %v567_v41  ;;  %v574_v60 = vpack.c.b16 %v543_v54, %v542_v53  ;;  %v549_v62 = vunpack.c.3.s8 %v517_v43 }
  0x22   : > { %v2950_v48 = vsel %vm591_vm4, 16843009, %v4347_v19  ;;  %v2953_v51 = vsel %vm590_vm5, 16843009, %v4347_v19  ;;  %vm592_vm6 = vnez %v571_v44  ;;  %vm593_vm7 = vnez %v573_v49 }
  0x23   : > { %v2956_v52 = vsel %vm592_vm6, 16843009, %v4347_v19  ;;  %v2967_v57 = vsel %vm593_vm7, 16843009, %v4347_v19  ;;  %v577_v59 = vpack.c.b8 %v576_v58, %v576_v58  ;;  %v546_v63 = vunpack.c.2.s8 %v516_v40 }
  0x24   : > { %1413 = vperm.xlu1 %2565, %v2879_v9   ;;  %1409 = vperm.xlu0 %2564, %v2882_v10   ;;  %v547_v0 = vunpack.c.2.s8 %v517_v43  ;;  %v575_v15 = vpack.c.b8 %v574_v60, %v574_v60  ;;  %v580_v16 = vpack.c.b16 %v549_v62, %v548_v61  ;;  %vm265_vm12 = vnez %v257_v27 }
  0x25   : > { %vm595_vm8 = vnez %v577_v59  ;;  %vm266_vm13 = vnez %v258_v28  ;;  %v510_v29 = vsel %vm265_vm12, 16843009, %v4347_v19  ;;  %vm267_vm14 = vnez %v259_v35 }
  0x26   : > { %v2972_v20 = vsel %vm595_vm8, 16843009, %v4347_v19  ;;  %v578_v21 = vpack.c.b16 %v547_v0, %v546_v63  ;;  %vm594_vm9 = vnez %v575_v15  ;;  %v511_v30 = vsel %vm266_vm13, 16843009, %v4347_v19 }
  0x27   : > { %v518_v31 = vunpack.c.0.s8 %v510_v29  ;;  %v519_v32 = vunpack.c.0.s8 %v511_v30  ;;  %v522_v37 = vunpack.c.2.s8 %v510_v29  ;;  %v523_v38 = vunpack.c.2.s8 %v511_v30  ;;  %v2402_v15 = vld [vmem:[%s4341_s2 + $0x1] ss:$2 sm:$0x3] }
  0x28   : > { %1421 = vperm.xlu1 %2565, %v2889_v11   ;;  %1417 = vperm.xlu0 %2564, %v2892_v12   ;;  %v579_v24 = vpack.c.b8 %v578_v21, %v578_v21  ;;  %v524_v40 = vunpack.c.3.s8 %v510_v29  ;;  %v525_v41 = vunpack.c.3.s8 %v511_v30  ;;  %vm268_vm15 = vnez %v260_v36 }
  0x29   : > { %v550_v39 = vpack.c.b16 %v519_v32, %v518_v31  ;;  %v404_v42 = vlaneseq  ;;  %v554_v44 = vpack.c.b16 %v523_v38, %v522_v37  ;;  %v2993_v49 = vsel %vm268_vm15, 16843009, %v4347_v19 }
  0x2a   : > { %vm596_vm11 = vnez %v579_v24  ;;  %v529_v60 = vunpack.c.1.s8 %v2993_v49 }
  0x2b   : > { %v2981_v26 = vsel %vm596_vm11, 16843009, %v4347_v19  ;;  %v551_v45 = vpack.c.b8 %v550_v39, %v550_v39  ;;  %v2995_v50 = vshrl.u32 %v404_v42, 7  ;;  %v555_v54 = vpack.c.b8 %v554_v44, %v554_v44 }
  0x2c   : > { %1429 = vperm.xlu1 %2565, %v2897_v13   ;;  %1425 = vperm.xlu0 %2564, %v2900_v14   ;;  %4407 = vst [vmem:[#allocation3_spill] sm:$0xff] %v2981_v26  ;;  %v4409_v39 = vmov 0 }
  0x2d   : > { %4408 = vst [vmem:[#allocation4_spill] sm:$0xff] %v2995_v50  ;;  %vm582_vm0 = vnez %v551_v45  ;;  %v4346_v61 = vsub.s32 0, %v2995_v50  ;;  %v4345_v62 = vsub.s32 1, %v2995_v50  ;;  %vm584_vm2 = vnez %v555_v54 }
  0x2e   : > { %v598_v63 = vsel %vm582_vm0, 16843009, %v4347_v19  ;;  %v600_v27 = vsel %vm584_vm2, 16843009, %v4347_v19  ;;  %vm4369_vm2 = vcmask 130048  }
  0x2f   : > { %v615_v24 = vunpack.c.1.s8 %v598_v63  ;;  %v3011_v28 = vrot.slane %v2402_v15, %v4346_v61  ;;  %v618_v35 = vunpack.c.0.s8 %v600_v27  ;;  %v619_v36 = vunpack.c.1.s8 %v600_v27 }
  0x30   : > { %1437 = vperm.xlu1 %2565, %v2912_v17   ;;  %1433 = vperm.xlu0 %2564, %v2915_v18  }
  0x31   : > { %vm3022_vm5 = vcmp.ne.s32.totalorder %v615_v24, 0  ;;  %vm3046_vm11 = vcmp.ne.s32.totalorder %v619_v36, 0 }
  0x34   : > { %1739 = vrot.lane.b32.xlu1 %v2570_v22, %s2797_s9  ;;  %1755 = vrot.lane.b32.xlu0 %v2573_v23, %s2797_s9  ;;  %v581_v22 = vpack.c.b8 %v580_v16, %v580_v16  ;;  %v2975_v23 = vsel %vm594_vm9, 16843009, %v4347_v19 }
  0x35   : > { %2566 = vset.pattern.permute.xlu1 %v4347_v19  ;;  %2567 = vset.pattern.permute.xlu0 %v4347_v19 }
  0x36   : > { %vm597_vm10 = vnez %v581_v22  ;;  %v614_v22 = vunpack.c.0.s8 %v598_v63 }
  0x37   : > { %v2978_v25 = vsel %vm597_vm10, 16843009, %v4347_v19  ;;  %vm3042_vm10 = vcmp.ne.s32.totalorder %v618_v35, 0 }
  0x38   : > { %1757 = vrot.lane.b32.xlu1 %v2571_v33, %s2797_s9  ;;  %1741 = vrot.lane.b32.xlu0 %v2575_v34, %s2797_s9  ;;  %4406 = vst [vmem:[#allocation2_spill] sm:$0xff] %v2978_v25  ;;  %v520_v33 = vunpack.c.1.s8 %v510_v29  ;;  %v521_v34 = vunpack.c.1.s8 %v511_v30  ;;  %v3015_v29 = vrot.slane %v2402_v15, %v4345_v62  ;;  %vm3018_vm4 = vcmp.ne.s32.totalorder %v614_v22, 0 }
  0x39   : > { %v4410_v39 = vsel %vm3018_vm4, 4294967295, %v4409_v39 }
  0x3a   : > { %v552_v43 = vpack.c.b16 %v521_v34, %v520_v33  ;;  %4411 = vst [vmem:[#allocation5_spill] sm:$0xff] %v4410_v39 }
  0x3c   : > { %1743 = vrot.lane.b32.xlu1 %v2572_v46, %s2797_s9  ;;  %1759 = vrot.lane.b32.xlu0 %v2576_v47, %s2797_s9  ;;  %v556_v46 = vpack.c.b16 %v525_v41, %v524_v40  ;;  %v2990_v47 = vsel %vm267_vm14, 16843009, %v4347_v19  ;;  %v553_v53 = vpack.c.b8 %v552_v43, %v552_v43  ;;  %v4412_v40 = vmov 0 }
  0x3d   : > { %v528_v59 = vunpack.c.1.s8 %v2990_v47  ;;  %v4413_v40 = vsel %vm3022_vm5, 4294967295, %v4412_v40 }
  0x3e   : > { %v557_v58 = vpack.c.b8 %v556_v46, %v556_v46  ;;  %vm583_vm1 = vnez %v553_v53  ;;  %4414 = vst [vmem:[#allocation6_spill] sm:$0xff] %v4413_v40 }
  0x3f   : > { %v560_v16 = vpack.c.b16 %v529_v60, %v528_v59  ;;  %v599_v21 = vsel %vm583_vm1, 16843009, %v4347_v19  ;;  %v4421_v59 = vmov 0  ;;  %v4424_v60 = vmov 0 }
  0x40   : > { %1761 = vrot.lane.b32.xlu1 %v2574_v55, %s2797_s9  ;;  %1745 = vrot.lane.b32.xlu0 %v2577_v56, %s2797_s9  ;;  %v526_v55 = vunpack.c.0.s8 %v2990_v47  ;;  %v527_v56 = vunpack.c.0.s8 %v2993_v49  ;;  %vm585_vm3 = vnez %v557_v58  ;;  %v616_v32 = vunpack.c.0.s8 %v599_v21 }
  0x41   : > { %v601_v30 = vsel %vm585_vm3, 16843009, %v4347_v19  ;;  %v617_v33 = vunpack.c.1.s8 %v599_v21  ;;  %v561_v34 = vpack.c.b8 %v560_v16, %v560_v16  ;;  %v4422_v59 = vsel %vm3042_vm10, 4294967295, %v4421_v59 }
  0x42   : > { %v558_v0 = vpack.c.b16 %v527_v56, %v526_v55  ;;  %v620_v41 = vunpack.c.0.s8 %v601_v30  ;;  %v621_v42 = vunpack.c.1.s8 %v601_v30  ;;  %vm3030_vm7 = vcmp.ne.s32.totalorder %v616_v32, 0  ;;  %4423 = vst [vmem:[#allocation7_spill] sm:$0xff] %v4422_v59 }
  0x43   : > { %vm3034_vm8 = vcmp.ne.s32.totalorder %v617_v33, 0  ;;  %vm3038_vm9 = vnez %v561_v34  ;;  %v4425_v60 = vsel %vm3046_vm11, 4294967295, %v4424_v60  ;;  %v4427_v16 = vmov 0 }
  0x44   : > { %v559_v31 = vpack.c.b8 %v558_v0, %v558_v0  ;;  %4426 = vst [vmem:[#allocation8_spill] sm:$0xff] %v4425_v60  ;;  %vm3050_vm12 = vcmp.ne.s32.totalorder %v620_v41, 0  ;;  %vm3054_vm13 = vcmp.ne.s32.totalorder %v621_v42, 0  ;;  %v4430_v21 = vmov 0 }
  0x45   : > { %v4428_v16 = vsel %vm3050_vm12, 4294967295, %v4427_v16  ;;  %v4431_v21 = vsel %vm3054_vm13, 4294967295, %v4430_v21  ;;  %v603_v35 = vsel %vm3038_vm9, 16843009, %v4347_v19 }
  0x46   : > { %vm586_vm6 = vnez %v559_v31  ;;  %4429 = vst [vmem:[#allocation9_spill] sm:$0xff] %v4428_v16  ;;  %4432 = vst [vmem:[#allocation10_spill] sm:$0xff] %v4431_v21 }
  0x47   : > { %v602_v22 = vsel %vm586_vm6, 16843009, %v4347_v19 }
  0x48   : > { %v623_v50 = vunpack.c.1.s8 %v602_v22 }
  0x4a   : > { %vm3116_vm15 = vcmp.ne.s32.totalorder %v623_v50, 0  ;;  %v4442_v50 = vmov 0 }
  0x93   : > { %v1386_v37 = vpop.permute.xlu1 %1385  ;;  %v1378_v38 = vpop.permute.xlu0 %1377 }
  0x94   : > { %v1455_v43 = vadd.f32 %v3011_v28, %v1386_v37  ;;  %v1451_v44 = vadd.f32 %v3011_v28, %v1378_v38  ;;  %v1452_v45 = vadd.f32 %v3015_v29, %v1378_v38  ;;  %v1456_v46 = vadd.f32 %v3015_v29, %v1386_v37 }
  0x96   : > { %v1487_v56 = vmul.f32 0.2, %v1455_v43  ;;  %v1483_v58 = vmul.f32 0.2, %v1451_v44  ;;  %v1484_v63 = vmul.f32 0.2, %v1452_v45 }
  0x97   : > { %v1390_v0 = vpop.permute.xlu1 %1389  ;;  %v1382_v15 = vpop.permute.xlu0 %1381  ;;  %v1488_v32 = vmul.f32 0.2, %v1456_v46 }
  0x98   : > { %v1457_v24 = vadd.f32 %v3011_v28, %v1390_v0  ;;  %v1458_v27 = vadd.f32 %v3015_v29, %v1390_v0  ;;  %v1453_v30 = vadd.f32 %v3011_v28, %v1382_v15  ;;  %v1454_v31 = vadd.f32 %v3015_v29, %v1382_v15 }
  0x99   : > { %v1515_v33 = vmax.f32 %v1451_v44, %v1483_v58  ;;  %v1516_v34 = vmax.f32 %v1452_v45, %v1484_v63  ;;  %v1519_v41 = vmax.f32 %v1455_v43, %v1487_v56  ;;  %v622_v44 = vunpack.c.0.s8 %v602_v22 }
  0x9a   : > { %v1489_v36 = vmul.f32 0.2, %v1457_v24  ;;  %v1490_v37 = vmul.f32 0.2, %v1458_v27  ;;  %v1485_v38 = vmul.f32 0.2, %v1453_v30 }
  0x9b   : > { %v1486_v42 = vmul.f32 0.2, %v1454_v31  ;;  %v1398_v62 = vpop.permute.xlu1 %1397  ;;  %v1394_v61 = vpop.permute.xlu0 %1393  ;;  %v3068_v0 = vsel %vm3018_vm4, %v1515_v33, -1e+30  ;;  %v3072_v15 = vsel %vm3022_vm5, %v1516_v34, -1e+30  ;;  %v1520_v33 = vmax.f32 %v1456_v46, %v1488_v32 }
  0x9c   : > { %v1461_v45 = vadd.f32 %v3011_v28, %v1398_v62  ;;  %v1462_v55 = vadd.f32 %v3015_v29, %v1398_v62  ;;  %v1459_v58 = vadd.f32 %v3011_v28, %v1394_v61  ;;  %v1460_v43 = vadd.f32 %v3015_v29, %v1394_v61 }
  0x9d   : > { %v1579_v56 = vmax.f32 %v3068_v0, %v3072_v15  ;;  %v1517_v63 = vmax.f32 %v1453_v30, %v1485_v38  ;;  %v1518_v19 = vmax.f32 %v1454_v31, %v1486_v42  ;;  %v3082_v34 = vsel %vm3042_vm10, %v1519_v41, -1e+30 }
  0x9e   : > { %v1491_v39 = vmul.f32 0.2, %v1459_v58  ;;  %v1521_v40 = vmax.f32 %v1457_v24, %v1489_v36  ;;  %v1492_v26 = vmul.f32 0.2, %v1460_v43  ;;  %v1522_v30 = vmax.f32 %v1458_v27, %v1490_v37 }
  0x9f   : > { %1580 = vmax.xlane.f32.xlu1 %v1579_v56  ;;  %v3084_v62 = vpop.permute.xlu1 %1405  ;;  %v3086_v25 = vpop.permute.xlu0 %1401  ;;  %v3090_v61 = vsel %vm3030_vm7, %v1517_v63, -1e+30  ;;  %v3094_v46 = vsel %vm3034_vm8, %v1518_v19, -1e+30  ;;  %v1493_v31 = vmul.f32 0.2, %v1461_v45  ;;  %v624_v38 = vunpack.c.0.s8 %v603_v35 }
  0xa0   : > { %v1494_v32 = vmul.f32 0.2, %v1462_v55  ;;  %v625_v24 = vunpack.c.1.s8 %v603_v35  ;;  %v1582_v22 = vmax.f32 %v3090_v61, %v3094_v46  ;;  %v3100_v36 = vsel %vm3046_vm11, %v1520_v33, -1e+30 }
  0xa1   : > { %v3104_v41 = vsel %vm3050_vm12, %v1521_v40, -1e+30  ;;  %v3108_v19 = vsel %vm3054_vm13, %v1522_v30, -1e+30  ;;  %v1585_v27 = vmax.f32 %v3082_v34, %v3100_v36  ;;  %vm3112_vm14 = vcmp.ne.s32.totalorder %v622_v44, 0 }
  0xa2   : > { %v4433_v35 = vmov 0  ;;  %v4436_v37 = vmov 0  ;;  %1583 = vmax.xlane.f32.xlu0 %v1582_v22  ;;  %v1523_v56 = vmax.f32 %v1459_v58, %v1491_v39  ;;  %v1524_v63 = vmax.f32 %v1460_v43, %v1492_v26 }
  0xa3   : > { %v4434_v35 = vsel %vm3112_vm14, 4294967295, %v4433_v35  ;;  %v4437_v37 = vsel %vm3116_vm15, 4294967295, %v4436_v37  ;;  %v3120_v42 = vpop.permute.xlu1 %1413  ;;  %v3122_v40 = vpop.permute.xlu0 %1409  ;;  %1586 = vmax.xlane.f32.xlu1 %v1585_v27  ;;  %v1588_v33 = vmax.f32 %v3104_v41, %v3108_v19  ;;  %vm3126_vm0 = vcmp.ne.s32.totalorder %v624_v38, 0 }
  0xa4   : > { %4435 = vst [vmem:[#allocation11_spill] sm:$0xff] %v4434_v35  ;;  %4438 = vst [vmem:[#allocation12_spill] sm:$0xff] %v4437_v37  ;;  %v4439_v44 = vmov 0  ;;  %vm3130_vm1 = vcmp.ne.s32.totalorder %v625_v24, 0  ;;  %v3136_v30 = vsel %vm3112_vm14, %v1523_v56, -1e+30  ;;  %v1525_v26 = vmax.f32 %v1461_v45, %v1493_v31 }
  0xa5   : > { %v4440_v44 = vsel %vm3126_vm0, 4294967295, %v4439_v44  ;;  %v4443_v50 = vsel %vm3130_vm1, 4294967295, %v4442_v50  ;;  %4445 = vst [vmem:[#allocation15_spill] sm:$0xff] %v3136_v30  ;;  %v3140_v39 = vsel %vm3116_vm15, %v1524_v63, -1e+30  ;;  %v1526_v58 = vmax.f32 %v1462_v55, %v1494_v32 }
  0xa6   : > { %4441 = vst [vmem:[#allocation13_spill] sm:$0xff] %v4440_v44  ;;  %4444 = vst [vmem:[#allocation14_spill] sm:$0xff] %v4443_v50  ;;  %v1591_v43 = vmax.f32 %v3136_v30, %v3140_v39  ;;  %1589 = vmax.xlane.f32.xlu0 %v1588_v33  ;;  %v3150_v22 = vsel %vm3126_vm0, %v1525_v26, -1e+30  ;;  %v4451_v35 = vmov 0  }
  0xa7   : > { %4446 = vst [vmem:[#allocation16_spill] sm:$0xff] %v3140_v39  ;;  %v3144_v38 = vpop.permute.xlu1 %1421  ;;  %v3146_v24 = vpop.permute.xlu0 %1417  ;;  %4447 = vst [vmem:[#allocation17_spill] sm:$0xff] %v3150_v22  ;;  %v3154_v27 = vsel %vm3130_vm1, %v1526_v58, -1e+30 }
  0xa8   : > { %1592 = vmax.xlane.f32.xlu1 %v1591_v43  ;;  %v1594_v45 = vmax.f32 %v3150_v22, %v3154_v27  ;;  %v2578_v43 = vld [vmem:[%s4340_s1 + $0x20] sm:$0xff]   ;;  %v4454_v22 = vmov 0 }
  0xaa   : > { %1595 = vmax.xlane.f32.xlu0 %v1594_v45 }
  0xab   : > { %v3158_v55 = vpop.permute.xlu1 %1429  ;;  %v3160_v31 = vpop.permute.xlu0 %1425 }
  0xaf   : > { %v3162_v32 = vpop.permute.xlu1 %1437  ;;  %v3164_v56 = vpop.permute.xlu0 %1433 }
  0xb3   : > { %v1740_v63 = vpop.permute.xlu1 %1739  ;;  %v1756_v33 = vpop.permute.xlu0 %1755 }
  0xb4   : > { %v1796_v26 = vsel %vm4369_vm2, %v1756_v33, 1065369472  ;;  %v1772_v58 = vsel %vm4369_vm2, %v1740_v63, 1065369472  ;;  %v3177_v33 = vld [vmem:[%s4340_s1 + $0x68] sm:$0xff]  }
  0xb5   : > { %2487 = vmatprep.subr.bf16.mxu1 %v1796_v26  ;;  %4448 = vst [vmem:[#allocation18_spill] sm:$0xff] %v3177_v33 }
  0xb6   : > { %2488 = vmatpush3.bf16.msra.mxu1 %v1772_v58 }
  0xb7   : > { %v1758_v45 = vpop.permute.xlu1 %1757  ;;  %v1742_v50 = vpop.permute.xlu0 %1741 }
  0xb8   : > { %v1799_v44 = vsel %vm4369_vm2, %v1758_v45, 1065369472  ;;  %v1775_v21 = vsel %vm4369_vm2, %v1742_v50, 1065369472  ;;  %v3186_v50 = vld [vmem:[%s4340_s1 + $0x60] sm:$0xff]  }
  0xb9   : > { %1747 = vrot.lane.b32.xlu1 %v2578_v43, %s2797_s9  ;;  %2489 = vmatprep.subr.bf16.mxu1 %v1799_v44  ;;  %4449 = vst [vmem:[#allocation19_spill] sm:$0xff] %v3186_v50 }
  0xba   : > { %2490 = vmatpush3.bf16.msra.mxu1 %v1775_v21 }
  0xbb   : > { %v1744_v63 = vpop.permute.xlu1 %1743  ;;  %v1760_v16 = vpop.permute.xlu0 %1759 }
  0xbc   : > { %v1802_v26 = vsel %vm4369_vm2, %v1760_v16, 1065369472  ;;  %v1778_v58 = vsel %vm4369_vm2, %v1744_v63, 1065369472  ;;  %v3195_v16 = vld [vmem:[%s4340_s1 + $0x28] sm:$0xff]   ;;  %v530_v63 = vunpack.c.2.s8 %v2990_v47 }
  0xbd   : > { %1765 = vrot.lane.b32.xlu1 %v3177_v33, %s2797_s9  ;;  %2491 = vmatprep.subr.bf16.mxu1 %v1802_v26  ;;  %4450 = vst [vmem:[#allocation20_spill] sm:$0xff] %v3195_v16  ;;  %v531_v26 = vunpack.c.2.s8 %v2993_v49 }
  0xbe   : > { %2492 = vmatpush3.bf16.msra.mxu1 %v1778_v58  ;;  %v532_v58 = vunpack.c.3.s8 %v2990_v47  ;;  %v1466_v47 = vadd.f32 %v3015_v29, %v3084_v62 }
  0xbf   : > { %v1762_v43 = vpop.permute.xlu1 %1761  ;;  %v1746_v45 = vpop.permute.xlu0 %1745 }
  0xc0   : > { %v1805_v21 = vsel %vm4369_vm2, %v1762_v43, 1065369472  ;;  %v1781_v44 = vsel %vm4369_vm2, %v1746_v45, 1065369472  ;;  %1763 = vrot.lane.b32.xlu0 %v3186_v50, %s2797_s9  ;;  %v533_v43 = vunpack.c.3.s8 %v2993_v49  ;;  %v562_v45 = vpack.c.b16 %v531_v26, %v530_v63 }
  0xc1   : > { %2493 = vmatprep.subr.bf16.mxu1 %v1805_v21  ;;  %v1463_v21 = vadd.f32 %v3011_v28, %v3086_v25 }
  0xc2   : > { %2494 = vmatpush3.bf16.msra.mxu1 %v1781_v44  ;;  %v564_v33 = vpack.c.b16 %v533_v43, %v532_v58  ;;  %v563_v50 = vpack.c.b8 %v562_v45, %v562_v45  ;;  %v1464_v44 = vadd.f32 %v3015_v29, %v3086_v25  ;;  %v1498_v43 = vmul.f32 0.2, %v1466_v47 }
  0xc3   : > { %v1495_v49 = vmul.f32 0.2, %v1463_v21 }
  0xc4   : > { %1749 = vrot.lane.b32.xlu0 %v3195_v16, %s2797_s9  ;;  %v565_v37 = vpack.c.b8 %v564_v33, %v564_v33  ;;  %vm588_vm3 = vnez %v563_v50  ;;  %v1465_v16 = vadd.f32 %v3011_v28, %v3084_v62  ;;  %v1496_v63 = vmul.f32 0.2, %v1464_v44 }
  0xc5   : > { %v604_v60 = vsel %vm588_vm3, 16843009, %v4451_v35  ;;  %v1527_v45 = vmax.f32 %v1463_v21, %v1495_v49  ;;  %v1530_v39 = vmax.f32 %v1466_v47, %v1498_v43  ;;  %v4456_v21 = vmov 0 }
  0xc6   : > { %vm589_vm6 = vnez %v565_v37  ;;  %v626_v26 = vunpack.c.0.s8 %v604_v60  ;;  %v627_v33 = vunpack.c.1.s8 %v604_v60  ;;  %v1497_v58 = vmul.f32 0.2, %v1465_v16 }
  0xc7   : > { %v605_v50 = vsel %vm589_vm6, 16843009, %v4451_v35  ;;  %v1528_v59 = vmax.f32 %v1464_v44, %v1496_v63  ;;  %v4452_v37 = vmov 0  ;;  %v4458_v44 = vmov 0 }
  0xc8   : > { %v628_v25 = vunpack.c.0.s8 %v605_v50  ;;  %v629_v30 = vunpack.c.1.s8 %v605_v50  ;;  %vm3213_vm9 = vcmp.ne.s32.totalorder %v626_v26, 0  ;;  %vm3217_vm3 = vcmp.ne.s32.totalorder %v627_v33, 0 }
  0xc9   : > { %v4453_v37 = vsel %vm3213_vm9, 4294967295, %v4452_v37  ;;  %v4455_v22 = vsel %vm3217_vm3, 4294967295, %v4454_v22  ;;  %v1529_v62 = vmax.f32 %v1465_v16, %v1497_v58  ;;  %v3223_v60 = vsel %vm3213_vm9, %v1527_v45, -1e+30 }
  0xca   : > { %v3227_v35 = vsel %vm3217_vm3, %v1528_v59, -1e+30  ;;  %vm3229_vm6 = vcmp.ne.s32.totalorder %v628_v25, 0  ;;  %vm3233_vm2 = vcmp.ne.s32.totalorder %v629_v30, 0  ;;  %v3254_v30 = vld [vmem:[%s4340_s1 + $0x70] sm:$0xff]   ;;  %v1470_v63 = vadd.f32 %v3015_v29, %v3120_v42 }
  0xcb   : > { %v4457_v21 = vsel %vm3229_vm6, 4294967295, %v4456_v21  ;;  %v4459_v44 = vsel %vm3233_vm2, 4294967295, %v4458_v44  ;;  %v1597_v16 = vmax.f32 %v3223_v60, %v3227_v35  ;;  %v3241_v47 = vsel %vm3229_vm6, %v1529_v62, -1e+30  ;;  %4460 = vst [vmem:[#allocation21_spill] sm:$0xff] %v3254_v30 }
  0xcc   : > { %v3245_v49 = vsel %vm3233_vm2, %v1530_v39, -1e+30  ;;  %v3262_v39 = vld [vmem:[%s4340_s1 + $0x30] sm:$0xff]   ;;  %v1502_v33 = vmul.f32 0.2, %v1470_v63  ;;  %v632_v50 = vunpack.c.0.s8 %v2950_v48  ;;  %v633_v58 = vunpack.c.1.s8 %v2950_v48 }
  0xcd   : > { %v1600_v59 = vmax.f32 %v3241_v47, %v3245_v49  ;;  %4461 = vst [vmem:[#allocation22_spill] sm:$0xff] %v3262_v39  ;;  %v1467_v25 = vadd.f32 %v3011_v28, %v3122_v40  ;;  %v1468_v62 = vadd.f32 %v3015_v29, %v3122_v40  ;;  %v630_v40 = vunpack.c.0.s8 %v2953_v51 }
  0xce   : > { %v1534_v45 = vmax.f32 %v1470_v63, %v1502_v33  ;;  %vm3290_vm3 = vcmp.ne.s32.totalorder %v632_v50, 0  ;;  %vm3294_vm9 = vcmp.ne.s32.totalorder %v633_v58, 0 }
  0xcf   : > { %v1500_v63 = vmul.f32 0.2, %v1468_v62  ;;  %vm3310_vm2 = vcmp.ne.s32.totalorder %v630_v40, 0 }
  0xd0   : > { %v3304_v48 = vsel %vm3294_vm9, %v1534_v45, -1e+30 }
  0xd1   : > { %v1532_v58 = vmax.f32 %v1468_v62, %v1500_v63 }
  0xe1   : > { %1598 = vmax.xlane.f32.xlu1 %v1597_v16  ;;  %v4464_v16 = vmov 0 }
  0xe2   : > { %v4465_v16 = vsel %vm3290_vm3, 4294967295, %v4464_v16 }
  0xe3   : > { %1601 = vmax.xlane.f32.xlu0 %v1600_v59 }
  0xf2   : > { %330 = vperm.xlu1 %2566, %v2860_v4   ;;  %v3267_v4 = vld [vmem:[%s4340_s1 + $0x38] sm:$0xff]  }
  0xf3   : > { %4462 = vst [vmem:[#allocation23_spill] sm:$0xff] %v3267_v4 }
  0xf6   : > { %335 = vperm.xlu1 %2566, %v2849_v1   ;;  %v3276_v1 = vld [vmem:[%s4340_s1 + $0x78] sm:$0xff]  }
  0xf7   : > { %4463 = vst [vmem:[#allocation24_spill] sm:$0xff] %v3276_v1 }
  0xf9   : > { %1767 = vrot.lane.b32.xlu0 %v3254_v30, %s2797_s9 }
  0xfa   : > { %345 = vperm.xlu1 %2566, %v2868_v6   ;;  %v1469_v6 = vadd.f32 %v3011_v28, %v3120_v42  ;;  %v4466_v42 = vmov 0 }
  0xfb   : > { %v4467_v42 = vsel %vm3294_vm9, 4294967295, %v4466_v42 }
  0xfc   : > { %v1501_v26 = vmul.f32 0.2, %v1469_v6 }
  0xfd   : > { %1753 = vrot.lane.b32.xlu0 %v3267_v4, %s2797_s9  ;;  %v4468_v4 = vmov 0 }
  0xfe   : > { %1751 = vrot.lane.b32.xlu1 %v3262_v39, %s2797_s9  ;;  %v1533_v43 = vmax.f32 %v1469_v6, %v1501_v26  ;;  %v1499_v6 = vmul.f32 0.2, %v1467_v25  ;;  %v631_v26 = vunpack.c.1.s8 %v2953_v51  ;;  %v4469_v4 = vsel %vm3310_vm2, 4294967295, %v4468_v4 }
  0xff   : > { %4470 = vst [vmem:[#allocation25_spill] sm:$0xff] %v4469_v4 }
 0x100   : > { %v3300_v59 = vsel %vm3290_vm3, %v1533_v43, -1e+30  ;;  %v1531_v50 = vmax.f32 %v1467_v25, %v1499_v6  ;;  %vm3314_vm3 = vcmp.ne.s32.totalorder %v631_v26, 0  ;;  %v4471_v43 = vmov 0 }
 0x101   : > { %v1606_v33 = vmax.f32 %v3300_v59, %v3304_v48  ;;  %v4472_v43 = vsel %vm3314_vm3, 4294967295, %v4471_v43  ;;  %v3324_v51 = vsel %vm3314_vm3, %v1532_v58, -1e+30  ;;  %vm4474_vm3 = vcmask 130048  }
 0x102   : > { %1769 = vrot.lane.b32.xlu1 %v3276_v1, %s2797_s9  ;;  %4473 = vst [vmem:[#allocation26_spill] sm:$0xff] %v4472_v43  ;;  %v3320_v45 = vsel %vm3310_vm2, %v1531_v50, -1e+30  ;;  %vm4475_vm2 = vmmov %vm4474_vm3  ;;  %s2799_s9 = smov 16  }
 0x103   : > { %v1603_v25 = vmax.f32 %v3320_v45, %v3324_v51  ;;  %vm4476_vm9 = vmmov %vm4475_vm2 }
 0x104   : > { %vm4477_vm6 = vmmov %vm4475_vm2 }
 0x11c   : > { %1607 = vmax.xlane.f32.xlu0 %v1606_v33 }
 0x126   : > { %1604 = vmax.xlane.f32.xlu1 %v1603_v25 }
 0x12c   : > { %v1581_v62 = vpop.xlane.xlu1 %1580 }
 0x12d   : > { %v1627_v6 = vmax.f32 %v1581_v62, 0.0 }
 0x12f   : > { %v1584_v63 = vpop.xlane.xlu0 %1583  ;;  %v3331_v33 = vsub.f32 %v3068_v0, %v1627_v6  ;;  %v1644_v50 = vsub.f32 %v3072_v15, %v1627_v6 }
 0x130   : > { %v1628_v40 = vmax.f32 %v1584_v63, 0.0  ;;  %v3328_v26 = vpop.xlane.xlu1 %1586 }
 0x132   : > { %v3335_v1 = vsub.f32 %v3090_v61, %v1628_v40  ;;  %v1646_v58 = vsub.f32 %v3094_v46, %v1628_v40  ;;  %325 = vperm.xlu0 %2567, %v2852_v2  }
 0x133   : > { %v3339_v39 = vpop.xlane.xlu0 %1589 }
 0x134   : > { %v1676_v63 = vpack.c.bf16 %v1646_v58, %v1644_v50 }
 0x135   : > { %v3343_v62 = vpop.xlane.xlu1 %1592 }
 0x136   : > { %340 = vperm.xlu0 %2567, %v2857_v3   ;;  %v1695_v0 = vmul.bf16 1069105081, %v1676_v63  ;;  %v1477_v63 = vadd.f32 %v3011_v28, %v3158_v55 }
 0x137   : > { %355 = vperm.xlu1 %2566, %v2876_v8   ;;  %v3347_v15 = vpop.xlane.xlu0 %1595 }
 0x138   : > { %2586 = vpow.bf16 %v1695_v0  ;;  %v1475_v0 = vadd.f32 %v3011_v28, %v3160_v31 }
 0x139   : > { %v1748_v61 = vpop.permute.xlu1 %1747 }
 0x13a   : > { %350 = vperm.xlu0 %2567, %v2865_v5   ;;  %v1784_v3 = vsel %vm4476_vm9, %v1748_v61, 1065369472  ;;  %v4480_v61 = vmov 0 }
 0x13b   : > { %365 = vperm.xlu1 %2566, %v2882_v10   ;;  %v1764_v2 = vpop.permute.xlu0 %1763  ;;  %v1472_v10 = vadd.f32 %v3015_v29, %v3146_v24 }
 0x13c   : > { %v1808_v46 = vsel %vm4474_vm3, %v1764_v2, 1065369472 }
 0x13d   : > { %v1766_v6 = vpop.permute.xlu1 %1765  ;;  %2495 = vmatprep.subr.bf16.mxu1 %v1808_v46  ;;  %v1504_v58 = vmul.f32 0.2, %v1472_v10 }
 0x13e   : > { %v1811_v40 = vsel %vm4475_vm2, %v1766_v6, 1065369472  ;;  %360 = vperm.xlu0 %2567, %v2873_v7   ;;  %2496 = vmatpush3.bf16.msra.mxu1 %v1784_v3  ;;  %v1471_v7 = vadd.f32 %v3011_v28, %v3146_v24  ;;  %v1478_v24 = vadd.f32 %v3015_v29, %v3158_v55  ;;  %v1476_v55 = vadd.f32 %v3015_v29, %v3160_v31 }
 0x13f   : > { %375 = vperm.xlu1 %2566, %v2892_v12   ;;  %v1750_v8 = vpop.permute.xlu0 %1749  ;;  %2497 = vmatprep.subr.bf16.mxu1 %v1811_v40  ;;  %v634_v12 = vunpack.c.0.s8 %v2956_v52  ;;  %v4484_v6 = vmov 0  ;;  %v1509_v3 = vmul.f32 0.2, %v1477_v63  ;;  %v1507_v31 = vmul.f32 0.2, %v1475_v0 }
 0x140   : > { %v1787_v50 = vsel %vm4477_vm6, %v1750_v8, 1065369472  ;;  %v1510_v8 = vmul.f32 0.2, %v1478_v24 }
 0x141   : > { %vm3379_vm2 = vcmp.ne.s32.totalorder %v634_v12, 0  ;;  %v1482_v12 = vadd.f32 %v3015_v29, %v3162_v32 }
 0x142   : > { %370 = vperm.xlu0 %2567, %v2879_v9   ;;  %2498 = vmatpush3.bf16.msra.mxu1 %v1787_v50  ;;  %v635_v9 = vunpack.c.1.s8 %v2956_v52  ;;  %v4478_v52 = vmov 0  ;;  %v1536_v50 = vmax.f32 %v1472_v10, %v1504_v58  ;;  %v639_v10 = vunpack.c.1.s8 %v2975_v23 }
 0x143   : > { %385 = vperm.xlu1 %2566, %v2900_v14   ;;  %v2587_v5 = vpop.eup %2586  ;;  %v636_v14 = vunpack.c.0.s8 %v2967_v57  ;;  %v4479_v52 = vsel %vm3379_vm2, 4294967295, %v4478_v52  ;;  %v1480_v58 = vadd.f32 %v3015_v29, %v3164_v56  ;;  %v1542_v30 = vmax.f32 %v1478_v24, %v1510_v8 }
 0x144   : > { %1851 = vmatprep.mubr.bf16.mxu1 %v2587_v5  ;;  %vm3385_vm9 = vcmp.ne.s32.totalorder %v635_v9, 0  ;;  %v1481_v5 = vadd.f32 %v3011_v28, %v3162_v32  ;;  %v641_v9 = vunpack.c.1.s8 %v2972_v20  ;;  %v1514_v4 = vmul.f32 0.2, %v1482_v12 }
 0x145   : > { %v4481_v61 = vsel %vm3385_vm9, 4294967295, %v4480_v61  ;;  %vm3389_vm3 = vcmp.ne.s32.totalorder %v636_v14, 0  ;;  %v638_v14 = vunpack.c.0.s8 %v2975_v23  ;;  %v3421_v25 = vsel %vm3385_vm9, %v1536_v50, -1e+30 }
 0x146   : > { %380 = vperm.xlu0 %2567, %v2889_v11   ;;  %v1503_v11 = vmul.f32 0.2, %v1471_v7  ;;  %4489 = vst [vmem:[#allocation28_spill] sm:$0xff] %v3421_v25  ;;  %v1513_v43 = vmul.f32 0.2, %v1481_v5  ;;  %vm3423_vm0 = vcmp.ne.s32.totalorder %v641_v9, 0 }
 0x147   : > { %400 = vperm.xlu1 %2566, %v2912_v17   ;;  %v1473_v17 = vadd.f32 %v3011_v28, %v3144_v38  ;;  %v4490_v23 = vmov 0  ;;  %vm3427_vm13 = vcmp.ne.s32.totalorder %v638_v14, 0  ;;  %v3453_v9 = vsel %vm3423_vm0, %v1542_v30, -1e+30 }
 0x148   : > { %v1535_v46 = vmax.f32 %v1471_v7, %v1503_v11  ;;  %v1479_v7 = vadd.f32 %v3011_v28, %v3164_v56  ;;  %v4491_v23 = vsel %vm3423_vm0, 4294967295, %v4490_v23 }
 0x149   : > { %v1505_v2 = vmul.f32 0.2, %v1473_v17 }
 0x14a   : > { %390 = vperm.xlu0 %2567, %v2897_v13   ;;  %v637_v13 = vunpack.c.1.s8 %v2967_v57  ;;  %v3417_v32 = vsel %vm3379_vm2, %v1535_v46, -1e+30  ;;  %v1511_v56 = vmul.f32 0.2, %v1479_v7  ;;  %vm3431_vm2 = vcmp.ne.s32.totalorder %v639_v10, 0 }
 0x14b   : > { %4488 = vst [vmem:[#allocation27_spill] sm:$0xff] %v3417_v32  ;;  %v1609_v24 = vmax.f32 %v3417_v32, %v3421_v25  ;;  %v1545_v10 = vmax.f32 %v1481_v5, %v1513_v43  ;;  %v4498_v25 = vld [vmem:[#allocation3_spill] sm:$0xff] }
 0x14c   : > { %vm3396_vm6 = vcmp.ne.s32.totalorder %v637_v13, 0  ;;  %v1508_v13 = vmul.f32 0.2, %v1476_v55  ;;  %v642_v32 = vunpack.c.0.s8 %v4498_v25 }
 0x14d   : > { %v4485_v6 = vsel %vm3396_vm6, 4294967295, %v4484_v6 }
 0x14e   : > { %395 = vperm.xlu0 %2567, %v2915_v18   ;;  %v1474_v18 = vadd.f32 %v3015_v29, %v3144_v38  ;;  %v640_v38 = vunpack.c.0.s8 %v2972_v20  ;;  %v1537_v20 = vmax.f32 %v1473_v17, %v1505_v2  ;;  %v4492_v29 = vmov 0  ;;  %v4496_v2 = vld [vmem:[#allocation2_spill] sm:$0xff] }
 0x14f   : > { %v4493_v29 = vsel %vm3427_vm13, 4294967295, %v4492_v29  ;;  %v644_v46 = vunpack.c.0.s8 %v4496_v2  ;;  %v1540_v14 = vmax.f32 %v1476_v55, %v1508_v13  ;;  %v1630_v55 = vmax.f32 %v3339_v39, 0.0 }
 0x150   : > { %v1506_v40 = vmul.f32 0.2, %v1474_v18  ;;  %vm3408_vm1 = vcmp.ne.s32.totalorder %v640_v38, 0  ;;  %v1541_v38 = vmax.f32 %v1477_v63, %v1509_v3  ;;  %v1512_v63 = vmul.f32 0.2, %v1480_v58 }
 0x151   : > { %v1539_v3 = vmax.f32 %v1475_v0, %v1507_v31  ;;  %vm3457_vm9 = vcmp.ne.s32.totalorder %v644_v46, 0  ;;  %v3479_v5 = vsel %vm3431_vm2, %v1540_v14, -1e+30  ;;  %v4508_v39 = vmov 0 }
 0x152   : > { %v1538_v28 = vmax.f32 %v1474_v18, %v1506_v40  ;;  %v645_v18 = vunpack.c.1.s8 %v4496_v2  ;;  %v3441_v40 = vsel %vm3389_vm3, %v1537_v20, -1e+30  ;;  %v3449_v50 = vsel %vm3408_vm1, %v1541_v38, -1e+30  ;;  %4503 = vst [vmem:[#allocation3_spill] sm:$0xff] %v3479_v5 }
 0x153   : > { %4497 = vst [vmem:[#allocation2_spill] sm:$0xff] %v3449_v50  ;;  %v1546_v2 = vmax.f32 %v1482_v12, %v1514_v4  ;;  %v643_v20 = vunpack.c.1.s8 %v4498_v25  ;;  %v1618_v43 = vmax.f32 %v3449_v50, %v3453_v9  ;;  %v321_v4 = vld [vmem:[%s4341_s2] ss:$2 sm:$0x3]  ;;  %v3474_v25 = vsel %vm3427_vm13, %v1539_v3, -1e+30 }
 0x154   : > { %v3445_v8 = vsel %vm3396_vm6, %v1538_v28, -1e+30  ;;  %vm3461_vm6 = vcmp.ne.s32.totalorder %v645_v18, 0  ;;  %v1543_v12 = vmax.f32 %v1479_v7, %v1511_v56  ;;  %v1544_v13 = vmax.f32 %v1480_v58, %v1512_v63  ;;  %v4510_v58 = vld [vmem:[#allocation4_spill] sm:$0xff]  ;;  %v4562_v18 = vld [vmem:[#allocation19_spill] sm:$0xff] }
 0x155   : > { %v1612_v30 = vmax.f32 %v3441_v40, %v3445_v8  ;;  %v3485_v38 = vsel %vm3457_vm9, %v1545_v10, -1e+30  ;;  %v3489_v46 = vsel %vm3461_vm6, %v1546_v2, -1e+30  ;;  %vm3491_vm13 = vcmp.ne.s32.totalorder %v642_v32, 0 }
 0x156   : > { %4504 = vst [vmem:[#allocation29_spill] sm:$0xff] %v3485_v38  ;;  %4505 = vst [vmem:[#allocation30_spill] sm:$0xff] %v3489_v46  ;;  %vm3495_vm0 = vcmp.ne.s32.totalorder %v643_v20, 0  ;;  %v1629_v7 = vmax.f32 %v3328_v26, 0.0  ;;  %v4511_v56 = vsub.s32 0, %v4510_v58  ;;  %v1615_v32 = vmax.f32 %v3474_v25, %v3479_v5 }
 0x157   : > { %v4509_v39 = vsel %vm3495_vm0, 4294967295, %v4508_v39  ;;  %v1650_v14 = vsub.f32 %v3108_v19, %v1630_v55  ;;  %v1624_v2 = vmax.f32 %v3485_v38, %v3489_v46  ;;  %v3517_v26 = vsel %vm3491_vm13, %v1543_v12, -1e+30 }
 0x158   : > { %v3502_v63 = vrot.slane %v321_v4, %v4511_v56  ;;  %4513 = vst [vmem:[#allocation4_spill] sm:$0xff] %v3517_v26  ;;  %v3521_v20 = vsel %vm3495_vm0, %v1544_v13, -1e+30  ;;  %v1632_v12 = vmax.f32 %v3347_v15, 0.0  ;;  %vm4514_vm0 = vcmask 130048  }
 0x16b   : > { %1610 = vmax.xlane.f32.xlu1 %v1609_v24  ;;  %v4512_v24 = vsub.s32 1, %v4510_v58  ;;  %v1621_v58 = vmax.f32 %v3517_v26, %v3521_v20 }
 0x16d   : > { %1613 = vmax.xlane.f32.xlu0 %v1612_v30  ;;  %v3506_v3 = vrot.slane %v321_v4, %v4512_v24 }
 0x16e   : > { %v3481_v28 = vpop.xlane.xlu1 %1598 }
 0x16f   : > { %1619 = vmax.xlane.f32.xlu1 %v1618_v43  ;;  %v1648_v43 = vsub.f32 %v3100_v36, %v1629_v7  ;;  %v1631_v36 = vmax.f32 %v3343_v62, 0.0 }
 0x170   : > { %v3511_v10 = vpop.xlane.xlu0 %1601 }
 0x171   : > { %1616 = vmax.xlane.f32.xlu0 %v1615_v32  ;;  %v1678_v56 = vpack.c.bf16 %v1650_v14, %v1648_v43  ;;  %v1649_v14 = vsub.f32 %v3104_v41, %v1630_v55  ;;  %v1654_v43 = vsub.f32 %v3154_v27, %v1632_v12  ;;  %v1634_v53 = vmax.f32 %v3511_v10, 0.0 }
 0x172   : > { %v331_v30 = vpop.permute.xlu1 %330 }
 0x173   : > { %v416_v4 = vadd.f32 %v3502_v63, %v331_v30  ;;  %v417_v19 = vadd.f32 %v3506_v3, %v331_v30  ;;  %1625 = vmax.xlane.f32.xlu1 %v1624_v2  ;;  %v4515_v2 = vpack.c.bf16 %v3335_v1, %v3331_v33  ;;  %v1701_v15 = vmul.bf16 1069105081, %v1678_v56 }
 0x174   : > { %v1768_v46 = vpop.permute.xlu0 %1767  ;;  %v1658_v56 = vsub.f32 %v3245_v49, %v1634_v53  ;;  %v1657_v49 = vsub.f32 %v3241_v47, %v1634_v53  ;;  %v2778_v47 = vld [vmem:[%s4340_s1 + $0x40] sm:$0xff]  }
 0x175   : > { %v448_v24 = vmul.f32 0.2, %v416_v4  ;;  %v449_v38 = vmul.f32 0.2, %v417_v19  ;;  %v1814_v13 = vsel %vm4514_vm0, %v1768_v46, 1065369472  ;;  %1622 = vmax.xlane.f32.xlu0 %v1621_v58  ;;  %v1647_v58 = vsub.f32 %v3082_v34, %v1629_v7 }
 0x176   : > { %v3530_v50 = vpop.permute.xlu1 %335  ;;  %2499 = vmatprep.subr.bf16.mxu1 %v1814_v13  ;;  %v1692_v30 = vmul.bf16 1069105081, %v4515_v2  ;;  %v1633_v34 = vmax.f32 %v3481_v28, 0.0  ;;  %v4519_v13 = vld [vmem:[#allocation15_spill] sm:$0xff]  ;;  %v2779_v53 = vld [vmem:[%s4340_s1] sm:$0xff]  }
 0x177   : > { %v480_v32 = vmax.f32 %v416_v4, %v448_v24  ;;  %v481_v5 = vmax.f32 %v417_v19, %v449_v38  ;;  %v4516_v38 = vld [vmem:[#allocation16_spill] sm:$0xff]  ;;  %v1677_v33 = vpack.c.bf16 %v1649_v14, %v1647_v58 }
 0x178   : > { %v1652_v1 = vsub.f32 %v4516_v38, %v1631_v36  ;;  %2588 = vpow.bf16 %v1692_v30  ;;  %v1754_v24 = vpop.permute.xlu0 %1753  ;;  %v1656_v30 = vsub.f32 %v3227_v35, %v1633_v34  ;;  %v1655_v35 = vsub.f32 %v3223_v60, %v1633_v34 }
 0x179   : > { %v3540_v46 = vsel %vm3030_vm7, %v480_v32, -1e+30  ;;  %v3547_v62 = vsel %vm3034_vm8, %v481_v5, -1e+30  ;;  %2590 = vpow.bf16 %v1701_v15  ;;  %vm4517_vm7 = vmmov %vm4514_vm0  ;;  %v1698_v54 = vmul.bf16 1069105081, %v1677_v33 }
 0x17a   : > { %v3543_v26 = vpop.permute.xlu1 %345  ;;  %v713_v41 = vmax.f32 %v3540_v46, %v3547_v62  ;;  %v1680_v27 = vpack.c.bf16 %v1654_v43, %v1652_v1  ;;  %v4518_v5 = vld [vmem:[#allocation17_spill] sm:$0xff]  ;;  %v1651_v32 = vsub.f32 %v4519_v13, %v1631_v36  ;;  %vm4520_vm8 = vmmov %vm4514_vm0  ;;  %v1793_v28 = vsel %vm4514_vm0, %v1754_v24, 1065369472  ;;  %v2783_v13 = vld [vmem:[%s4340_s1 + $0x10] sm:$0xff]  }
 0x17b   : > { %v1653_v4 = vsub.f32 %v4518_v5, %v1632_v12  ;;  %2592 = vpow.bf16 %v1698_v54  ;;  %v1682_v15 = vpack.c.bf16 %v1658_v56, %v1656_v30  ;;  %v1681_v38 = vpack.c.bf16 %v1657_v49, %v1655_v35  ;;  %v2780_v54 = vld [vmem:[%s4340_s1 + $0x48] sm:$0xff]   ;;  %v2782_v56 = vld [vmem:[%s4340_s1 + $0x50] sm:$0xff]  }
 0x17c   : > { %714 = vmax.xlane.f32.xlu1 %v713_v41  ;;  %v1707_v19 = vmul.bf16 1069105081, %v1680_v27  ;;  %v980_v5 = vsel %vm4514_vm0, %v2780_v54, 1065369472  ;;  %v419_v30 = vadd.f32 %v3506_v3, %v3530_v50 }
 0x17d   : > { %v1679_v14 = vpack.c.bf16 %v1653_v4, %v1651_v32  ;;  %v1713_v36 = vmul.bf16 1069105081, %v1682_v15  ;;  %v1710_v41 = vmul.bf16 1069105081, %v1681_v38  ;;  %v2781_v4 = vld [vmem:[%s4340_s1 + $0x8] sm:$0xff]  }
 0x17e   : > { %v1752_v55 = vpop.permute.xlu1 %1751  ;;  %2594 = vpow.bf16 %v1707_v19  ;;  %v959_v32 = vsel %vm4514_vm0, %v2783_v13, 1065369472  ;;  %v451_v15 = vmul.f32 0.2, %v419_v30 }
 0x17f   : > { %v1790_v7 = vsel %vm4517_vm7, %v1752_v55, 1065369472  ;;  %v1704_v58 = vmul.bf16 1069105081, %v1679_v14  ;;  %vm4521_vm7 = vmmov %vm4514_vm0 }
 0x180   : > { %2500 = vmatpush3.bf16.msra.mxu1 %v1790_v7  ;;  %v977_v60 = vsel %vm4521_vm7, %v2778_v47, 1065369472  ;;  %vm4523_vm7 = vmmov %vm4514_vm0 }
 0x181   : > { %2596 = vpow.bf16 %v1704_v58  ;;  %2423 = vmatprep.subr.bf16.mxu0 %v977_v60  ;;  %v956_v19 = vsel %vm4523_vm7, %v2781_v4, 1065369472  ;;  %vm4548_vm7 = vnez %v4465_v16  ;;  %v4552_v16 = vld [vmem:[#allocation26_spill] sm:$0xff] }
 0x182   : > { %v1770_v2 = vpop.permute.xlu1 %1769  ;;  %2598 = vpow.bf16 %v1713_v36 }
 0x183   : > { %v1817_v10 = vsel %vm4520_vm8, %v1770_v2, 1065369472  ;;  %v2589_v12 = vpop.eup %2588  ;;  %2600 = vpow.bf16 %v1710_v41  ;;  %vm4522_vm8 = vmmov %vm4514_vm0  ;;  %v418_v2 = vadd.f32 %v3502_v63, %v3530_v50  ;;  %v483_v50 = vmax.f32 %v419_v30, %v451_v15 }
 0x184   : > { %2501 = vmatprep.subr.bf16.mxu1 %v1817_v10  ;;  %v2591_v43 = vpop.eup %2590  ;;  %v953_v34 = vsel %vm4522_vm8, %v2779_v53, 1065369472  ;;  %vm4524_vm8 = vmmov %vm4514_vm0 }
 0x185   : > { %2502 = vmatpush3.bf16.msra.mxu1 %v1793_v28  ;;  %2424 = vmatpush3.bf16.msra.mxu0 %v953_v34  ;;  %v983_v24 = vsel %vm4524_vm8, %v2782_v56, 1065369472  ;;  %v450_v14 = vmul.f32 0.2, %v418_v2  ;;  %v422_v28 = vadd.f32 %v3502_v63, %v3543_v26  ;;  %vm4549_vm8 = vnez %v4467_v42 }
 0x186   : > { %v2593_v1 = vpop.eup %2592  ;;  %2425 = vmatprep.subr.bf16.mxu0 %v980_v5 }
 0x187   : > { %v482_v49 = vmax.f32 %v418_v2, %v450_v14  ;;  %v454_v36 = vmul.f32 0.2, %v422_v28 }
 0x188   : > { %1852 = vmatmul.mubr.bf16.vlgmr.msra.gmra.mrb[0].mxu1 %v2589_v12  ;;  %v423_v12 = vadd.f32 %v3506_v3, %v3543_v26 }
 0x189   : > { %1859 = vmatprep.mubr.bf16.mxu1 %v2591_v43  ;;  %v2595_v33 = vpop.eup %2594  ;;  %2426 = vmatpush3.bf16.msra.mxu0 %v956_v19  ;;  %v486_v34 = vmax.f32 %v422_v28, %v454_v36  ;;  %v3605_v56 = vsel %vm3042_vm10, %v482_v49, -1e+30 }
 0x18a   : > { %2427 = vmatprep.subr.bf16.mxu0 %v983_v24  ;;  %v455_v41 = vmul.f32 0.2, %v423_v12  ;;  %4526 = vst [vmem:[#allocation16_spill] sm:$0xff] %v3605_v56 }
 0x18c   : > { %v2597_v27 = vpop.eup %2596 }
 0x18d   : > { %v2599_v55 = vpop.eup %2598  ;;  %2428 = vmatpush3.bf16.msra.mxu0 %v959_v32 }
 0x18e   : > { %v2601_v7 = vpop.eup %2600 }
 0x190   : > { %1860 = vmatmul.mubr.bf16.gmra.mrb[4].mxu1 %v2593_v1 }
 0x191   : > { %1867 = vmatprep.mubr.bf16.mxu1 %v2595_v33 }
 0x198   : > { %1868 = vmatmul.mubr.bf16.gmra.mrb[8].mxu1 %v2597_v27 }
 0x199   : > { %1875 = vmatprep.mubr.bf16.mxu1 %v2599_v55 }
 0x1a0   : > { %1876 = vmatmul.mubr.bf16.gmra.mrb[12].mxu1 %v2601_v7 }
 0x1a9   : > { %v1608_v10 = vpop.xlane.xlu0 %1607 }
 0x1aa   : > { %v1636_v43 = vmax.f32 %v1608_v10, 0.0 }
 0x1ac   : > { %v1661_v7 = vsub.f32 %v3300_v59, %v1636_v43  ;;  %v1662_v47 = vsub.f32 %v3304_v48, %v1636_v43  ;;  %v3609_v48 = vsel %vm3046_vm11, %v483_v50, -1e+30  ;;  %vm4544_vm11 = vnez %v4457_v21 }
 0x1ad   : > { %4528 = vst [vmem:[#allocation17_spill] sm:$0xff] %v3609_v48  ;;  %v716_v36 = vmax.f32 %v3605_v56, %v3609_v48 }
 0x1b1   : > { %v326_v58 = vpop.permute.xlu0 %325 }
 0x1b2   : > { %v414_v35 = vadd.f32 %v3502_v63, %v326_v58  ;;  %v415_v38 = vadd.f32 %v3506_v3, %v326_v58 }
 0x1b3   : > { %v1605_v1 = vpop.xlane.xlu1 %1604 }
 0x1b4   : > { %v1635_v33 = vmax.f32 %v1605_v1, 0.0  ;;  %v446_v27 = vmul.f32 0.2, %v414_v35  ;;  %v447_v55 = vmul.f32 0.2, %v415_v38 }
 0x1b5   : > { %v341_v53 = vpop.permute.xlu0 %340 }
 0x1b6   : > { %v1659_v26 = vsub.f32 %v3320_v45, %v1635_v33  ;;  %v1660_v60 = vsub.f32 %v3324_v51, %v1635_v33  ;;  %v420_v54 = vadd.f32 %v3502_v63, %v341_v53  ;;  %v421_v5 = vadd.f32 %v3506_v3, %v341_v53 }
 0x1b7   : > { %v356_v4 = vpop.permute.xlu1 %355  ;;  %v478_v24 = vmax.f32 %v414_v35, %v446_v27  ;;  %v487_v45 = vmax.f32 %v423_v12, %v455_v41  ;;  %v479_v51 = vmax.f32 %v415_v38, %v447_v55  ;;  %v3622_v12 = vsel %vm3112_vm14, %v486_v34, -1e+30  ;;  %v4537_v55 = vld [vmem:[#allocation10_spill] sm:$0xff] }
 0x1b8   : > { %v1683_v13 = vpack.c.bf16 %v1661_v7, %v1659_v26  ;;  %v1684_v59 = vpack.c.bf16 %v1662_v47, %v1660_v60  ;;  %v452_v2 = vmul.f32 0.2, %v420_v54  ;;  %v453_v14 = vmul.f32 0.2, %v421_v5  ;;  %4530 = vst [vmem:[#allocation15_spill] sm:$0xff] %v3622_v12 }
 0x1b9   : > { %v3612_v28 = vadd.f32 %v3502_v63, %v356_v4  ;;  %v351_v15 = vpop.permute.xlu0 %350  ;;  %v3615_v43 = vadd.f32 %v3506_v3, %v356_v4  ;;  %v3630_v33 = vsel %vm3018_vm4, %v478_v24, -1e+30  ;;  %v3634_v7 = vsel %vm3116_vm15, %v487_v45, -1e+30 }
 0x1ba   : > { %v1716_v30 = vmul.bf16 1069105081, %v1683_v13  ;;  %v1719_v10 = vmul.bf16 1069105081, %v1684_v59  ;;  %v424_v58 = vadd.f32 %v3502_v63, %v351_v15  ;;  %v425_v38 = vadd.f32 %v3506_v3, %v351_v15  ;;  %4533 = vst [vmem:[#allocation7_spill] sm:$0xff] %v3634_v7 }
 0x1bb   : > { %v366_v49 = vpop.permute.xlu1 %365  ;;  %v484_v41 = vmax.f32 %v420_v54, %v452_v2  ;;  %v485_v47 = vmax.f32 %v421_v5, %v453_v14  ;;  %v3637_v26 = vmul.f32 0.2, %v3612_v28  ;;  %v3641_v34 = vsel %vm3022_vm5, %v479_v51, -1e+30  ;;  %v4540_v14 = vld [vmem:[#allocation13_spill] sm:$0xff] }
 0x1bc   : > { %2602 = vpow.bf16 %v1716_v30  ;;  %v3626_v1 = vadd.f32 %v3502_v63, %v366_v49  ;;  %v456_v27 = vmul.f32 0.2, %v424_v58  ;;  %v457_v60 = vmul.f32 0.2, %v425_v38 }
 0x1bd   : > { %2604 = vpow.bf16 %v1719_v10  ;;  %v361_v4 = vpop.permute.xlu0 %360  ;;  %v3644_v19 = vmul.f32 0.2, %v3615_v43  ;;  %v3647_v54 = vadd.f32 %v3506_v3, %v366_v49  ;;  %v710_v24 = vmax.f32 %v3630_v33, %v3641_v34 }
 0x1be   : > { %v428_v5 = vadd.f32 %v3502_v63, %v361_v4  ;;  %v3653_v59 = vmul.f32 0.2, %v3626_v1  ;;  %v429_v32 = vadd.f32 %v3506_v3, %v361_v4  ;;  %v722_v51 = vmax.f32 %v3622_v12, %v3634_v7 }
 0x1bf   : > { %v376_v13 = vpop.permute.xlu1 %375  ;;  %v488_v2 = vmax.f32 %v424_v58, %v456_v27  ;;  %711 = vmax.xlane.f32.xlu0 %v710_v24  ;;  %v3666_v15 = vsel %vm3050_vm12, %v484_v41, -1e+30  ;;  %v490_v49 = vmax.f32 %v3612_v28, %v3637_v26  ;;  %v489_v35 = vmax.f32 %v425_v38, %v457_v60 }
 0x1c0   : > { %v3657_v45 = vadd.f32 %v3502_v63, %v376_v13  ;;  %v460_v30 = vmul.f32 0.2, %v428_v5  ;;  %v3662_v10 = vadd.f32 %v3506_v3, %v376_v13  ;;  %4536 = vst [vmem:[#allocation8_spill] sm:$0xff] %v3666_v15  ;;  %v461_v50 = vmul.f32 0.2, %v429_v32 }
 0x1c1   : > { %vm4538_vm4 = vnez %v4537_v55  ;;  %v371_v4 = vpop.permute.xlu0 %370  ;;  %v491_v58 = vmax.f32 %v3615_v43, %v3644_v19  ;;  %v3677_v27 = vmul.f32 0.2, %v3647_v54  ;;  %v494_v43 = vmax.f32 %v3626_v1, %v3653_v59 }
 0x1c2   : > { %v3672_v53 = vsel %vm4538_vm4, %v485_v47, -1e+30  ;;  %v432_v24 = vadd.f32 %v3502_v63, %v371_v4  ;;  %v3683_v28 = vmul.f32 0.2, %v3657_v45  ;;  %v3686_v38 = vmul.f32 0.2, %v3662_v10 }
 0x1c3   : > { %4539 = vst [vmem:[#allocation11_spill] sm:$0xff] %v3672_v53  ;;  %v719_v41 = vmax.f32 %v3666_v15, %v3672_v53  ;;  %v386_v13 = vpop.permute.xlu1 %385  ;;  %v433_v47 = vadd.f32 %v3506_v3, %v371_v4  ;;  %v492_v60 = vmax.f32 %v428_v5, %v460_v30  ;;  %717 = vmax.xlane.f32.xlu0 %v716_v36  ;;  %v4542_v4 = vld [vmem:[#allocation14_spill] sm:$0xff] }
 0x1c4   : > { %v3690_v26 = vadd.f32 %v3502_v63, %v386_v13  ;;  %v464_v19 = vmul.f32 0.2, %v432_v24  ;;  %vm4541_vm5 = vnez %v4540_v14  ;;  %v493_v12 = vmax.f32 %v429_v32, %v461_v50 }
 0x1c5   : > { %720 = vmax.xlane.f32.xlu1 %v719_v41  ;;  %v3696_v55 = vsel %vm4541_vm5, %v488_v2, -1e+30  ;;  %v465_v7 = vmul.f32 0.2, %v433_v47  ;;  %v3699_v48 = vadd.f32 %v3506_v3, %v386_v13  ;;  %vm4543_vm10 = vnez %v4542_v4  ;;  %v381_v53 = vpop.permute.xlu0 %380 }
 0x1c6   : > { %v3703_v56 = vsel %vm4543_vm10, %v489_v35, -1e+30  ;;  %v495_v1 = vmax.f32 %v3647_v54, %v3677_v27  ;;  %v3708_v36 = vmul.f32 0.2, %v3690_v26  ;;  %v436_v59 = vadd.f32 %v3502_v63, %v381_v53 }
 0x1c7   : > { %v2603_v15 = vpop.eup %2602  ;;  %v725_v5 = vmax.f32 %v3696_v55, %v3703_v56  ;;  %v401_v32 = vpop.permute.xlu1 %400  ;;  %v498_v30 = vmax.f32 %v3657_v45, %v3683_v28  ;;  %v499_v35 = vmax.f32 %v3662_v10, %v3686_v38  ;;  %v437_v50 = vadd.f32 %v3506_v3, %v381_v53  ;;  %723 = vmax.xlane.f32.xlu0 %v722_v51 }
 0x1c8   : > { %v2605_v2 = vpop.eup %2604  ;;  %v3719_v54 = vadd.f32 %v3502_v63, %v401_v32  ;;  %v496_v27 = vmax.f32 %v432_v24, %v464_v19  ;;  %v468_v41 = vmul.f32 0.2, %v436_v59  ;;  %v3722_v13 = vadd.f32 %v3506_v3, %v401_v32 }
 0x1c9   : > { %726 = vmax.xlane.f32.xlu1 %v725_v5  ;;  %v3726_v14 = vsel %vm4544_vm11, %v492_v60, -1e+30  ;;  %v497_v45 = vmax.f32 %v433_v47, %v465_v7  ;;  %v471_v28 = vmul.f32 0.2, %v3699_v48  ;;  %v469_v10 = vmul.f32 0.2, %v437_v50  ;;  %1883 = vmatprep.mubr.bf16.mxu1 %v2605_v2  ;;  %v391_v24 = vpop.permute.xlu0 %390 }
 0x1ca   : > { %vm4545_vm12 = vnez %v4459_v44  ;;  %v502_v51 = vmax.f32 %v3690_v26, %v3708_v36  ;;  %v476_v38 = vmul.f32 0.2, %v3719_v54  ;;  %1884 = vmatmul.mubr.bf16.gmra.mrb[16].mxu1 %v2603_v15  ;;  %vm4546_vm14 = vnez %v4453_v37 }
 0x1cb   : > { %v3731_v53 = vsel %vm4545_vm12, %v493_v12, -1e+30  ;;  %v3740_v7 = vsel %vm4546_vm14, %v490_v49, -1e+30  ;;  %v500_v47 = vmax.f32 %v436_v59, %v468_v41  ;;  %v477_v60 = vmul.f32 0.2, %v3722_v13 }
 0x1cc   : > { %v731_v21 = vmax.f32 %v3726_v14, %v3731_v53  ;;  %vm4547_vm15 = vnez %v4455_v22  ;;  %v440_v12 = vadd.f32 %v3502_v63, %v391_v24  ;;  %v501_v26 = vmax.f32 %v437_v50, %v469_v10 }
 0x1cd   : > { %v3745_v44 = vsel %vm4547_vm15, %v491_v58, -1e+30  ;;  %v441_v15 = vadd.f32 %v3506_v3, %v391_v24  ;;  %v3753_v37 = vsel %vm4548_vm7, %v496_v27, -1e+30  ;;  %v503_v49 = vmax.f32 %v3699_v48, %v471_v28  ;;  %v4550_v58 = vld [vmem:[#allocation25_spill] sm:$0xff]  ;;  %v396_v5 = vpop.permute.xlu0 %395 }
 0x1ce   : > { %732 = vmax.xlane.f32.xlu1 %v731_v21  ;;  %v728_v19 = vmax.f32 %v3740_v7, %v3745_v44  ;;  %v472_v4 = vmul.f32 0.2, %v440_v12  ;;  %v3758_v22 = vsel %vm4549_vm8, %v497_v45, -1e+30  ;;  %vm4551_vm0 = vnez %v4550_v58 }
 0x1cf   : > { %v3762_v36 = vsel %vm4551_vm0, %v494_v43, -1e+30  ;;  %v473_v59 = vmul.f32 0.2, %v441_v15  ;;  %v737_v32 = vmax.f32 %v3753_v37, %v3758_v22  ;;  %vm4553_vm4 = vnez %v4552_v16 }
 0x1d0   : > { %729 = vmax.xlane.f32.xlu0 %v728_v19  ;;  %v3768_v2 = vsel %vm4553_vm4, %v495_v1, -1e+30  ;;  %v442_v48 = vadd.f32 %v3502_v63, %v396_v5  ;;  %v504_v50 = vmax.f32 %v440_v12, %v472_v4  ;;  %v443_v27 = vadd.f32 %v3506_v3, %v396_v5  ;;  %v4567_v4 = vld [vmem:[#allocation20_spill] sm:$0xff]  ;;  %v4569_v5 = vld [vmem:[#allocation21_spill] sm:$0xff] }
 0x1d1   : > { %v734_v42 = vmax.f32 %v3762_v36, %v3768_v2  ;;  %v3776_v43 = vsel %vm3389_vm3, %v500_v47, -1e+30  ;;  %v505_v41 = vmax.f32 %v441_v15, %v473_v59  ;;  %vm4554_vm5 = vnez %v4485_v6  ;;  %v4565_v15 = vld [vmem:[#allocation18_spill] sm:$0xff] }
 0x1d2   : > { %738 = vmax.xlane.f32.xlu1 %v737_v32  ;;  %v474_v45 = vmul.f32 0.2, %v442_v48  ;;  %v3780_v28 = vsel %vm4554_vm5, %v501_v26, -1e+30  ;;  %vm4555_vm10 = vnez %v4479_v52  ;;  %v475_v1 = vmul.f32 0.2, %v443_v27 }
 0x1d3   : > { %v3784_v63 = vsel %vm4555_vm10, %v498_v30, -1e+30  ;;  %v743_v10 = vmax.f32 %v3776_v43, %v3780_v28  ;;  %vm4556_vm11 = vnez %v4481_v61  ;;  %v3794_v3 = vsel %vm3408_vm1, %v504_v50, -1e+30  ;;  %v4571_v32 = vld [vmem:[#allocation22_spill] sm:$0xff] }
 0x1d4   : > { %v3790_v57 = vsel %vm4556_vm11, %v499_v35, -1e+30  ;;  %v508_v6 = vmax.f32 %v3719_v54, %v476_v38  ;;  %735 = vmax.xlane.f32.xlu0 %v734_v42  ;;  %vm4557_vm3 = vnez %v4491_v23  ;;  %v509_v30 = vmax.f32 %v3722_v13, %v477_v60  ;;  %v2784_v13 = vld [vmem:[%s4340_s1 + $0x58] sm:$0xff]   ;;  %v4575_v42 = vld [vmem:[#allocation23_spill] sm:$0xff] }
 0x1d5   : > { %v3799_v52 = vsel %vm4557_vm3, %v505_v41, -1e+30  ;;  %v506_v24 = vmax.f32 %v442_v48, %v474_v45  ;;  %v507_v21 = vmax.f32 %v443_v27, %v475_v1  ;;  %v740_v61 = vmax.f32 %v3784_v63, %v3790_v57  ;;  %v4573_v48 = vld [vmem:[#allocation24_spill] sm:$0xff] }
 0x1d6   : > { %744 = vmax.xlane.f32.xlu1 %v743_v10  ;;  %v749_v11 = vmax.f32 %v3794_v3, %v3799_v52  ;;  %vm4558_vm1 = vnez %v4493_v29  ;;  %v3812_v23 = vsel %vm3431_vm2, %v503_v49, -1e+30  ;;  %v3816_v54 = vsel %vm3457_vm9, %v508_v6, -1e+30  ;;  %v2785_v29 = vld [vmem:[%s4340_s1 + $0x18] sm:$0xff]  }
 0x1d7   : > { %v3808_v35 = vsel %vm4558_vm1, %v502_v51, -1e+30  ;;  %vm4559_vm12 = vcmask 130048   ;;  %v3828_v17 = vsel %vm3461_vm6, %v509_v30, -1e+30  ;;  %vm4561_vm2 = vnez %v4509_v39  ;;  %v2786_v39 = vld [vmem:[%s4340_s1 + $0x20] sm:$0xff]  }
 0x1d8   : > { %741 = vmax.xlane.f32.xlu0 %v740_v61  ;;  %v986_v38 = vsel %vm4559_vm12, %v2784_v13, 1065369472  ;;  %vm4560_vm14 = vmmov %vm4559_vm12  ;;  %v3832_v0 = vsel %vm3491_vm13, %v506_v24, -1e+30  ;;  %v3836_v47 = vsel %vm4561_vm2, %v507_v21, -1e+30  ;;  %v746_v60 = vmax.f32 %v3808_v35, %v3812_v23 }
 0x1d9   : > { %v962_v51 = vsel %vm4560_vm14, %v2785_v29, 1065369472  ;;  %2429 = vmatprep.subr.bf16.mxu0 %v986_v38  ;;  %v755_v31 = vmax.f32 %v3816_v54, %v3828_v17  ;;  %v752_v12 = vmax.f32 %v3832_v0, %v3836_v47  ;;  %vm4563_vm13 = vmmov %vm4559_vm12  ;;  %v2798_v41 = vmov 16   ;;  %v4577_v21 = vld [vmem:[#allocation27_spill] sm:$0xff] }
 0x1da   : > { %750 = vmax.xlane.f32.xlu1 %v749_v11  ;;  %2430 = vmatpush3.bf16.msra.mxu0 %v962_v51  ;;  %v989_v26 = vsel %vm4563_vm13, %v4562_v18, 1065369472  ;;  %vm4564_vm9 = vmmov %vm4559_vm12  ;;  %v4578_v11 = vld [vmem:[#allocation28_spill] sm:$0xff] }
 0x1db   : > { %v965_v19 = vsel %vm4564_vm9, %v2786_v39, 1065369472  ;;  %2431 = vmatprep.subr.bf16.mxu0 %v989_v26  ;;  %vm4566_vm6 = vmmov %vm4564_vm9  ;;  %2568 = vset.pattern.permute.xlu0 %v2798_v41 }
 0x1dc   : > { %747 = vmax.xlane.f32.xlu0 %v746_v60  ;;  %v992_v49 = vsel %vm4566_vm6, %v4565_v15, 1065369472  ;;  %vm4568_vm15 = vmmov %vm4566_vm6  ;;  %2569 = vset.pattern.permute.xlu1 %v2798_v41 }
 0x1dd   : > { %v968_v58 = vsel %vm4568_vm15, %v4567_v4, 1065369472  ;;  %vm4570_vm7 = vmmov %vm4566_vm6  ;;  %v4579_v4 = vld [vmem:[#allocation3_spill] sm:$0xff] }
 0x1de   : > { %756 = vmax.xlane.f32.xlu1 %v755_v31  ;;  %2432 = vmatpush3.bf16.msra.mxu0 %v965_v19  ;;  %v995_v59 = vsel %vm4570_vm7, %v4569_v5, 1065369472  ;;  %vm4572_vm8 = vmmov %vm4566_vm6 }
 0x1df   : > { %2433 = vmatprep.subr.bf16.mxu0 %v992_v49  ;;  %v971_v16 = vsel %vm4572_vm8, %v4571_v32, 1065369472  ;;  %vm4574_vm0 = vmmov %vm4566_vm6 }
 0x1e0   : > { %753 = vmax.xlane.f32.xlu0 %v752_v12  ;;  %v998_v50 = vsel %vm4574_vm0, %v4573_v48, 1065369472  ;;  %vm4576_vm4 = vmmov %vm4574_vm0 }
 0x1e1   : > { %v974_v27 = vsel %vm4576_vm4, %v4575_v42, 1065369472 }
 0x1e2   : > { %2434 = vmatpush3.bf16.msra.mxu0 %v968_v58 }
 0x1e3   : > { %2435 = vmatprep.subr.bf16.mxu0 %v995_v59  ;;  %v4580_v59 = vld [vmem:[#allocation2_spill] sm:$0xff] }
 0x1e6   : > { %2436 = vmatpush3.bf16.msra.mxu0 %v971_v16 }
 0x1e7   : > { %2437 = vmatprep.subr.bf16.mxu0 %v998_v50  ;;  %v4581_v50 = vld [vmem:[#allocation30_spill] sm:$0xff] }
 0x1ea   : > { %2438 = vmatpush3.bf16.msra.mxu0 %v974_v27 }
 0x1f8   : > { %v1611_v45 = vpop.xlane.xlu1 %1610 }
 0x1f9   : > { %v1637_v1 = vmax.f32 %v1611_v45, 0.0  ;;  %v4582_v45 = vld [vmem:[#allocation4_spill] sm:$0xff] }
 0x1fa   : > { %v1614_v10 = vpop.xlane.xlu0 %1613 }
 0x1fb   : > { %v1638_v6 = vmax.f32 %v1614_v10, 0.0  ;;  %v1663_v61 = vsub.f32 %v4577_v21, %v1637_v1  ;;  %v1664_v13 = vsub.f32 %v4578_v11, %v1637_v1  ;;  %v4583_v10 = vld [vmem:[#allocation29_spill] sm:$0xff] }
 0x1fc   : > { %v1620_v30 = vpop.xlane.xlu1 %1619 }
 0x1fd   : > { %v1640_v24 = vmax.f32 %v1620_v30, 0.0  ;;  %v1665_v38 = vsub.f32 %v3441_v40, %v1638_v6  ;;  %v1666_v29 = vsub.f32 %v3445_v8, %v1638_v6 }
 0x1fe   : > { %v1617_v51 = vpop.xlane.xlu0 %1616 }
 0x1ff   : > { %v1685_v60 = vpack.c.bf16 %v1665_v38, %v1663_v61  ;;  %v1686_v31 = vpack.c.bf16 %v1666_v29, %v1664_v13  ;;  %v1639_v12 = vmax.f32 %v1617_v51, 0.0  ;;  %v1670_v26 = vsub.f32 %v3453_v9, %v1640_v24 }
 0x200   : > { %v1626_v18 = vpop.xlane.xlu1 %1625  ;;  %v1669_v40 = vsub.f32 %v4580_v59, %v1640_v24 }
 0x201   : > { %v1642_v39 = vmax.f32 %v1626_v18, 0.0  ;;  %v1722_v19 = vmul.bf16 1069105081, %v1685_v60  ;;  %v1725_v15 = vmul.bf16 1069105081, %v1686_v31  ;;  %v1667_v49 = vsub.f32 %v3474_v25, %v1639_v12 }
 0x202   : > { %v1668_v58 = vsub.f32 %v4579_v4, %v1639_v12  ;;  %v1623_v5 = vpop.xlane.xlu0 %1622 }
 0x203   : > { %2606 = vpow.bf16 %v1722_v19  ;;  %v1641_v8 = vmax.f32 %v1623_v5, 0.0  ;;  %v1687_v16 = vpack.c.bf16 %v1669_v40, %v1667_v49  ;;  %v1674_v42 = vsub.f32 %v4581_v50, %v1642_v39  ;;  %v4584_v40 = vld [vmem:[#allocation8_spill] sm:$0xff] }
 0x204   : > { %v1688_v32 = vpack.c.bf16 %v1670_v26, %v1668_v58  ;;  %2608 = vpow.bf16 %v1725_v15  ;;  %v1673_v6 = vsub.f32 %v4583_v10, %v1642_v39  ;;  %v4588_v10 = vld [vmem:[#allocation7_spill] sm:$0xff] }
 0x205   : > { %v1672_v9 = vsub.f32 %v3521_v20, %v1641_v8  ;;  %v1728_v41 = vmul.bf16 1069105081, %v1687_v16  ;;  %v1671_v25 = vsub.f32 %v4582_v45, %v1641_v8  ;;  %v4585_v8 = vld [vmem:[#allocation11_spill] sm:$0xff] }
 0x206   : > { %v1731_v48 = vmul.bf16 1069105081, %v1688_v32 }
 0x207   : > { %v1690_v27 = vpack.c.bf16 %v1674_v42, %v1672_v9  ;;  %v1689_v30 = vpack.c.bf16 %v1673_v6, %v1671_v25 }
 0x208   : > { %2610 = vpow.bf16 %v1731_v48  ;;  %v4586_v48 = vld [vmem:[#allocation16_spill] sm:$0xff] }
 0x209   : > { %v1737_v1 = vmul.bf16 1069105081, %v1690_v27  ;;  %2612 = vpow.bf16 %v1728_v41  ;;  %v1734_v61 = vmul.bf16 1069105081, %v1689_v30  ;;  %v715_v29 = vpop.xlane.xlu1 %714 }
 0x20a   : > { %v759_v51 = vmax.f32 %v715_v29, 0.0  ;;  %v4589_v29 = vld [vmem:[#allocation15_spill] sm:$0xff] }
 0x20b   : > { %2614 = vpow.bf16 %v1737_v1 }
 0x20c   : > { %2616 = vpow.bf16 %v1734_v61  ;;  %v776_v12 = vsub.f32 %v3540_v46, %v759_v51  ;;  %v777_v18 = vsub.f32 %v3547_v62, %v759_v51  ;;  %v4587_v46 = vld [vmem:[#allocation17_spill] sm:$0xff] }
 0x20e   : > { %v2607_v24 = vpop.eup %2606 }
 0x20f   : > { %v2609_v21 = vpop.eup %2608 }
 0x210   : > { %1891 = vmatprep.mubr.bf16.mxu1 %v2609_v21 }
 0x211   : > { %1892 = vmatmul.mubr.bf16.gmra.mrb[20].mxu1 %v2607_v24 }
 0x213   : > { %v2611_v11 = vpop.eup %2610 }
 0x214   : > { %1899 = vmatprep.mubr.bf16.mxu1 %v2611_v11  ;;  %v2613_v20 = vpop.eup %2612 }
 0x216   : > { %v2615_v13 = vpop.eup %2614 }
 0x217   : > { %v2617_v38 = vpop.eup %2616 }
 0x219   : > { %1900 = vmatmul.mubr.bf16.gmra.mrb[24].mxu1 %v2613_v20 }
 0x21a   : > { %1907 = vmatprep.mubr.bf16.mxu1 %v2615_v13 }
 0x221   : > { %1908 = vmatmul.mubr.bf16.gmra.mrb[28].mxu1 %v2617_v38 }
 0x24c   : > { %v712_v60 = vpop.xlane.xlu0 %711 }
 0x24d   : > { %v758_v31 = vmax.f32 %v712_v60, 0.0 }
 0x24f   : > { %v774_v26 = vsub.f32 %v3630_v33, %v758_v31  ;;  %v775_v39 = vsub.f32 %v3641_v34, %v758_v31 }
 0x250   : > { %v718_v15 = vpop.xlane.xlu0 %717 }
 0x251   : > { %v806_v49 = vpack.c.bf16 %v776_v12, %v774_v26  ;;  %v760_v58 = vmax.f32 %v718_v15, 0.0  ;;  %v807_v5 = vpack.c.bf16 %v777_v18, %v775_v39 }
 0x252   : > { %v721_v19 = vpop.xlane.xlu1 %720 }
 0x253   : > { %v761_v4 = vmax.f32 %v721_v19, 0.0  ;;  %v823_v59 = vmul.bf16 1069105081, %v806_v49  ;;  %v778_v50 = vsub.f32 %v4586_v48, %v760_v58  ;;  %v779_v42 = vsub.f32 %v4587_v46, %v760_v58 }
 0x254   : > { %v724_v9 = vpop.xlane.xlu0 %723  ;;  %v826_v33 = vmul.bf16 1069105081, %v807_v5 }
 0x255   : > { %v780_v32 = vsub.f32 %v4584_v40, %v761_v4  ;;  %v781_v16 = vsub.f32 %v4585_v8, %v761_v4  ;;  %2618 = vpow.bf16 %v823_v59  ;;  %v762_v27 = vmax.f32 %v724_v9, 0.0 }
 0x256   : > { %v727_v62 = vpop.xlane.xlu1 %726  ;;  %2620 = vpow.bf16 %v826_v33 }
 0x257   : > { %v763_v34 = vmax.f32 %v727_v62, 0.0  ;;  %v808_v41 = vpack.c.bf16 %v780_v32, %v778_v50  ;;  %v809_v45 = vpack.c.bf16 %v781_v16, %v779_v42  ;;  %v783_v6 = vsub.f32 %v4588_v10, %v762_v27 }
 0x258   : > { %v782_v51 = vsub.f32 %v4589_v29, %v762_v27 }
 0x259   : > { %v785_v25 = vsub.f32 %v3703_v56, %v763_v34  ;;  %v832_v1 = vmul.bf16 1069105081, %v809_v45  ;;  %v829_v61 = vmul.bf16 1069105081, %v808_v41  ;;  %v784_v38 = vsub.f32 %v3696_v55, %v763_v34 }
 0x25b   : > { %v733_v30 = vpop.xlane.xlu1 %732  ;;  %v2503_v21 = vpop.f32.mrb[0].mxu1  ;;  %2622 = vpow.bf16 %v832_v1  ;;  %v811_v11 = vpack.c.bf16 %v785_v25, %v783_v6  ;;  %v810_v55 = vpack.c.bf16 %v784_v38, %v782_v51 }
 0x25c   : > { %v765_v24 = vmax.f32 %v733_v30, 0.0  ;;  %v2504_v13 = vpop.f32.mrb[1].mxu1  ;;  %2624 = vpow.bf16 %v829_v61 }
 0x25d   : > { %v730_v20 = vpop.xlane.xlu0 %729  ;;  %v2506_v31 = vpop.f32.mrb[2].mxu1  ;;  %v838_v12 = vmul.bf16 1069105081, %v811_v11  ;;  %v3887_v26 = vadd.f32 %v2504_v13, %v2503_v21  ;;  %v835_v50 = vmul.bf16 1069105081, %v810_v55 }
 0x25e   : > { %v764_v60 = vmax.f32 %v730_v20, 0.0  ;;  %v789_v56 = vsub.f32 %v3731_v53, %v765_v24  ;;  %v2507_v39 = vpop.f32.mrb[3].mxu1  ;;  %v788_v8 = vsub.f32 %v3726_v14, %v765_v24 }
 0x25f   : > { %v739_v18 = vpop.xlane.xlu1 %738  ;;  %vm1916_vm5 = vcmp.eq.f32.partialorder %v3887_v26, 0.0  ;;  %v3891_v49 = vadd.f32 %v2507_v39, %v2506_v31  ;;  %2626 = vpow.bf16 %v838_v12 }
 0x260   : > { %v787_v19 = vsub.f32 %v3745_v44, %v764_v60  ;;  %v767_v4 = vmax.f32 %v739_v18, 0.0  ;;  %v2619_v58 = vpop.eup %2618  ;;  %v1932_v53 = vsel %vm1916_vm5, 1.0, %v3887_v26  ;;  %v786_v16 = vsub.f32 %v3740_v7, %v764_v60 }
 0x261   : > { %v736_v15 = vpop.xlane.xlu0 %735  ;;  %vm1917_vm10 = vcmp.eq.f32.partialorder %v3891_v49, 0.0  ;;  %v2621_v40 = vpop.eup %2620  ;;  %2628 = vrcp.f32 %v1932_v53 }
 0x262   : > { %v813_v5 = vpack.c.bf16 %v789_v56, %v787_v19  ;;  %v766_v59 = vmax.f32 %v736_v15, 0.0  ;;  %v1933_v44 = vsel %vm1917_vm10, 1.0, %v3891_v49  ;;  %1032 = vmatprep.mubr.bf16.mxu0 %v2621_v40  ;;  %v793_v33 = vsub.f32 %v3758_v22, %v767_v4 }
 0x263   : > { %v2509_v32 = vpop.f32.mrb[4].mxu1  ;;  %2630 = vrcp.f32 %v1933_v44  ;;  %v745_v46 = vpop.xlane.xlu1 %744  ;;  %1033 = vmatmul.mubr.bf16.vlgmr.msra.gmra.mrb[0].mxu0 %v2619_v58  ;;  %v812_v14 = vpack.c.bf16 %v788_v8, %v786_v16 }
 0x264   : > { %v2510_v48 = vpop.f32.mrb[5].mxu1  ;;  %v844_v9 = vmul.bf16 1069105081, %v813_v5  ;;  %v791_v34 = vsub.f32 %v3768_v2, %v766_v59  ;;  %2632 = vpow.bf16 %v835_v50  ;;  %v769_v25 = vmax.f32 %v745_v46, 0.0 }
 0x265   : > { %v3898_v42 = vadd.f32 %v2510_v48, %v2509_v32  ;;  %v2512_v62 = vpop.f32.mrb[6].mxu1  ;;  %v742_v27 = vpop.xlane.xlu0 %741  ;;  %v792_v2 = vsub.f32 %v3753_v37, %v767_v4  ;;  %v790_v30 = vsub.f32 %v3762_v36, %v766_v59  ;;  %v841_v61 = vmul.bf16 1069105081, %v812_v14 }
 0x266   : > { %v2513_v41 = vpop.f32.mrb[7].mxu1  ;;  %v2623_v45 = vpop.eup %2622  ;;  %v768_v1 = vmax.f32 %v742_v27, 0.0  ;;  %2634 = vpow.bf16 %v844_v9  ;;  %v815_v10 = vpack.c.bf16 %v793_v33, %v791_v34  ;;  %v797_v13 = vsub.f32 %v3780_v28, %v769_v25 }
 0x267   : > { %1040 = vmatprep.mubr.bf16.mxu0 %v2623_v45  ;;  %vm1918_vm11 = vcmp.eq.f32.partialorder %v3898_v42, 0.0  ;;  %v3903_v7 = vadd.f32 %v2513_v41, %v2512_v62  ;;  %v2625_v22 = vpop.eup %2624  ;;  %v814_v12 = vpack.c.bf16 %v792_v2, %v790_v30  ;;  %v751_v56 = vpop.xlane.xlu1 %750  ;;  %v796_v5 = vsub.f32 %v3776_v43, %v769_v25 }
 0x268   : > { %v1934_v6 = vsel %vm1918_vm11, 1.0, %v3898_v42  ;;  %v795_v38 = vsub.f32 %v3790_v57, %v768_v1  ;;  %v850_v37 = vmul.bf16 1069105081, %v815_v10  ;;  %v771_v19 = vmax.f32 %v751_v56, 0.0 }
 0x269   : > { %vm1919_vm3 = vcmp.eq.f32.partialorder %v3903_v7, 0.0  ;;  %2636 = vrcp.f32 %v1934_v6  ;;  %v748_v18 = vpop.xlane.xlu0 %747  ;;  %v847_v55 = vmul.bf16 1069105081, %v814_v12  ;;  %v794_v40 = vsub.f32 %v3784_v63, %v768_v1 }
 0x26a   : > { %v2627_v21 = vpop.eup %2626  ;;  %v1935_v29 = vsel %vm1919_vm3, 1.0, %v3903_v7  ;;  %v817_v57 = vpack.c.bf16 %v797_v13, %v795_v38  ;;  %v770_v15 = vmax.f32 %v748_v18, 0.0  ;;  %v801_v50 = vsub.f32 %v3799_v52, %v771_v19 }
 0x26b   : > { %v2515_v24 = vpop.f32.mrb[8].mxu1  ;;  %v2629_v20 = vpop.eup %2628  ;;  %1041 = vmatmul.mubr.bf16.gmra.mrb[4].mxu0 %v2625_v22  ;;  %2638 = vrcp.f32 %v1935_v29  ;;  %v816_v34 = vpack.c.bf16 %v796_v5, %v794_v40  ;;  %v800_v1 = vsub.f32 %v3794_v3, %v771_v19 }
 0x26c   : > { %v2516_v11 = vpop.f32.mrb[9].mxu1  ;;  %1048 = vmatprep.mubr.bf16.mxu0 %v2627_v21  ;;  %1966 = vperm.xlu0 %2568, %v2629_v20   ;;  %2640 = vpow.bf16 %v841_v61  ;;  %v856_v44 = vmul.bf16 1069105081, %v817_v57  ;;  %v799_v46 = vsub.f32 %v3812_v23, %v770_v15  ;;  %v757_v62 = vpop.xlane.xlu1 %756  ;;  %v798_v10 = vsub.f32 %v3808_v35, %v770_v15 }
 0x26d   : > { %v3912_v51 = vadd.f32 %v2516_v11, %v2515_v24  ;;  %v2518_v60 = vpop.f32.mrb[10].mxu1  ;;  %v2631_v31 = vpop.eup %2630  ;;  %2642 = vpow.bf16 %v850_v37  ;;  %v773_v27 = vmax.f32 %v757_v62, 0.0  ;;  %v853_v25 = vmul.bf16 1069105081, %v816_v34 }
 0x26e   : > { %v2519_v36 = vpop.f32.mrb[11].mxu1  ;;  %1971 = vperm.xlu1 %2569, %v2631_v31   ;;  %v754_v9 = vpop.xlane.xlu0 %753  ;;  %v819_v52 = vpack.c.bf16 %v801_v50, %v799_v46  ;;  %v818_v21 = vpack.c.bf16 %v800_v1, %v798_v10 }
 0x26f   : > { %vm1920_vm1 = vcmp.eq.f32.partialorder %v3912_v51, 0.0  ;;  %v3915_v28 = vadd.f32 %v2519_v36, %v2518_v60  ;;  %v2633_v58 = vpop.eup %2632  ;;  %v772_v45 = vmax.f32 %v754_v9, 0.0  ;;  %v805_v30 = vsub.f32 %v3828_v17, %v773_v27 }
 0x270   : > { %v1936_v39 = vsel %vm1920_vm1, 1.0, %v3912_v51  ;;  %v862_v2 = vmul.bf16 1069105081, %v819_v52  ;;  %v859_v13 = vmul.bf16 1069105081, %v818_v21  ;;  %v804_v38 = vsub.f32 %v3816_v54, %v773_v27 }
 0x271   : > { %vm1921_vm12 = vcmp.eq.f32.partialorder %v3915_v28, 0.0  ;;  %2644 = vrcp.f32 %v1936_v39  ;;  %v2635_v53 = vpop.eup %2634  ;;  %v803_v24 = vsub.f32 %v3836_v47, %v772_v45  ;;  %v802_v29 = vsub.f32 %v3832_v0, %v772_v45 }
 0x272   : > { %v1937_v32 = vsel %vm1921_vm12, 1.0, %v3915_v28  ;;  %2646 = vpow.bf16 %v847_v55 }
 0x273   : > { %v2521_v4 = vpop.f32.mrb[12].mxu1  ;;  %1049 = vmatmul.mubr.bf16.gmra.mrb[8].mxu0 %v2633_v58  ;;  %v2637_v48 = vpop.eup %2636  ;;  %2648 = vrcp.f32 %v1937_v32  ;;  %v821_v3 = vpack.c.bf16 %v805_v30, %v803_v24  ;;  %v820_v47 = vpack.c.bf16 %v804_v38, %v802_v29 }
 0x274   : > { %v2522_v59 = vpop.f32.mrb[13].mxu1  ;;  %1056 = vmatprep.mubr.bf16.mxu0 %v2635_v53  ;;  %1976 = vperm.xlu1 %2569, %v2637_v48   ;;  %2650 = vpow.bf16 %v856_v44 }
 0x275   : > { %v3922_v8 = vadd.f32 %v2522_v59, %v2521_v4  ;;  %v2524_v16 = vpop.f32.mrb[14].mxu1  ;;  %v2639_v41 = vpop.eup %2638  ;;  %v868_v17 = vmul.bf16 1069105081, %v821_v3  ;;  %v865_v36 = vmul.bf16 1069105081, %v820_v47 }
 0x276   : > { %v2525_v43 = vpop.f32.mrb[15].mxu1 }
 0x277   : > { %vm1922_vm14 = vcmp.eq.f32.partialorder %v3922_v8, 0.0  ;;  %v3927_v63 = vadd.f32 %v2525_v43, %v2524_v16  ;;  %v2641_v23 = vpop.eup %2640 }
 0x278   : > { %v1938_v33 = vsel %vm1922_vm14, 1.0, %v3922_v8  ;;  %1981 = vperm.xlu1 %2569, %v2639_v41   ;;  %v2643_v14 = vpop.eup %2642 }
 0x279   : > { %2652 = vrcp.f32 %v1938_v33  ;;  %vm1923_vm2 = vcmp.eq.f32.partialorder %v3927_v63, 0.0 }
 0x27a   : > { %v1939_v6 = vsel %vm1923_vm2, 1.0, %v3927_v63 }
 0x27b   : > { %1057 = vmatmul.mubr.bf16.gmra.mrb[12].mxu0 %v2641_v23  ;;  %v2645_v22 = vpop.eup %2644  ;;  %2654 = vrcp.f32 %v1939_v6 }
 0x27c   : > { %1064 = vmatprep.mubr.bf16.mxu0 %v2643_v14  ;;  %1986 = vperm.xlu1 %2569, %v2645_v22   ;;  %2656 = vpow.bf16 %v853_v25 }
 0x27d   : > { %v2647_v61 = vpop.eup %2646  ;;  %2658 = vpow.bf16 %v862_v2 }
 0x27e   : > { %v2649_v11 = vpop.eup %2648  ;;  %2660 = vpow.bf16 %v859_v13 }
 0x27f   : > { %v2651_v35 = vpop.eup %2650  ;;  %2662 = vpow.bf16 %v868_v17 }
 0x280   : > { %1991 = vperm.xlu1 %2569, %v2649_v11   ;;  %2664 = vpow.bf16 %v865_v36 }
 0x283   : > { %v2653_v20 = vpop.eup %2652  ;;  %1065 = vmatmul.mubr.bf16.gmra.mrb[16].mxu0 %v2647_v61 }
 0x284   : > { %1072 = vmatprep.mubr.bf16.mxu0 %v2651_v35  ;;  %1996 = vperm.xlu1 %2569, %v2653_v20  }
 0x285   : > { %v2655_v60 = vpop.eup %2654 }
 0x287   : > { %v2657_v31 = vpop.eup %2656 }
 0x288   : > { %2001 = vperm.xlu1 %2569, %v2655_v60   ;;  %v2659_v37 = vpop.eup %2658 }
 0x289   : > { %v2661_v12 = vpop.eup %2660 }
 0x28a   : > { %v2663_v56 = vpop.eup %2662 }
 0x28b   : > { %1073 = vmatmul.mubr.bf16.gmra.mrb[20].mxu0 %v2657_v31  ;;  %v2665_v54 = vpop.eup %2664 }
 0x28c   : > { %1080 = vmatprep.mubr.bf16.mxu0 %v2659_v37 }
 0x293   : > { %1081 = vmatmul.mubr.bf16.gmra.mrb[24].mxu0 %v2661_v12 }
 0x294   : > { %1088 = vmatprep.mubr.bf16.mxu0 %v2663_v56 }
 0x29b   : > { %1089 = vmatmul.mubr.bf16.gmra.mrb[28].mxu0 %v2665_v54 }
 0x29d   : > { %v2527_v0 = vpop.f32.mrb[16].mxu1 }
 0x29e   : > { %v2528_v18 = vpop.f32.mrb[17].mxu1 }
 0x29f   : > { %v3938_v57 = vadd.f32 %v2528_v18, %v2527_v0  ;;  %v2530_v39 = vpop.f32.mrb[18].mxu1 }
 0x2a0   : > { %v2531_v19 = vpop.f32.mrb[19].mxu1 }
 0x2a1   : > { %vm1924_vm13 = vcmp.eq.f32.partialorder %v3938_v57, 0.0  ;;  %v3941_v15 = vadd.f32 %v2531_v19, %v2530_v39 }
 0x2a2   : > { %v1940_v55 = vsel %vm1924_vm13, 1.0, %v3938_v57 }
 0x2a3   : > { %2666 = vrcp.f32 %v1940_v55  ;;  %vm1925_vm9 = vcmp.eq.f32.partialorder %v3941_v15, 0.0 }
 0x2a4   : > { %v1941_v4 = vsel %vm1925_vm9, 1.0, %v3941_v15 }
 0x2a5   : > { %2668 = vrcp.f32 %v1941_v4 }
 0x2ad   : > { %v2667_v58 = vpop.eup %2666 }
 0x2ae   : > { %2006 = vperm.xlu1 %2569, %v2667_v58  }
 0x2af   : > { %v2669_v5 = vpop.eup %2668 }
 0x2b0   : > { %2011 = vperm.xlu0 %2568, %v2669_v5  }
 0x2e4   : > { %v2533_v59 = vpop.f32.mrb[20].mxu1 }
 0x2e5   : > { %v2534_v53 = vpop.f32.mrb[21].mxu1 }
 0x2e6   : > { %v3946_v40 = vadd.f32 %v2534_v53, %v2533_v59  ;;  %v2536_v44 = vpop.f32.mrb[22].mxu1 }
 0x2e7   : > { %v2537_v32 = vpop.f32.mrb[23].mxu1 }
 0x2e8   : > { %vm1926_vm6 = vcmp.eq.f32.partialorder %v3946_v40, 0.0  ;;  %v3949_v16 = vadd.f32 %v2537_v32, %v2536_v44 }
 0x2e9   : > { %v1942_v48 = vsel %vm1926_vm6, 1.0, %v3946_v40 }
 0x2ea   : > { %2670 = vrcp.f32 %v1942_v48  ;;  %vm1927_vm15 = vcmp.eq.f32.partialorder %v3949_v16, 0.0 }
 0x2eb   : > { %v1943_v50 = vsel %vm1927_vm15, 1.0, %v3949_v16 }
 0x2ec   : > { %2672 = vrcp.f32 %v1943_v50  ;;  %v2539_v46 = vpop.f32.mrb[24].mxu1 }
 0x2ed   : > { %v2540_v62 = vpop.f32.mrb[25].mxu1  ;;  %v1972_v54 = vpop.permute.xlu1 %1971 }
 0x2ee   : > { %v3954_v43 = vadd.f32 %v2540_v62, %v2539_v46  ;;  %v2542_v9 = vpop.f32.mrb[26].mxu1 }
 0x2ef   : > { %v2543_v33 = vpop.f32.mrb[27].mxu1 }
 0x2f0   : > { %vm1928_vm7 = vcmp.eq.f32.partialorder %v3954_v43, 0.0  ;;  %v3957_v34 = vadd.f32 %v2543_v33, %v2542_v9 }
 0x2f1   : > { %v1944_v27 = vsel %vm1928_vm7, 1.0, %v3954_v43 }
 0x2f2   : > { %2674 = vrcp.f32 %v1944_v27  ;;  %vm1929_vm8 = vcmp.eq.f32.partialorder %v3957_v34, 0.0 }
 0x2f3   : > { %v1945_v41 = vsel %vm1929_vm8, 1.0, %v3957_v34  ;;  %v1977_v4 = vpop.permute.xlu1 %1976 }
 0x2f4   : > { %v2671_v52 = vpop.eup %2670  ;;  %v2545_v45 = vpop.f32.mrb[28].mxu1  ;;  %2676 = vrcp.f32 %v1945_v41 }
 0x2f5   : > { %2016 = vperm.xlu1 %2569, %v2671_v52   ;;  %v2546_v23 = vpop.f32.mrb[29].mxu1 }
 0x2f6   : > { %v2673_v14 = vpop.eup %2672  ;;  %v3962_v25 = vadd.f32 %v2546_v23, %v2545_v45  ;;  %v2548_v1 = vpop.f32.mrb[30].mxu1 }
 0x2f7   : > { %v2549_v10 = vpop.f32.mrb[31].mxu1  ;;  %2021 = vperm.xlu0 %2568, %v2673_v14   ;;  %v1982_v50 = vpop.permute.xlu1 %1981 }
 0x2f8   : > { %vm1930_vm0 = vcmp.eq.f32.partialorder %v3962_v25, 0.0  ;;  %v3965_v6 = vadd.f32 %v2549_v10, %v2548_v1 }
 0x2f9   : > { %v1946_v22 = vsel %vm1930_vm0, 1.0, %v3962_v25 }
 0x2fa   : > { %2678 = vrcp.f32 %v1946_v22  ;;  %vm1931_vm4 = vcmp.eq.f32.partialorder %v3965_v6, 0.0 }
 0x2fb   : > { %v1947_v30 = vsel %vm1931_vm4, 1.0, %v3965_v6  ;;  %v1987_v23 = vpop.permute.xlu1 %1986 }
 0x2fc   : > { %v2675_v2 = vpop.eup %2674  ;;  %2680 = vrcp.f32 %v1947_v30 }
 0x2fd   : > { %2026 = vperm.xlu1 %2569, %v2675_v2  }
 0x2fe   : > { %v2677_v24 = vpop.eup %2676 }
 0x2ff   : > { %2031 = vperm.xlu0 %2568, %v2677_v24  }
 0x304   : > { %v2679_v21 = vpop.eup %2678 }
 0x305   : > { %2036 = vperm.xlu1 %2569, %v2679_v21   ;;  %v1967_v21 = vpop.permute.xlu0 %1966 }
 0x306   : > { %v2681_v61 = vpop.eup %2680 }
 0x307   : > { %2041 = vperm.xlu0 %2568, %v2681_v61  }
 0x336   : > { %v2439_v11 = vpop.f32.mrb[0].mxu0 }
 0x337   : > { %v2440_v3 = vpop.f32.mrb[1].mxu0 }
 0x338   : > { %v3970_v35 = vadd.f32 %v2440_v3, %v2439_v11  ;;  %v2442_v20 = vpop.f32.mrb[2].mxu0  ;;  %v1992_v11 = vpop.permute.xlu1 %1991 }
 0x339   : > { %v2443_v13 = vpop.f32.mrb[3].mxu0 }
 0x33a   : > { %vm1097_vm5 = vcmp.eq.f32.partialorder %v3970_v35, 0.0  ;;  %v3973_v38 = vadd.f32 %v2443_v13, %v2442_v20  ;;  %v2044_v13 = vmul.f32 %v3887_v26, %v1967_v21 }
 0x33b   : > { %v1113_v29 = vsel %vm1097_vm5, 1.0, %v3970_v35 }
 0x33c   : > { %2682 = vrcp.f32 %v1113_v29  ;;  %vm1098_vm10 = vcmp.eq.f32.partialorder %v3973_v38, 0.0  ;;  %v4013_v29 = vld [vmem:[%s4343_s4 + $0x1] ss:$0 sm:$0xff] }
 0x33d   : > { %v1114_v17 = vsel %vm1098_vm10, 1.0, %v3973_v38 }
 0x33e   : > { %2684 = vrcp.f32 %v1114_v17  ;;  %v2445_v47 = vpop.f32.mrb[4].mxu0  ;;  %v2045_v17 = vmul.f32 %v3891_v49, %v1972_v54 }
 0x33f   : > { %v2446_v60 = vpop.f32.mrb[5].mxu0 }
 0x340   : > { %v3978_v31 = vadd.f32 %v2446_v60, %v2445_v47  ;;  %v2448_v37 = vpop.f32.mrb[6].mxu0 }
 0x341   : > { %v2449_v36 = vpop.f32.mrb[7].mxu0 }
 0x342   : > { %vm1099_vm11 = vcmp.eq.f32.partialorder %v3978_v31, 0.0  ;;  %v3981_v12 = vadd.f32 %v2449_v36, %v2448_v37  ;;  %v2046_v37 = vmul.f32 %v3898_v42, %v1977_v4  ;;  %v2047_v4 = vmul.f32 %v3903_v7, %v1982_v50 }
 0x343   : > { %v1115_v56 = vsel %vm1099_vm11, 1.0, %v3978_v31  ;;  %v2049_v50 = vmul.f32 %v3915_v28, %v1992_v11  ;;  %v2012_v11 = vpop.permute.xlu0 %2011 }
 0x344   : > { %2686 = vrcp.f32 %v1115_v56  ;;  %vm1100_vm3 = vcmp.eq.f32.partialorder %v3981_v12, 0.0  ;;  %v4027_v54 = vadd.f32 %v4013_v29, %v2046_v37  ;;  %v4041_v7 = vadd.f32 %v4013_v29, %v2047_v4 }
 0x345   : > { %v1116_v0 = vsel %vm1100_vm3, 1.0, %v3981_v12 }
 0x346   : > { %v2683_v18 = vpop.eup %2682  ;;  %2688 = vrcp.f32 %v1116_v0  ;;  %v2451_v39 = vpop.f32.mrb[8].mxu0  ;;  %v4019_v0 = vadd.f32 %v4013_v29, %v2044_v13  ;;  %vm2082_vm11 = vcmp.gt.f32.partialorder %v4027_v54, 0.0  ;;  %vm2083_vm3 = vcmp.gt.f32.partialorder %v4041_v7, 0.0 }
 0x347   : > { %1147 = vperm.xlu1 %2569, %v2683_v18   ;;  %v2452_v19 = vpop.f32.mrb[9].mxu0  ;;  %v1997_v18 = vpop.permute.xlu1 %1996 }
 0x348   : > { %v2685_v55 = vpop.eup %2684  ;;  %v3986_v58 = vadd.f32 %v2452_v19, %v2451_v39  ;;  %v2454_v5 = vpop.f32.mrb[10].mxu0  ;;  %vm2080_vm5 = vcmp.gt.f32.partialorder %v4019_v0, 0.0 }
 0x349   : > { %1152 = vperm.xlu0 %2568, %v2685_v55   ;;  %v2455_v59 = vpop.f32.mrb[11].mxu0  ;;  %v4024_v55 = vadd.f32 %v4013_v29, %v2045_v17 }
 0x34a   : > { %vm1101_vm1 = vcmp.eq.f32.partialorder %v3986_v58, 0.0  ;;  %v3989_v53 = vadd.f32 %v2455_v59, %v2454_v5  ;;  %v2096_v59 = vmul.f32 1.442695, %v4019_v0 }
 0x34b   : > { %v1117_v44 = vsel %vm1101_vm1, 1.0, %v3986_v58  ;;  %vm2081_vm10 = vcmp.gt.f32.partialorder %v4024_v55, 0.0 }
 0x34c   : > { %2690 = vrcp.f32 %v1117_v44  ;;  %vm1102_vm12 = vcmp.eq.f32.partialorder %v3989_v53, 0.0  ;;  %v2098_v44 = vmul.f32 1.442695, %v4024_v55 }
 0x34d   : > { %v1118_v32 = vsel %vm1102_vm12, 1.0, %v3989_v53 }
 0x34e   : > { %v2687_v48 = vpop.eup %2686  ;;  %2692 = vrcp.f32 %v1118_v32  ;;  %v2457_v46 = vpop.f32.mrb[12].mxu0  ;;  %v2048_v32 = vmul.f32 %v3912_v51, %v1987_v23 }
 0x34f   : > { %1157 = vperm.xlu1 %2569, %v2687_v48   ;;  %v2458_v62 = vpop.f32.mrb[13].mxu0 }
 0x350   : > { %v2689_v9 = vpop.eup %2688  ;;  %v3994_v33 = vadd.f32 %v2458_v62, %v2457_v46  ;;  %v2460_v27 = vpop.f32.mrb[14].mxu0  ;;  %v2100_v62 = vmul.f32 1.442695, %v4027_v54  ;;  %v4047_v23 = vadd.f32 %v4013_v29, %v2048_v32 }
 0x351   : > { %1162 = vperm.xlu0 %2568, %v2689_v9   ;;  %v2461_v41 = vpop.f32.mrb[15].mxu0  ;;  %v2002_v9 = vpop.permute.xlu1 %2001 }
 0x352   : > { %vm1103_vm14 = vcmp.eq.f32.partialorder %v3994_v33, 0.0  ;;  %v3997_v52 = vadd.f32 %v2461_v41, %v2460_v27  ;;  %v2051_v21 = vmul.f32 %v3927_v63, %v2002_v9  ;;  %vm2084_vm1 = vcmp.gt.f32.partialorder %v4047_v23, 0.0 }
 0x353   : > { %v1119_v45 = vsel %vm1103_vm14, 1.0, %v3994_v33 }
 0x354   : > { %2694 = vrcp.f32 %v1119_v45  ;;  %vm1104_vm2 = vcmp.eq.f32.partialorder %v3997_v52, 0.0  ;;  %v4068_v37 = vadd.f32 %v4013_v29, %v2051_v21 }
 0x355   : > { %v1120_v14 = vsel %vm1104_vm2, 1.0, %v3997_v52 }
 0x356   : > { %v2691_v1 = vpop.eup %2690  ;;  %2696 = vrcp.f32 %v1120_v14  ;;  %v2463_v10 = vpop.f32.mrb[16].mxu0  ;;  %vm2087_vm2 = vcmp.gt.f32.partialorder %v4068_v37, 0.0 }
 0x357   : > { %1167 = vperm.xlu1 %2569, %v2691_v1   ;;  %v2464_v22 = vpop.f32.mrb[17].mxu0  ;;  %v2050_v1 = vmul.f32 %v3922_v8, %v1997_v18  ;;  %v2104_v8 = vmul.f32 1.442695, %v4047_v23 }
 0x358   : > { %v2693_v2 = vpop.eup %2692  ;;  %v4002_v30 = vadd.f32 %v2464_v22, %v2463_v10  ;;  %v2466_v24 = vpop.f32.mrb[18].mxu0 }
 0x359   : > { %1172 = vperm.xlu0 %2568, %v2693_v2   ;;  %v2467_v61 = vpop.f32.mrb[19].mxu0  ;;  %v2007_v22 = vpop.permute.xlu1 %2006  ;;  %v2102_v2 = vmul.f32 1.442695, %v4041_v7 }
 0x35a   : > { %vm1105_vm13 = vcmp.eq.f32.partialorder %v4002_v30, 0.0  ;;  %v4005_v3 = vadd.f32 %v2467_v61, %v2466_v24  ;;  %v4055_v24 = vadd.f32 %v4013_v29, %v2049_v50  ;;  %v2052_v13 = vmul.f32 %v3938_v57, %v2007_v22 }
 0x35b   : > { %v1121_v20 = vsel %vm1105_vm13, 1.0, %v4002_v30 }
 0x35c   : > { %2698 = vrcp.f32 %v1121_v20  ;;  %vm1106_vm9 = vcmp.eq.f32.partialorder %v4005_v3, 0.0  ;;  %v4062_v20 = vadd.f32 %v4013_v29, %v2050_v1  ;;  %v2106_v63 = vmul.f32 1.442695, %v4055_v24 }
 0x35d   : > { %v1122_v47 = vsel %vm1106_vm9, 1.0, %v4005_v3  ;;  %vm2085_vm12 = vcmp.gt.f32.partialorder %v4055_v24, 0.0 }
 0x35e   : > { %v2695_v60 = vpop.eup %2694  ;;  %2700 = vrcp.f32 %v1122_v47  ;;  %v2469_v36 = vpop.f32.mrb[20].mxu0  ;;  %v2108_v57 = vmul.f32 1.442695, %v4062_v20  ;;  %vm2086_vm14 = vcmp.gt.f32.partialorder %v4062_v20, 0.0 }
 0x35f   : > { %1177 = vperm.xlu1 %2569, %v2695_v60   ;;  %v2470_v56 = vpop.f32.mrb[21].mxu0 }
 0x360   : > { %v2697_v26 = vpop.eup %2696  ;;  %v4021_v39 = vadd.f32 %v2470_v56, %v2469_v36  ;;  %v2472_v19 = vpop.f32.mrb[22].mxu0  ;;  %v2053_v36 = vmul.f32 %v3941_v15, %v2012_v11 }
 0x361   : > { %1182 = vperm.xlu0 %2568, %v2697_v26   ;;  %v2473_v49 = vpop.f32.mrb[23].mxu0 }
 0x362   : > { %vm1107_vm6 = vcmp.eq.f32.partialorder %v4021_v39, 0.0  ;;  %v4030_v42 = vadd.f32 %v2473_v49, %v2472_v19  ;;  %v4075_v49 = vadd.f32 %v4013_v29, %v2052_v13  ;;  %v4082_v32 = vadd.f32 %v4013_v29, %v2053_v36 }
 0x363   : > { %v1123_v5 = vsel %vm1107_vm6, 1.0, %v4021_v39 }
 0x364   : > { %2702 = vrcp.f32 %v1123_v5  ;;  %vm1108_vm15 = vcmp.eq.f32.partialorder %v4030_v42, 0.0  ;;  %v2114_v22 = vmul.f32 1.442695, %v4082_v32  ;;  %vm2088_vm13 = vcmp.gt.f32.partialorder %v4075_v49, 0.0 }
 0x365   : > { %v1124_v48 = vsel %vm1108_vm15, 1.0, %v4030_v42  ;;  %vm2089_vm9 = vcmp.gt.f32.partialorder %v4082_v32, 0.0 }
 0x366   : > { %v2699_v46 = vpop.eup %2698  ;;  %2704 = vrcp.f32 %v1124_v48  ;;  %v2475_v27 = vpop.f32.mrb[24].mxu0 }
 0x367   : > { %1187 = vperm.xlu1 %2569, %v2699_v46   ;;  %v2476_v41 = vpop.f32.mrb[25].mxu0  ;;  %2706 = vpow2.f32 %v2096_v59 }
 0x368   : > { %v2701_v45 = vpop.eup %2700  ;;  %v4044_v14 = vadd.f32 %v2476_v41, %v2475_v27  ;;  %v2478_v51 = vpop.f32.mrb[26].mxu0  ;;  %2708 = vpow2.f32 %v2098_v44  ;;  %v2110_v44 = vmul.f32 1.442695, %v4068_v37  ;;  %v2112_v27 = vmul.f32 1.442695, %v4075_v49 }
 0x369   : > { %1192 = vperm.xlu0 %2568, %v2701_v45   ;;  %v2479_v10 = vpop.f32.mrb[27].mxu0  ;;  %2710 = vpow2.f32 %v2100_v62 }
 0x36a   : > { %vm1109_vm7 = vcmp.eq.f32.partialorder %v4044_v14, 0.0  ;;  %v4051_v28 = vadd.f32 %v2479_v10, %v2478_v51 }
 0x36b   : > { %v1125_v61 = vsel %vm1109_vm7, 1.0, %v4044_v14 }
 0x36c   : > { %2712 = vrcp.f32 %v1125_v61  ;;  %vm1110_vm8 = vcmp.eq.f32.partialorder %v4051_v28, 0.0 }
 0x36d   : > { %v1126_v17 = vsel %vm1110_vm8, 1.0, %v4051_v28 }
 0x36e   : > { %v2703_v47 = vpop.eup %2702  ;;  %2714 = vrcp.f32 %v1126_v17  ;;  %v2481_v60 = vpop.f32.mrb[28].mxu0 }
 0x36f   : > { %2716 = vpow2.f32 %v2102_v2  ;;  %1197 = vperm.xlu1 %2569, %v2703_v47   ;;  %v2482_v56 = vpop.f32.mrb[29].mxu0 }
 0x370   : > { %v2705_v26 = vpop.eup %2704  ;;  %v4071_v18 = vadd.f32 %v2482_v56, %v2481_v60  ;;  %v2484_v19 = vpop.f32.mrb[30].mxu0  ;;  %2718 = vpow2.f32 %v2104_v8 }
 0x371   : > { %1202 = vperm.xlu0 %2568, %v2705_v26   ;;  %v2485_v4 = vpop.f32.mrb[31].mxu0  ;;  %v2707_v5 = vpop.eup %2706  ;;  %2720 = vpow2.f32 %v2106_v63 }
 0x372   : > { %vm1111_vm0 = vcmp.eq.f32.partialorder %v4071_v18, 0.0  ;;  %v4078_v59 = vadd.f32 %v2485_v4, %v2484_v19  ;;  %v2709_v15 = vpop.eup %2708  ;;  %v2404_v51 = vadd.f32 -1.0, %v2707_v5 }
 0x373   : > { %v1127_v48 = vsel %vm1111_vm0, 1.0, %v4071_v18  ;;  %v2711_v62 = vpop.eup %2710 }
 0x374   : > { %v2017_v46 = vpop.permute.xlu1 %2016  ;;  %2722 = vrcp.f32 %v1127_v48  ;;  %vm1112_vm4 = vcmp.eq.f32.partialorder %v4078_v59, 0.0  ;;  %v2144_v8 = vmul.f32 1.6732632, %v2404_v51  ;;  %v2406_v13 = vadd.f32 -1.0, %v2711_v62 }
 0x375   : > { %v2054_v9 = vmul.f32 %v3946_v40, %v2017_v46  ;;  %2724 = vpow2.f32 %v2108_v57  ;;  %v1128_v50 = vsel %vm1112_vm4, 1.0, %v4078_v59  ;;  %v2405_v40 = vadd.f32 -1.0, %v2709_v15 }
 0x376   : > { %v2022_v41 = vpop.permute.xlu0 %2021  ;;  %v2713_v45 = vpop.eup %2712  ;;  %2726 = vrcp.f32 %v1128_v50  ;;  %v2160_v19 = vsel %vm2080_vm5, %v4019_v0, %v2144_v8  ;;  %v2146_v57 = vmul.f32 1.6732632, %v2406_v13 }
 0x377   : > { %v4090_v1 = vadd.f32 %v4013_v29, %v2054_v9  ;;  %v2055_v10 = vmul.f32 %v3949_v16, %v2022_v41  ;;  %2728 = vpow2.f32 %v2110_v44  ;;  %1207 = vperm.xlu1 %2569, %v2713_v45   ;;  %v2145_v60 = vmul.f32 1.6732632, %v2405_v40 }
 0x378   : > { %v2715_v2 = vpop.eup %2714  ;;  %2730 = vpow2.f32 %v2112_v27  ;;  %v2176_v50 = vmul.f32 1.050701, %v2160_v19  ;;  %v2162_v45 = vsel %vm2082_vm11, %v4027_v54, %v2146_v57 }
 0x379   : > { %v4095_v21 = vadd.f32 %v4013_v29, %v2055_v10  ;;  %v2717_v61 = vpop.eup %2716  ;;  %v2116_v11 = vmul.f32 1.442695, %v4090_v1  ;;  %1212 = vperm.xlu0 %2568, %v2715_v2   ;;  %2732 = vpow2.f32 %v2114_v22  ;;  %v2161_v46 = vsel %vm2081_vm10, %v4024_v55, %v2145_v60 }
 0x37a   : > { %v2719_v17 = vpop.eup %2718  ;;  %v2407_v63 = vadd.f32 -1.0, %v2717_v61  ;;  %v2177_v22 = vmul.f32 1.050701, %v2161_v46  ;;  %v2178_v13 = vmul.f32 1.050701, %v2162_v45  ;;  %vm2090_vm6 = vcmp.gt.f32.partialorder %v4090_v1, 0.0 }
 0x37b   : > { %v2118_v16 = vmul.f32 1.442695, %v4095_v21  ;;  %v2721_v56 = vpop.eup %2720  ;;  %2734 = vpow2.f32 %v2116_v11  ;;  %v2408_v4 = vadd.f32 -1.0, %v2719_v17  ;;  %vm2091_vm15 = vcmp.gt.f32.partialorder %v4095_v21, 0.0 }
 0x37c   : > { %v2027_v47 = vpop.permute.xlu1 %2026  ;;  %v2147_v62 = vmul.f32 1.6732632, %v2407_v63  ;;  %v2409_v9 = vadd.f32 -1.0, %v2721_v56  ;;  %vm2272_vm10 = vcmask 261120  }
 0x37d   : > { %v2056_v36 = vmul.f32 %v3954_v43, %v2027_v47  ;;  %2736 = vpow2.f32 %v2118_v16  ;;  %v2148_v51 = vmul.f32 1.6732632, %v2408_v4 }
 0x37e   : > { %v2723_v26 = vpop.eup %2722  ;;  %v2032_v15 = vpop.permute.xlu0 %2031  ;;  %v2163_v40 = vsel %vm2083_vm3, %v4041_v7, %v2147_v62  ;;  %v2149_v61 = vmul.f32 1.6732632, %v2409_v9 }
 0x37f   : > { %v4103_v5 = vadd.f32 %v4013_v29, %v2056_v36  ;;  %v2725_v44 = vpop.eup %2724  ;;  %1217 = vperm.xlu1 %2569, %v2723_v26   ;;  %v2057_v43 = vmul.f32 %v3957_v34, %v2032_v15  ;;  %v2164_v17 = vsel %vm2084_vm1, %v4047_v23, %v2148_v51  ;;  %v2179_v36 = vmul.f32 1.050701, %v2163_v40 }
 0x380   : > { %v2727_v48 = vpop.eup %2726  ;;  %v2410_v10 = vadd.f32 -1.0, %v2725_v44  ;;  %v2165_v56 = vsel %vm2085_vm12, %v4055_v24, %v2149_v61  ;;  %v2180_v4 = vmul.f32 1.050701, %v2164_v17  ;;  %vm4590_vm12 = vcmask 130048  }
 0x381   : > { %v2120_v0 = vmul.f32 1.442695, %v4103_v5  ;;  %v2729_v27 = vpop.eup %2728  ;;  %1222 = vperm.xlu0 %2568, %v2727_v48   ;;  %v4111_v41 = vadd.f32 %v4013_v29, %v2057_v43  ;;  %vm2092_vm7 = vcmp.gt.f32.partialorder %v4103_v5, 0.0 }
 0x382   : > { %v2731_v34 = vpop.eup %2730  ;;  %v2411_v11 = vadd.f32 -1.0, %v2729_v27  ;;  %v2150_v16 = vmul.f32 1.6732632, %v2410_v10 }
 0x383   : > { %2738 = vpow2.f32 %v2120_v0  ;;  %v2122_v55 = vmul.f32 1.442695, %v4111_v41  ;;  %2208 = vrot.lane.b32.xlu1 %v2176_v50, %s2799_s9  ;;  %v2733_v54 = vpop.eup %2732  ;;  %v2412_v47 = vadd.f32 -1.0, %v2731_v34  ;;  %vm2093_vm8 = vcmp.gt.f32.partialorder %v4111_v41, 0.0 }
 0x384   : > { %v2037_v2 = vpop.permute.xlu1 %2036  ;;  %v2151_v26 = vmul.f32 1.6732632, %v2411_v11  ;;  %v2413_v19 = vadd.f32 -1.0, %v2733_v54  ;;  %v2166_v44 = vsel %vm2086_vm14, %v4062_v20, %v2150_v16 }
 0x385   : > { %v2058_v8 = vmul.f32 %v3962_v25, %v2037_v2  ;;  %2740 = vpow2.f32 %v2122_v55  ;;  %2210 = vrot.lane.b32.xlu0 %v2177_v22, %s2799_s9  ;;  %v2735_v7 = vpop.eup %2734  ;;  %v2152_v43 = vmul.f32 1.6732632, %v2412_v47  ;;  %v2182_v27 = vmul.f32 1.050701, %v2166_v44 }
 0x386   : > { %v2042_v63 = vpop.permute.xlu0 %2041  ;;  %v2414_v48 = vadd.f32 -1.0, %v2735_v7  ;;  %v2167_v62 = vsel %vm2087_vm2, %v4068_v37, %v2151_v26  ;;  %v2153_v9 = vmul.f32 1.6732632, %v2413_v19  ;;  %v4166_v19 = vld [vmem:[%s4343_s4] ss:$0 sm:$0xff]  ;;  %vm4591_vm2 = vmmov %vm4590_vm12 }
 0x387   : > { %v4123_v60 = vadd.f32 %v4013_v29, %v2058_v8  ;;  %2212 = vrot.lane.b32.xlu1 %v2178_v13, %s2799_s9  ;;  %v2059_v25 = vmul.f32 %v3965_v6, %v2042_v63  ;;  %v2737_v57 = vpop.eup %2736  ;;  %v2181_v6 = vmul.f32 1.050701, %v2165_v56  ;;  %v2183_v51 = vmul.f32 1.050701, %v2167_v62 }
 0x388   : > { %v2415_v0 = vadd.f32 -1.0, %v2737_v57  ;;  %v2154_v20 = vmul.f32 1.6732632, %v2414_v48  ;;  %v2169_v37 = vsel %vm2089_vm9, %v4082_v32, %v2153_v9  ;;  %vm4592_vm9 = vmmov %vm4591_vm2 }
 0x389   : > { %v2124_v23 = vmul.f32 1.442695, %v4123_v60  ;;  %2214 = vrot.lane.b32.xlu0 %v2179_v36, %s2799_s9  ;;  %v2079_v15 = vadd.f32 %v4013_v29, %v2059_v25  ;;  %v2168_v29 = vsel %vm2088_vm13, %v4075_v49, %v2152_v43  ;;  %v2185_v2 = vmul.f32 1.050701, %v2169_v37 }
 0x38a   : > { %v2155_v10 = vmul.f32 1.6732632, %v2415_v0  ;;  %v2184_v22 = vmul.f32 1.050701, %v2168_v29  ;;  %v2170_v55 = vsel %vm2090_vm6, %v4090_v1, %v2154_v20  ;;  %vm2094_vm0 = vcmp.gt.f32.partialorder %v4123_v60, 0.0 }
 0x38b   : > { %2742 = vpow2.f32 %v2124_v23  ;;  %v2126_v24 = vmul.f32 1.442695, %v2079_v15  ;;  %2216 = vrot.lane.b32.xlu1 %v2180_v4, %s2799_s9  ;;  %v2186_v32 = vmul.f32 1.050701, %v2170_v55  ;;  %vm2095_vm4 = vcmp.gt.f32.partialorder %v2079_v15, 0.0 }
 0x38c   : > { %v2171_v61 = vsel %vm2091_vm15, %v4095_v21, %v2155_v10  ;;  %vm4593_vm15 = vmmov %vm4591_vm2 }
 0x38d   : > { %v2739_v46 = vpop.eup %2738  ;;  %2744 = vpow2.f32 %v2126_v24  ;;  %2218 = vrot.lane.b32.xlu0 %v2181_v6, %s2799_s9  ;;  %v2187_v1 = vmul.f32 1.050701, %v2171_v61 }
 0x38e   : > { %v2416_v50 = vadd.f32 -1.0, %v2739_v46 }
 0x38f   : > { %v2741_v45 = vpop.eup %2740  ;;  %2220 = vrot.lane.b32.xlu1 %v2182_v27, %s2799_s9 }
 0x390   : > { %v2417_v34 = vadd.f32 -1.0, %v2741_v45  ;;  %v2156_v49 = vmul.f32 1.6732632, %v2416_v50 }
 0x391   : > { %2222 = vrot.lane.b32.xlu0 %v2183_v51, %s2799_s9 }
 0x392   : > { %v2157_v11 = vmul.f32 1.6732632, %v2417_v34  ;;  %v2172_v54 = vsel %vm2092_vm7, %v4103_v5, %v2156_v49 }
 0x393   : > { %2224 = vrot.lane.b32.xlu1 %v2184_v22, %s2799_s9  ;;  %v2188_v47 = vmul.f32 1.050701, %v2172_v54 }
 0x394   : > { %v2173_v16 = vsel %vm2093_vm8, %v4111_v41, %v2157_v11  ;;  %vm4594_vm8 = vmmov %vm4591_vm2 }
 0x395   : > { %v2743_v40 = vpop.eup %2742  ;;  %2226 = vrot.lane.b32.xlu0 %v2185_v2, %s2799_s9  ;;  %v2189_v36 = vmul.f32 1.050701, %v2173_v16 }
 0x396   : > { %v2418_v8 = vadd.f32 -1.0, %v2743_v40 }
 0x397   : > { %v2745_v13 = vpop.eup %2744  ;;  %2228 = vrot.lane.b32.xlu1 %v2186_v32, %s2799_s9 }
 0x398   : > { %v2158_v17 = vmul.f32 1.6732632, %v2418_v8  ;;  %v2419_v21 = vadd.f32 -1.0, %v2745_v13 }
 0x399   : > { %2230 = vrot.lane.b32.xlu0 %v2187_v1, %s2799_s9 }
 0x39a   : > { %v2174_v63 = vsel %vm2094_vm0, %v4123_v60, %v2158_v17  ;;  %v2159_v7 = vmul.f32 1.6732632, %v2419_v21 }
 0x39b   : > { %v2190_v5 = vmul.f32 1.050701, %v2174_v63  ;;  %2232 = vrot.lane.b32.xlu1 %v2188_v47, %s2799_s9 }
 0x39c   : > { %v2175_v25 = vsel %vm2095_vm4, %v2079_v15, %v2159_v7  ;;  %vm4595_vm4 = vmmov %vm4591_vm2 }
 0x39d   : > { %v2191_v56 = vmul.f32 1.050701, %v2175_v25  ;;  %2234 = vrot.lane.b32.xlu0 %v2189_v36, %s2799_s9 }
 0x39f   : > { %2236 = vrot.lane.b32.xlu1 %v2190_v5, %s2799_s9 }
 0x3a1   : > { %2238 = vrot.lane.b32.xlu0 %v2191_v56, %s2799_s9 }
 0x3c6   : > { %v1148_v41 = vpop.permute.xlu1 %1147 }
 0x3c7   : > { %v1225_v60 = vmul.f32 %v3970_v35, %v1148_v41 }
 0x3c8   : > { %v1153_v26 = vpop.permute.xlu0 %1152 }
 0x3c9   : > { %v1226_v23 = vmul.f32 %v3973_v38, %v1153_v26  ;;  %v4170_v4 = vadd.f32 %v4166_v19, %v1225_v60 }
 0x3cb   : > { %v4173_v44 = vadd.f32 %v4166_v19, %v1226_v23  ;;  %v1277_v6 = vmul.f32 1.442695, %v4170_v4  ;;  %vm1261_vm5 = vcmp.gt.f32.partialorder %v4170_v4, 0.0 }
 0x3cd   : > { %v1279_v46 = vmul.f32 1.442695, %v4173_v44  ;;  %2746 = vpow2.f32 %v1277_v6  ;;  %vm1262_vm11 = vcmp.gt.f32.partialorder %v4173_v44, 0.0 }
 0x3ce   : > { %v1158_v57 = vpop.permute.xlu1 %1157 }
 0x3cf   : > { %v1227_v43 = vmul.f32 %v3978_v31, %v1158_v57  ;;  %2748 = vpow2.f32 %v1279_v46 }
 0x3d0   : > { %v1163_v15 = vpop.permute.xlu0 %1162 }
 0x3d1   : > { %v1228_v35 = vmul.f32 %v3981_v12, %v1163_v15  ;;  %v4180_v38 = vadd.f32 %v4166_v19, %v1227_v43 }
 0x3d3   : > { %v4184_v0 = vadd.f32 %v4166_v19, %v1228_v35  ;;  %v1281_v12 = vmul.f32 1.442695, %v4180_v38  ;;  %vm1263_vm3 = vcmp.gt.f32.partialorder %v4180_v38, 0.0 }
 0x3d5   : > { %v1283_v45 = vmul.f32 1.442695, %v4184_v0  ;;  %2750 = vpow2.f32 %v1281_v12  ;;  %vm1264_vm1 = vcmp.gt.f32.partialorder %v4184_v0, 0.0 }
 0x3d6   : > { %v1168_v48 = vpop.permute.xlu1 %1167 }
 0x3d7   : > { %v1229_v62 = vmul.f32 %v3986_v58, %v1168_v48  ;;  %2752 = vpow2.f32 %v1283_v45  ;;  %v2747_v11 = vpop.eup %2746 }
 0x3d8   : > { %v1173_v24 = vpop.permute.xlu0 %1172  ;;  %v2386_v1 = vadd.f32 -1.0, %v2747_v11 }
 0x3d9   : > { %v1230_v27 = vmul.f32 %v3989_v53, %v1173_v24  ;;  %v4189_v29 = vadd.f32 %v4166_v19, %v1229_v62 }
 0x3da   : > { %v1325_v56 = vmul.f32 1.6732632, %v2386_v1 }
 0x3db   : > { %v4194_v58 = vadd.f32 %v4166_v19, %v1230_v27  ;;  %v1285_v53 = vmul.f32 1.442695, %v4189_v29  ;;  %vm1265_vm14 = vcmp.gt.f32.partialorder %v4189_v29, 0.0 }
 0x3dc   : > { %v1341_v6 = vsel %vm1261_vm5, %v4170_v4, %v1325_v56 }
 0x3dd   : > { %2754 = vpow2.f32 %v1285_v53  ;;  %vm1266_vm13 = vcmp.gt.f32.partialorder %v4194_v58, 0.0 }
 0x3de   : > { %v1178_v9 = vpop.permute.xlu1 %1177 }
 0x3df   : > { %v1231_v20 = vmul.f32 %v3994_v33, %v1178_v9  ;;  %v1287_v33 = vmul.f32 1.442695, %v4194_v58 }
 0x3e0   : > { %v1183_v31 = vpop.permute.xlu0 %1182 }
 0x3e1   : > { %v1232_v51 = vmul.f32 %v3997_v52, %v1183_v31  ;;  %v4199_v10 = vadd.f32 %v4166_v19, %v1231_v20  ;;  %2756 = vpow2.f32 %v1287_v33 }
 0x3e3   : > { %v4204_v55 = vadd.f32 %v4166_v19, %v1232_v51  ;;  %v1289_v52 = vmul.f32 1.442695, %v4199_v10  ;;  %vm1267_vm6 = vcmp.gt.f32.partialorder %v4199_v10, 0.0 }
 0x3e5   : > { %v1291_v32 = vmul.f32 1.442695, %v4204_v55  ;;  %2758 = vpow2.f32 %v1289_v52  ;;  %vm1268_vm7 = vcmp.gt.f32.partialorder %v4204_v55, 0.0 }
 0x3e6   : > { %v1188_v50 = vpop.permute.xlu1 %1187 }
 0x3e7   : > { %v1233_v34 = vmul.f32 %v4002_v30, %v1188_v50  ;;  %v2749_v30 = vpop.eup %2748  ;;  %2760 = vpow2.f32 %v1291_v32 }
 0x3e8   : > { %v1193_v37 = vpop.permute.xlu0 %1192  ;;  %v2387_v17 = vadd.f32 -1.0, %v2749_v30 }
 0x3e9   : > { %v1234_v49 = vmul.f32 %v4005_v3, %v1193_v37  ;;  %v4209_v40 = vadd.f32 %v4166_v19, %v1233_v34 }
 0x3ea   : > { %v1326_v60 = vmul.f32 1.6732632, %v2387_v17 }
 0x3eb   : > { %v4214_v8 = vadd.f32 %v4166_v19, %v1234_v49  ;;  %v1293_v3 = vmul.f32 1.442695, %v4209_v40  ;;  %vm1269_vm0 = vcmp.gt.f32.partialorder %v4209_v40, 0.0 }
 0x3ec   : > { %v1342_v9 = vsel %vm1262_vm11, %v4173_v44, %v1326_v60  ;;  %v1357_v44 = vmul.f32 1.050701, %v1341_v6  ;;  %vm4596_vm11 = vmmov %vm4591_vm2 }
 0x3ed   : > { %v1295_v21 = vmul.f32 1.442695, %v4214_v8  ;;  %2762 = vpow2.f32 %v1293_v3  ;;  %v1358_v37 = vmul.f32 1.050701, %v1342_v9  ;;  %vm1270_vm5 = vcmp.gt.f32.partialorder %v4214_v8, 0.0 }
 0x3ee   : > { %v1198_v22 = vpop.permute.xlu1 %1197 }
 0x3ef   : > { %v1235_v61 = vmul.f32 %v4021_v39, %v1198_v22  ;;  %v2751_v39 = vpop.eup %2750  ;;  %2764 = vpow2.f32 %v1295_v21 }
 0x3f0   : > { %v1203_v2 = vpop.permute.xlu0 %1202  ;;  %v2388_v41 = vadd.f32 -1.0, %v2751_v39 }
 0x3f1   : > { %v1236_v54 = vmul.f32 %v4030_v42, %v1203_v2  ;;  %v4219_v13 = vadd.f32 %v4166_v19, %v1235_v61  ;;  %v2753_v42 = vpop.eup %2752 }
 0x3f2   : > { %v2755_v26 = vpop.eup %2754 }
 0x3f3   : > { %v4223_v47 = vadd.f32 %v4166_v19, %v1236_v54  ;;  %v1297_v36 = vmul.f32 1.442695, %v4219_v13  ;;  %v2757_v15 = vpop.eup %2756  ;;  %v2390_v48 = vadd.f32 -1.0, %v2755_v26 }
 0x3f4   : > { %v2759_v24 = vpop.eup %2758  ;;  %v2391_v31 = vadd.f32 -1.0, %v2757_v15 }
 0x3f5   : > { %v1299_v23 = vmul.f32 1.442695, %v4223_v47  ;;  %2766 = vpow2.f32 %v1297_v36  ;;  %v2761_v20 = vpop.eup %2760  ;;  %v1329_v50 = vmul.f32 1.6732632, %v2390_v48  ;;  %v2392_v45 = vadd.f32 -1.0, %v2759_v24 }
 0x3f6   : > { %v1208_v16 = vpop.permute.xlu1 %1207  ;;  %v2393_v2 = vadd.f32 -1.0, %v2761_v20 }
 0x3f7   : > { %v1237_v63 = vmul.f32 %v4044_v14, %v1208_v16  ;;  %v2389_v14 = vadd.f32 -1.0, %v2753_v42  ;;  %2768 = vpow2.f32 %v1299_v23  ;;  %v2763_v34 = vpop.eup %2762  ;;  %v1331_v32 = vmul.f32 1.6732632, %v2392_v45 }
 0x3f8   : > { %v1213_v7 = vpop.permute.xlu0 %1212  ;;  %v2394_v54 = vadd.f32 -1.0, %v2763_v34  ;;  %v1345_v1 = vsel %vm1265_vm14, %v4189_v29, %v1329_v50  ;;  %v1332_v39 = vmul.f32 1.6732632, %v2393_v2 }
 0x3f9   : > { %v4228_v5 = vadd.f32 %v4166_v19, %v1237_v63  ;;  %v1238_v25 = vmul.f32 %v4051_v28, %v1213_v7  ;;  %v1327_v28 = vmul.f32 1.6732632, %v2388_v41  ;;  %v1328_v27 = vmul.f32 1.6732632, %v2389_v14  ;;  %v2765_v61 = vpop.eup %2764 }
 0x3fa   : > { %v2395_v21 = vadd.f32 -1.0, %v2765_v61  ;;  %v1361_v36 = vmul.f32 1.050701, %v1345_v1  ;;  %v1347_v26 = vsel %vm1267_vm6, %v4199_v10, %v1331_v32 }
 0x3fb   : > { %v4233_v57 = vadd.f32 %v4166_v19, %v1238_v25  ;;  %v1301_v43 = vmul.f32 1.442695, %v4228_v5  ;;  %v1343_v53 = vsel %vm1263_vm3, %v4180_v38, %v1327_v28  ;;  %v1344_v38 = vsel %vm1264_vm1, %v4184_v0, %v1328_v27  ;;  %vm4597_vm1 = vmmov %vm4591_vm2 }
 0x3fc   : > { %v1359_v30 = vmul.f32 1.050701, %v1343_v53  ;;  %v1360_v16 = vmul.f32 1.050701, %v1344_v38  ;;  %v1333_v25 = vmul.f32 1.6732632, %v2394_v54  ;;  %v1348_v28 = vsel %vm1268_vm7, %v4204_v55, %v1332_v39  ;;  %vm4598_vm14 = vmmov %vm4597_vm1 }
 0x3fd   : > { %v1303_v46 = vmul.f32 1.442695, %v4233_v57  ;;  %2770 = vpow2.f32 %v1301_v43  ;;  %v1334_v14 = vmul.f32 1.6732632, %v2395_v21  ;;  %v1364_v27 = vmul.f32 1.050701, %v1348_v28  ;;  %vm4600_vm6 = vmmov %vm4597_vm1 }
 0x3fe   : > { %v1218_v35 = vpop.permute.xlu1 %1217  ;;  %vm1271_vm3 = vcmp.gt.f32.partialorder %v4219_v13, 0.0  ;;  %vm4601_vm7 = vmmov %vm4597_vm1 }
 0x3ff   : > { %v1239_v62 = vmul.f32 %v4071_v18, %v1218_v35  ;;  %2772 = vpow2.f32 %v1303_v46  ;;  %v2767_v17 = vpop.eup %2766  ;;  %v1363_v35 = vmul.f32 1.050701, %v1347_v26 }
 0x400   : > { %v1223_v12 = vpop.permute.xlu0 %1222  ;;  %v2396_v56 = vadd.f32 -1.0, %v2767_v17 }
 0x401   : > { %v4252_v4 = vadd.f32 %v4166_v19, %v1239_v62  ;;  %v1240_v18 = vmul.f32 %v4078_v59, %v1223_v12  ;;  %v1330_v59 = vmul.f32 1.6732632, %v2391_v31  ;;  %v2769_v42 = vpop.eup %2768  ;;  %v1349_v62 = vsel %vm1269_vm0, %v4209_v40, %v1333_v25  ;;  %vm4602_vm0 = vmmov %vm4597_vm1 }
 0x402   : > { %v2209_v51 = vpop.permute.xlu1 %2208  ;;  %v2397_v15 = vadd.f32 -1.0, %v2769_v42  ;;  %v1335_v6 = vmul.f32 1.6732632, %v2396_v56  ;;  %v1365_v50 = vmul.f32 1.050701, %v1349_v62 }
 0x403   : > { %v1305_v22 = vmul.f32 1.442695, %v4252_v4  ;;  %v4258_v33 = vadd.f32 %v4166_v19, %v1240_v18  ;;  %v2256_v49 = vsel %vm4590_vm12, %v1357_v44, %v2209_v51  ;;  %v1346_v7 = vsel %vm1266_vm13, %v4194_v58, %v1330_v59  ;;  %vm4599_vm13 = vmmov %vm4597_vm1 }
 0x404   : > { %2273 = vst.msk [vmem:[%s4249_s26] sm:$0xff] %vm2272_vm10, %v2256_v49  ;;  %v2211_v52 = vpop.permute.xlu0 %2210  ;;  %v1362_v23 = vmul.f32 1.050701, %v1346_v7  ;;  %v1336_v31 = vmul.f32 1.6732632, %v2397_v15  ;;  %v1350_v18 = vsel %vm1270_vm5, %v4214_v8, %v1334_v14  ;;  %v1351_v53 = vsel %vm1271_vm3, %v4219_v13, %v1335_v6  ;;  %vm4604_vm5 = vmmov %vm4602_vm0 }
 0x405   : > { %2774 = vpow2.f32 %v1305_v22  ;;  %v1307_v11 = vmul.f32 1.442695, %v4258_v33  ;;  %v2257_v19 = vsel %vm4591_vm2, %v1358_v37, %v2211_v52  ;;  %vm1272_vm12 = vcmp.gt.f32.partialorder %v4223_v47, 0.0 }
 0x406   : > { %2274 = vst.msk [vmem:[%s4249_s26 + $0x8] sm:$0xff] %vm2272_vm10, %v2257_v19  ;;  %v2213_v3 = vpop.permute.xlu1 %2212  ;;  %v1366_v22 = vmul.f32 1.050701, %v1350_v18  ;;  %v1352_v2 = vsel %vm1272_vm12, %v4223_v47, %v1336_v31  ;;  %vm1273_vm2 = vcmp.gt.f32.partialorder %v4228_v5, 0.0  ;;  %v1367_v38 = vmul.f32 1.050701, %v1351_v53 }
 0x407   : > { %2776 = vpow2.f32 %v1307_v11  ;;  %v2258_v0 = vsel %vm4592_vm9, %v1359_v30, %v2213_v3  ;;  %v2771_v60 = vpop.eup %2770  ;;  %vm1274_vm9 = vcmp.gt.f32.partialorder %v4233_v57, 0.0  ;;  %v1368_v30 = vmul.f32 1.050701, %v1352_v2 }
 0x408   : > { %2275 = vst.msk [vmem:[%s4249_s26 + $0x10] sm:$0xff] %vm2272_vm10, %v2258_v0  ;;  %v2215_v63 = vpop.permute.xlu0 %2214  ;;  %v2398_v24 = vadd.f32 -1.0, %v2771_v60 }
 0x409   : > { %v2259_v29 = vsel %vm4593_vm15, %v1360_v16, %v2215_v63  ;;  %v2773_v48 = vpop.eup %2772  ;;  %vm1275_vm15 = vcmp.gt.f32.partialorder %v4252_v4, 0.0 }
 0x40a   : > { %2276 = vst.msk [vmem:[%s4249_s26 + $0x18] sm:$0xff] %vm2272_vm10, %v2259_v29  ;;  %v2217_v41 = vpop.permute.xlu1 %2216  ;;  %v2399_v12 = vadd.f32 -1.0, %v2773_v48  ;;  %v1337_v45 = vmul.f32 1.6732632, %v2398_v24 }
 0x40b   : > { %v2260_v58 = vsel %vm4594_vm8, %v1361_v36, %v2217_v41  ;;  %vm1276_vm8 = vcmp.gt.f32.partialorder %v4258_v33, 0.0 }
 0x40c   : > { %2277 = vst.msk [vmem:[%s4249_s26 + $0x20] sm:$0xff] %vm2272_vm10, %v2260_v58  ;;  %v2219_v43 = vpop.permute.xlu0 %2218  ;;  %v1338_v8 = vmul.f32 1.6732632, %v2399_v12  ;;  %v1353_v11 = vsel %vm1273_vm2, %v4228_v5, %v1337_v45 }
 0x40d   : > { %v2261_v10 = vsel %vm4595_vm4, %v1362_v23, %v2219_v43  ;;  %v1369_v1 = vmul.f32 1.050701, %v1353_v11  ;;  %vm4603_vm4 = vmmov %vm4602_vm0 }
 0x40e   : > { %2278 = vst.msk [vmem:[%s4249_s26 + $0x28] sm:$0xff] %vm2272_vm10, %v2261_v10  ;;  %v2221_v46 = vpop.permute.xlu1 %2220  ;;  %v1354_v54 = vsel %vm1274_vm9, %v4233_v57, %v1338_v8 }
 0x40f   : > { %v2775_v9 = vpop.eup %2774  ;;  %v2262_v55 = vsel %vm4596_vm11, %v1363_v35, %v2221_v46  ;;  %v1370_v16 = vmul.f32 1.050701, %v1354_v54  ;;  %vm4605_vm11 = vmmov %vm4602_vm0 }
 0x410   : > { %2279 = vst.msk [vmem:[%s4249_s26 + $0x30] sm:$0xff] %vm2272_vm10, %v2262_v55  ;;  %v2223_v20 = vpop.permute.xlu0 %2222  ;;  %v2400_v51 = vadd.f32 -1.0, %v2775_v9 }
 0x411   : > { %v2777_v44 = vpop.eup %2776  ;;  %v2263_v40 = vsel %vm4597_vm1, %v1364_v27, %v2223_v20 }
 0x412   : > { %2280 = vst.msk [vmem:[%s4249_s26 + $0x38] sm:$0xff] %vm2272_vm10, %v2263_v40  ;;  %v2225_v37 = vpop.permute.xlu1 %2224  ;;  %v2401_v49 = vadd.f32 -1.0, %v2777_v44  ;;  %v1339_v13 = vmul.f32 1.6732632, %v2400_v51 }
 0x413   : > { %v2264_v34 = vsel %vm4598_vm14, %v1365_v50, %v2225_v37 }
 0x414   : > { %2281 = vst.msk [vmem:[%s4249_s26 + $0x40] sm:$0xff] %vm2272_vm10, %v2264_v34  ;;  %v2227_v59 = vpop.permute.xlu0 %2226  ;;  %v1340_v32 = vmul.f32 1.6732632, %v2401_v49  ;;  %v1355_v17 = vsel %vm1275_vm15, %v4252_v4, %v1339_v13 }
 0x415   : > { %v2265_v52 = vsel %vm4599_vm13, %v1366_v22, %v2227_v59  ;;  %v1371_v63 = vmul.f32 1.050701, %v1355_v17 }
 0x416   : > { %2282 = vst.msk [vmem:[%s4249_s26 + $0x48] sm:$0xff] %vm2272_vm10, %v2265_v52  ;;  %v2229_v61 = vpop.permute.xlu1 %2228  ;;  %v1356_v39 = vsel %vm1276_vm8, %v4258_v33, %v1340_v32 }
 0x417   : > { %v2266_v19 = vsel %vm4600_vm6, %v1367_v38, %v2229_v61  ;;  %v1372_v4 = vmul.f32 1.050701, %v1356_v39 }
 0x418   : > { %2283 = vst.msk [vmem:[%s4249_s26 + $0x50] sm:$0xff] %vm2272_vm10, %v2266_v19  ;;  %v2231_v47 = vpop.permute.xlu0 %2230 }
 0x419   : > { %v2267_v3 = vsel %vm4601_vm7, %v1368_v30, %v2231_v47 }
 0x41a   : > { %2284 = vst.msk [vmem:[%s4249_s26 + $0x58] sm:$0xff] %vm2272_vm10, %v2267_v3  ;;  %v2233_v5 = vpop.permute.xlu1 %2232 }
 0x41b   : > { %v2268_v0 = vsel %vm4602_vm0, %v1369_v1, %v2233_v5 }
 0x41c   : > { %2285 = vst.msk [vmem:[%s4249_s26 + $0x60] sm:$0xff] %vm2272_vm10, %v2268_v0  ;;  %v2235_v57 = vpop.permute.xlu0 %2234 }
 0x41d   : > { %v2269_v21 = vsel %vm4603_vm4, %v1370_v16, %v2235_v57 }
 0x41e   : > { %2286 = vst.msk [vmem:[%s4249_s26 + $0x68] sm:$0xff] %vm2272_vm10, %v2269_v21  ;;  %v2237_v7 = vpop.permute.xlu1 %2236 }
 0x41f   : > { %v2270_v42 = vsel %vm4604_vm5, %v1371_v63, %v2237_v7 }
 0x420   : > { %2287 = vst.msk [vmem:[%s4249_s26 + $0x70] sm:$0xff] %vm2272_vm10, %v2270_v42  ;;  %v2239_v29 = vpop.permute.xlu0 %2238 }
 0x421   : > { %v2271_v36 = vsel %vm4605_vm11, %v1372_v4, %v2239_v29 }
 0x422   : > { %2288 = vst.msk [vmem:[%s4249_s26 + $0x78] sm:$0xff] %vm2272_vm10, %v2271_v36 }
 0x423 PF: > { %s15_s18 = sadd.s32 1, %s2793_s18  }
 0x424   : > { %p12_p5 = scmp.ge.s32.totalorder %s15_s18, 4  }
 0x426   :  { %14 = sbr.rel (!%p12_p5) target bundleno = 1 (0x1), region = 74 }

// kernel: gat_full_forward.3
= control target key start
LH: loop header
LB: loop body
LE: loop exit
PB: predicated region body
PF: predicated region fallthrough
CT: control target
= control target key end

     0   :  { %s5435_s24 = smov 0   ;;  %s8393_s0 = inlined_call_operand.vmem [shape: s8[256,256], index: 0, kind: input, shape index: {}]   ;;  %s8394_s1 = inlined_call_operand.vmem [shape: bf16[256,64], index: 1, kind: input, shape index: {}]   ;;  %s8395_s2 = inlined_call_operand.vmem [shape: f32[4,256], index: 2, kind: input, shape index: {}]   ;;  %s8396_s3 = inlined_call_operand.vmem [shape: f32[256,4], index: 3, kind: input, shape index: {}]   ;;  %s8397_s4 = inlined_call_operand.vmem [shape: f32[2,16], index: 4, kind: input, shape index: {}]   ;;  %s8398_s5 = inlined_call_operand.vmem [shape: f32[16,4], index: 5, kind: input, shape index: {}]   ;;  %s8399_s6 = inlined_call_operand.vmem [shape: f32[1,4], index: 6, kind: input, shape index: {}]   ;;  %s8400_s7 = inlined_call_operand.vmem [shape: f32[256,4], index: 7, kind: output, shape index: {}]  }
   0x1 LB: > { %s4417_s25 = sadd.s32 4294967295, %s5385_s24   ;;  %p4421_p0 = scmp.ge.s32.totalorder %s5385_s24, 1  ;;  %s5385_s24 = sphi %s5435_s24, %s17_s24  }
   0x2   : > { %p250_p1 = scmp.lt.s32.totalorder %s5385_s24, 3 }
   0x4   : > { %p251_p2 = pnand %p4421_p0, %p250_p1 }
   0x6   : > { %254 = sbr.rel (%p251_p2) target bundleno = 2378 (0x94a), region = 48 }
   0xd   : > { %s4425_s26 = sshll.u32 %s4417_s25, 4  ;;  %v5387_v0 = vmov 1   ;;  %v8401_v1 = vmov 0   ;;  %s4422_s8 = sshll.u32 %s4417_s25, 2  ;;  %v458_v43 = vlaneseq  ;;  %vm8443_vm8 = vcmask 130048  }
   0xe   : > { %4859 = vset.pattern.permute.xlu1 %v5387_v0  ;;  %4858 = vset.pattern.permute.xlu0 %v8401_v1  ;;  %p296_p3 = scmp.lt.s32.totalorder %s4425_s26, 31  ;;  %p289_p4 = scmp.lt.s32.totalorder %s4422_s8, 7  ;;  %v375_v51 = vld [vmem:[%s8395_s2] ss:$4 sm:$0x3] }
   0xf   : > { %v459_v46 = vshrl.u32 %v458_v43, 7  ;;  %v4462_v52 = vld [vmem:[%s8395_s2 + $0x1] ss:$4 sm:$0x3]  ;;  %s5389_s19 = smov 112   ;;  %s5392_s18 = smov 96  }
  0x10   : > { %s9020_s26 = smov (!%p296_p3, %s4425_s26), 31  ;;  %s9022_s8 = smov (!%p289_p4, %s4422_s8), 7 }
  0x11   : > { %s4426_s27 = sshll.u32 %s9020_s26, 3  ;;  %s4533_s9 = sshll.u32 %s9022_s8, 4  ;;  %v5531_v49 = vsub.s32 0, %v459_v46  ;;  %v5533_v50 = vsub.s32 1, %v459_v46 }
  0x12   : > { %s5453_s30 = scalar_lea.vmem %s8396_s3, %s4426_s27  ;;  %s5466_s12 = scalar_lea.vmem %s8393_s0, %s4533_s9 }
  0x13   : > { %v327_v2 = vld [vmem:[%s5453_s30] sm:$0xff]  ;;  %v328_v3 = vld [vmem:[%s5453_s30 + $0x8] sm:$0xff]  ;;  %v329_v4 = vld [vmem:[%s5453_s30 + $0x10] sm:$0xff]  ;;  %8609 = vst [vmem:[#allocation3_spill] sm:$0xff] %v5531_v49  ;;  %v5543_v54 = vrot.slane %v375_v51, %v5531_v49  ;;  %v5546_v55 = vrot.slane %v375_v51, %v5533_v50  ;;  %v5549_v56 = vrot.slane %v4462_v52, %v5531_v49  ;;  %v5553_v60 = vrot.slane %v4462_v52, %v5533_v50  ;;  %s5393_s21 = smov 80   ;;  %s8340_s9 = scalar_lea.vmem %s8400_s7, %s4426_s27 }
  0x14   : > { %1447 = vperm.xlu1 %4859, %v327_v2   ;;  %379 = vperm.xlu0 %4858, %v327_v2   ;;  %v330_v5 = vld [vmem:[%s5453_s30 + $0x18] sm:$0xff]  ;;  %v332_v6 = vld [vmem:[%s5453_s30 + $0x28] sm:$0xff]  ;;  %v333_v7 = vld [vmem:[%s5453_s30 + $0x30] sm:$0xff]  ;;  %8610 = vst [vmem:[#allocation4_spill] sm:$0xff] %v5533_v50 }
  0x15   : > { %v331_v8 = vld [vmem:[%s5453_s30 + $0x20] sm:$0xff]  ;;  %v313_v9 = vld [vmem:[%s5466_s12 + $0x10] sm:$0xff]  ;;  %v314_v10 = vld [vmem:[%s5466_s12 + $0x18] sm:$0xff] }
  0x16   : > { %v336_v11 = vld [vmem:[%s5453_s30 + $0x48] sm:$0xff]  ;;  %vm321_vm0 = vnez %v313_v9  ;;  %vm322_vm1 = vnez %v314_v10  ;;  %v337_v12 = vld [vmem:[%s5453_s30 + $0x50] sm:$0xff]  ;;  %v334_v20 = vld [vmem:[%s5453_s30 + $0x38] sm:$0xff] }
  0x17   : > { %v5475_v13 = vsel %vm321_vm0, 16843009, %v8401_v1  ;;  %v5478_v14 = vsel %vm322_vm1, 16843009, %v8401_v1  ;;  %v340_v17 = vld [vmem:[%s5453_s30 + $0x68] sm:$0xff]  ;;  %v341_v19 = vld [vmem:[%s5453_s30 + $0x70] sm:$0xff] }
  0x18   : > { %1451 = vperm.xlu1 %4859, %v328_v3   ;;  %384 = vperm.xlu0 %4858, %v328_v3   ;;  %v584_v15 = vunpack.c.2.s8 %v5475_v13  ;;  %v585_v16 = vunpack.c.2.s8 %v5478_v14  ;;  %v335_v21 = vld [vmem:[%s5453_s30 + $0x40] sm:$0xff]  ;;  %v338_v22 = vld [vmem:[%s5453_s30 + $0x58] sm:$0xff]  ;;  %v586_v23 = vunpack.c.3.s8 %v5475_v13  ;;  %v587_v24 = vunpack.c.3.s8 %v5478_v14  ;;  %v316_v29 = vld [vmem:[%s5466_s12 + $0x28] sm:$0xff] }
  0x19   : > { %v339_v26 = vld [vmem:[%s5453_s30 + $0x60] sm:$0xff]  ;;  %v342_v27 = vld [vmem:[%s5453_s30 + $0x78] sm:$0xff]  ;;  %vm324_vm3 = vnez %v316_v29  ;;  %v312_v36 = vld [vmem:[%s5466_s12 + $0x8] sm:$0xff] }
  0x1a   : > { %v5484_v18 = vpack.c.b16 %v585_v16, %v584_v15  ;;  %v5498_v25 = vpack.c.b16 %v587_v24, %v586_v23  ;;  %v315_v28 = vld [vmem:[%s5466_s12 + $0x20] sm:$0xff]  ;;  %v5513_v31 = vsel %vm324_vm3, 16843009, %v8401_v1  ;;  %vm320_vm5 = vnez %v312_v36 }
  0x1b   : > { %vm323_vm2 = vnez %v315_v28  ;;  %v595_v33 = vunpack.c.3.s8 %v5513_v31  ;;  %v311_v35 = vld [vmem:[%s5466_s12] sm:$0xff]  ;;  %v5525_v38 = vsel %vm320_vm5, 16843009, %v8401_v1 }
  0x1c   : > { %389 = vperm.xlu0 %4858, %v329_v4   ;;  %4860 = vset.pattern.permute.xlu1 %v8401_v1  ;;  %v5510_v30 = vsel %vm323_vm2, 16843009, %v8401_v1  ;;  %vm319_vm4 = vnez %v311_v35  ;;  %v573_v40 = vunpack.c.0.s8 %v5525_v38  ;;  %v575_v42 = vunpack.c.1.s8 %v5525_v38 }
  0x1d   : > { %394 = vperm.xlu1 %4860, %v330_v5   ;;  %v594_v32 = vunpack.c.3.s8 %v5510_v30  ;;  %v5522_v37 = vsel %vm319_vm4, 16843009, %v8401_v1 }
  0x1e   : > { %v572_v39 = vunpack.c.0.s8 %v5522_v37  ;;  %v574_v41 = vunpack.c.1.s8 %v5522_v37 }
  0x1f   : > { %v5517_v34 = vpack.c.b16 %v595_v33, %v594_v32 }
  0x20   : > { %404 = vperm.xlu0 %4858, %v332_v6   ;;  %v604_v44 = vpack.c.b16 %v573_v40, %v572_v39  ;;  %v606_v45 = vpack.c.b16 %v575_v42, %v574_v41  ;;  %v8620_v40 = vmov 0 }
  0x21   : > { %4861 = vset.pattern.permute.xlu1 %v5387_v0  ;;  %8608 = vst [vmem:[#allocation2_spill] sm:$0xff] %v5517_v34 }
  0x22   : > { %1459 = vperm.xlu1 %4861, %v330_v5   ;;  %v605_v47 = vpack.c.b8 %v604_v44, %v604_v44  ;;  %v607_v48 = vpack.c.b8 %v606_v45, %v606_v45  ;;  %v5562_v5 = vld [vmem:[%s8394_s1 + $0x40] sm:$0xff]  }
  0x23   : > { %v1031_v16 = vsel %vm8443_vm8, %v5562_v5, 1065369472 }
  0x24   : > { %409 = vperm.xlu0 %4858, %v333_v7   ;;  %vm636_vm6 = vnez %v605_v47  ;;  %vm637_vm7 = vnez %v607_v48  ;;  %4534 = vmatprep.subr.bf16.mxu0 %v1031_v16 }
  0x25   : > { %v652_v53 = vsel %vm636_vm6, 16843009, %v8401_v1  ;;  %v653_v59 = vsel %vm637_vm7, 16843009, %v8401_v1 }
  0x26   : > { %4862 = vset.pattern.permute.xlu1 %v8401_v1  ;;  %v668_v57 = vunpack.c.0.s8 %v652_v53  ;;  %v669_v58 = vunpack.c.1.s8 %v652_v53  ;;  %v671_v15 = vunpack.c.1.s8 %v653_v59 }
  0x27   : > { %399 = vperm.xlu1 %4862, %v331_v8  }
  0x28   : > { %424 = vperm.xlu0 %4858, %v336_v11   ;;  %vm5564_vm9 = vcmp.ne.s32.totalorder %v668_v57, 0  ;;  %vm5568_vm10 = vcmp.ne.s32.totalorder %v669_v58, 0  ;;  %vm5592_vm12 = vcmp.ne.s32.totalorder %v671_v15, 0  ;;  %v5668_v15 = vld [vmem:[%s8394_s1 + $0x18] sm:$0xff]  }
  0x29   : > { %v8621_v40 = vsel %vm5592_vm12, 4294967295, %v8620_v40  ;;  %v1016_v16 = vsel %vm8443_vm8, %v5668_v15, 1065369472 }
  0x2a   : > { %8622 = vst [vmem:[#allocation8_spill] sm:$0xff] %v8621_v40 }
  0x2b   : > { %4863 = vset.pattern.permute.xlu1 %v5387_v0 }
  0x2c   : > { %429 = vperm.xlu0 %4858, %v337_v12   ;;  %1463 = vperm.xlu1 %4863, %v331_v8   ;;  %v8614_v8 = vmov 0 }
  0x2d   : > { %v8615_v8 = vsel %vm5568_vm10, 4294967295, %v8614_v8 }
  0x2e   : > { %8616 = vst [vmem:[#allocation6_spill] sm:$0xff] %v8615_v8 }
  0x30   : > { %444 = vperm.xlu0 %4858, %v340_v17   ;;  %1467 = vperm.xlu1 %4863, %v332_v6  }
  0x34   : > { %449 = vperm.xlu0 %4858, %v341_v19   ;;  %4864 = vset.pattern.permute.xlu1 %v8401_v1 }
  0x35   : > { %414 = vperm.xlu1 %4864, %v334_v20  }
  0x38   : > { %4872 = vset.pattern.permute.xlu0 %v5387_v0 }
  0x39   : > { %4865 = vset.pattern.permute.xlu1 %v5387_v0  ;;  %1455 = vperm.xlu0 %4872, %v329_v4   ;;  %v670_v4 = vunpack.c.0.s8 %v653_v59 }
  0x3a   : > { %1475 = vperm.xlu1 %4865, %v334_v20  }
  0x3b   : > { %vm5578_vm11 = vcmp.ne.s32.totalorder %v670_v4, 0  ;;  %v5650_v4 = vld [vmem:[%s8394_s1 + $0x50] sm:$0xff]  }
  0x3d   : > { %1471 = vperm.xlu0 %4872, %v333_v7   ;;  %v8611_v7 = vmov 0 }
  0x3e   : > { %4866 = vset.pattern.permute.xlu1 %v8401_v1  ;;  %v8612_v7 = vsel %vm5564_vm9, 4294967295, %v8611_v7 }
  0x3f   : > { %419 = vperm.xlu1 %4866, %v335_v21   ;;  %8613 = vst [vmem:[#allocation5_spill] sm:$0xff] %v8612_v7 }
  0x41   : > { %1487 = vperm.xlu0 %4872, %v337_v12  }
  0x43   : > { %4867 = vset.pattern.permute.xlu1 %v5387_v0 }
  0x44   : > { %1479 = vperm.xlu1 %4867, %v335_v21  }
  0x45   : > { %1503 = vperm.xlu0 %4872, %v341_v19  }
  0x48   : > { %1483 = vperm.xlu1 %4867, %v336_v11  }
  0x4c   : > { %4868 = vset.pattern.permute.xlu1 %v8401_v1 }
  0x4d   : > { %434 = vperm.xlu1 %4868, %v338_v22  }
  0x51   : > { %4869 = vset.pattern.permute.xlu1 %v5387_v0 }
  0x52   : > { %1491 = vperm.xlu1 %4869, %v338_v22  }
  0x56   : > { %4870 = vset.pattern.permute.xlu1 %v8401_v1 }
  0x57   : > { %439 = vperm.xlu1 %4870, %v339_v26  }
  0x5b   : > { %4871 = vset.pattern.permute.xlu1 %v5387_v0 }
  0x5c   : > { %1495 = vperm.xlu1 %4871, %v339_v26   ;;  %v8617_v26 = vmov 0 }
  0x5d   : > { %v8618_v26 = vsel %vm5578_vm11, 4294967295, %v8617_v26 }
  0x5e   : > { %8619 = vst [vmem:[#allocation7_spill] sm:$0xff] %v8618_v26 }
  0x60   : > { %1499 = vperm.xlu1 %4871, %v340_v17  }
  0x64   : > { %4873 = vset.pattern.permute.xlu1 %v8401_v1 }
  0x65   : > { %454 = vperm.xlu1 %4873, %v342_v27  }
  0x69   : > { %4874 = vset.pattern.permute.xlu1 %v5387_v0 }
  0x6a   : > { %1507 = vperm.xlu1 %4874, %v342_v27  }
  0x93   : > { %v1448_v61 = vpop.permute.xlu1 %1447  ;;  %v380_v62 = vpop.permute.xlu0 %379 }
  0x94   : > { %v1521_v63 = vadd.f32 %v5549_v56, %v1448_v61  ;;  %v468_v0 = vadd.f32 %v5543_v54, %v380_v62  ;;  %v469_v2 = vadd.f32 %v5546_v55, %v380_v62  ;;  %v1522_v3 = vadd.f32 %v5553_v60, %v1448_v61  ;;  %v4882_v61 = vld [vmem:[%s8394_s1] sm:$0xff]  }
  0x95   : > { %v1007_v62 = vsel %vm8443_vm8, %v4882_v61, 1065369472 }
  0x96   : > { %v500_v6 = vmul.f32 0.2, %v468_v0  ;;  %v1553_v9 = vmul.f32 0.2, %v1521_v63  ;;  %v501_v10 = vmul.f32 0.2, %v469_v2  ;;  %4535 = vmatpush3.bf16.msra.mxu0 %v1007_v62 }
  0x97   : > { %v1452_v11 = vpop.permute.xlu1 %1451  ;;  %v385_v12 = vpop.permute.xlu0 %384  ;;  %v1554_v22 = vmul.f32 0.2, %v1522_v3 }
  0x98   : > { %v1523_v17 = vadd.f32 %v5549_v56, %v1452_v11  ;;  %v1524_v19 = vadd.f32 %v5553_v60, %v1452_v11  ;;  %v470_v20 = vadd.f32 %v5543_v54, %v385_v12  ;;  %v471_v21 = vadd.f32 %v5546_v55, %v385_v12  ;;  %v5661_v11 = vld [vmem:[%s8394_s1 + $0x58] sm:$0xff]  }
  0x99   : > { %v532_v23 = vmax.f32 %v468_v0, %v500_v6  ;;  %v533_v24 = vmax.f32 %v469_v2, %v501_v10  ;;  %v1585_v41 = vmax.f32 %v1521_v63, %v1553_v9  ;;  %v1586_v45 = vmax.f32 %v1522_v3, %v1554_v22  ;;  %v5633_v63 = vld [vmem:[%s8394_s1 + $0x48] sm:$0xff]   ;;  %v5645_v3 = vld [vmem:[%s8394_s1 + $0x10] sm:$0xff]  }
  0x9a   : > { %v1555_v27 = vmul.f32 0.2, %v1523_v17  ;;  %v1556_v28 = vmul.f32 0.2, %v1524_v19  ;;  %v502_v29 = vmul.f32 0.2, %v470_v20  ;;  %v578_v22 = vunpack.c.3.s8 %v5522_v37 }
  0x9b   : > { %v503_v32 = vmul.f32 0.2, %v471_v21  ;;  %v5584_v33 = vsel %vm5564_vm9, %v532_v23, -1e+30  ;;  %v5588_v35 = vsel %vm5568_vm10, %v533_v24, -1e+30  ;;  %v579_v23 = vunpack.c.3.s8 %v5525_v38  ;;  %v390_v62 = vpop.permute.xlu0 %389 }
  0x9c   : > { %v764_v36 = vmax.f32 %v5584_v33, %v5588_v35  ;;  %v534_v39 = vmax.f32 %v470_v20, %v502_v29  ;;  %v1587_v43 = vmax.f32 %v1523_v17, %v1555_v27  ;;  %v1588_v44 = vmax.f32 %v1524_v19, %v1556_v28  ;;  %v5638_v0 = vld [vmem:[%s8394_s1 + $0x8] sm:$0xff]   ;;  %v5675_v17 = vld [vmem:[%s8394_s1 + $0x60] sm:$0xff]  }
  0x9d   : > { %v535_v42 = vmax.f32 %v471_v21, %v503_v32  ;;  %v5618_v57 = vsel %vm5564_vm9, %v1585_v41, -1e+30  ;;  %v5622_v58 = vsel %vm5568_vm10, %v1586_v45, -1e+30  ;;  %v1034_v2 = vsel %vm8443_vm8, %v5633_v63, 1065369472 }
  0x9e   : > { %765 = vmax.xlane.f32.xlu0 %v764_v36  ;;  %v5598_v46 = vsel %vm5578_vm11, %v534_v39, -1e+30  ;;  %v5606_v48 = vsel %vm5578_vm11, %v1587_v43, -1e+30  ;;  %v5610_v51 = vsel %vm5592_vm12, %v1588_v44, -1e+30  ;;  %v1649_v59 = vmax.f32 %v5618_v57, %v5622_v58  ;;  %4536 = vmatprep.subr.bf16.mxu0 %v1034_v2 }
  0x9f   : > { %v5602_v47 = vsel %vm5592_vm12, %v535_v42, -1e+30  ;;  %v1652_v53 = vmax.f32 %v5606_v48, %v5610_v51  ;;  %v1010_v6 = vsel %vm8443_vm8, %v5638_v0, 1065369472  ;;  %v1037_v9 = vsel %vm8443_vm8, %v5650_v4, 1065369472 }
  0xa0   : > { %v767_v52 = vmax.f32 %v5598_v46, %v5602_v47  ;;  %4537 = vmatpush3.bf16.msra.mxu0 %v1010_v6  ;;  %v1013_v10 = vsel %vm8443_vm8, %v5645_v3, 1065369472  ;;  %v1040_v12 = vsel %vm8443_vm8, %v5661_v11, 1065369472  ;;  %v5680_v19 = vld [vmem:[%s8394_s1 + $0x20] sm:$0xff]   ;;  %v5694_v24 = vld [vmem:[%s8394_s1 + $0x68] sm:$0xff]   ;;  %v577_v27 = vunpack.c.2.s8 %v5525_v38 }
  0xa1   : > { %4538 = vmatprep.subr.bf16.mxu0 %v1037_v9  ;;  %v1043_v20 = vsel %vm8443_vm8, %v5675_v17, 1065369472  ;;  %v1019_v21 = vsel %vm8443_vm8, %v5680_v19, 1065369472  ;;  %v5701_v28 = vld [vmem:[%s8394_s1 + $0x28] sm:$0xff]   ;;  %v610_v36 = vpack.c.b16 %v579_v23, %v578_v22  ;;  %v5715_v39 = vld [vmem:[%s8394_s1 + $0x30] sm:$0xff]  }
  0xa2   : > { %768 = vmax.xlane.f32.xlu1 %v767_v52  ;;  %1653 = vmax.xlane.f32.xlu0 %v1652_v53  ;;  %v1046_v29 = vsel %vm8443_vm8, %v5694_v24, 1065369472  ;;  %v1022_v32 = vsel %vm8443_vm8, %v5701_v28, 1065369472  ;;  %v5720_v41 = vld [vmem:[%s8394_s1 + $0x78] sm:$0xff]  }
  0xa3   : > { %v5727_v43 = vld [vmem:[%s8394_s1 + $0x38] sm:$0xff]   ;;  %v611_v44 = vpack.c.b8 %v610_v36, %v610_v36  ;;  %v1025_v52 = vsel %vm8443_vm8, %v5715_v39, 1065369472  ;;  %v1052_v53 = vsel %vm8443_vm8, %v5720_v41, 1065369472 }
  0xa4   : > { %4539 = vmatpush3.bf16.msra.mxu0 %v1013_v10  ;;  %v472_v10 = vadd.f32 %v5543_v54, %v390_v62 }
  0xa5   : > { %4540 = vmatprep.subr.bf16.mxu0 %v1040_v12  ;;  %vm639_vm13 = vnez %v611_v44  ;;  %v473_v12 = vadd.f32 %v5546_v55, %v390_v62 }
  0xa6   : > { %1650 = vmax.xlane.f32.xlu1 %v1649_v59  ;;  %v395_v59 = vpop.permute.xlu1 %394  ;;  %v655_v9 = vsel %vm639_vm13, 16843009, %v8401_v1 }
  0xa7   : > { %v474_v2 = vadd.f32 %v5543_v54, %v395_v59  ;;  %v475_v6 = vadd.f32 %v5546_v55, %v395_v59  ;;  %v505_v36 = vmul.f32 0.2, %v473_v12  ;;  %v8626_v59 = vmov 0 }
  0xa8   : > { %4541 = vmatpush3.bf16.msra.mxu0 %v1016_v16 }
  0xa9   : > { %4542 = vmatprep.subr.bf16.mxu0 %v1043_v20  ;;  %v507_v22 = vmul.f32 0.2, %v475_v6 }
  0xaa   : > { %v1460_v16 = vpop.permute.xlu1 %1459 }
  0xab   : > { %v1527_v23 = vadd.f32 %v5549_v56, %v1460_v16 }
  0xac   : > { %4543 = vmatpush3.bf16.msra.mxu0 %v1019_v21  ;;  %v506_v21 = vmul.f32 0.2, %v474_v2 }
  0xad   : > { %4544 = vmatprep.subr.bf16.mxu0 %v1046_v29  ;;  %v675_v29 = vunpack.c.1.s8 %v655_v9 }
  0xaf   : > { %vm5747_vm0 = vcmp.ne.s32.totalorder %v675_v29, 0 }
  0xb0   : > { %4545 = vmatpush3.bf16.msra.mxu0 %v1022_v32  ;;  %v504_v32 = vmul.f32 0.2, %v472_v10  ;;  %v8627_v59 = vsel %vm5747_vm0, 4294967295, %v8626_v59 }
  0xb1   : > { %8628 = vst [vmem:[#allocation10_spill] sm:$0xff] %v8627_v59 }
  0xb2   : > { %v536_v62 = vmax.f32 %v472_v10, %v504_v32  ;;  %v400_v32 = vpop.permute.xlu1 %399 }
  0xb7   : > { %1825 = vrot.lane.b32.xlu1 %v5562_v5, %s5389_s19  ;;  %v576_v5 = vunpack.c.2.s8 %v5522_v37  ;;  %v5710_v37 = vld [vmem:[%s8394_s1 + $0x70] sm:$0xff]  }
  0xb8   : > { %1809 = vrot.lane.b32.xlu0 %v4882_v61, %s5389_s19  ;;  %v1049_v42 = vsel %vm8443_vm8, %v5710_v37, 1065369472  ;;  %v1028_v61 = vsel %vm8443_vm8, %v5727_v43, 1065369472 }
  0xb9   : > { %v608_v38 = vpack.c.b16 %v577_v27, %v576_v5  ;;  %4546 = vmatprep.subr.bf16.mxu0 %v1049_v42  ;;  %v1528_v5 = vadd.f32 %v5553_v60, %v1460_v16  ;;  %v674_v27 = vunpack.c.0.s8 %v655_v9  ;;  %v1559_v42 = vmul.f32 0.2, %v1527_v23 }
  0xba   : > { %4547 = vmatpush3.bf16.msra.mxu0 %v1025_v52  ;;  %v539_v52 = vmax.f32 %v475_v6, %v507_v22  ;;  %v537_v16 = vmax.f32 %v473_v12, %v505_v36  ;;  %v8629_v9 = vmov 0  ;;  %v8632_v22 = vmov 0  ;;  %v5789_v36 = vpop.permute.xlu0 %404 }
  0xbb   : > { %v609_v45 = vpack.c.b8 %v608_v38, %v608_v38  ;;  %4548 = vmatprep.subr.bf16.mxu0 %v1052_v53  ;;  %v1560_v44 = vmul.f32 0.2, %v1528_v5  ;;  %vm5743_vm15 = vcmp.ne.s32.totalorder %v674_v27, 0  ;;  %v8623_v53 = vmov 0 }
  0xbc   : > { %v8624_v53 = vsel %vm5743_vm15, 4294967295, %v8623_v53  ;;  %v1591_v6 = vmax.f32 %v1527_v23, %v1559_v42 }
  0xbd   : > { %vm638_vm14 = vnez %v609_v45  ;;  %v538_v45 = vmax.f32 %v474_v2, %v506_v21  ;;  %8625 = vst [vmem:[#allocation9_spill] sm:$0xff] %v8624_v53  ;;  %v5761_v2 = vsel %vm5747_vm0, %v539_v52, -1e+30  ;;  %v1592_v21 = vmax.f32 %v1528_v5, %v1560_v44 }
  0xbe   : > { %4549 = vmatpush3.bf16.msra.mxu0 %v1028_v61  ;;  %v654_v20 = vsel %vm638_vm14, 16843009, %v8401_v1  ;;  %v5779_v27 = vsel %vm5743_vm15, %v1591_v6, -1e+30  ;;  %v5793_v42 = vpop.permute.xlu0 %409  ;;  %v8639_v53 = vmov 0  }
  0xbf   : > { %v672_v38 = vunpack.c.0.s8 %v654_v20  ;;  %v673_v61 = vunpack.c.1.s8 %v654_v20  ;;  %v5757_v1 = vsel %vm5743_vm15, %v538_v45, -1e+30  ;;  %8635 = vst [vmem:[#allocation13_spill] sm:$0xff] %v5779_v27  ;;  %v5783_v23 = vsel %vm5747_vm0, %v1592_v21, -1e+30 }
  0xc0   : > { %v773_v10 = vmax.f32 %v5757_v1, %v5761_v2  ;;  %8636 = vst [vmem:[#allocation14_spill] sm:$0xff] %v5783_v23  ;;  %v1658_v29 = vmax.f32 %v5779_v27, %v5783_v23  ;;  %v8643_v23 = vmov 0 }
  0xc1   : > { %vm5751_vm1 = vcmp.ne.s32.totalorder %v672_v38, 0  ;;  %vm5763_vm2 = vcmp.ne.s32.totalorder %v673_v61, 0  ;;  %v5791_v38 = vpop.permute.xlu1 %1463 }
  0xc2   : > { %v8630_v9 = vsel %vm5751_vm1, 4294967295, %v8629_v9  ;;  %v8633_v22 = vsel %vm5763_vm2, 4294967295, %v8632_v22  ;;  %v5771_v12 = vsel %vm5751_vm1, %v536_v62, -1e+30  ;;  %v5775_v20 = vsel %vm5763_vm2, %v537_v16, -1e+30  ;;  %v5797_v45 = vpop.permute.xlu0 %424 }
  0xc3   : > { %8631 = vst [vmem:[#allocation11_spill] sm:$0xff] %v8630_v9  ;;  %8634 = vst [vmem:[#allocation12_spill] sm:$0xff] %v8633_v22  ;;  %v770_v5 = vmax.f32 %v5771_v12, %v5775_v20  ;;  %v580_v62 = vunpack.c.0.s8 %v5475_v13  ;;  %v581_v16 = vunpack.c.0.s8 %v5478_v14 }
  0xc5   : > { %v5795_v44 = vpop.permute.xlu1 %1467  ;;  %v612_v21 = vpack.c.b16 %v581_v16, %v580_v62 }
  0xc6   : > { %v5807_v61 = vpop.permute.xlu0 %429 }
  0xc9   : > { %v5801_v52 = vpop.permute.xlu1 %414 }
  0xcd   : > { %v5811_v6 = vpop.permute.xlu1 %1475 }
  0xd7   : > { %774 = vmax.xlane.f32.xlu0 %v773_v10  ;;  %v5813_v10 = vpop.permute.xlu0 %444 }
  0xd8   : > { %8637 = vst [vmem:[#allocation15_spill] sm:$0xff] %v5813_v10 }
  0xdb   : > { %771 = vmax.xlane.f32.xlu1 %v770_v5  ;;  %1659 = vmax.xlane.f32.xlu0 %v1658_v29  ;;  %v613_v5 = vpack.c.b8 %v612_v21, %v612_v21  ;;  %v5817_v29 = vpop.permute.xlu0 %449 }
  0xdc   : > { %8638 = vst [vmem:[#allocation16_spill] sm:$0xff] %v5817_v29 }
  0xdd   : > { %vm640_vm3 = vnez %v613_v5 }
  0xde   : > { %v656_v8 = vsel %vm640_vm3, 16843009, %v8639_v53 }
  0xdf   : > { %v1456_v7 = vpop.permute.xlu0 %1455  ;;  %v676_v50 = vunpack.c.0.s8 %v656_v8  ;;  %v677_v21 = vunpack.c.1.s8 %v656_v8 }
  0xe0   : > { %v1525_v62 = vadd.f32 %v5549_v56, %v1456_v7  ;;  %v1526_v16 = vadd.f32 %v5553_v60, %v1456_v7 }
  0xe1   : > { %vm5828_vm4 = vcmp.ne.s32.totalorder %v676_v50, 0  ;;  %vm5832_vm5 = vcmp.ne.s32.totalorder %v677_v21, 0 }
  0xe2   : > { %v1557_v5 = vmul.f32 0.2, %v1525_v62  ;;  %v1558_v29 = vmul.f32 0.2, %v1526_v16  ;;  %v8644_v23 = vsel %vm5832_vm5, 4294967295, %v8643_v23 }
  0xe3   : > { %8645 = vst [vmem:[#allocation18_spill] sm:$0xff] %v8644_v23 }
  0xec   : > { %1827 = vrot.lane.b32.xlu1 %v5633_v63, %s5389_s19  ;;  %v5815_v63 = vpop.permute.xlu1 %419 }
  0xf0   : > { %1811 = vrot.lane.b32.xlu1 %v5638_v0, %s5389_s19  ;;  %v476_v0 = vadd.f32 %v5543_v54, %v400_v32  ;;  %v5821_v59 = vpop.permute.xlu1 %1479 }
  0xf1   : > { %1813 = vrot.lane.b32.xlu0 %v5645_v3, %s5389_s19  ;;  %v477_v3 = vadd.f32 %v5546_v55, %v400_v32  ;;  %v8640_v32 = vmov 0 }
  0xf2   : > { %v508_v40 = vmul.f32 0.2, %v476_v0  ;;  %v8641_v32 = vsel %vm5828_vm4, 4294967295, %v8640_v32 }
  0xf3   : > { %v509_v26 = vmul.f32 0.2, %v477_v3  ;;  %8642 = vst [vmem:[#allocation17_spill] sm:$0xff] %v8641_v32 }
  0xf4   : > { %v5826_v49 = vpop.permute.xlu1 %1483  ;;  %v540_v10 = vmax.f32 %v476_v0, %v508_v40  ;;  %v1589_v40 = vmax.f32 %v1525_v62, %v1557_v5  ;;  %v5864_v62 = vpop.permute.xlu0 %1471 }
  0xf5   : > { %v541_v27 = vmax.f32 %v477_v3, %v509_v26  ;;  %v1590_v26 = vmax.f32 %v1526_v16, %v1558_v29 }
  0xf6   : > { %v5840_v7 = vsel %vm5828_vm4, %v540_v10, -1e+30  ;;  %v5852_v3 = vsel %vm5751_vm1, %v1589_v40, -1e+30 }
  0xf7   : > { %v5844_v8 = vsel %vm5832_vm5, %v541_v27, -1e+30  ;;  %8647 = vst [vmem:[#allocation20_spill] sm:$0xff] %v5852_v3  ;;  %v5856_v21 = vsel %vm5763_vm2, %v1590_v26, -1e+30 }
  0xf8   : > { %v5836_v34 = vpop.permute.xlu1 %434  ;;  %v776_v50 = vmax.f32 %v5840_v7, %v5844_v8  ;;  %8648 = vst [vmem:[#allocation21_spill] sm:$0xff] %v5856_v21  ;;  %v1655_v27 = vmax.f32 %v5852_v3, %v5856_v21  ;;  %v5868_v5 = vpop.permute.xlu0 %1487 }
  0xfc   : > { %v5848_v0 = vpop.permute.xlu1 %1491  ;;  %v5876_v26 = vpop.permute.xlu0 %1503 }
  0xfd   : > { %8646 = vst [vmem:[#allocation19_spill] sm:$0xff] %v5848_v0  ;;  %8653 = vst [vmem:[#allocation26_spill] sm:$0xff] %v5876_v26 }
 0x100   : > { %v5860_v10 = vpop.permute.xlu1 %439 }
 0x101   : > { %8649 = vst [vmem:[#allocation22_spill] sm:$0xff] %v5860_v10 }
 0x104   : > { %v5862_v29 = vpop.permute.xlu1 %1495 }
 0x105   : > { %8650 = vst [vmem:[#allocation23_spill] sm:$0xff] %v5862_v29 }
 0x108   : > { %v5866_v16 = vpop.permute.xlu1 %1499 }
 0x109   : > { %8651 = vst [vmem:[#allocation24_spill] sm:$0xff] %v5866_v16 }
 0x10c   : > { %v5870_v40 = vpop.permute.xlu1 %454 }
 0x10d   : > { %8652 = vst [vmem:[#allocation25_spill] sm:$0xff] %v5870_v40 }
 0x110   : > { %777 = vmax.xlane.f32.xlu0 %v776_v50  ;;  %v582_v50 = vunpack.c.1.s8 %v5475_v13  ;;  %v5880_v22 = vpop.permute.xlu1 %1507 }
 0x111   : > { %8654 = vst [vmem:[#allocation27_spill] sm:$0xff] %v5880_v22 }
 0x114   : > { %1656 = vmax.xlane.f32.xlu1 %v1655_v27  ;;  %v583_v27 = vunpack.c.1.s8 %v5478_v14  ;;  %v1529_v14 = vadd.f32 %v5549_v56, %v5791_v38 }
 0x116   : > { %v614_v29 = vpack.c.b16 %v583_v27, %v582_v50  ;;  %v1530_v50 = vadd.f32 %v5553_v60, %v5791_v38 }
 0x118   : > { %v615_v0 = vpack.c.b8 %v614_v29, %v614_v29 }
 0x11a   : > { %vm5896_vm6 = vnez %v615_v0 }
 0x125   : > { %1829 = vrot.lane.b32.xlu1 %v5650_v4, %s5389_s19 }
 0x126   : > { %1831 = vrot.lane.b32.xlu0 %v5661_v11, %s5389_s19 }
 0x12b   : > { %v766_v9 = vpop.xlane.xlu0 %765 }
 0x12c   : > { %v812_v16 = vmax.f32 %v766_v9, 0.0 }
 0x12e   : > { %v828_v4 = vsub.f32 %v5584_v33, %v812_v16  ;;  %v829_v11 = vsub.f32 %v5588_v35, %v812_v16  ;;  %v478_v33 = vadd.f32 %v5543_v54, %v5789_v36 }
 0x12f   : > { %v769_v3 = vpop.xlane.xlu1 %768  ;;  %v1654_v21 = vpop.xlane.xlu0 %1653 }
 0x130   : > { %v813_v40 = vmax.f32 %v769_v3, 0.0  ;;  %v1698_v10 = vmax.f32 %v1654_v21, 0.0 }
 0x132   : > { %v830_v26 = vsub.f32 %v5598_v46, %v813_v40  ;;  %v831_v13 = vsub.f32 %v5602_v47, %v813_v40  ;;  %v5893_v35 = vsub.f32 %v5606_v48, %v1698_v10  ;;  %v1716_v46 = vsub.f32 %v5610_v51, %v1698_v10 }
 0x133   : > { %v1651_v9 = vpop.xlane.xlu1 %1650  ;;  %v1810_v21 = vpop.permute.xlu0 %1809  ;;  %v8657_v47 = vmov 0 }
 0x134   : > { %v860_v27 = vpack.c.bf16 %v830_v26, %v828_v4  ;;  %v1697_v22 = vmax.f32 %v1651_v9, 0.0  ;;  %v861_v3 = vpack.c.bf16 %v831_v13, %v829_v11  ;;  %v479_v26 = vadd.f32 %v5546_v55, %v5789_v36 }
 0x135   : > { %v1561_v4 = vmul.f32 0.2, %v1529_v14  ;;  %v1562_v11 = vmul.f32 0.2, %v1530_v50  ;;  %v1842_v13 = vsel %vm8443_vm8, %v1810_v21, 1065369472 }
 0x136   : > { %v877_v29 = vmul.bf16 1069105081, %v860_v27  ;;  %v5901_v38 = vsub.f32 %v5618_v57, %v1697_v22  ;;  %v1714_v16 = vsub.f32 %v5622_v58, %v1697_v22  ;;  %v880_v40 = vmul.bf16 1069105081, %v861_v3 }
 0x137   : > { %v1826_v48 = vpop.permute.xlu1 %1825  ;;  %v657_v58 = vsel %vm5896_vm6, 16843009, %v8639_v53  ;;  %v510_v22 = vmul.f32 0.2, %v478_v33  ;;  %v511_v36 = vmul.f32 0.2, %v479_v26  ;;  %v1593_v9 = vmax.f32 %v1529_v14, %v1561_v4 }
 0x138   : > { %4897 = vpow.bf16 %v877_v29  ;;  %v1866_v0 = vsel %vm8443_vm8, %v1826_v48, 1065369472  ;;  %v1746_v10 = vpack.c.bf16 %v1716_v46, %v1714_v16  ;;  %v1594_v27 = vmax.f32 %v1530_v50, %v1562_v11 }
 0x139   : > { %4598 = vmatprep.subr.bf16.mxu1 %v1866_v0  ;;  %4899 = vpow.bf16 %v880_v40  ;;  %v678_v3 = vunpack.c.0.s8 %v657_v58  ;;  %v679_v21 = vunpack.c.1.s8 %v657_v58  ;;  %v5915_v29 = vsel %vm5828_vm4, %v1593_v9, -1e+30 }
 0x13a   : > { %v1765_v57 = vmul.bf16 1069105081, %v1746_v10  ;;  %4599 = vmatpush3.bf16.msra.mxu1 %v1842_v13  ;;  %v5919_v46 = vsel %vm5832_vm5, %v1594_v27, -1e+30  ;;  %v542_v16 = vmax.f32 %v478_v33, %v510_v22  ;;  %v543_v40 = vmax.f32 %v479_v26, %v511_v36 }
 0x13b   : > { %vm5921_vm7 = vcmp.ne.s32.totalorder %v678_v3, 0  ;;  %vm5925_vm13 = vcmp.ne.s32.totalorder %v679_v21, 0  ;;  %v8660_v14 = vmov 0  ;;  %v1661_v4 = vmax.f32 %v5915_v29, %v5919_v46 }
 0x13c   : > { %4901 = vpow.bf16 %v1765_v57  ;;  %v8658_v47 = vsel %vm5921_vm7, 4294967295, %v8657_v47  ;;  %v8661_v14 = vsel %vm5925_vm13, 4294967295, %v8660_v14  ;;  %v5933_v48 = vsel %vm5921_vm7, %v542_v16, -1e+30 }
 0x13d   : > { %8659 = vst [vmem:[#allocation28_spill] sm:$0xff] %v8658_v47  ;;  %8662 = vst [vmem:[#allocation29_spill] sm:$0xff] %v8661_v14  ;;  %v5937_v33 = vsel %vm5925_vm13, %v543_v40, -1e+30  ;;  %v619_v0 = vpack.c.b8 %v5498_v25, %v5498_v25  ;;  %v482_v58 = vadd.f32 %v5543_v54, %v5801_v52  ;;  %v483_v36 = vadd.f32 %v5546_v55, %v5801_v52 }
 0x13e   : > { %v779_v26 = vmax.f32 %v5933_v48, %v5937_v33  ;;  %v1531_v21 = vadd.f32 %v5549_v56, %v5795_v44  ;;  %v1532_v16 = vadd.f32 %v5553_v60, %v5795_v44  ;;  %v8460_v47 = vmov 2  }
 0x13f   : > { %vm643_vm14 = vnez %v619_v0  ;;  %v514_v40 = vmul.f32 0.2, %v482_v58  ;;  %v515_v52 = vmul.f32 0.2, %v483_v36  ;;  %4875 = vset.pattern.permute.xlu0 %v8460_v47 }
 0x140   : > { %v659_v27 = vsel %vm643_vm14, 16843009, %v8639_v53  ;;  %v1563_v0 = vmul.f32 0.2, %v1531_v21 }
 0x141   : > { %v547_v44 = vmax.f32 %v483_v36, %v515_v52 }
 0x143   : > { %v4898_v50 = vpop.eup %4897 }
 0x144   : > { %v4900_v11 = vpop.eup %4899 }
 0x145   : > { %1086 = vmatprep.mubr.bf16.mxu0 %v4900_v11  ;;  %1662 = vmax.xlane.f32.xlu0 %v1661_v4 }
 0x146   : > { %1087 = vmatmul.mubr.bf16.vlgmr.msra.gmra.mrb[0].mxu0 %v4898_v50 }
 0x147   : > { %v4902_v13 = vpop.eup %4901 }
 0x148   : > { %1921 = vmatprep.mubr.bf16.mxu1 %v4902_v13 }
 0x149   : > { %780 = vmax.xlane.f32.xlu1 %v779_v26 }
 0x15a   : > { %1815 = vrot.lane.b32.xlu1 %v5668_v15, %s5389_s19 }
 0x15b   : > { %1833 = vrot.lane.b32.xlu0 %v5675_v17, %s5389_s19 }
 0x164   : > { %v775_v10 = vpop.xlane.xlu0 %774 }
 0x165   : > { %v815_v57 = vmax.f32 %v775_v10, 0.0 }
 0x167   : > { %v834_v15 = vsub.f32 %v5757_v1, %v815_v57  ;;  %v835_v17 = vsub.f32 %v5761_v2, %v815_v57  ;;  %v682_v1 = vunpack.c.0.s8 %v659_v27  ;;  %v683_v2 = vunpack.c.1.s8 %v659_v27 }
 0x168   : > { %v772_v22 = vpop.xlane.xlu1 %771 }
 0x169   : > { %v814_v9 = vmax.f32 %v772_v22, 0.0  ;;  %v546_v22 = vmax.f32 %v482_v58, %v514_v40  ;;  %vm5962_vm3 = vcmp.ne.s32.totalorder %v682_v1, 0  ;;  %vm5966_vm6 = vcmp.ne.s32.totalorder %v683_v2, 0 }
 0x16a   : > { %v1595_v58 = vmax.f32 %v1531_v21, %v1563_v0  ;;  %v8436_v21 = vmov 3   ;;  %v480_v2 = vadd.f32 %v5543_v54, %v5793_v42 }
 0x16b   : > { %v832_v3 = vsub.f32 %v5771_v12, %v814_v9  ;;  %v833_v25 = vsub.f32 %v5775_v20, %v814_v9  ;;  %v1564_v20 = vmul.f32 0.2, %v1532_v16  ;;  %v8663_v9 = vmov 0  ;;  %4876 = vset.pattern.permute.xlu1 %v8436_v21 }
 0x16c   : > { %v1828_v50 = vpop.permute.xlu1 %1827  ;;  %v8664_v9 = vsel %vm5962_vm3, 4294967295, %v8663_v9  ;;  %v5972_v27 = vsel %vm5962_vm3, %v546_v22, -1e+30  ;;  %v1533_v22 = vadd.f32 %v5549_v56, %v5864_v62 }
 0x16d   : > { %v862_v4 = vpack.c.bf16 %v834_v15, %v832_v3  ;;  %v863_v11 = vpack.c.bf16 %v835_v17, %v833_v25  ;;  %v1869_v26 = vsel %vm8443_vm8, %v1828_v50, 1065369472  ;;  %8665 = vst [vmem:[#allocation30_spill] sm:$0xff] %v8664_v9  ;;  %v8666_v15 = vmov 0 }
 0x16e   : > { %4600 = vmatprep.subr.bf16.mxu1 %v1869_v26  ;;  %v8667_v15 = vsel %vm5966_vm6, 4294967295, %v8666_v15  ;;  %v5976_v17 = vsel %vm5966_vm6, %v547_v44, -1e+30  ;;  %v1596_v36 = vmax.f32 %v1532_v16, %v1564_v20  ;;  %v5982_v25 = vsel %vm5921_vm7, %v1595_v58, -1e+30  ;;  %v5997_v16 = vpop.xlane.xlu0 %1659 }
 0x16f   : > { %v883_v13 = vmul.bf16 1069105081, %v862_v4  ;;  %v886_v12 = vmul.bf16 1069105081, %v863_v11  ;;  %8668 = vst [vmem:[#allocation31_spill] sm:$0xff] %v8667_v15  ;;  %v785_v3 = vmax.f32 %v5972_v27, %v5976_v17  ;;  %v617_v11 = vpack.c.b8 %v5484_v18, %v5484_v18 }
 0x170   : > { %v1812_v10 = vpop.permute.xlu1 %1811  ;;  %v5986_v40 = vsel %vm5925_vm13, %v1596_v36, -1e+30  ;;  %v1536_v18 = vadd.f32 %v5553_v60, %v5811_v6  ;;  %v512_v20 = vmul.f32 0.2, %v480_v2  ;;  %v1534_v58 = vadd.f32 %v5553_v60, %v5864_v62 }
 0x171   : > { %4903 = vpow.bf16 %v883_v13  ;;  %v1845_v57 = vsel %vm8443_vm8, %v1812_v10, 1065369472  ;;  %v1664_v52 = vmax.f32 %v5982_v25, %v5986_v40  ;;  %vm642_vm14 = vnez %v617_v11 }
 0x172   : > { %4905 = vpow.bf16 %v886_v12  ;;  %4601 = vmatpush3.bf16.msra.mxu1 %v1845_v57  ;;  %v1814_v26 = vpop.permute.xlu0 %1813  ;;  %v8669_v11 = vmov 0  ;;  %v1566_v51 = vmul.f32 0.2, %v1534_v58 }
 0x17a   : > { %786 = vmax.xlane.f32.xlu0 %v785_v3 }
 0x17c   : > { %v4904_v50 = vpop.eup %4903 }
 0x17d   : > { %v4906_v4 = vpop.eup %4905 }
 0x17e   : > { %1094 = vmatprep.mubr.bf16.mxu0 %v4906_v4  ;;  %1665 = vmax.xlane.f32.xlu1 %v1664_v52  ;;  %v1565_v52 = vmul.f32 0.2, %v1533_v22  ;;  %v544_v4 = vmax.f32 %v480_v2, %v512_v20 }
 0x17f   : > { %1095 = vmatmul.mubr.bf16.gmra.mrb[4].mxu0 %v4904_v50 }
 0x180   : > { %v1597_v2 = vmax.f32 %v1533_v22, %v1565_v52  ;;  %v593_v52 = vunpack.c.2.s8 %v5513_v31 }
 0x18f   : > { %1817 = vrot.lane.b32.xlu1 %v5680_v19, %s5389_s19  ;;  %v481_v19 = vadd.f32 %v5546_v55, %v5793_v42  ;;  %v1568_v42 = vmul.f32 0.2, %v1536_v18 }
 0x190   : > { %1835 = vrot.lane.b32.xlu0 %v5694_v24, %s5389_s19  ;;  %v1535_v24 = vadd.f32 %v5549_v56, %v5811_v6  ;;  %v1848_v6 = vsel %vm8443_vm8, %v1814_v26, 1065369472 }
 0x191   : > { %v513_v10 = vmul.f32 0.2, %v481_v19  ;;  %v1600_v62 = vmax.f32 %v1536_v18, %v1568_v42  ;;  %v1598_v18 = vmax.f32 %v1534_v58, %v1566_v51  ;;  %v590_v51 = vunpack.c.1.s8 %v5510_v30 }
 0x192   : > { %v1567_v57 = vmul.f32 0.2, %v1535_v24  ;;  %v589_v42 = vunpack.c.0.s8 %v5513_v31 }
 0x193   : > { %v545_v21 = vmax.f32 %v481_v19, %v513_v10 }
 0x194   : > { %1819 = vrot.lane.b32.xlu0 %v5701_v28, %s5389_s19  ;;  %v658_v28 = vsel %vm642_vm14, 16843009, %v8639_v53  ;;  %v1599_v14 = vmax.f32 %v1535_v24, %v1567_v57  ;;  %v6044_v24 = vsel %vm5966_vm6, %v1600_v62, -1e+30  ;;  %v591_v57 = vunpack.c.1.s8 %v5513_v31 }
 0x195   : > { %v680_v0 = vunpack.c.0.s8 %v658_v28  ;;  %v681_v50 = vunpack.c.1.s8 %v658_v28  ;;  %v487_v62 = vadd.f32 %v5546_v55, %v5797_v45 }
 0x196   : > { %v6040_v19 = vsel %vm5962_vm3, %v1599_v14, -1e+30  ;;  %v622_v22 = vpack.c.b16 %v591_v57, %v590_v51 }
 0x197   : > { %vm6021_vm14 = vcmp.ne.s32.totalorder %v680_v0, 0  ;;  %vm6026_vm13 = vcmp.ne.s32.totalorder %v681_v50, 0  ;;  %v1670_v20 = vmax.f32 %v6040_v19, %v6044_v24  ;;  %v592_v50 = vunpack.c.2.s8 %v5510_v30 }
 0x198   : > { %v8670_v11 = vsel %vm6021_vm14, 4294967295, %v8669_v11  ;;  %v6032_v26 = vsel %vm6021_vm14, %v544_v4, -1e+30  ;;  %v6036_v28 = vsel %vm6026_vm13, %v545_v21, -1e+30  ;;  %v623_v58 = vpack.c.b8 %v622_v22, %v622_v22 }
 0x199   : > { %8671 = vst [vmem:[#allocation32_spill] sm:$0xff] %v8670_v11  ;;  %v782_v0 = vmax.f32 %v6032_v26, %v6036_v28  ;;  %v6052_v10 = vsel %vm6021_vm14, %v1597_v2, -1e+30  ;;  %v6056_v21 = vsel %vm6026_vm13, %v1598_v18, -1e+30 }
 0x19a   : > { %v1667_v14 = vmax.f32 %v6052_v10, %v6056_v21 }
 0x19d   : > { %v6001_v1 = vpop.xlane.xlu0 %777 }
 0x1a1   : > { %v6009_v13 = vpop.xlane.xlu1 %1656  ;;  %v1832_v12 = vpop.permute.xlu0 %1831 }
 0x1a2   : > { %v1875_v3 = vsel %vm8443_vm8, %v1832_v12, 1065369472  ;;  %v8672_v12 = vmov 0 }
 0x1a3   : > { %v8673_v12 = vsel %vm6026_vm13, 4294967295, %v8672_v12 }
 0x1a4   : > { %8674 = vst [vmem:[#allocation33_spill] sm:$0xff] %v8673_v12 }
 0x1a5   : > { %v1830_v44 = vpop.permute.xlu1 %1829 }
 0x1a6   : > { %v1872_v36 = vsel %vm8443_vm8, %v1830_v44, 1065369472  ;;  %v588_v44 = vunpack.c.0.s8 %v5510_v30  ;;  %vm645_vm8 = vnez %v623_v58  ;;  %v624_v30 = vpack.c.b16 %v593_v52, %v592_v50 }
 0x1a7   : > { %4602 = vmatprep.subr.bf16.mxu1 %v1872_v36  ;;  %v661_v4 = vsel %vm645_vm8, 16843009, %v8639_v53  ;;  %vm8677_vm8 = vcmask 130048  }
 0x1a8   : > { %4603 = vmatpush3.bf16.msra.mxu1 %v1848_v6  ;;  %v620_v36 = vpack.c.b16 %v589_v42, %v588_v44  ;;  %v519_v44 = vmul.f32 0.2, %v487_v62  ;;  %vm8678_vm3 = vmmov %vm8677_vm8 }
 0x1a9   : > { %4604 = vmatprep.subr.bf16.mxu1 %v1875_v3 }
 0x1aa   : > { %v621_v6 = vpack.c.b8 %v620_v36, %v620_v36  ;;  %v485_v36 = vadd.f32 %v5546_v55, %v5815_v63 }
 0x1ac   : > { %vm6078_vm6 = vnez %v621_v6 }
 0x1b3   : > { %783 = vmax.xlane.f32.xlu1 %v782_v0  ;;  %1671 = vmax.xlane.f32.xlu0 %v1670_v20  ;;  %v686_v20 = vunpack.c.0.s8 %v661_v4 }
 0x1b7   : > { %1668 = vmax.xlane.f32.xlu1 %v1667_v14  ;;  %v8682_v14 = vmov 0 }
 0x1c8   : > { %1821 = vrot.lane.b32.xlu1 %v5715_v39, %s5389_s19  ;;  %v816_v39 = vmax.f32 %v6001_v1, 0.0 }
 0x1c9   : > { %1837 = vrot.lane.b32.xlu0 %v5710_v37, %s5389_s19  ;;  %v486_v37 = vadd.f32 %v5543_v54, %v5797_v45  ;;  %v484_v45 = vadd.f32 %v5543_v54, %v5815_v63  ;;  %v1538_v63 = vadd.f32 %v5553_v60, %v5821_v59 }
 0x1ca   : > { %v836_v31 = vsub.f32 %v5840_v7, %v816_v39  ;;  %v837_v1 = vsub.f32 %v5844_v8, %v816_v39  ;;  %v687_v8 = vunpack.c.1.s8 %v661_v4  ;;  %v625_v39 = vpack.c.b8 %v624_v30, %v624_v30 }
 0x1cb   : > { %v518_v22 = vmul.f32 0.2, %v486_v37  ;;  %v516_v4 = vmul.f32 0.2, %v484_v45 }
 0x1d2   : > { %v6068_v3 = vpop.xlane.xlu0 %1662 }
 0x1d6   : > { %v781_v2 = vpop.xlane.xlu1 %780  ;;  %v1834_v0 = vpop.permute.xlu0 %1833 }
 0x1d7   : > { %v817_v18 = vmax.f32 %v781_v2, 0.0  ;;  %v1878_v58 = vsel %vm8677_vm8, %v1834_v0, 1065369472  ;;  %v1537_v2 = vadd.f32 %v5549_v56, %v5821_v59  ;;  %vm6099_vm8 = vcmp.ne.s32.totalorder %v686_v20, 0 }
 0x1d8   : > { %v8679_v0 = vmov 0  ;;  %v488_v59 = vadd.f32 %v5543_v54, %v5807_v61 }
 0x1d9   : > { %v838_v51 = vsub.f32 %v5933_v48, %v817_v18  ;;  %v839_v57 = vsub.f32 %v5937_v33, %v817_v18  ;;  %v660_v33 = vsel %vm6078_vm6, 16843009, %v8639_v53  ;;  %v550_v18 = vmax.f32 %v486_v37, %v518_v22 }
 0x1da   : > { %v1816_v42 = vpop.permute.xlu1 %1815  ;;  %v8680_v0 = vsel %vm6099_vm8, 4294967295, %v8679_v0  ;;  %v684_v30 = vunpack.c.0.s8 %v660_v33  ;;  %vm646_vm6 = vnez %v625_v39  ;;  %v489_v37 = vadd.f32 %v5546_v55, %v5807_v61 }
 0x1db   : > { %v864_v6 = vpack.c.bf16 %v838_v51, %v836_v31  ;;  %v865_v50 = vpack.c.bf16 %v839_v57, %v837_v1  ;;  %v1851_v7 = vsel %vm8678_vm3, %v1816_v42, 1065369472  ;;  %8681 = vst [vmem:[#allocation34_spill] sm:$0xff] %v8680_v0  ;;  %v517_v31 = vmul.f32 0.2, %v485_v36 }
 0x1dc   : > { %4605 = vmatpush3.bf16.msra.mxu1 %v1851_v7  ;;  %v551_v1 = vmax.f32 %v487_v62, %v519_v44  ;;  %vm6103_vm3 = vcmp.ne.s32.totalorder %v687_v8, 0  ;;  %v685_v51 = vunpack.c.1.s8 %v660_v33  ;;  %v1569_v20 = vmul.f32 0.2, %v1537_v2 }
 0x1dd   : > { %v889_v48 = vmul.bf16 1069105081, %v864_v6  ;;  %v892_v52 = vmul.bf16 1069105081, %v865_v50  ;;  %4606 = vmatprep.subr.bf16.mxu1 %v1878_v58  ;;  %v8683_v14 = vsel %vm6103_vm3, 4294967295, %v8682_v14  ;;  %v548_v44 = vmax.f32 %v484_v45, %v516_v4 }
 0x1de   : > { %8684 = vst [vmem:[#allocation35_spill] sm:$0xff] %v8683_v14  ;;  %v1570_v57 = vmul.f32 0.2, %v1538_v63  ;;  %v6113_v22 = vsel %vm6099_vm8, %v550_v18, -1e+30  ;;  %v549_v42 = vmax.f32 %v485_v36, %v517_v31  ;;  %vm6119_vm13 = vcmp.ne.s32.totalorder %v684_v30, 0 }
 0x1df   : > { %4907 = vpow.bf16 %v889_v48  ;;  %v6117_v62 = vsel %vm6103_vm3, %v551_v1, -1e+30  ;;  %v8685_v58 = vmov 0  ;;  %vm6123_vm14 = vcmp.ne.s32.totalorder %v685_v51, 0 }
 0x1e0   : > { %4909 = vpow.bf16 %v892_v52  ;;  %v8686_v58 = vsel %vm6119_vm13, 4294967295, %v8685_v58  ;;  %v8688_v6 = vmov 0  ;;  %v662_v61 = vsel %vm646_vm6, 16843009, %v8639_v53 }
 0x1e1   : > { %8687 = vst [vmem:[#allocation36_spill] sm:$0xff] %v8686_v58  ;;  %v8689_v6 = vsel %vm6123_vm14, 4294967295, %v8688_v6  ;;  %v520_v50 = vmul.f32 0.2, %v488_v59  ;;  %v521_v7 = vmul.f32 0.2, %v489_v37  ;;  %v791_v8 = vmax.f32 %v6113_v22, %v6117_v62 }
 0x1e2   : > { %8690 = vst [vmem:[#allocation37_spill] sm:$0xff] %v8689_v6  ;;  %v6132_v48 = vsel %vm6119_vm13, %v548_v44, -1e+30  ;;  %v6136_v45 = vsel %vm6123_vm14, %v549_v42, -1e+30  ;;  %v1601_v36 = vmax.f32 %v1537_v2, %v1569_v20  ;;  %v1602_v52 = vmax.f32 %v1538_v63, %v1570_v57  ;;  %v6173_v42 = vld [vmem:[%s5453_s30] sm:$0xff] }
 0x1e3   : > { %v688_v33 = vunpack.c.0.s8 %v662_v61  ;;  %v689_v39 = vunpack.c.1.s8 %v662_v61  ;;  %v788_v4 = vmax.f32 %v6132_v48, %v6136_v45  ;;  %v552_v51 = vmax.f32 %v488_v59, %v520_v50  ;;  %v5346_v50 = vld [vmem:[%s5453_s30 + $0x8] sm:$0xff] }
 0x1e4   : > { %v6142_v1 = vsel %vm6119_vm13, %v1601_v36, -1e+30  ;;  %v6146_v30 = vsel %vm6123_vm14, %v1602_v52, -1e+30  ;;  %v553_v2 = vmax.f32 %v489_v37, %v521_v7  ;;  %v8691_v63 = vmov 0  ;;  %v6180_v36 = vld [vmem:[%s5453_s30 + $0x18] sm:$0xff] }
 0x1e5   : > { %vm6148_vm6 = vcmp.ne.s32.totalorder %v688_v33, 0  ;;  %vm6152_vm7 = vcmp.ne.s32.totalorder %v689_v39, 0  ;;  %v8694_v20 = vmov 0  ;;  %v1673_v57 = vmax.f32 %v6142_v1, %v6146_v30 }
 0x1e6   : > { %v8692_v63 = vsel %vm6148_vm6, 4294967295, %v8691_v63  ;;  %v8695_v20 = vsel %vm6152_vm7, 4294967295, %v8694_v20  ;;  %v6160_v59 = vsel %vm6148_vm6, %v552_v51, -1e+30  ;;  %v6164_v37 = vsel %vm6152_vm7, %v553_v2, -1e+30 }
 0x1e7   : > { %8693 = vst [vmem:[#allocation38_spill] sm:$0xff] %v8692_v63  ;;  %8696 = vst [vmem:[#allocation39_spill] sm:$0xff] %v8695_v20  ;;  %v794_v44 = vmax.f32 %v6160_v59, %v6164_v37  ;;  %vm8697_vm14 = vcmask 130048   ;;  %v1539_v33 = vadd.f32 %v5549_v56, %v5826_v49  ;;  %v1540_v39 = vadd.f32 %v5553_v60, %v5826_v49 }
 0x1e8   : > { %792 = vmax.xlane.f32.xlu0 %v791_v8  ;;  %vm8698_vm13 = vmmov %vm8697_vm14 }
 0x1e9   : > { %vm8699_vm5 = vmmov %vm8698_vm13  ;;  %v1571_v51 = vmul.f32 0.2, %v1539_v33  ;;  %v1572_v2 = vmul.f32 0.2, %v1540_v39 }
 0x1ea   : > { %v4908_v18 = vpop.eup %4907 }
 0x1eb   : > { %v4910_v31 = vpop.eup %4909  ;;  %v1603_v49 = vmax.f32 %v1539_v33, %v1571_v51 }
 0x1ec   : > { %1102 = vmatprep.mubr.bf16.mxu0 %v4910_v31  ;;  %789 = vmax.xlane.f32.xlu1 %v788_v4  ;;  %v6190_v4 = vld [vmem:[%s5453_s30 + $0x28] sm:$0xff] }
 0x1ed   : > { %1103 = vmatmul.mubr.bf16.gmra.mrb[8].mxu0 %v4908_v18  ;;  %v6203_v6 = vsel %vm6099_vm8, %v1603_v49, -1e+30  ;;  %v5353_v49 = vld [vmem:[%s5453_s30 + $0x58] sm:$0xff] }
 0x1f0   : > { %1674 = vmax.xlane.f32.xlu1 %v1673_v57  ;;  %v6195_v57 = vld [vmem:[%s5453_s30 + $0x30] sm:$0xff] }
 0x1f4   : > { %795 = vmax.xlane.f32.xlu1 %v794_v44  ;;  %v1604_v44 = vmax.f32 %v1540_v39, %v1572_v2  ;;  %v6212_v39 = vld [vmem:[%s5453_s30 + $0x48] sm:$0xff]  ;;  %v6218_v2 = vld [vmem:[%s5453_s30 + $0x50] sm:$0xff] }
 0x1fe   : > { %1839 = vrot.lane.b32.xlu0 %v5720_v41, %s5389_s19 }
 0x202   : > { %1823 = vrot.lane.b32.xlu0 %v5727_v43, %s5389_s19 }
 0x205   : > { %3111 = vperm.xlu1 %4876, %v6173_v42  }
 0x207   : > { %v787_v61 = vpop.xlane.xlu0 %786 }
 0x209   : > { %3115 = vperm.xlu1 %4876, %v5346_v50  }
 0x20b   : > { %v6177_v7 = vpop.xlane.xlu1 %1665  ;;  %v1836_v8 = vpop.permute.xlu0 %1835 }
 0x20c   : > { %v1881_v52 = vsel %vm8697_vm14, %v1836_v8, 1065369472 }
 0x20d   : > { %3123 = vperm.xlu1 %4876, %v6180_v36  }
 0x20f   : > { %v1818_v41 = vpop.permute.xlu1 %1817  ;;  %v1820_v43 = vpop.permute.xlu0 %1819 }
 0x210   : > { %v1854_v18 = vsel %vm8698_vm13, %v1818_v41, 1065369472  ;;  %v1857_v31 = vsel %vm8699_vm5, %v1820_v43, 1065369472  ;;  %v5350_v41 = vld [vmem:[%s5453_s30 + $0x40] sm:$0xff]  ;;  %vm8705_vm13 = vmmov %vm8699_vm5 }
 0x211   : > { %3131 = vperm.xlu1 %4876, %v6190_v4   ;;  %4607 = vmatpush3.bf16.msra.mxu1 %v1854_v18 }
 0x212   : > { %4608 = vmatprep.subr.bf16.mxu1 %v1881_v52 }
 0x215   : > { %3135 = vperm.xlu1 %4876, %v6195_v57   ;;  %4609 = vmatpush3.bf16.msra.mxu1 %v1857_v31  ;;  %v6207_v31 = vsel %vm6103_vm3, %v1604_v44, -1e+30  ;;  %v6228_v44 = vld [vmem:[%s5453_s30 + $0x10] sm:$0xff] }
 0x216   : > { %v1676_v51 = vmax.f32 %v6203_v6, %v6207_v31 }
 0x219   : > { %v4550_v8 = vpop.f32.mrb[0].mxu0  ;;  %3143 = vperm.xlu1 %4876, %v5350_v41  }
 0x21a   : > { %v4551_v18 = vpop.f32.mrb[1].mxu0 }
 0x21b   : > { %v6199_v52 = vadd.f32 %v4551_v18, %v4550_v8  ;;  %v4553_v43 = vpop.f32.mrb[2].mxu0  ;;  %v6223_v8 = vld [vmem:[%s5453_s30 + $0x68] sm:$0xff]  ;;  %v1541_v18 = vadd.f32 %v5549_v56, %v5868_v5 }
 0x21c   : > { %v4554_v47 = vpop.f32.mrb[3].mxu0 }
 0x21d   : > { %8700 = vst [vmem:[#allocation40_spill] sm:$0xff] %v6199_v52  ;;  %v6209_v33 = vadd.f32 %v4554_v47, %v4553_v43  ;;  %3147 = vperm.xlu1 %4876, %v6212_v39   ;;  %v8702_v47 = vmov 2   ;;  %v1542_v43 = vadd.f32 %v5553_v60, %v5868_v5 }
 0x21f   : > { %8701 = vst [vmem:[#allocation41_spill] sm:$0xff] %v6209_v33  ;;  %v1573_v33 = vmul.f32 0.2, %v1541_v18  ;;  %v1574_v52 = vmul.f32 0.2, %v1542_v43 }
 0x221   : > { %3151 = vperm.xlu1 %4876, %v6218_v2   ;;  %1677 = vmax.xlane.f32.xlu0 %v1676_v51  ;;  %v819_v51 = vmax.f32 %v787_v61, 0.0  ;;  %v1605_v61 = vmax.f32 %v1541_v18, %v1573_v33  ;;  %v8707_v33 = vld [vmem:[#allocation2_spill] sm:$0xff] }
 0x225   : > { %3155 = vperm.xlu1 %4876, %v5353_v49  }
 0x229   : > { %3163 = vperm.xlu1 %4876, %v6223_v8  }
 0x22d   : > { %4877 = vset.pattern.permute.xlu1 %v8702_v47  ;;  %v843_v47 = vsub.f32 %v5976_v17, %v819_v51  ;;  %v6245_v17 = vld [vmem:[%s5453_s30 + $0x60] sm:$0xff] }
 0x237   : > { %2285 = vperm.xlu0 %4875, %v5346_v50   ;;  %v842_v50 = vsub.f32 %v5972_v27, %v819_v51 }
 0x23b   : > { %2289 = vperm.xlu0 %4875, %v6228_v44  }
 0x23f   : > { %2313 = vperm.xlu0 %4875, %v5350_v41   ;;  %v1606_v41 = vmax.f32 %v1542_v43, %v1574_v52  ;;  %v318_v52 = vld [vmem:[%s5466_s12 + $0x38] sm:$0xff] }
 0x240   : > { %v784_v14 = vpop.xlane.xlu1 %783  ;;  %v6235_v0 = vpop.xlane.xlu0 %1671 }
 0x241   : > { %v818_v58 = vmax.f32 %v784_v14, 0.0 }
 0x243   : > { %v840_v15 = vsub.f32 %v6032_v26, %v818_v58  ;;  %v841_v9 = vsub.f32 %v6036_v28, %v818_v58  ;;  %2325 = vperm.xlu0 %4875, %v5353_v49   ;;  %v6250_v28 = vsel %vm6148_vm6, %v1605_v61, -1e+30  ;;  %v6254_v58 = vsel %vm6152_vm7, %v1606_v41, -1e+30 }
 0x244   : > { %v6241_v12 = vpop.xlane.xlu1 %1668  ;;  %v1838_v5 = vpop.permute.xlu0 %1837  ;;  %8703 = vst [vmem:[#allocation42_spill] sm:$0xff] %v6250_v28  ;;  %8704 = vst [vmem:[#allocation43_spill] sm:$0xff] %v6254_v58  ;;  %v627_v49 = vpack.c.b8 %v8707_v33, %v8707_v33  ;;  %v490_v41 = vadd.f32 %v5543_v54, %v5836_v34 }
 0x245   : > { %v866_v11 = vpack.c.bf16 %v842_v50, %v840_v15  ;;  %v867_v23 = vpack.c.bf16 %v843_v47, %v841_v9  ;;  %v1884_v14 = vsel %vm8699_vm5, %v1838_v5, 1065369472  ;;  %v317_v15 = vld [vmem:[%s5466_s12 + $0x30] sm:$0xff]  ;;  %vm326_vm5 = vnez %v318_v52 }
 0x246   : > { %4610 = vmatprep.subr.bf16.mxu1 %v1884_v14  ;;  %vm325_vm14 = vnez %v317_v15  ;;  %v6268_v43 = vsel %vm326_vm5, 16843009, %v8639_v53  ;;  %v491_v14 = vadd.f32 %v5546_v55, %v5836_v34  ;;  %v522_v33 = vmul.f32 0.2, %v490_v41 }
 0x247   : > { %v895_v27 = vmul.bf16 1069105081, %v866_v11  ;;  %v898_v32 = vmul.bf16 1069105081, %v867_v23  ;;  %2329 = vperm.xlu0 %4875, %v6245_v17   ;;  %v1679_v23 = vmax.f32 %v6250_v28, %v6254_v58  ;;  %v8706_v11 = vmov 3   ;;  %v8710_v58 = vld [vmem:[#allocation19_spill] sm:$0xff] }
 0x248   : > { %v1822_v26 = vpop.permute.xlu1 %1821  ;;  %v6265_v18 = vsel %vm325_vm14, 16843009, %v8639_v53  ;;  %v597_v51 = vunpack.c.0.s8 %v6268_v43  ;;  %v1543_v28 = vadd.f32 %v5549_v56, %v8710_v58  ;;  %v1544_v34 = vadd.f32 %v5553_v60, %v8710_v58 }
 0x249   : > { %4911 = vpow.bf16 %v895_v27  ;;  %v1860_v9 = vsel %vm8705_vm13, %v1822_v26, 1065369472  ;;  %vm647_vm13 = vnez %v627_v49  ;;  %v523_v49 = vmul.f32 0.2, %v491_v14 }
 0x24a   : > { %4913 = vpow.bf16 %v898_v32  ;;  %4611 = vmatpush3.bf16.msra.mxu1 %v1860_v9  ;;  %v596_v32 = vunpack.c.0.s8 %v6265_v18  ;;  %v663_v5 = vsel %vm647_vm13, 16843009, %v8639_v53 }
 0x24b   : > { %4878 = vset.pattern.permute.xlu0 %v8706_v11  ;;  %v690_v11 = vunpack.c.0.s8 %v663_v5  ;;  %v691_v20 = vunpack.c.1.s8 %v663_v5  ;;  %v1576_v5 = vmul.f32 0.2, %v1544_v34 }
 0x24c   : > { %v628_v9 = vpack.c.b16 %v597_v51, %v596_v32  ;;  %v554_v32 = vmax.f32 %v490_v41, %v522_v33  ;;  %v555_v51 = vmax.f32 %v491_v14, %v523_v49 }
 0x24d   : > { %1680 = vmax.xlane.f32.xlu1 %v1679_v23  ;;  %vm6285_vm14 = vcmp.ne.s32.totalorder %v690_v11, 0  ;;  %vm6289_vm5 = vcmp.ne.s32.totalorder %v691_v20, 0  ;;  %v1608_v11 = vmax.f32 %v1544_v34, %v1576_v5  ;;  %v1699_v34 = vmax.f32 %v6009_v13, 0.0 }
 0x24e   : > { %v629_v63 = vpack.c.b8 %v628_v9, %v628_v9  ;;  %v6301_v20 = vsel %vm6285_vm14, %v554_v32, -1e+30  ;;  %v1700_v5 = vmax.f32 %v5997_v16, 0.0 }
 0x24f   : > { %v6316_v32 = vsel %vm6289_vm5, %v1608_v11, -1e+30  ;;  %v1702_v11 = vmax.f32 %v6177_v7, 0.0 }
 0x250   : > { %vm648_vm13 = vnez %v629_v63  ;;  %v6305_v63 = vsel %vm6289_vm5, %v555_v51, -1e+30 }
 0x251   : > { %v664_v58 = vsel %vm648_vm13, 16843009, %v8639_v53 }
 0x252   : > { %v4556_v50 = vpop.f32.mrb[4].mxu0  ;;  %v692_v33 = vunpack.c.0.s8 %v664_v58  ;;  %v693_v49 = vunpack.c.1.s8 %v664_v58  ;;  %v8724_v58 = vld [vmem:[#allocation21_spill] sm:$0xff] }
 0x253   : > { %v4557_v47 = vpop.f32.mrb[5].mxu0 }
 0x254   : > { %v4912_v61 = vpop.eup %4911  ;;  %v6277_v27 = vadd.f32 %v4557_v47, %v4556_v50  ;;  %v4559_v26 = vpop.f32.mrb[6].mxu0  ;;  %v8711_v50 = vmov 0  ;;  %v8714_v47 = vmov 0  ;;  %vm6322_vm13 = vcmp.ne.s32.totalorder %v692_v33, 0  ;;  %v8726_v33 = vld [vmem:[#allocation20_spill] sm:$0xff] }
 0x255   : > { %v4914_v15 = vpop.eup %4913  ;;  %v4560_v52 = vpop.f32.mrb[7].mxu0  ;;  %v8712_v50 = vsel %vm6285_vm14, 4294967295, %v8711_v50  ;;  %v8715_v47 = vsel %vm6289_vm5, 4294967295, %v8714_v47  ;;  %vm6326_vm7 = vcmp.ne.s32.totalorder %v693_v49, 0  ;;  %v1717_v49 = vsub.f32 %v8726_v33, %v1699_v34 }
 0x256   : > { %8708 = vst [vmem:[#allocation2_spill] sm:$0xff] %v6277_v27  ;;  %v6279_v23 = vadd.f32 %v4560_v52, %v4559_v26  ;;  %1110 = vmatprep.mubr.bf16.mxu0 %v4914_v15  ;;  %8713 = vst [vmem:[#allocation19_spill] sm:$0xff] %v8712_v50  ;;  %v8717_v26 = vld [vmem:[#allocation22_spill] sm:$0xff]  ;;  %vm8729_vm5 = vcmask 130048  }
 0x257   : > { %1111 = vmatmul.mubr.bf16.gmra.mrb[12].mxu0 %v4912_v61  ;;  %8716 = vst [vmem:[#allocation45_spill] sm:$0xff] %v8715_v47  ;;  %v1575_v61 = vmul.f32 0.2, %v1543_v28  ;;  %v492_v9 = vadd.f32 %v5543_v54, %v8717_v26  ;;  %v493_v15 = vadd.f32 %v5546_v55, %v8717_v26  ;;  %v6319_v27 = vld [vmem:[%s5453_s30 + $0x20] sm:$0xff] }
 0x258   : > { %8709 = vst [vmem:[#allocation44_spill] sm:$0xff] %v6279_v23 }
 0x259   : > { %v524_v41 = vmul.f32 0.2, %v492_v9  ;;  %v525_v14 = vmul.f32 0.2, %v493_v15  ;;  %v1607_v52 = vmax.f32 %v1543_v28, %v1575_v61  ;;  %v8721_v28 = vmov 0 }
 0x25a   : > { %v8722_v28 = vsel %vm6326_vm7, 4294967295, %v8721_v28 }
 0x25b   : > { %v6312_v26 = vsel %vm6285_vm14, %v1607_v52, -1e+30  ;;  %v556_v51 = vmax.f32 %v492_v9, %v524_v41  ;;  %v557_v23 = vmax.f32 %v493_v15, %v525_v14  ;;  %8723 = vst [vmem:[#allocation46_spill] sm:$0xff] %v8722_v28  ;;  %v1718_v41 = vsub.f32 %v8724_v58, %v1699_v34  ;;  %v8725_v14 = vld [vmem:[#allocation14_spill] sm:$0xff] }
 0x25c   : > { %v1682_v61 = vmax.f32 %v6312_v26, %v6316_v32  ;;  %v1720_v52 = vsub.f32 %v8725_v14, %v1700_v5 }
 0x25d   : > { %v6336_v9 = vsel %vm6322_vm13, %v556_v51, -1e+30  ;;  %v6340_v15 = vsel %vm6326_vm7, %v557_v23, -1e+30  ;;  %v1701_v23 = vmax.f32 %v6068_v3, 0.0  ;;  %v6355_v51 = vld [vmem:[%s5453_s30 + $0x38] sm:$0xff] }
 0x25e   : > { %2281 = vperm.xlu1 %4877, %v6173_v42   ;;  %v797_v42 = vmax.f32 %v6301_v20, %v6305_v63  ;;  %v800_v13 = vmax.f32 %v6336_v9, %v6340_v15  ;;  %v1748_v16 = vpack.c.bf16 %v1720_v52, %v1718_v41  ;;  %v1704_v52 = vmax.f32 %v6235_v0, 0.0 }
 0x25f   : > { %v1722_v7 = vsub.f32 %v5919_v46, %v1701_v23 }
 0x260   : > { %v1771_v14 = vmul.bf16 1069105081, %v1748_v16  ;;  %v1723_v16 = vsub.f32 %v5982_v25, %v1702_v11  ;;  %v1728_v25 = vsub.f32 %v6044_v24, %v1704_v52 }
 0x262   : > { %2293 = vperm.xlu1 %4877, %v6180_v36   ;;  %v8718_v36 = vmov 0 }
 0x263   : > { %v8719_v36 = vsel %vm6322_vm13, 4294967295, %v8718_v36 }
 0x264   : > { %8720 = vst [vmem:[#allocation22_spill] sm:$0xff] %v8719_v36 }
 0x266   : > { %2297 = vperm.xlu1 %4877, %v6319_v27   ;;  %798 = vmax.xlane.f32.xlu0 %v797_v42 }
 0x26a   : > { %2301 = vperm.xlu1 %4877, %v6190_v4   ;;  %1683 = vmax.xlane.f32.xlu0 %v1682_v61  ;;  %v8727_v4 = vpack.c.bf16 %v5893_v35, %v5901_v38  ;;  %v8728_v61 = vld [vmem:[#allocation13_spill] sm:$0xff]  ;;  %v1703_v35 = vmax.f32 %v6241_v12, 0.0 }
 0x26b   : > { %v1719_v58 = vsub.f32 %v8728_v61, %v1700_v5 }
 0x26c   : > { %v1762_v42 = vmul.bf16 1069105081, %v8727_v4  ;;  %v1726_v4 = vsub.f32 %v6056_v21, %v1703_v35  ;;  %v1725_v24 = vsub.f32 %v6052_v10, %v1703_v35 }
 0x26d   : > { %v1747_v41 = vpack.c.bf16 %v1719_v58, %v1717_v49  ;;  %v1721_v49 = vsub.f32 %v5915_v29, %v1701_v23 }
 0x26e   : > { %2305 = vperm.xlu1 %4877, %v6195_v57   ;;  %801 = vmax.xlane.f32.xlu0 %v800_v13  ;;  %v1724_v57 = vsub.f32 %v5986_v40, %v1702_v11  ;;  %4915 = vpow.bf16 %v1762_v42 }
 0x26f   : > { %4917 = vpow.bf16 %v1771_v14  ;;  %v1768_v34 = vmul.bf16 1069105081, %v1747_v41  ;;  %v1749_v11 = vpack.c.bf16 %v1723_v16, %v1721_v49  ;;  %v600_v16 = vunpack.c.2.s8 %v6265_v18 }
 0x270   : > { %v1750_v3 = vpack.c.bf16 %v1724_v57, %v1722_v7  ;;  %v5359_v57 = vld [vmem:[%s5453_s30 + $0x70] sm:$0xff]  ;;  %v603_v49 = vunpack.c.3.s8 %v6268_v43 }
 0x271   : > { %4919 = vpow.bf16 %v1768_v34  ;;  %v1774_v14 = vmul.bf16 1069105081, %v1749_v11  ;;  %v599_v34 = vunpack.c.1.s8 %v6268_v43 }
 0x272   : > { %2309 = vperm.xlu1 %4877, %v6355_v51  }
 0x275   : > { %v793_v13 = vpop.xlane.xlu0 %792 }
 0x276   : > { %2317 = vperm.xlu1 %4877, %v6212_v39   ;;  %v821_v38 = vmax.f32 %v793_v13, 0.0  ;;  %v1777_v39 = vmul.bf16 1069105081, %v1750_v3  ;;  %v5360_v13 = vld [vmem:[%s5453_s30 + $0x78] sm:$0xff] }
 0x278   : > { %v846_v12 = vsub.f32 %v6113_v22, %v821_v38  ;;  %v847_v42 = vsub.f32 %v6117_v62, %v821_v38  ;;  %4921 = vpow.bf16 %v1777_v39  ;;  %v1752_v22 = vpack.c.bf16 %v1728_v25, %v1726_v4  ;;  %v8730_v4 = vld [vmem:[#allocation15_spill] sm:$0xff] }
 0x279   : > { %v790_v33 = vpop.xlane.xlu1 %789  ;;  %v1840_v5 = vpop.permute.xlu0 %1839  ;;  %v598_v38 = vunpack.c.1.s8 %v6265_v18 }
 0x27a   : > { %v820_v40 = vmax.f32 %v790_v33, 0.0  ;;  %2321 = vperm.xlu1 %4877, %v6218_v2   ;;  %v1887_v46 = vsel %vm8729_vm5, %v1840_v5, 1065369472  ;;  %v1783_v41 = vmul.bf16 1069105081, %v1752_v22 }
 0x27b   : > { %4612 = vmatprep.subr.bf16.mxu1 %v1887_v46 }
 0x27c   : > { %v844_v0 = vsub.f32 %v6132_v48, %v820_v40  ;;  %v845_v61 = vsub.f32 %v6136_v45, %v820_v40  ;;  %v4916_v48 = vpop.eup %4915  ;;  %v601_v40 = vunpack.c.2.s8 %v6268_v43 }
 0x27d   : > { %v1824_v2 = vpop.permute.xlu0 %1823  ;;  %v4918_v45 = vpop.eup %4917 }
 0x27e   : > { %v868_v58 = vpack.c.bf16 %v846_v12, %v844_v0  ;;  %v869_v29 = vpack.c.bf16 %v847_v42, %v845_v61  ;;  %2333 = vperm.xlu1 %4877, %v6223_v8   ;;  %v1863_v21 = vsel %vm8729_vm5, %v1824_v2, 1065369472  ;;  %v1727_v8 = vsub.f32 %v6040_v19, %v1704_v52  ;;  %v4920_v3 = vpop.eup %4919  ;;  %v6388_v46 = vpop.xlane.xlu1 %1674 }
 0x27f   : > { %4613 = vmatpush3.bf16.msra.mxu1 %v1863_v21  ;;  %v630_v52 = vpack.c.b16 %v599_v34, %v598_v38  ;;  %v632_v39 = vpack.c.b16 %v601_v40, %v600_v16  ;;  %v495_v0 = vadd.f32 %v5546_v55, %v8730_v4 }
 0x280   : > { %v901_v62 = vmul.bf16 1069105081, %v868_v58  ;;  %v904_v23 = vmul.bf16 1069105081, %v869_v29  ;;  %v1751_v7 = vpack.c.bf16 %v1727_v8, %v1725_v24  ;;  %v8731_v58 = vld [vmem:[#allocation24_spill] sm:$0xff] }
 0x281   : > { %v631_v5 = vpack.c.b8 %v630_v52, %v630_v52  ;;  %v633_v2 = vpack.c.b8 %v632_v39, %v632_v39  ;;  %v527_v43 = vmul.f32 0.2, %v495_v0  ;;  %v1547_v29 = vadd.f32 %v5549_v56, %v8731_v58 }
 0x282   : > { %4923 = vpow.bf16 %v901_v62  ;;  %2337 = vperm.xlu1 %4877, %v5359_v57   ;;  %1922 = vmatmul.mubr.bf16.vlgmr.msra.gmra.mrb[0].mxu1 %v4916_v48  ;;  %v1780_v35 = vmul.bf16 1069105081, %v1751_v7  ;;  %v6396_v61 = vpop.xlane.xlu1 %795  ;;  %v1548_v21 = vadd.f32 %v5553_v60, %v8731_v58  ;;  %v8732_v48 = vld [vmem:[#allocation16_spill] sm:$0xff]  ;;  %v8733_v7 = vmov 0 }
 0x283   : > { %4925 = vpow.bf16 %v904_v23  ;;  %1929 = vmatprep.mubr.bf16.mxu1 %v4918_v45  ;;  %v4922_v10 = vpop.eup %4921  ;;  %vm649_vm5 = vnez %v631_v5  ;;  %vm650_vm14 = vnez %v633_v2  ;;  %v496_v45 = vadd.f32 %v5543_v54, %v8732_v48 }
 0x284   : > { %3119 = vperm.xlu0 %4878, %v6228_v44   ;;  %4927 = vpow.bf16 %v1774_v14  ;;  %v665_v25 = vsel %vm649_vm5, 16843009, %v8639_v53  ;;  %v497_v14 = vadd.f32 %v5546_v55, %v8732_v48  ;;  %v1580_v8 = vmul.f32 0.2, %v1548_v21  ;;  %v8748_v48 = vld [vmem:[#allocation27_spill] sm:$0xff] }
 0x285   : > { %4929 = vpow.bf16 %v1783_v41  ;;  %v694_v22 = vunpack.c.0.s8 %v665_v25  ;;  %v695_v62 = vunpack.c.1.s8 %v665_v25  ;;  %v1579_v41 = vmul.f32 0.2, %v1547_v29 }
 0x286   : > { %2341 = vperm.xlu1 %4877, %v5360_v13   ;;  %4931 = vpow.bf16 %v1780_v35  ;;  %v6407_v24 = vpop.permute.xlu1 %3111  ;;  %v666_v38 = vsel %vm650_vm14, 16843009, %v8639_v53  ;;  %v1612_v5 = vmax.f32 %v1548_v21, %v1580_v8  ;;  %v1552_v8 = vadd.f32 %v5553_v60, %v8748_v48 }
 0x287   : > { %vm6409_vm6 = vcmp.ne.s32.totalorder %v694_v22, 0  ;;  %vm6415_vm3 = vcmp.ne.s32.totalorder %v695_v62, 0  ;;  %v8742_v22 = vmov 0  ;;  %v8745_v62 = vmov 0 }
 0x288   : > { %3127 = vperm.xlu0 %4878, %v6319_v27   ;;  %v8734_v7 = vsel %vm6409_vm6, 4294967295, %v8733_v7  ;;  %v6449_v58 = vsel %vm6415_vm3, %v1612_v5, -1e+30 }
 0x289   : > { %8735 = vst [vmem:[#allocation21_spill] sm:$0xff] %v8734_v7 }
 0x28a   : > { %1930 = vmatmul.mubr.bf16.gmra.mrb[4].mxu1 %v4920_v3 }
 0x28b   : > { %1937 = vmatprep.mubr.bf16.mxu1 %v4922_v10  ;;  %v8737_v10 = vmov 0 }
 0x28c   : > { %3139 = vperm.xlu0 %4878, %v6355_v51   ;;  %v602_v51 = vunpack.c.3.s8 %v6265_v18  ;;  %v8738_v10 = vsel %vm6415_vm3, 4294967295, %v8737_v10 }
 0x28d   : > { %v4924_v19 = vpop.eup %4923  ;;  %8739 = vst [vmem:[#allocation14_spill] sm:$0xff] %v8738_v10 }
 0x28e   : > { %v4926_v44 = vpop.eup %4925  ;;  %v634_v12 = vpack.c.b16 %v603_v49, %v602_v51  ;;  %v696_v51 = vunpack.c.0.s8 %v666_v38  ;;  %v697_v49 = vunpack.c.1.s8 %v666_v38  ;;  %v1705_v38 = vmax.f32 %v6388_v46, 0.0 }
 0x28f   : > { %1118 = vmatprep.mubr.bf16.mxu0 %v4926_v44  ;;  %v4928_v33 = vpop.eup %4927  ;;  %v529_v44 = vmul.f32 0.2, %v497_v14 }
 0x290   : > { %1119 = vmatmul.mubr.bf16.gmra.mrb[16].mxu0 %v4924_v19  ;;  %3159 = vperm.xlu0 %4878, %v6245_v17   ;;  %v4930_v27 = vpop.eup %4929  ;;  %v494_v17 = vadd.f32 %v5543_v54, %v8730_v4  ;;  %v635_v11 = vpack.c.b8 %v634_v12, %v634_v12  ;;  %v528_v19 = vmul.f32 0.2, %v496_v45  ;;  %v8741_v4 = vld [vmem:[#allocation26_spill] sm:$0xff]  ;;  %vm6451_vm14 = vcmp.ne.s32.totalorder %v696_v51, 0 }
 0x291   : > { %v4932_v42 = vpop.eup %4931  ;;  %v8743_v22 = vsel %vm6451_vm14, 4294967295, %v8742_v22 }
 0x292   : > { %1938 = vmatmul.mubr.bf16.gmra.mrb[8].mxu1 %v4928_v33  ;;  %v526_v18 = vmul.f32 0.2, %v494_v17  ;;  %vm651_vm5 = vnez %v635_v11  ;;  %v8740_v33 = vld [vmem:[#allocation23_spill] sm:$0xff]  ;;  %8744 = vst [vmem:[#allocation20_spill] sm:$0xff] %v8743_v22 }
 0x293   : > { %1945 = vmatprep.mubr.bf16.mxu1 %v4930_v27  ;;  %v667_v34 = vsel %vm651_vm5, 16843009, %v8639_v53  ;;  %v1611_v27 = vmax.f32 %v1547_v29, %v1579_v41  ;;  %v6435_v53 = vpop.permute.xlu1 %3115  ;;  %vm6455_vm5 = vcmp.ne.s32.totalorder %v697_v49, 0  ;;  %v8749_v41 = vmov 0 }
 0x294   : > { %3167 = vperm.xlu0 %4878, %v5359_v57   ;;  %v558_v23 = vmax.f32 %v494_v17, %v526_v18  ;;  %v559_v57 = vmax.f32 %v495_v0, %v527_v43  ;;  %v1549_v17 = vadd.f32 %v5549_v56, %v8741_v4  ;;  %v698_v12 = vunpack.c.0.s8 %v667_v34 }
 0x295   : > { %v1550_v0 = vadd.f32 %v5553_v60, %v8741_v4  ;;  %v699_v2 = vunpack.c.1.s8 %v667_v34  ;;  %v561_v18 = vmax.f32 %v497_v14, %v529_v44  ;;  %v6445_v43 = vsel %vm6409_vm6, %v1611_v27, -1e+30  ;;  %v8755_v44 = vld [vmem:[#allocation3_spill] sm:$0xff]  ;;  %v8756_v27 = vld [vmem:[#allocation4_spill] sm:$0xff] }
 0x296   : > { %v6425_v52 = vsel %vm6409_vm6, %v558_v23, -1e+30  ;;  %v6431_v16 = vsel %vm6415_vm3, %v559_v57, -1e+30  ;;  %v8746_v62 = vsel %vm6455_vm5, 4294967295, %v8745_v62  ;;  %vm6466_vm3 = vcmp.ne.s32.totalorder %v698_v12, 0 }
 0x297   : > { %v803_v25 = vmax.f32 %v6425_v52, %v6431_v16  ;;  %8747 = vst [vmem:[#allocation13_spill] sm:$0xff] %v8746_v62  ;;  %v1581_v14 = vmul.f32 0.2, %v1549_v17  ;;  %v4497_v57 = vld [vmem:[%s8395_s2 + $0x3] ss:$4 sm:$0x3] }
 0x298   : > { %3171 = vperm.xlu0 %4878, %v5360_v13   ;;  %v8736_v13 = vld [vmem:[#allocation25_spill] sm:$0xff]  ;;  %v8750_v41 = vsel %vm6466_vm3, 4294967295, %v8749_v41  ;;  %vm6476_vm6 = vcmp.ne.s32.totalorder %v699_v2, 0  ;;  %v6493_v5 = vrot.slane %v4497_v57, %v8756_v27  ;;  %v4480_v2 = vld [vmem:[%s8395_s2 + $0x2] ss:$4 sm:$0x3] }
 0x299   : > { %v498_v3 = vadd.f32 %v5543_v54, %v8736_v13  ;;  %v499_v35 = vadd.f32 %v5546_v55, %v8736_v13  ;;  %v1545_v54 = vadd.f32 %v5549_v56, %v8740_v33  ;;  %v1546_v55 = vadd.f32 %v5553_v60, %v8740_v33  ;;  %8751 = vst [vmem:[#allocation15_spill] sm:$0xff] %v8750_v41 }
 0x29a   : > { %1946 = vmatmul.mubr.bf16.gmra.mrb[12].mxu1 %v4932_v42  ;;  %v560_v42 = vmax.f32 %v496_v45, %v528_v19  ;;  %v6461_v45 = vadd.f32 %v5549_v56, %v8748_v48  ;;  %v1582_v13 = vmul.f32 0.2, %v1550_v0  ;;  %v8752_v56 = vmov 0 }
 0x29b   : > { %v530_v40 = vmul.f32 0.2, %v498_v3  ;;  %v531_v39 = vmul.f32 0.2, %v499_v35  ;;  %v1577_v11 = vmul.f32 0.2, %v1545_v54  ;;  %v6490_v33 = vrot.slane %v4497_v57, %v8755_v44 }
 0x29c   : > { %v1578_v29 = vmul.f32 0.2, %v1546_v55  ;;  %v8753_v56 = vsel %vm6476_vm6, 4294967295, %v8752_v56  ;;  %v6483_v34 = vsel %vm6451_vm14, %v560_v42, -1e+30  ;;  %v1613_v12 = vmax.f32 %v1549_v17, %v1581_v14 }
 0x29d   : > { %v562_v21 = vmax.f32 %v498_v3, %v530_v40  ;;  %v563_v23 = vmax.f32 %v499_v35, %v531_v39  ;;  %v6472_v3 = vpop.permute.xlu1 %3123  ;;  %v1688_v35 = vmax.f32 %v6445_v43, %v6449_v58  ;;  %8754 = vst [vmem:[#allocation24_spill] sm:$0xff] %v8753_v56  ;;  %v6487_v19 = vsel %vm6455_vm5, %v561_v18, -1e+30 }
 0x29e   : > { %v1609_v60 = vmax.f32 %v1545_v54, %v1577_v11  ;;  %v1610_v51 = vmax.f32 %v1546_v55, %v1578_v29  ;;  %v1583_v49 = vmul.f32 0.2, %v6461_v45  ;;  %v1584_v54 = vmul.f32 0.2, %v1552_v8 }
 0x29f   : > { %v6497_v46 = vsel %vm6466_vm3, %v562_v21, -1e+30  ;;  %v6502_v4 = vsel %vm6476_vm6, %v563_v23, -1e+30  ;;  %v1614_v42 = vmax.f32 %v1550_v0, %v1582_v13  ;;  %v1729_v18 = vsub.f32 %v6142_v1, %v1705_v38 }
 0x2a0   : > { %v1730_v55 = vsub.f32 %v6146_v30, %v1705_v38  ;;  %v3185_v21 = vadd.f32 %v6490_v33, %v6407_v24  ;;  %v3186_v17 = vadd.f32 %v6493_v5, %v6407_v24  ;;  %v6521_v23 = vsel %vm6322_vm13, %v1609_v60, -1e+30 }
 0x2a1   : > { %v6517_v0 = vpop.permute.xlu1 %3131  ;;  %v6525_v1 = vsel %vm6326_vm7, %v1610_v51, -1e+30  ;;  %v6531_v48 = vrot.slane %v4480_v2, %v8756_v27  ;;  %v1615_v24 = vmax.f32 %v6461_v45, %v1583_v49  ;;  %v809_v14 = vmax.f32 %v6497_v46, %v6502_v4 }
 0x2a2   : > { %v6538_v57 = vsel %vm6451_vm14, %v1613_v12, -1e+30  ;;  %v6542_v13 = vsel %vm6455_vm5, %v1614_v42, -1e+30  ;;  %v3217_v27 = vmul.f32 0.2, %v3185_v21  ;;  %v3187_v45 = vadd.f32 %v6490_v33, %v6435_v53 }
 0x2a3   : > { %v3188_v49 = vadd.f32 %v6493_v5, %v6435_v53  ;;  %v1691_v12 = vmax.f32 %v6538_v57, %v6542_v13  ;;  %v6558_v42 = vsel %vm6466_vm3, %v1615_v24, -1e+30 }
 0x2aa   : > { %804 = vmax.xlane.f32.xlu1 %v803_v25  ;;  %v806_v25 = vmax.f32 %v6483_v34, %v6487_v19 }
 0x2ae   : > { %1689 = vmax.xlane.f32.xlu1 %v1688_v35  ;;  %v1678_v40 = vpop.xlane.xlu0 %1677  ;;  %v1616_v35 = vmax.f32 %v1552_v8, %v1584_v54  ;;  %v6552_v54 = vpop.permute.xlu1 %3135 }
 0x2af   : > { %v1706_v39 = vmax.f32 %v1678_v40, 0.0  ;;  %v3218_v40 = vmul.f32 0.2, %v3186_v17 }
 0x2b0   : > { %v6562_v53 = vsel %vm6476_vm6, %v1616_v35, -1e+30 }
 0x2b1   : > { %v1731_v11 = vsub.f32 %v6203_v6, %v1706_v39  ;;  %v1732_v29 = vsub.f32 %v6207_v31, %v1706_v39  ;;  %v6528_v31 = vrot.slane %v4480_v2, %v8755_v44  ;;  %v1685_v44 = vmax.f32 %v6521_v23, %v6525_v1 }
 0x2b2   : > { %807 = vmax.xlane.f32.xlu1 %v806_v25  ;;  %v6574_v35 = vpop.permute.xlu1 %3143 }
 0x2b3   : > { %v1753_v6 = vpack.c.bf16 %v1731_v11, %v1729_v18  ;;  %v1754_v30 = vpack.c.bf16 %v1732_v29, %v1730_v55  ;;  %v3249_v18 = vmax.f32 %v3185_v21, %v3217_v27  ;;  %v3250_v55 = vmax.f32 %v3186_v17, %v3218_v40 }
 0x2b4   : > { %v3219_v11 = vmul.f32 0.2, %v3187_v45  ;;  %v3220_v29 = vmul.f32 0.2, %v3188_v49 }
 0x2b5   : > { %v1786_v38 = vmul.bf16 1069105081, %v1753_v6  ;;  %v1789_v60 = vmul.bf16 1069105081, %v1754_v30 }
 0x2b6   : > { %810 = vmax.xlane.f32.xlu1 %v809_v14  ;;  %v2286_v51 = vpop.permute.xlu0 %2285  ;;  %v1694_v14 = vmax.f32 %v6558_v42, %v6562_v53  ;;  %v3251_v17 = vmax.f32 %v3187_v45, %v3219_v11  ;;  %v3252_v27 = vmax.f32 %v3188_v49, %v3220_v29  ;;  %v6598_v11 = vpop.permute.xlu1 %3147 }
 0x2b7   : > { %4933 = vpow.bf16 %v1786_v38  ;;  %v2357_v39 = vadd.f32 %v6528_v31, %v2286_v51  ;;  %v2358_v8 = vadd.f32 %v6531_v48, %v2286_v51  ;;  %1686 = vmax.xlane.f32.xlu0 %v1685_v44  ;;  %v6580_v51 = vsel %vm5564_vm9, %v3249_v18, -1e+30  ;;  %8762 = vst [vmem:[#allocation25_spill] sm:$0xff] %v6598_v11 }
 0x2b8   : > { %4935 = vpow.bf16 %v1789_v60  ;;  %v6592_v18 = vsel %vm5578_vm11, %v3251_v17, -1e+30 }
 0x2b9   : > { %v2389_v25 = vmul.f32 0.2, %v2357_v39  ;;  %v2390_v2 = vmul.f32 0.2, %v2358_v8 }
 0x2ba   : > { %1692 = vmax.xlane.f32.xlu1 %v1691_v12 }
 0x2bb   : > { %v2421_v6 = vmax.f32 %v2357_v39, %v2389_v25  ;;  %v2422_v30 = vmax.f32 %v2358_v8, %v2390_v2  ;;  %v6584_v8 = vsel %vm5568_vm10, %v3250_v55, -1e+30  ;;  %v6596_v55 = vsel %vm5592_vm12, %v3252_v27, -1e+30  ;;  %v2290_v27 = vpop.permute.xlu0 %2289 }
 0x2bd   : > { %v6568_v24 = vsel %vm5578_vm11, %v2421_v6, -1e+30  ;;  %v6572_v44 = vsel %vm5592_vm12, %v2422_v30, -1e+30 }
 0x2be   : > { %1695 = vmax.xlane.f32.xlu1 %v1694_v14  ;;  %v2486_v21 = vmax.f32 %v6568_v24, %v6572_v44  ;;  %v3313_v14 = vmax.f32 %v6580_v51, %v6584_v8 }
 0x2c0   : > { %v4562_v12 = vpop.f32.mrb[8].mxu0  ;;  %2487 = vmax.xlane.f32.xlu0 %v2486_v21  ;;  %v3316_v21 = vmax.f32 %v6592_v18, %v6596_v55 }
 0x2c1   : > { %v4563_v25 = vpop.f32.mrb[9].mxu0 }
 0x2c2   : > { %v4934_v2 = vpop.eup %4933  ;;  %v6586_v6 = vadd.f32 %v4563_v25, %v4562_v12  ;;  %v4565_v30 = vpop.f32.mrb[10].mxu0 }
 0x2c3   : > { %v4936_v45 = vpop.eup %4935  ;;  %v4566_v49 = vpop.f32.mrb[11].mxu0 }
 0x2c4   : > { %8761 = vst [vmem:[#allocation16_spill] sm:$0xff] %v6586_v6  ;;  %v6600_v29 = vadd.f32 %v4566_v49, %v4565_v30  ;;  %1953 = vmatprep.mubr.bf16.mxu1 %v4936_v45  ;;  %3314 = vmax.xlane.f32.xlu0 %v3313_v14  ;;  %v6604_v12 = vpop.permute.xlu1 %3151  ;;  %v5361_v30 = vld [vmem:[%s8394_s1] sm:$0xff]  }
 0x2c5   : > { %1954 = vmatmul.mubr.bf16.gmra.mrb[16].mxu1 %v4934_v2  ;;  %8764 = vst [vmem:[#allocation26_spill] sm:$0xff] %v6604_v12  ;;  %v2360_v12 = vadd.f32 %v6531_v48, %v2290_v27 }
 0x2c6   : > { %8763 = vst [vmem:[#allocation23_spill] sm:$0xff] %v6600_v29 }
 0x2c7   : > { %v2392_v40 = vmul.f32 0.2, %v2360_v12 }
 0x2c8   : > { %3317 = vmax.xlane.f32.xlu0 %v3316_v21  ;;  %v6606_v38 = vpop.permute.xlu1 %3155  ;;  %v6616_v21 = vpop.permute.xlu0 %2313 }
 0x2c9   : > { %8765 = vst [vmem:[#allocation27_spill] sm:$0xff] %v6606_v38 }
 0x2cc   : > { %v6608_v17 = vpop.permute.xlu1 %3163  ;;  %v6628_v36 = vpop.permute.xlu0 %2325 }
 0x2cd   : > { %8766 = vst [vmem:[#allocation3_spill] sm:$0xff] %v6608_v17  ;;  %8767 = vst [vmem:[#allocation4_spill] sm:$0xff] %v6628_v36 }
 0x2da   : > { %v1681_v60 = vpop.xlane.xlu1 %1680 }
 0x2db   : > { %v1707_v11 = vmax.f32 %v1681_v60, 0.0  ;;  %v8773_v60 = vld [vmem:[#allocation42_spill] sm:$0xff] }
 0x2de   : > { %v2282_v25 = vpop.permute.xlu1 %2281  ;;  %2643 = vrot.lane.b32.xlu0 %v5361_v30, %s5392_s18 }
 0x2df   : > { %v2355_v2 = vadd.f32 %v6528_v31, %v2282_v25  ;;  %v2356_v14 = vadd.f32 %v6531_v48, %v2282_v25  ;;  %v2359_v25 = vadd.f32 %v6528_v31, %v2290_v27 }
 0x2e1   : > { %v2387_v45 = vmul.f32 0.2, %v2355_v2  ;;  %v2388_v49 = vmul.f32 0.2, %v2356_v14 }
 0x2e3   : > { %v2419_v29 = vmax.f32 %v2355_v2, %v2387_v45  ;;  %v2420_v6 = vmax.f32 %v2356_v14, %v2388_v49  ;;  %v2391_v2 = vmul.f32 0.2, %v2359_v25  ;;  %v6632_v14 = vpop.permute.xlu0 %2329 }
 0x2e4   : > { %8768 = vst [vmem:[#allocation7_spill] sm:$0xff] %v6632_v14 }
 0x2e5   : > { %v6620_v62 = vsel %vm5564_vm9, %v2419_v29, -1e+30  ;;  %v6624_v22 = vsel %vm5568_vm10, %v2420_v6, -1e+30  ;;  %v822_v29 = vmax.f32 %v6396_v61, 0.0  ;;  %v2423_v45 = vmax.f32 %v2359_v25, %v2391_v2 }
 0x2e6   : > { %v2483_v28 = vmax.f32 %v6620_v62, %v6624_v22  ;;  %v2424_v6 = vmax.f32 %v2360_v12, %v2392_v40  ;;  %v8774_v40 = vld [vmem:[#allocation43_spill] sm:$0xff]  ;;  %vm8797_vm10 = vcmask 130048  }
 0x2e7   : > { %v848_v56 = vsub.f32 %v6160_v59, %v822_v29  ;;  %v849_v41 = vsub.f32 %v6164_v37, %v822_v29  ;;  %v6641_v14 = vsel %vm5751_vm1, %v2423_v45, -1e+30  ;;  %v1733_v59 = vsub.f32 %v8773_v60, %v1707_v11  ;;  %vm8798_vm11 = vmmov %vm8797_vm10 }
 0x2e8   : > { %2484 = vmax.xlane.f32.xlu1 %v2483_v28  ;;  %8770 = vst [vmem:[#allocation8_spill] sm:$0xff] %v6641_v14  ;;  %v6645_v12 = vsel %vm5763_vm2, %v2424_v6, -1e+30  ;;  %v1734_v37 = vsub.f32 %v8774_v40, %v1707_v11  ;;  %v2294_v6 = vpop.permute.xlu1 %2293  ;;  %v6679_v40 = vld [vmem:[%s8394_s1 + $0x50] sm:$0xff]   ;;  %vm8799_vm12 = vmmov %vm8797_vm10 }
 0x2e9   : > { %8772 = vst [vmem:[#allocation5_spill] sm:$0xff] %v6645_v12 }
 0x2f3   : > { %v799_v39 = vpop.xlane.xlu0 %798 }
 0x2f4   : > { %v823_v49 = vmax.f32 %v799_v39, 0.0 }
 0x2f6   : > { %v850_v28 = vsub.f32 %v6301_v20, %v823_v49  ;;  %v851_v10 = vsub.f32 %v6305_v63, %v823_v49  ;;  %v5363_v49 = vld [vmem:[%s8394_s1 + $0x48] sm:$0xff]  }
 0x2f7   : > { %v1684_v27 = vpop.xlane.xlu0 %1683 }
 0x2f8   : > { %v870_v47 = vpack.c.bf16 %v850_v28, %v848_v56  ;;  %v871_v61 = vpack.c.bf16 %v851_v10, %v849_v41  ;;  %v1708_v25 = vmax.f32 %v1684_v27, 0.0  ;;  %v5362_v56 = vld [vmem:[%s8394_s1 + $0x40] sm:$0xff]   ;;  %v2489_v10 = vmax.f32 %v6641_v14, %v6645_v12 }
 0x2f9   : > { %2659 = vrot.lane.b32.xlu1 %v5362_v56, %s5392_s18 }
 0x2fa   : > { %v907_v29 = vmul.bf16 1069105081, %v870_v47  ;;  %v910_v20 = vmul.bf16 1069105081, %v871_v61  ;;  %v1735_v63 = vsub.f32 %v6312_v26, %v1708_v25  ;;  %v1736_v39 = vsub.f32 %v6316_v32, %v1708_v25  ;;  %v6658_v26 = vpop.permute.xlu1 %2297  ;;  %v5364_v25 = vld [vmem:[%s8394_s1 + $0x8] sm:$0xff]  }
 0x2fc   : > { %4937 = vpow.bf16 %v907_v29  ;;  %v1755_v41 = vpack.c.bf16 %v1735_v63, %v1733_v59  ;;  %v1756_v45 = vpack.c.bf16 %v1736_v39, %v1734_v37  ;;  %v2361_v29 = vadd.f32 %v6528_v31, %v2294_v6  ;;  %v802_v63 = vpop.xlane.xlu0 %801 }
 0x2fd   : > { %4939 = vpow.bf16 %v910_v20  ;;  %2490 = vmax.xlane.f32.xlu0 %v2489_v10  ;;  %3489 = vrot.lane.b32.xlu1 %v5362_v56, %s5393_s21  ;;  %v2362_v20 = vadd.f32 %v6531_v48, %v2294_v6 }
 0x2fe   : > { %v1792_v47 = vmul.bf16 1069105081, %v1755_v41  ;;  %v1795_v11 = vmul.bf16 1069105081, %v1756_v45  ;;  %v6665_v27 = vpop.permute.xlu1 %2301  ;;  %v2393_v56 = vmul.f32 0.2, %v2361_v29  ;;  %v3191_v45 = vadd.f32 %v6490_v33, %v6472_v3 }
 0x2ff   : > { %v2394_v10 = vmul.f32 0.2, %v2362_v20 }
 0x300   : > { %4941 = vpow.bf16 %v1792_v47  ;;  %v3192_v47 = vadd.f32 %v6493_v5, %v6472_v3  ;;  %v3223_v6 = vmul.f32 0.2, %v3191_v45 }
 0x301   : > { %4943 = vpow.bf16 %v1795_v11  ;;  %3473 = vrot.lane.b32.xlu1 %v5361_v30, %s5393_s21  ;;  %v2425_v11 = vmax.f32 %v2361_v29, %v2393_v56 }
 0x302   : > { %v6671_v60 = vpop.permute.xlu1 %2305  ;;  %v3255_v29 = vmax.f32 %v3191_v45, %v3223_v6 }
 0x303   : > { %v6689_v41 = vpop.permute.xlu0 %3119  ;;  %v6701_v12 = vsel %vm5743_vm15, %v2425_v11, -1e+30 }
 0x304   : > { %8778 = vst [vmem:[#allocation12_spill] sm:$0xff] %v6701_v12 }
 0x305   : > { %2661 = vrot.lane.b32.xlu1 %v5363_v49, %s5392_s18 }
 0x306   : > { %v6674_v59 = vpop.permute.xlu1 %2309 }
 0x307   : > { %v4938_v32 = vpop.eup %4937 }
 0x308   : > { %v4940_v28 = vpop.eup %4939 }
 0x309   : > { %1126 = vmatprep.mubr.bf16.mxu0 %v4940_v28  ;;  %2645 = vrot.lane.b32.xlu1 %v5364_v25, %s5392_s18  ;;  %v6697_v28 = vpop.permute.xlu0 %3127 }
 0x30a   : > { %1127 = vmatmul.mubr.bf16.gmra.mrb[20].mxu0 %v4938_v32  ;;  %v6683_v37 = vpop.permute.xlu1 %2317  ;;  %v2426_v32 = vmax.f32 %v2362_v20, %v2394_v10 }
 0x30b   : > { %v4942_v61 = vpop.eup %4941 }
 0x30c   : > { %v4944_v30 = vpop.eup %4943  ;;  %v6705_v17 = vsel %vm5747_vm0, %v2426_v32, -1e+30  ;;  %v6719_v32 = vsel %vm5743_vm15, %v3255_v29, -1e+30  ;;  %vm8800_vm15 = vmmov %vm8797_vm10 }
 0x30d   : > { %1961 = vmatprep.mubr.bf16.mxu1 %v4944_v30  ;;  %8780 = vst [vmem:[#allocation42_spill] sm:$0xff] %v6705_v17  ;;  %8783 = vst [vmem:[#allocation10_spill] sm:$0xff] %v6719_v32 }
 0x30e   : > { %1962 = vmatmul.mubr.bf16.gmra.mrb[20].mxu1 %v4942_v61  ;;  %v6687_v39 = vpop.permute.xlu1 %2321  ;;  %v3224_v61 = vmul.f32 0.2, %v3192_v47 }
 0x30f   : > { %8775 = vst [vmem:[#allocation6_spill] sm:$0xff] %v6687_v39  ;;  %v6713_v39 = vpop.permute.xlu0 %3139 }
 0x310   : > { %v3256_v20 = vmax.f32 %v3192_v47, %v3224_v61  ;;  %v824_v61 = vmax.f32 %v802_v63, 0.0 }
 0x312   : > { %v853_v14 = vsub.f32 %v6340_v15, %v824_v61 }
 0x313   : > { %3491 = vrot.lane.b32.xlu0 %v5363_v49, %s5393_s21  ;;  %v6695_v49 = vpop.permute.xlu1 %2333  ;;  %v6727_v47 = vpop.permute.xlu0 %3159 }
 0x314   : > { %8776 = vst [vmem:[#allocation11_spill] sm:$0xff] %v6695_v49  ;;  %v2492_v49 = vmax.f32 %v6701_v12, %v6705_v17 }
 0x317   : > { %2663 = vrot.lane.b32.xlu0 %v6679_v40, %s5392_s18  ;;  %v6709_v56 = vpop.permute.xlu1 %2337  ;;  %v6733_v29 = vpop.permute.xlu0 %3167 }
 0x31b   : > { %v6725_v45 = vpop.permute.xlu1 %2341  ;;  %v6737_v63 = vpop.permute.xlu0 %3171 }
 0x32a   : > { %v4568_v30 = vpop.f32.mrb[12].mxu0 }
 0x32b   : > { %v4569_v38 = vpop.f32.mrb[13].mxu0 }
 0x32c   : > { %v6707_v36 = vadd.f32 %v4569_v38, %v4568_v30  ;;  %v4571_v3 = vpop.f32.mrb[14].mxu0  ;;  %v6723_v38 = vsel %vm5747_vm0, %v3256_v20, -1e+30  ;;  %vm8801_vm0 = vmmov %vm8797_vm10 }
 0x32d   : > { %v4572_v10 = vpop.f32.mrb[15].mxu0  ;;  %2493 = vmax.xlane.f32.xlu1 %v2492_v49  ;;  %8784 = vst [vmem:[#allocation47_spill] sm:$0xff] %v6723_v38  ;;  %v3322_v6 = vmax.f32 %v6719_v32, %v6723_v38  ;;  %v852_v49 = vsub.f32 %v6336_v9, %v824_v61 }
 0x32e   : > { %8781 = vst [vmem:[#allocation43_spill] sm:$0xff] %v6707_v36  ;;  %v6715_v11 = vadd.f32 %v4572_v10, %v4571_v3 }
 0x330   : > { %8782 = vst [vmem:[#allocation9_spill] sm:$0xff] %v6715_v11 }
 0x336   : > { %3323 = vmax.xlane.f32.xlu0 %v3322_v6 }
 0x337   : > { %v805_v30 = vpop.xlane.xlu1 %804 }
 0x338   : > { %v825_v3 = vmax.f32 %v805_v30, 0.0 }
 0x33a   : > { %v854_v50 = vsub.f32 %v6425_v52, %v825_v3  ;;  %v855_v20 = vsub.f32 %v6431_v16, %v825_v3 }
 0x33b   : > { %v1690_v10 = vpop.xlane.xlu1 %1689 }
 0x33c   : > { %v872_v11 = vpack.c.bf16 %v854_v50, %v852_v49  ;;  %v873_v36 = vpack.c.bf16 %v855_v20, %v853_v14  ;;  %v1710_v15 = vmax.f32 %v1690_v10, 0.0 }
 0x33e   : > { %v913_v12 = vmul.bf16 1069105081, %v872_v11  ;;  %v916_v17 = vmul.bf16 1069105081, %v873_v36  ;;  %3475 = vrot.lane.b32.xlu1 %v5364_v25, %s5393_s21  ;;  %v1739_v49 = vsub.f32 %v6445_v43, %v1710_v15 }
 0x33f   : > { %v808_v32 = vpop.xlane.xlu1 %807 }
 0x340   : > { %4945 = vpow.bf16 %v913_v12  ;;  %v826_v9 = vmax.f32 %v808_v32, 0.0  ;;  %v1740_v12 = vsub.f32 %v6449_v58, %v1710_v15  ;;  %v6751_v58 = vld [vmem:[%s8394_s1 + $0x10] sm:$0xff]  }
 0x341   : > { %4947 = vpow.bf16 %v916_v17 }
 0x342   : > { %v856_v16 = vsub.f32 %v6483_v34, %v826_v9  ;;  %v857_v3 = vsub.f32 %v6487_v19, %v826_v9 }
 0x343   : > { %v811_v6 = vpop.xlane.xlu1 %810 }
 0x344   : > { %v827_v61 = vmax.f32 %v811_v6, 0.0  ;;  %v1687_v30 = vpop.xlane.xlu0 %1686 }
 0x345   : > { %v1709_v52 = vmax.f32 %v1687_v30, 0.0 }
 0x346   : > { %v858_v11 = vsub.f32 %v6497_v46, %v827_v61  ;;  %v859_v36 = vsub.f32 %v6502_v4, %v827_v61 }
 0x347   : > { %v1737_v17 = vsub.f32 %v6521_v23, %v1709_v52  ;;  %v1738_v25 = vsub.f32 %v6525_v1, %v1709_v52  ;;  %v1693_v32 = vpop.xlane.xlu1 %1692 }
 0x348   : > { %v874_v14 = vpack.c.bf16 %v858_v11, %v856_v16  ;;  %v875_v50 = vpack.c.bf16 %v859_v36, %v857_v3  ;;  %v1711_v34 = vmax.f32 %v1693_v32, 0.0  ;;  %v6764_v36 = vld [vmem:[%s8394_s1 + $0x58] sm:$0xff]  }
 0x349   : > { %v1757_v20 = vpack.c.bf16 %v1739_v49, %v1737_v17  ;;  %v1758_v10 = vpack.c.bf16 %v1740_v12, %v1738_v25 }
 0x34a   : > { %v919_v6 = vmul.bf16 1069105081, %v874_v14  ;;  %v922_v19 = vmul.bf16 1069105081, %v875_v50  ;;  %v1741_v23 = vsub.f32 %v6538_v57, %v1711_v34  ;;  %v1742_v15 = vsub.f32 %v6542_v13, %v1711_v34 }
 0x34b   : > { %v4946_v9 = vpop.eup %4945  ;;  %v1798_v46 = vmul.bf16 1069105081, %v1757_v20  ;;  %v1801_v30 = vmul.bf16 1069105081, %v1758_v10  ;;  %v1696_v4 = vpop.xlane.xlu1 %1695  ;;  %v3189_v13 = vadd.f32 %v6490_v33, %v6689_v41 }
 0x34c   : > { %v4948_v61 = vpop.eup %4947  ;;  %4949 = vpow.bf16 %v919_v6  ;;  %v1712_v43 = vmax.f32 %v1696_v4, 0.0  ;;  %2647 = vrot.lane.b32.xlu0 %v6751_v58, %s5392_s18 }
 0x34d   : > { %4951 = vpow.bf16 %v922_v19  ;;  %1134 = vmatprep.mubr.bf16.mxu0 %v4948_v61  ;;  %v6756_v1 = vpop.xlane.xlu0 %2487  ;;  %v3221_v20 = vmul.f32 0.2, %v3189_v13 }
 0x34e   : > { %4953 = vpow.bf16 %v1798_v46  ;;  %v1743_v52 = vsub.f32 %v6558_v42, %v1712_v43  ;;  %v1744_v16 = vsub.f32 %v6562_v53, %v1712_v43  ;;  %1135 = vmatmul.mubr.bf16.gmra.mrb[24].mxu0 %v4946_v9  ;;  %v3190_v42 = vadd.f32 %v6493_v5, %v6689_v41 }
 0x34f   : > { %4955 = vpow.bf16 %v1801_v30 }
 0x350   : > { %v1759_v3 = vpack.c.bf16 %v1743_v52, %v1741_v23  ;;  %v1760_v11 = vpack.c.bf16 %v1744_v16, %v1742_v15  ;;  %2665 = vrot.lane.b32.xlu0 %v6764_v36, %s5392_s18  ;;  %v3222_v10 = vmul.f32 0.2, %v3190_v42 }
 0x351   : > { %v3315_v57 = vpop.xlane.xlu0 %3314 }
 0x352   : > { %v1807_v49 = vmul.bf16 1069105081, %v1760_v11  ;;  %v1804_v53 = vmul.bf16 1069105081, %v1759_v3  ;;  %v3361_v12 = vmax.f32 %v3315_v57, 0.0  ;;  %v3254_v16 = vmax.f32 %v3190_v42, %v3222_v10 }
 0x353   : > { %v2364_v3 = vadd.f32 %v6531_v48, %v6658_v26 }
 0x354   : > { %4957 = vpow.bf16 %v1807_v49  ;;  %v6775_v9 = vsub.f32 %v6580_v51, %v3361_v12  ;;  %v3378_v41 = vsub.f32 %v6584_v8, %v3361_v12  ;;  %v3253_v51 = vmax.f32 %v3189_v13, %v3221_v20 }
 0x355   : > { %v4614_v17 = vpop.f32.mrb[0].mxu1  ;;  %v3318_v25 = vpop.xlane.xlu0 %3317  ;;  %4959 = vpow.bf16 %v1804_v53  ;;  %v6798_v13 = vsel %vm5763_vm2, %v3254_v16, -1e+30  ;;  %vm8803_vm2 = vmmov %vm8801_vm0 }
 0x356   : > { %v3362_v32 = vmax.f32 %v3318_v25, 0.0  ;;  %v4615_v14 = vpop.f32.mrb[1].mxu1  ;;  %8785 = vst [vmem:[#allocation48_spill] sm:$0xff] %v6775_v9  ;;  %v6794_v53 = vsel %vm5751_vm1, %v3253_v51, -1e+30  ;;  %vm8802_vm1 = vmmov %vm8801_vm0  ;;  %v8863_v9 = vld [vmem:[#allocation35_spill] sm:$0xff] }
 0x357   : > { %v4950_v50 = vpop.eup %4949  ;;  %v6772_v34 = vadd.f32 %v4615_v14, %v4614_v17  ;;  %v4617_v6 = vpop.f32.mrb[2].mxu1  ;;  %8788 = vst [vmem:[#allocation51_spill] sm:$0xff] %v6794_v53  ;;  %v3319_v14 = vmax.f32 %v6794_v53, %v6798_v13  ;;  %v8870_v53 = vld [vmem:[#allocation38_spill] sm:$0xff] }
 0x358   : > { %v4952_v19 = vpop.eup %4951  ;;  %v6779_v46 = vsub.f32 %v6592_v18, %v3362_v32  ;;  %v3380_v30 = vsub.f32 %v6596_v55, %v3362_v32  ;;  %v4618_v4 = vpop.f32.mrb[3].mxu1  ;;  %v2363_v55 = vadd.f32 %v6528_v31, %v6658_v26  ;;  %v2396_v32 = vmul.f32 0.2, %v2364_v3 }
 0x359   : > { %v4954_v61 = vpop.eup %4953  ;;  %1142 = vmatprep.mubr.bf16.mxu0 %v4952_v19  ;;  %v6782_v43 = vadd.f32 %v4618_v4, %v4617_v6 }
 0x35a   : > { %8786 = vst [vmem:[#allocation49_spill] sm:$0xff] %v6779_v46  ;;  %v4956_v23 = vpop.eup %4955  ;;  %v3410_v52 = vpack.c.bf16 %v3380_v30, %v3378_v41  ;;  %1143 = vmatmul.mubr.bf16.gmra.mrb[28].mxu0 %v4950_v50  ;;  %v2395_v26 = vmul.f32 0.2, %v2363_v55  ;;  %v2428_v19 = vmax.f32 %v2364_v3, %v2396_v32 }
 0x35b   : > { %1969 = vmatprep.mubr.bf16.mxu1 %v4956_v23 }
 0x35c   : > { %v3429_v8 = vmul.bf16 1069105081, %v3410_v52  ;;  %1970 = vmatmul.mubr.bf16.gmra.mrb[24].mxu1 %v4954_v61  ;;  %v2427_v6 = vmax.f32 %v2363_v55, %v2395_v26 }
 0x35d   : > { %v4620_v18 = vpop.f32.mrb[4].mxu1 }
 0x35e   : > { %v4621_v11 = vpop.f32.mrb[5].mxu1  ;;  %4961 = vpow.bf16 %v3429_v8 }
 0x35f   : > { %v6790_v57 = vadd.f32 %v4621_v11, %v4620_v18  ;;  %v4623_v49 = vpop.f32.mrb[6].mxu1  ;;  %v4958_v42 = vpop.eup %4957  ;;  %v6814_v18 = vsel %vm5828_vm4, %v2427_v6, -1e+30  ;;  %v8793_v11 = vld [vmem:[#allocation18_spill] sm:$0xff] }
 0x360   : > { %v4624_v12 = vpop.f32.mrb[7].mxu1  ;;  %1977 = vmatprep.mubr.bf16.mxu1 %v4958_v42  ;;  %v4960_v25 = vpop.eup %4959  ;;  %vm8794_vm9 = vnez %v8793_v11 }
 0x361   : > { %8787 = vst [vmem:[#allocation50_spill] sm:$0xff] %v6790_v57  ;;  %v6800_v17 = vadd.f32 %v4624_v12, %v4623_v49  ;;  %v6818_v49 = vsel %vm8794_vm9, %v2428_v19, -1e+30 }
 0x362   : > { %3320 = vmax.xlane.f32.xlu1 %v3319_v14  ;;  %v2495_v3 = vmax.f32 %v6814_v18, %v6818_v49  ;;  %v2532_v14 = vmax.f32 %v6756_v1, 0.0 }
 0x363   : > { %8789 = vst [vmem:[#allocation52_spill] sm:$0xff] %v6800_v17  ;;  %v4574_v50 = vpop.f32.mrb[16].mxu0 }
 0x364   : > { %1978 = vmatmul.mubr.bf16.gmra.mrb[28].mxu1 %v4960_v25  ;;  %v4575_v7 = vpop.f32.mrb[17].mxu0  ;;  %v2550_v6 = vsub.f32 %v6572_v44, %v2532_v14 }
 0x365   : > { %v6804_v20 = vadd.f32 %v4575_v7, %v4574_v50  ;;  %v4577_v2 = vpop.f32.mrb[18].mxu0  ;;  %v4626_v10 = vpop.f32.mrb[8].mxu1 }
 0x366   : > { %v4578_v41 = vpop.f32.mrb[19].mxu0  ;;  %v4627_v30 = vpop.f32.mrb[9].mxu1 }
 0x367   : > { %v6806_v4 = vadd.f32 %v4578_v41, %v4577_v2  ;;  %v6808_v61 = vadd.f32 %v4627_v30, %v4626_v10  ;;  %v4629_v23 = vpop.f32.mrb[10].mxu1  ;;  %v2644_v2 = vpop.permute.xlu0 %2643  ;;  %v6832_v10 = vsub.f32 %v6568_v24, %v2532_v14  ;;  %v5368_v24 = vld [vmem:[%s8394_s1 + $0x18] sm:$0xff]  }
 0x368   : > { %v4630_v52 = vpop.f32.mrb[11].mxu1 }
 0x369   : > { %8790 = vst [vmem:[#allocation53_spill] sm:$0xff] %v6808_v61  ;;  %v6810_v51 = vadd.f32 %v4630_v52, %v4629_v23  ;;  %v4962_v16 = vpop.eup %4961 }
 0x36a   : > { %3585 = vmatprep.mubr.bf16.mxu1 %v4962_v16 }
 0x36b   : > { %8791 = vst [vmem:[#allocation54_spill] sm:$0xff] %v6810_v51 }
 0x36d   : > { %v4632_v55 = vpop.f32.mrb[12].mxu1 }
 0x36e   : > { %v4633_v42 = vpop.f32.mrb[13].mxu1 }
 0x36f   : > { %v6822_v12 = vadd.f32 %v4633_v42, %v4632_v55  ;;  %v4635_v25 = vpop.f32.mrb[14].mxu1  ;;  %2496 = vmax.xlane.f32.xlu0 %v2495_v3  ;;  %v6855_v42 = vld [vmem:[%s8394_s1 + $0x60] sm:$0xff]  }
 0x370   : > { %v4636_v26 = vpop.f32.mrb[15].mxu1 }
 0x371   : > { %8795 = vst [vmem:[#allocation17_spill] sm:$0xff] %v6822_v12  ;;  %v6824_v32 = vadd.f32 %v4636_v26, %v4635_v25 }
 0x373   : > { %8796 = vst [vmem:[#allocation18_spill] sm:$0xff] %v6824_v32  ;;  %3493 = vrot.lane.b32.xlu1 %v6679_v40, %s5393_s21  ;;  %v2676_v40 = vsel %vm8797_vm10, %v2644_v2, 1065369472  ;;  %v2365_v2 = vadd.f32 %v6528_v31, %v6665_v27  ;;  %vm8804_vm10 = vmmov %vm8801_vm0 }
 0x375   : > { %v2485_v50 = vpop.xlane.xlu1 %2484 }
 0x376   : > { %v2531_v7 = vmax.f32 %v2485_v50, 0.0 }
 0x377   : > { %3477 = vrot.lane.b32.xlu1 %v6751_v58, %s5393_s21 }
 0x378   : > { %v6836_v19 = vsub.f32 %v6620_v62, %v2531_v7  ;;  %v2548_v41 = vsub.f32 %v6624_v22, %v2531_v7 }
 0x379   : > { %v2660_v30 = vpop.permute.xlu1 %2659 }
 0x37a   : > { %v2580_v23 = vpack.c.bf16 %v2550_v6, %v2548_v41  ;;  %v2700_v52 = vsel %vm8798_vm11, %v2660_v30, 1065369472  ;;  %v2366_v6 = vadd.f32 %v6531_v48, %v6665_v27 }
 0x37b   : > { %4662 = vmatprep.subr.bf16.mxu0 %v2700_v52  ;;  %2649 = vrot.lane.b32.xlu1 %v5368_v24, %s5392_s18  ;;  %v3195_v52 = vadd.f32 %v6490_v33, %v6517_v0 }
 0x37c   : > { %v2599_v62 = vmul.bf16 1069105081, %v2580_v23  ;;  %4663 = vmatpush3.bf16.msra.mxu0 %v2676_v40  ;;  %v2397_v40 = vmul.f32 0.2, %v2365_v2  ;;  %v2398_v23 = vmul.f32 0.2, %v2366_v6 }
 0x37d   : > { %v3490_v44 = vpop.permute.xlu1 %3489 }
 0x37e   : > { %v3530_v22 = vsel %vm8799_vm12, %v3490_v44, 1065369472  ;;  %4963 = vpow.bf16 %v2599_v62  ;;  %v3196_v62 = vadd.f32 %v6493_v5, %v6517_v0  ;;  %v2429_v44 = vmax.f32 %v2365_v2, %v2397_v40 }
 0x37f   : > { %4726 = vmatprep.subr.bf16.mxu1 %v3530_v22  ;;  %v2430_v22 = vmax.f32 %v2366_v6, %v2398_v23 }
 0x381   : > { %v3474_v58 = vpop.permute.xlu1 %3473 }
 0x382   : > { %v3506_v16 = vsel %vm8800_vm15, %v3474_v58, 1065369472  ;;  %vm8811_vm15 = vmmov %vm8801_vm0 }
 0x383   : > { %4727 = vmatpush3.bf16.msra.mxu1 %v3506_v16 }
 0x385   : > { %3495 = vrot.lane.b32.xlu0 %v6764_v36, %s5393_s21  ;;  %v2662_v55 = vpop.permute.xlu1 %2661 }
 0x386   : > { %v2703_v3 = vsel %vm8801_vm0, %v2662_v55, 1065369472 }
 0x387   : > { %4664 = vmatprep.subr.bf16.mxu0 %v2703_v3  ;;  %v3227_v3 = vmul.f32 0.2, %v3195_v52 }
 0x389   : > { %2667 = vrot.lane.b32.xlu0 %v6855_v42, %s5392_s18  ;;  %v2646_v26 = vpop.permute.xlu1 %2645  ;;  %v4964_v14 = vpop.eup %4963  ;;  %v3259_v0 = vmax.f32 %v3195_v52, %v3227_v3  ;;  %v3194_v3 = vadd.f32 %v6493_v5, %v6697_v28 }
 0x38a   : > { %v6859_v25 = vpop.xlane.xlu0 %2490  ;;  %v2679_v50 = vsel %vm8802_vm1, %v2646_v26, 1065369472  ;;  %2755 = vmatprep.mubr.bf16.mxu0 %v4964_v14  ;;  %v3228_v26 = vmul.f32 0.2, %v3196_v62  ;;  %vm8812_vm1 = vmmov %vm8801_vm0 }
 0x38b   : > { %4665 = vmatpush3.bf16.msra.mxu0 %v2679_v50 }
 0x38c   : > { %v3260_v2 = vmax.f32 %v3196_v62, %v3228_v26  ;;  %v5370_v62 = vld [vmem:[%s8394_s1 + $0x20] sm:$0xff]  }
 0x38e   : > { %v3492_v36 = vpop.permute.xlu0 %3491 }
 0x38f   : > { %v3533_v7 = vsel %vm8803_vm2, %v3492_v36, 1065369472  ;;  %v8805_v36 = vld [vmem:[#allocation28_spill] sm:$0xff] }
 0x390   : > { %4728 = vmatprep.subr.bf16.mxu1 %v3533_v7  ;;  %vm8806_vm11 = vnez %v8805_v36 }
 0x391   : > { %v6878_v7 = vsel %vm8806_vm11, %v2429_v44, -1e+30  ;;  %v6888_v40 = vsel %vm8806_vm11, %v3259_v0, -1e+30  ;;  %vm8825_vm11 = vmmov %vm8801_vm0 }
 0x392   : > { %v2664_v41 = vpop.permute.xlu0 %2663  ;;  %8809 = vst [vmem:[#allocation28_spill] sm:$0xff] %v6888_v40 }
 0x393   : > { %v2706_v30 = vsel %vm8804_vm10, %v2664_v41, 1065369472  ;;  %v8807_v41 = vld [vmem:[#allocation29_spill] sm:$0xff] }
 0x394   : > { %4666 = vmatprep.subr.bf16.mxu0 %v2706_v30  ;;  %vm8808_vm12 = vnez %v8807_v41  ;;  %v3226_v41 = vmul.f32 0.2, %v3194_v3 }
 0x395   : > { %v6882_v30 = vsel %vm8808_vm12, %v2430_v22, -1e+30  ;;  %v6892_v23 = vsel %vm8808_vm12, %v3260_v2, -1e+30  ;;  %vm8826_vm12 = vmmov %vm8801_vm0 }
 0x396   : > { %v2498_v6 = vmax.f32 %v6878_v7, %v6882_v30  ;;  %8810 = vst [vmem:[#allocation29_spill] sm:$0xff] %v6892_v23  ;;  %v3328_v44 = vmax.f32 %v6888_v40, %v6892_v23 }
 0x398   : > { %v4638_v58 = vpop.f32.mrb[16].mxu1 }
 0x399   : > { %v4639_v16 = vpop.f32.mrb[17].mxu1 }
 0x39a   : > { %v6872_v55 = vadd.f32 %v4639_v16, %v4638_v58  ;;  %v4641_v27 = vpop.f32.mrb[18].mxu1  ;;  %v5371_v16 = vld [vmem:[%s8394_s1 + $0x68] sm:$0xff]  }
 0x39b   : > { %v4642_v14 = vpop.f32.mrb[19].mxu1 }
 0x39c   : > { %v6874_v50 = vadd.f32 %v4642_v14, %v4641_v27 }
 0x39f   : > { %2499 = vmax.xlane.f32.xlu1 %v2498_v6 }
 0x3a8   : > { %3329 = vmax.xlane.f32.xlu0 %v3328_v44  ;;  %v3258_v44 = vmax.f32 %v3194_v3, %v3226_v41  ;;  %v8815_v41 = vld [vmem:[#allocation32_spill] sm:$0xff] }
 0x3a9   : > { %vm8816_vm2 = vnez %v8815_v41  ;;  %v7066_v41 = vld [vmem:[%s8394_s1 + $0x38] sm:$0xff]  }
 0x3b0   : > { %3479 = vrot.lane.b32.xlu1 %v5368_v24, %s5393_s21  ;;  %v3193_v24 = vadd.f32 %v6490_v33, %v6697_v28 }
 0x3b2   : > { %v3225_v36 = vmul.f32 0.2, %v3193_v24 }
 0x3b4   : > { %v3257_v6 = vmax.f32 %v3193_v24, %v3225_v36 }
 0x3b6   : > { %v6922_v28 = vsel %vm5828_vm4, %v3257_v6, -1e+30  ;;  %vm8823_vm4 = vmmov %vm8801_vm0 }
 0x3b7   : > { %8813 = vst [vmem:[#allocation55_spill] sm:$0xff] %v6922_v28 }
 0x3ba   : > { %v6897_v52 = vpop.xlane.xlu1 %2493 }
 0x3be   : > { %2651 = vrot.lane.b32.xlu0 %v5370_v62, %s5392_s18  ;;  %v3476_v22 = vpop.permute.xlu1 %3475 }
 0x3bf   : > { %v3509_v58 = vsel %vm8811_vm15, %v3476_v22, 1065369472  ;;  %v2367_v22 = vadd.f32 %v6528_v31, %v6671_v60  ;;  %vm8827_vm15 = vmmov %vm8801_vm0 }
 0x3c0   : > { %4729 = vmatpush3.bf16.msra.mxu1 %v3509_v58  ;;  %v2368_v58 = vadd.f32 %v6531_v48, %v6671_v60  ;;  %v8817_v60 = vld [vmem:[#allocation33_spill] sm:$0xff] }
 0x3c1   : > { %vm8818_vm10 = vnez %v8817_v60 }
 0x3c2   : > { %2669 = vrot.lane.b32.xlu0 %v5371_v16, %s5392_s18  ;;  %v2400_v15 = vmul.f32 0.2, %v2368_v58 }
 0x3c3   : > { %v6908_v27 = vpop.xlane.xlu0 %3323 }
 0x3c4   : > { %v2432_v36 = vmax.f32 %v2368_v58, %v2400_v15 }
 0x3c6   : > { %v6936_v8 = vsel %vm8818_vm10, %v2432_v36, -1e+30 }
 0x3c7   : > { %v2648_v26 = vpop.permute.xlu0 %2647 }
 0x3c8   : > { %v2682_v14 = vsel %vm8801_vm0, %v2648_v26, 1065369472  ;;  %v6926_v26 = vsel %vm8794_vm9, %v3258_v44, -1e+30  ;;  %vm8824_vm9 = vmmov %vm8801_vm0 }
 0x3c9   : > { %4667 = vmatpush3.bf16.msra.mxu0 %v2682_v14  ;;  %8814 = vst [vmem:[#allocation56_spill] sm:$0xff] %v6926_v26  ;;  %v2399_v14 = vmul.f32 0.2, %v2367_v22  ;;  %v3325_v24 = vmax.f32 %v6922_v28, %v6926_v26 }
 0x3cb   : > { %v2666_v0 = vpop.permute.xlu0 %2665  ;;  %v2431_v3 = vmax.f32 %v2367_v22, %v2399_v14 }
 0x3cc   : > { %v2709_v2 = vsel %vm8812_vm1, %v2666_v0, 1065369472 }
 0x3cd   : > { %4668 = vmatprep.subr.bf16.mxu0 %v2709_v2  ;;  %v6932_v0 = vsel %vm8816_vm2, %v2431_v3, -1e+30 }
 0x3ce   : > { %v2501_v1 = vmax.f32 %v6932_v0, %v6936_v8 }
 0x3d4   : > { %3326 = vmax.xlane.f32.xlu1 %v3325_v24 }
 0x3dd   : > { %v4580_v2 = vpop.f32.mrb[20].mxu0 }
 0x3de   : > { %v4581_v11 = vpop.f32.mrb[21].mxu0 }
 0x3df   : > { %v6938_v6 = vadd.f32 %v4581_v11, %v4580_v2  ;;  %v4583_v44 = vpop.f32.mrb[22].mxu0  ;;  %v5372_v2 = vld [vmem:[%s8394_s1 + $0x28] sm:$0xff]  }
 0x3e0   : > { %v4584_v32 = vpop.f32.mrb[23].mxu0 }
 0x3e1   : > { %8819 = vst [vmem:[#allocation32_spill] sm:$0xff] %v6938_v6  ;;  %v6942_v24 = vadd.f32 %v4584_v32, %v4583_v44  ;;  %v4644_v15 = vpop.f32.mrb[20].mxu1  ;;  %2502 = vmax.xlane.f32.xlu0 %v2501_v1 }
 0x3e2   : > { %v4645_v22 = vpop.f32.mrb[21].mxu1 }
 0x3e3   : > { %8820 = vst [vmem:[#allocation33_spill] sm:$0xff] %v6942_v24  ;;  %v6944_v58 = vadd.f32 %v4645_v22, %v4644_v15  ;;  %v4647_v14 = vpop.f32.mrb[22].mxu1 }
 0x3e4   : > { %v4648_v3 = vpop.f32.mrb[23].mxu1 }
 0x3e5   : > { %8821 = vst [vmem:[#allocation57_spill] sm:$0xff] %v6944_v58  ;;  %v6946_v36 = vadd.f32 %v4648_v3, %v4647_v14  ;;  %3497 = vrot.lane.b32.xlu1 %v6855_v42, %s5393_s21  ;;  %v6963_v42 = vld [vmem:[%s8394_s1 + $0x70] sm:$0xff]   ;;  %v8828_v58 = vld [vmem:[#allocation30_spill] sm:$0xff] }
 0x3e6   : > { %vm8829_vm0 = vnez %v8828_v58 }
 0x3e7   : > { %8822 = vst [vmem:[#allocation58_spill] sm:$0xff] %v6946_v36 }
 0x3e9   : > { %3481 = vrot.lane.b32.xlu1 %v5370_v62, %s5393_s21 }
 0x3ed   : > { %2653 = vrot.lane.b32.xlu1 %v5372_v2, %s5392_s18 }
 0x3ef   : > { %v6955_v32 = vpop.xlane.xlu1 %3320 }
 0x3f3   : > { %v3494_v1 = vpop.permute.xlu1 %3493 }
 0x3f4   : > { %v3536_v11 = vsel %vm8823_vm4, %v3494_v1, 1065369472  ;;  %v2369_v1 = vadd.f32 %v6528_v31, %v6674_v59 }
 0x3f5   : > { %4730 = vmatprep.subr.bf16.mxu1 %v3536_v11  ;;  %v2370_v11 = vadd.f32 %v6531_v48, %v6674_v59 }
 0x3f6   : > { %v2401_v36 = vmul.f32 0.2, %v2369_v1 }
 0x3f7   : > { %3499 = vrot.lane.b32.xlu0 %v5371_v16, %s5393_s21  ;;  %v3478_v44 = vpop.permute.xlu1 %3477  ;;  %v2402_v24 = vmul.f32 0.2, %v2370_v11 }
 0x3f8   : > { %v3512_v15 = vsel %vm8824_vm9, %v3478_v44, 1065369472  ;;  %vm8842_vm9 = vmmov %vm8823_vm4 }
 0x3f9   : > { %4731 = vmatpush3.bf16.msra.mxu1 %v3512_v15  ;;  %v2434_v12 = vmax.f32 %v2370_v11, %v2402_v24 }
 0x3fb   : > { %2671 = vrot.lane.b32.xlu0 %v6963_v42, %s5392_s18  ;;  %v2650_v22 = vpop.permute.xlu1 %2649 }
 0x3fc   : > { %v6967_v62 = vpop.xlane.xlu0 %2496  ;;  %v2685_v14 = vsel %vm8825_vm11, %v2650_v22, 1065369472  ;;  %v3199_v22 = vadd.f32 %v6490_v33, %v6713_v39  ;;  %vm8844_vm11 = vmmov %vm8823_vm4 }
 0x3fd   : > { %4669 = vmatpush3.bf16.msra.mxu0 %v2685_v14  ;;  %v3200_v14 = vadd.f32 %v6493_v5, %v6713_v39 }
 0x3fe   : > { %v3231_v51 = vmul.f32 0.2, %v3199_v22 }
 0x3ff   : > { %v3232_v61 = vmul.f32 0.2, %v3200_v14 }
 0x400   : > { %v3496_v3 = vpop.permute.xlu0 %3495  ;;  %v3263_v6 = vmax.f32 %v3199_v22, %v3231_v51 }
 0x401   : > { %v3539_v16 = vsel %vm8826_vm12, %v3496_v3, 1065369472  ;;  %v2433_v3 = vmax.f32 %v2369_v1, %v2401_v36 }
 0x402   : > { %4732 = vmatprep.subr.bf16.mxu1 %v3539_v16  ;;  %v8830_v16 = vld [vmem:[#allocation31_spill] sm:$0xff]  ;;  %v6992_v39 = vsel %vm8829_vm0, %v3263_v6, -1e+30 }
 0x403   : > { %v6982_v59 = vsel %vm8829_vm0, %v2433_v3, -1e+30  ;;  %vm8831_vm1 = vnez %v8830_v16  ;;  %8832 = vst [vmem:[#allocation30_spill] sm:$0xff] %v6992_v39 }
 0x404   : > { %v2668_v44 = vpop.permute.xlu0 %2667 }
 0x405   : > { %v2712_v15 = vsel %vm8827_vm15, %v2668_v44, 1065369472  ;;  %v6986_v44 = vsel %vm8831_vm1, %v2434_v12, -1e+30 }
 0x406   : > { %4670 = vmatprep.subr.bf16.mxu0 %v2712_v15  ;;  %v3264_v15 = vmax.f32 %v3200_v14, %v3232_v61  ;;  %v2504_v17 = vmax.f32 %v6982_v59, %v6986_v44 }
 0x408   : > { %v6996_v24 = vsel %vm8831_vm1, %v3264_v15, -1e+30 }
 0x409   : > { %8833 = vst [vmem:[#allocation31_spill] sm:$0xff] %v6996_v24  ;;  %v3334_v36 = vmax.f32 %v6992_v39, %v6996_v24  ;;  %v5394_v39 = vmov 16  }
 0x40a   : > { %4880 = vset.pattern.permute.xlu0 %v5394_v39  ;;  %4879 = vset.pattern.permute.xlu1 %v5394_v39 }
 0x411   : > { %2505 = vmax.xlane.f32.xlu1 %v2504_v17 }
 0x41a   : > { %3335 = vmax.xlane.f32.xlu0 %v3334_v36 }
 0x421   : > { %v4586_v12 = vpop.f32.mrb[24].mxu0 }
 0x422   : > { %v4587_v1 = vpop.f32.mrb[25].mxu0  ;;  %3483 = vrot.lane.b32.xlu1 %v5372_v2, %s5393_s21 }
 0x423   : > { %v7000_v51 = vadd.f32 %v4587_v1, %v4586_v12  ;;  %v4589_v61 = vpop.f32.mrb[26].mxu0  ;;  %v5374_v12 = vld [vmem:[%s8394_s1 + $0x30] sm:$0xff]  }
 0x424   : > { %v4590_v17 = vpop.f32.mrb[27].mxu0 }
 0x425   : > { %8834 = vst [vmem:[#allocation59_spill] sm:$0xff] %v7000_v51  ;;  %v7003_v11 = vadd.f32 %v4590_v17, %v4589_v61 }
 0x427   : > { %8835 = vst [vmem:[#allocation60_spill] sm:$0xff] %v7003_v11 }
 0x42c   : > { %v7005_v58 = vpop.xlane.xlu1 %2499 }
 0x42d   : > { %v4592_v6 = vpop.f32.mrb[28].mxu0 }
 0x42e   : > { %v4593_v22 = vpop.f32.mrb[29].mxu0 }
 0x42f   : > { %v7007_v14 = vadd.f32 %v4593_v22, %v4592_v6  ;;  %v4650_v3 = vpop.f32.mrb[24].mxu1  ;;  %v4595_v16 = vpop.f32.mrb[30].mxu0 }
 0x430   : > { %v4651_v15 = vpop.f32.mrb[25].mxu1  ;;  %v4596_v36 = vpop.f32.mrb[31].mxu0  ;;  %2655 = vrot.lane.b32.xlu0 %v5374_v12, %s5392_s18 }
 0x431   : > { %8836 = vst [vmem:[#allocation61_spill] sm:$0xff] %v7007_v14  ;;  %v7013_v2 = vadd.f32 %v4651_v15, %v4650_v3  ;;  %v4653_v1 = vpop.f32.mrb[26].mxu1  ;;  %v7015_v61 = vadd.f32 %v4596_v36, %v4595_v16  ;;  %v3480_v17 = vpop.permute.xlu1 %3479  ;;  %v5375_v14 = vld [vmem:[%s8394_s1 + $0x78] sm:$0xff]   ;;  %v3197_v3 = vadd.f32 %v6490_v33, %v6552_v54  ;;  %v3198_v16 = vadd.f32 %v6493_v5, %v6552_v54 }
 0x432   : > { %v4654_v11 = vpop.f32.mrb[27].mxu1  ;;  %v3515_v6 = vsel %vm8823_vm4, %v3480_v17, 1065369472 }
 0x433   : > { %8837 = vst [vmem:[#allocation62_spill] sm:$0xff] %v7013_v2  ;;  %8838 = vst [vmem:[#allocation63_spill] sm:$0xff] %v7015_v61  ;;  %v7018_v22 = vadd.f32 %v4654_v11, %v4653_v1  ;;  %4733 = vmatpush3.bf16.msra.mxu1 %v3515_v6  ;;  %v3229_v2 = vmul.f32 0.2, %v3197_v3  ;;  %v3230_v57 = vmul.f32 0.2, %v3198_v16 }
 0x434   : > { %2673 = vrot.lane.b32.xlu0 %v5375_v14, %s5392_s18 }
 0x435   : > { %8839 = vst [vmem:[#allocation64_spill] sm:$0xff] %v7018_v22  ;;  %v7024_v51 = vpop.xlane.xlu0 %3329  ;;  %v3261_v40 = vmax.f32 %v3197_v3, %v3229_v2  ;;  %v3262_v28 = vmax.f32 %v3198_v16, %v3230_v57  ;;  %v8847_v3 = vld [vmem:[#allocation36_spill] sm:$0xff] }
 0x436   : > { %8840 = vst [vmem:[#allocation65_spill] sm:$0xff] %v7024_v51  ;;  %vm8848_vm12 = vnez %v8847_v3 }
 0x437   : > { %v4656_v15 = vpop.f32.mrb[28].mxu1 }
 0x438   : > { %v4657_v36 = vpop.f32.mrb[29].mxu1 }
 0x439   : > { %v7030_v17 = vadd.f32 %v4657_v36, %v4656_v15  ;;  %v4659_v11 = vpop.f32.mrb[30].mxu1  ;;  %v2652_v1 = vpop.permute.xlu0 %2651  ;;  %v2371_v15 = vadd.f32 %v6528_v31, %v6616_v21  ;;  %v2372_v36 = vadd.f32 %v6531_v48, %v6616_v21  ;;  %v8850_v21 = vld [vmem:[#allocation37_spill] sm:$0xff] }
 0x43a   : > { %v4660_v61 = vpop.f32.mrb[31].mxu1  ;;  %v2688_v22 = vsel %vm8842_vm9, %v2652_v1, 1065369472  ;;  %vm8851_vm15 = vnez %v8850_v21  ;;  %vm8864_vm9 = vnez %v8863_v9  ;;  %v2383_v9 = vadd.f32 %v6528_v31, %v6709_v56 }
 0x43b   : > { %8841 = vst [vmem:[#allocation66_spill] sm:$0xff] %v7030_v17  ;;  %v7033_v6 = vadd.f32 %v4660_v61, %v4659_v11  ;;  %4671 = vmatpush3.bf16.msra.mxu0 %v2688_v22  ;;  %v7042_v61 = vsel %vm8816_vm2, %v3261_v40, -1e+30  ;;  %v7046_v22 = vsel %vm8818_vm10, %v3262_v28, -1e+30  ;;  %vm8854_vm2 = vmmov %vm8823_vm4 }
 0x43c   : > { %8845 = vst [vmem:[#allocation68_spill] sm:$0xff] %v7042_v61  ;;  %8846 = vst [vmem:[#allocation69_spill] sm:$0xff] %v7046_v22  ;;  %v2403_v39 = vmul.f32 0.2, %v2371_v15  ;;  %v2404_v11 = vmul.f32 0.2, %v2372_v36  ;;  %v3331_v57 = vmax.f32 %v7042_v61, %v7046_v22 }
 0x43d   : > { %8843 = vst [vmem:[#allocation67_spill] sm:$0xff] %v7033_v6  ;;  %v2670_v24 = vpop.permute.xlu0 %2669  ;;  %vm8855_vm10 = vmmov %vm8854_vm2 }
 0x43e   : > { %v2715_v54 = vsel %vm8844_vm11, %v2670_v24, 1065369472  ;;  %v2435_v24 = vmax.f32 %v2371_v15, %v2403_v39  ;;  %v2436_v2 = vmax.f32 %v2372_v36, %v2404_v11  ;;  %vm8856_vm0 = vmmov %vm8854_vm2  ;;  %vm8871_vm11 = vnez %v8870_v53 }
 0x43f   : > { %4672 = vmatprep.subr.bf16.mxu0 %v2715_v54  ;;  %vm8857_vm1 = vmmov %vm8856_vm0 }
 0x440   : > { %v7052_v16 = vsel %vm8848_vm12, %v2435_v24, -1e+30  ;;  %v7056_v40 = vsel %vm8851_vm15, %v2436_v2, -1e+30  ;;  %v2373_v24 = vadd.f32 %v6528_v31, %v6683_v37  ;;  %v2374_v2 = vadd.f32 %v6531_v48, %v6683_v37  ;;  %vm8858_vm4 = vmmov %vm8856_vm0 }
 0x441   : > { %8849 = vst [vmem:[#allocation36_spill] sm:$0xff] %v7052_v16  ;;  %8852 = vst [vmem:[#allocation37_spill] sm:$0xff] %v7056_v40  ;;  %v2507_v28 = vmax.f32 %v7052_v16, %v7056_v40  ;;  %v8860_v16 = vld [vmem:[#allocation4_spill] sm:$0xff] }
 0x446   : > { %3332 = vmax.xlane.f32.xlu1 %v3331_v57 }
 0x453   : > { %2508 = vmax.xlane.f32.xlu0 %v2507_v28  ;;  %v3202_v28 = vadd.f32 %v6493_v5, %v6574_v35 }
 0x457   : > { %3501 = vrot.lane.b32.xlu1 %v6963_v42, %s5393_s21 }
 0x45b   : > { %3485 = vrot.lane.b32.xlu1 %v5374_v12, %s5393_s21 }
 0x45f   : > { %2657 = vrot.lane.b32.xlu1 %v7066_v41, %s5392_s18 }
 0x461   : > { %v7070_v60 = vpop.xlane.xlu1 %3326 }
 0x462   : > { %8853 = vst [vmem:[#allocation70_spill] sm:$0xff] %v7070_v60 }
 0x465   : > { %v3498_v1 = vpop.permute.xlu1 %3497 }
 0x466   : > { %v3542_v54 = vsel %vm8854_vm2, %v3498_v1, 1065369472 }
 0x467   : > { %4734 = vmatprep.subr.bf16.mxu1 %v3542_v54 }
 0x469   : > { %3503 = vrot.lane.b32.xlu0 %v5375_v14, %s5393_s21  ;;  %v3482_v15 = vpop.permute.xlu1 %3481  ;;  %v3201_v14 = vadd.f32 %v6490_v33, %v6574_v35  ;;  %v2377_v35 = vadd.f32 %v6528_v31, %v8860_v16 }
 0x46a   : > { %v3518_v42 = vsel %vm8855_vm10, %v3482_v15, 1065369472  ;;  %v2405_v15 = vmul.f32 0.2, %v2373_v24 }
 0x46b   : > { %4735 = vmatpush3.bf16.msra.mxu1 %v3518_v42  ;;  %v2406_v42 = vmul.f32 0.2, %v2374_v2 }
 0x46d   : > { %v2654_v36 = vpop.permute.xlu1 %2653  ;;  %v2438_v17 = vmax.f32 %v2374_v2, %v2406_v42  ;;  %v8867_v2 = vld [vmem:[#allocation27_spill] sm:$0xff] }
 0x46e   : > { %v7075_v12 = vpop.xlane.xlu0 %2502  ;;  %v2691_v39 = vsel %vm8856_vm0, %v2654_v36, 1065369472  ;;  %v3233_v36 = vmul.f32 0.2, %v3201_v14 }
 0x46f   : > { %4673 = vmatpush3.bf16.msra.mxu0 %v2691_v39  ;;  %v3234_v39 = vmul.f32 0.2, %v3202_v28  ;;  %v7102_v46 = vsel %vm8864_vm9, %v2438_v17, -1e+30 }
 0x470   : > { %v3265_v61 = vmax.f32 %v3201_v14, %v3233_v36  ;;  %8865 = vst [vmem:[#allocation4_spill] sm:$0xff] %v7102_v46  ;;  %v3207_v14 = vadd.f32 %v6490_v33, %v8867_v2 }
 0x471   : > { %v3266_v40 = vmax.f32 %v3202_v28, %v3234_v39  ;;  %v2409_v28 = vmul.f32 0.2, %v2377_v35 }
 0x472   : > { %v3500_v11 = vpop.permute.xlu0 %3499  ;;  %v3239_v3 = vmul.f32 0.2, %v3207_v14 }
 0x473   : > { %v3545_v57 = vsel %vm8857_vm1, %v3500_v11, 1065369472  ;;  %v8859_v11 = vld [vmem:[#allocation6_spill] sm:$0xff] }
 0x474   : > { %4736 = vmatprep.subr.bf16.mxu1 %v3545_v57  ;;  %v2375_v6 = vadd.f32 %v6528_v31, %v8859_v11  ;;  %v2376_v37 = vadd.f32 %v6531_v48, %v8859_v11  ;;  %v2437_v57 = vmax.f32 %v2373_v24, %v2405_v15  ;;  %v7106_v24 = vsel %vm8848_vm12, %v3265_v61, -1e+30 }
 0x475   : > { %8866 = vst [vmem:[#allocation34_spill] sm:$0xff] %v7106_v24  ;;  %v7114_v15 = vsel %vm8851_vm15, %v3266_v40, -1e+30  ;;  %v2441_v40 = vmax.f32 %v2377_v35, %v2409_v28 }
 0x476   : > { %v2672_v1 = vpop.permute.xlu0 %2671  ;;  %v2407_v22 = vmul.f32 0.2, %v2375_v6  ;;  %v7098_v26 = vsel %vm6099_vm8, %v2437_v57, -1e+30  ;;  %8868 = vst [vmem:[#allocation35_spill] sm:$0xff] %v7114_v15  ;;  %v3337_v61 = vmax.f32 %v7106_v24, %v7114_v15  ;;  %v8869_v57 = vld [vmem:[#allocation11_spill] sm:$0xff] }
 0x477   : > { %v2718_v54 = vsel %vm8858_vm4, %v2672_v1, 1065369472  ;;  %v2378_v1 = vadd.f32 %v6531_v48, %v8860_v16  ;;  %8862 = vst [vmem:[#allocation6_spill] sm:$0xff] %v7098_v26  ;;  %v3208_v16 = vadd.f32 %v6493_v5, %v8867_v2  ;;  %v2510_v17 = vmax.f32 %v7098_v26, %v7102_v46  ;;  %vm8895_vm4 = vmmov %vm8857_vm1 }
 0x478   : > { %4674 = vmatprep.subr.bf16.mxu0 %v2718_v54  ;;  %v2408_v54 = vmul.f32 0.2, %v2376_v37  ;;  %v2439_v36 = vmax.f32 %v2375_v6, %v2407_v22  ;;  %v2381_v2 = vadd.f32 %v6528_v31, %v8869_v57  ;;  %v2382_v21 = vadd.f32 %v6531_v48, %v8869_v57  ;;  %v8872_v22 = vld [vmem:[#allocation39_spill] sm:$0xff] }
 0x479   : > { %v2410_v42 = vmul.f32 0.2, %v2378_v1  ;;  %v3240_v11 = vmul.f32 0.2, %v3208_v16  ;;  %vm8873_vm12 = vnez %v8872_v22 }
 0x47a   : > { %v2440_v39 = vmax.f32 %v2376_v37, %v2408_v54  ;;  %v7126_v6 = vsel %vm8871_vm11, %v2439_v36, -1e+30  ;;  %v8874_v54 = vld [vmem:[#allocation3_spill] sm:$0xff]  ;;  %v2413_v24 = vmul.f32 0.2, %v2381_v2 }
 0x47b   : > { %v2442_v51 = vmax.f32 %v2378_v1, %v2410_v42  ;;  %v3212_v15 = vadd.f32 %v6493_v5, %v8874_v54  ;;  %v2414_v46 = vmul.f32 0.2, %v2382_v21  ;;  %v3271_v1 = vmax.f32 %v3207_v14, %v3239_v3  ;;  %v8875_v42 = vld [vmem:[#allocation19_spill] sm:$0xff] }
 0x47c   : > { %v7130_v37 = vsel %vm8873_vm12, %v2440_v39, -1e+30  ;;  %v3272_v28 = vmax.f32 %v3208_v16, %v3240_v11  ;;  %vm8876_vm15 = vnez %v8875_v42  ;;  %v8877_v39 = vld [vmem:[#allocation45_spill] sm:$0xff]  ;;  %v2445_v60 = vmax.f32 %v2381_v2, %v2413_v24 }
 0x47d   : > { %v2513_v35 = vmax.f32 %v7126_v6, %v7130_v37  ;;  %v7140_v36 = vsel %vm8876_vm15, %v2441_v40, -1e+30  ;;  %vm8878_vm2 = vnez %v8877_v39  ;;  %v3244_v26 = vmul.f32 0.2, %v3212_v15  ;;  %v8879_v2 = vld [vmem:[#allocation21_spill] sm:$0xff]  ;;  %v8881_v40 = vld [vmem:[#allocation14_spill] sm:$0xff] }
 0x47e   : > { %v2385_v14 = vadd.f32 %v6528_v31, %v6725_v45  ;;  %v2386_v16 = vadd.f32 %v6531_v48, %v6725_v45  ;;  %v7154_v3 = vsel %vm8876_vm15, %v3271_v1, -1e+30  ;;  %vm8880_vm10 = vnez %v8879_v2  ;;  %vm8909_vm15 = vmmov %vm8857_vm1 }
 0x47f   : > { %vm8882_vm0 = vnez %v8881_v40 }
 0x480   : > { %v2418_v1 = vmul.f32 0.2, %v2386_v16 }
 0x482   : > { %v2450_v42 = vmax.f32 %v2386_v16, %v2418_v1 }
 0x483   : > { %2511 = vmax.xlane.f32.xlu1 %v2510_v17  ;;  %v3211_v17 = vadd.f32 %v6490_v33, %v8874_v54  ;;  %v2446_v54 = vmax.f32 %v2382_v21, %v2414_v46  ;;  %v3276_v46 = vmax.f32 %v3212_v15, %v3244_v26  ;;  %v7164_v21 = vsel %vm8880_vm10, %v2445_v60, -1e+30 }
 0x484   : > { %v7194_v2 = vsel %vm6476_vm6, %v2450_v42, -1e+30 }
 0x485   : > { %v3243_v57 = vmul.f32 0.2, %v3211_v17  ;;  %v7168_v45 = vsel %vm8882_vm0, %v2446_v54, -1e+30  ;;  %v7184_v15 = vsel %vm8882_vm0, %v3276_v46, -1e+30  ;;  %vm8929_vm0 = vmmov %vm8857_vm1 }
 0x486   : > { %8883 = vst [vmem:[#allocation27_spill] sm:$0xff] %v7168_v45  ;;  %v2522_v26 = vmax.f32 %v7164_v21, %v7168_v45  ;;  %8888 = vst [vmem:[#allocation39_spill] sm:$0xff] %v7194_v2 }
 0x487   : > { %v3275_v24 = vmax.f32 %v3211_v17, %v3243_v57 }
 0x488   : > { %3338 = vmax.xlane.f32.xlu0 %v3337_v61  ;;  %v7144_v61 = vsel %vm8878_vm2, %v2442_v51, -1e+30  ;;  %v7158_v51 = vsel %vm8878_vm2, %v3272_v28, -1e+30  ;;  %v3215_v28 = vadd.f32 %v6490_v33, %v6737_v63  ;;  %vm8910_vm2 = vmmov %vm8857_vm1 }
 0x489   : > { %v2516_v38 = vmax.f32 %v7140_v36, %v7144_v61  ;;  %v3346_v11 = vmax.f32 %v7154_v3, %v7158_v51  ;;  %v7180_v60 = vsel %vm8880_vm10, %v3275_v24, -1e+30  ;;  %vm1995_vm10 = vcmp.eq.f32.partialorder %v6874_v50, 0.0 }
 0x48a   : > { %8884 = vst [vmem:[#allocation11_spill] sm:$0xff] %v7180_v60  ;;  %v3247_v39 = vmul.f32 0.2, %v3215_v28 }
 0x48c   : > { %2514 = vmax.xlane.f32.xlu0 %v2513_v35  ;;  %v2417_v35 = vmul.f32 0.2, %v2385_v14 }
 0x48e   : > { %v2449_v17 = vmax.f32 %v2385_v14, %v2417_v35 }
 0x490   : > { %2517 = vmax.xlane.f32.xlu0 %v2516_v38  ;;  %v3216_v38 = vadd.f32 %v6493_v5, %v6737_v63  ;;  %v3352_v63 = vmax.f32 %v7180_v60, %v7184_v15  ;;  %v7190_v45 = vsel %vm6466_vm3, %v2449_v17, -1e+30 }
 0x491   : > { %8886 = vst [vmem:[#allocation38_spill] sm:$0xff] %v7190_v45  ;;  %v2528_v14 = vmax.f32 %v7190_v45, %v7194_v2 }
 0x492   : > { %v3248_v57 = vmul.f32 0.2, %v3216_v38 }
 0x494   : > { %3347 = vmax.xlane.f32.xlu0 %v3346_v11  ;;  %3487 = vrot.lane.b32.xlu1 %v7066_v41, %s5393_s21  ;;  %v3279_v41 = vmax.f32 %v3215_v28, %v3247_v39  ;;  %v3280_v54 = vmax.f32 %v3216_v38, %v3248_v57  ;;  %v8891_v38 = vld [vmem:[#allocation25_spill] sm:$0xff] }
 0x495   : > { %v3204_v17 = vadd.f32 %v6493_v5, %v8891_v38 }
 0x496   : > { %v7200_v16 = vsel %vm6466_vm3, %v3279_v41, -1e+30  ;;  %v7204_v46 = vsel %vm6476_vm6, %v3280_v54, -1e+30  ;;  %vm1159_vm3 = vcmp.eq.f32.partialorder %v6804_v20, 0.0  ;;  %vm8893_vm6 = vmmov %vm8857_vm1 }
 0x497   : > { %8889 = vst [vmem:[#allocation3_spill] sm:$0xff] %v7200_v16  ;;  %8890 = vst [vmem:[#allocation19_spill] sm:$0xff] %v7204_v46  ;;  %v3358_v35 = vmax.f32 %v7200_v16, %v7204_v46  ;;  %v3236_v57 = vmul.f32 0.2, %v3204_v17  ;;  %v1175_v24 = vsel %vm1159_vm3, 1.0, %v6804_v20  ;;  %v8894_v46 = vld [vmem:[#allocation7_spill] sm:$0xff] }
 0x498   : > { %2523 = vmax.xlane.f32.xlu0 %v2522_v26  ;;  %v3203_v26 = vadd.f32 %v6490_v33, %v8891_v38  ;;  %4965 = vrcp.f32 %v1175_v24  ;;  %v2379_v2 = vadd.f32 %v6528_v31, %v8894_v46  ;;  %v2380_v45 = vadd.f32 %v6531_v48, %v8894_v46 }
 0x499   : > { %v3209_v24 = vadd.f32 %v6490_v33, %v6727_v47  ;;  %v3210_v46 = vadd.f32 %v6493_v5, %v6727_v47  ;;  %v2384_v47 = vadd.f32 %v6531_v48, %v6709_v56 }
 0x49a   : > { %v3235_v39 = vmul.f32 0.2, %v3203_v26 }
 0x49b   : > { %v2416_v48 = vmul.f32 0.2, %v2384_v47 }
 0x49c   : > { %3353 = vmax.xlane.f32.xlu0 %v3352_v63  ;;  %v8892_v63 = vld [vmem:[#allocation26_spill] sm:$0xff] }
 0x49d   : > { %v3205_v41 = vadd.f32 %v6490_v33, %v8892_v63  ;;  %v3206_v11 = vadd.f32 %v6493_v5, %v8892_v63 }
 0x49e   : > { %v7206_v40 = vpop.xlane.xlu1 %2505 }
 0x49f   : > { %v3238_v16 = vmul.f32 0.2, %v3206_v11 }
 0x4a0   : > { %2529 = vmax.xlane.f32.xlu0 %v2528_v14 }
 0x4a2   : > { %v3484_v1 = vpop.permute.xlu1 %3483 }
 0x4a3   : > { %v3521_v28 = vsel %vm8857_vm1, %v3484_v1, 1065369472  ;;  %v3268_v1 = vmax.f32 %v3204_v17, %v3236_v57  ;;  %v2411_v17 = vmul.f32 0.2, %v2379_v2 }
 0x4a4   : > { %3359 = vmax.xlane.f32.xlu0 %v3358_v35  ;;  %4737 = vmatpush3.bf16.msra.mxu1 %v3521_v28  ;;  %v3267_v35 = vmax.f32 %v3203_v26, %v3235_v39  ;;  %v3237_v28 = vmul.f32 0.2, %v3205_v41  ;;  %v3270_v26 = vmax.f32 %v3206_v11, %v3238_v16  ;;  %v2412_v39 = vmul.f32 0.2, %v2380_v45 }
 0x4a5   : > { %v7235_v57 = vsel %vm8864_vm9, %v3268_v1, -1e+30  ;;  %v2443_v16 = vmax.f32 %v2379_v2, %v2411_v17  ;;  %v3242_v1 = vmul.f32 0.2, %v3210_v46  ;;  %v2415_v2 = vmul.f32 0.2, %v2383_v9 }
 0x4a6   : > { %v3269_v63 = vmax.f32 %v3205_v41, %v3237_v28  ;;  %v2444_v41 = vmax.f32 %v2380_v45, %v2412_v39  ;;  %v7251_v11 = vsel %vm8873_vm12, %v3270_v26, -1e+30  ;;  %v3213_v45 = vadd.f32 %v6490_v33, %v6733_v29 }
 0x4a7   : > { %v7215_v42 = vpop.xlane.xlu0 %3335  ;;  %v7261_v22 = vsel %vm6322_vm13, %v2443_v16, -1e+30  ;;  %v3214_v26 = vadd.f32 %v6493_v5, %v6733_v29  ;;  %v2447_v17 = vmax.f32 %v2383_v9, %v2415_v2  ;;  %v2533_v28 = vmax.f32 %v6859_v25, 0.0 }
 0x4a8   : > { %v7245_v23 = vsel %vm8871_vm11, %v3269_v63, -1e+30  ;;  %v3274_v63 = vmax.f32 %v3210_v46, %v3242_v1  ;;  %v3245_v39 = vmul.f32 0.2, %v3213_v45  ;;  %vm1160_vm9 = vcmp.eq.f32.partialorder %v6806_v4, 0.0  ;;  %vm8908_vm11 = vmmov %vm8857_vm1 }
 0x4a9   : > { %v3343_v53 = vmax.f32 %v7245_v23, %v7251_v11  ;;  %v7283_v9 = vsel %vm6451_vm14, %v2447_v17, -1e+30  ;;  %v8902_v17 = vld [vmem:[#allocation5_spill] sm:$0xff]  ;;  %vm1987_vm12 = vcmp.eq.f32.partialorder %v6782_v43, 0.0 }
 0x4aa   : > { %v3277_v29 = vmax.f32 %v3213_v45, %v3245_v39  ;;  %v2534_v45 = vmax.f32 %v6897_v52, 0.0  ;;  %v2552_v39 = vsub.f32 %v8902_v17, %v2533_v28 }
 0x4ab   : > { %v2656_v54 = vpop.permute.xlu0 %2655 }
 0x4ac   : > { %v2694_v14 = vsel %vm8893_vm6, %v2656_v54, 1065369472  ;;  %v7231_v54 = vsel %vm6099_vm8, %v3267_v35, -1e+30  ;;  %v3241_v35 = vmul.f32 0.2, %v3209_v24 }
 0x4ad   : > { %4675 = vmatpush3.bf16.msra.mxu0 %v2694_v14  ;;  %v4966_v14 = vpop.eup %4965  ;;  %vm1986_vm8 = vcmp.eq.f32.partialorder %v6772_v34, 0.0 }
 0x4ae   : > { %v3273_v56 = vmax.f32 %v3209_v24, %v3241_v35  ;;  %v2002_v52 = vsel %vm1986_vm8, 1.0, %v6772_v34 }
 0x4af   : > { %v2674_v38 = vpop.permute.xlu0 %2673 }
 0x4b0   : > { %v2721_v60 = vsel %vm8895_vm4, %v2674_v38, 1065369472  ;;  %v7265_v38 = vsel %vm6326_vm7, %v2444_v41, -1e+30  ;;  %v7273_v16 = vsel %vm6322_vm13, %v3273_v56, -1e+30 }
 0x4b1   : > { %4676 = vmatprep.subr.bf16.mxu0 %v2721_v60  ;;  %v3340_v60 = vmax.f32 %v7231_v54, %v7235_v57  ;;  %v2519_v33 = vmax.f32 %v7261_v22, %v7265_v38  ;;  %v7277_v41 = vsel %vm6326_vm7, %v3274_v63, -1e+30  ;;  %v8901_v56 = vld [vmem:[#allocation42_spill] sm:$0xff]  ;;  %vm1994_vm13 = vcmp.eq.f32.partialorder %v6872_v55, 0.0 }
 0x4b2   : > { %v3349_v5 = vmax.f32 %v7273_v16, %v7277_v41  ;;  %v2554_v63 = vsub.f32 %v8901_v56, %v2534_v45  ;;  %v2010_v56 = vsel %vm1994_vm13, 1.0, %v6872_v55 }
 0x4b8   : > { %3341 = vmax.xlane.f32.xlu1 %v3340_v60  ;;  %v2448_v60 = vmax.f32 %v2384_v47, %v2416_v48  ;;  %v8900_v48 = vld [vmem:[#allocation40_spill] sm:$0xff] }
 0x4b9   : > { %vm1151_vm7 = vcmp.eq.f32.partialorder %v8900_v48, 0.0 }
 0x4ba   : > { %1241 = vperm.xlu0 %4880, %v4966_v14   ;;  %v3246_v14 = vmul.f32 0.2, %v3214_v26  ;;  %v7287_v35 = vsel %vm6455_vm5, %v2448_v60, -1e+30  ;;  %v2536_v60 = vmax.f32 %v7005_v58, 0.0  ;;  %v8905_v58 = vld [vmem:[#allocation8_spill] sm:$0xff] }
 0x4bb   : > { %v2525_v1 = vmax.f32 %v7283_v9, %v7287_v35 }
 0x4bc   : > { %3344 = vmax.xlane.f32.xlu1 %v3343_v53  ;;  %v3278_v24 = vmax.f32 %v3214_v26, %v3246_v14  ;;  %v7293_v53 = vsel %vm6451_vm14, %v3277_v29, -1e+30  ;;  %v1167_v26 = vsel %vm1151_vm7, 1.0, %v8900_v48  ;;  %v2535_v14 = vmax.f32 %v6967_v62, 0.0 }
 0x4bd   : > { %4967 = vrcp.f32 %v1167_v26  ;;  %v8906_v26 = vld [vmem:[#allocation41_spill] sm:$0xff] }
 0x4be   : > { %v7297_v2 = vsel %vm6455_vm5, %v3278_v24, -1e+30  ;;  %v8904_v24 = vld [vmem:[#allocation12_spill] sm:$0xff]  ;;  %4969 = vrcp.f32 %v2002_v52  ;;  %v2556_v62 = vsub.f32 %v6818_v49, %v2535_v14  ;;  %vm1152_vm14 = vcmp.eq.f32.partialorder %v8906_v26, 0.0  ;;  %vm8907_vm5 = vmmov %vm8857_vm1 }
 0x4bf   : > { %v3355_v31 = vmax.f32 %v7293_v53, %v7297_v2  ;;  %v2553_v46 = vsub.f32 %v8904_v24, %v2534_v45  ;;  %v2538_v45 = vmax.f32 %v7206_v40, 0.0  ;;  %v2557_v52 = vsub.f32 %v6878_v7, %v2536_v60 }
 0x4c0   : > { %2520 = vmax.xlane.f32.xlu1 %v2519_v33  ;;  %v2582_v33 = vpack.c.bf16 %v2554_v63, %v2552_v39  ;;  %v2555_v40 = vsub.f32 %v6814_v18, %v2535_v14 }
 0x4c1   : > { %v2562_v24 = vsub.f32 %v6986_v44, %v2538_v45 }
 0x4c2   : > { %v2605_v47 = vmul.bf16 1069105081, %v2582_v33  ;;  %v2583_v7 = vpack.c.bf16 %v2557_v52, %v2555_v40  ;;  %v3363_v40 = vmax.f32 %v6955_v32, 0.0 }
 0x4c4   : > { %3350 = vmax.xlane.f32.xlu1 %v3349_v5  ;;  %v8903_v5 = vpack.c.bf16 %v6832_v10, %v6836_v19 }
 0x4c6   : > { %v2596_v29 = vmul.bf16 1069105081, %v8903_v5 }
 0x4c7   : > { %v4968_v33 = vpop.eup %4967 }
 0x4c8   : > { %2526 = vmax.xlane.f32.xlu1 %v2525_v1  ;;  %v2558_v1 = vsub.f32 %v6882_v30, %v2536_v60  ;;  %4971 = vpow.bf16 %v2596_v29  ;;  %v1168_v30 = vsel %vm1152_vm14, 1.0, %v8906_v26 }
 0x4c9   : > { %4973 = vpow.bf16 %v2605_v47 }
 0x4ca   : > { %v2584_v17 = vpack.c.bf16 %v2558_v1, %v2556_v62  ;;  %4975 = vrcp.f32 %v2010_v56 }
 0x4cb   : > { %4977 = vrcp.f32 %v1168_v30  ;;  %v2011_v30 = vsel %vm1995_vm10, 1.0, %v6874_v50 }
 0x4cc   : > { %3356 = vmax.xlane.f32.xlu1 %v3355_v31  ;;  %v2551_v31 = vsub.f32 %v8905_v58, %v2533_v28  ;;  %v2537_v28 = vmax.f32 %v7075_v12, 0.0  ;;  %v2611_v29 = vmul.bf16 1069105081, %v2584_v17  ;;  %v1176_v12 = vsel %vm1160_vm9, 1.0, %v6806_v4  ;;  %v4970_v58 = vpop.eup %4969 }
 0x4ce   : > { %v2581_v10 = vpack.c.bf16 %v2553_v46, %v2551_v31  ;;  %v2560_v47 = vsub.f32 %v6936_v8, %v2537_v28  ;;  %v2003_v31 = vsel %vm1987_vm12, 1.0, %v6782_v43  ;;  %v2559_v17 = vsub.f32 %v6932_v0, %v2537_v28 }
 0x4d0   : > { %v2602_v49 = vmul.bf16 1069105081, %v2581_v10  ;;  %v2586_v44 = vpack.c.bf16 %v2562_v24, %v2560_v47  ;;  %v2561_v10 = vsub.f32 %v6982_v59, %v2538_v45  ;;  %v3382_v47 = vsub.f32 %v6798_v13, %v3363_v40  ;;  %v8920_v13 = vld [vmem:[#allocation29_spill] sm:$0xff] }
 0x4d2   : > { %4979 = vpow.bf16 %v2602_v49 }
 0x4d3   : > { %v7311_v25 = vpop.xlane.xlu1 %3332  ;;  %4981 = vpow.bf16 %v2611_v29  ;;  %v4972_v14 = vpop.eup %4971 }
 0x4d4   : > { %4983 = vrcp.f32 %v1176_v12  ;;  %v4974_v8 = vpop.eup %4973  ;;  %v3364_v12 = vmax.f32 %v6908_v27, 0.0 }
 0x4d5   : > { %v4976_v62 = vpop.eup %4975  ;;  %4985 = vrcp.f32 %v2003_v31  ;;  %v8914_v31 = vld [vmem:[#allocation65_spill] sm:$0xff] }
 0x4d7   : > { %v3502_v63 = vpop.permute.xlu1 %3501 }
 0x4d8   : > { %v3548_v19 = vsel %vm8907_vm5, %v3502_v63, 1065369472  ;;  %v2608_v63 = vmul.bf16 1069105081, %v2583_v7 }
 0x4d9   : > { %4738 = vmatprep.subr.bf16.mxu1 %v3548_v19  ;;  %v2617_v19 = vmul.bf16 1069105081, %v2586_v44 }
 0x4da   : > { %4987 = vpow.bf16 %v2608_v63 }
 0x4db   : > { %v3486_v39 = vpop.permute.xlu1 %3485  ;;  %4989 = vpow.bf16 %v2617_v19  ;;  %v8918_v19 = vld [vmem:[#allocation10_spill] sm:$0xff] }
 0x4dc   : > { %v3524_v5 = vsel %vm8908_vm11, %v3486_v39, 1065369472  ;;  %v4978_v39 = vpop.eup %4977  ;;  %4991 = vrcp.f32 %v2011_v30  ;;  %v8919_v30 = vld [vmem:[#allocation56_spill] sm:$0xff] }
 0x4dd   : > { %1201 = vperm.xlu1 %4879, %v4968_v33   ;;  %4739 = vmatpush3.bf16.msra.mxu1 %v3524_v5  ;;  %v2585_v33 = vpack.c.bf16 %v2561_v10, %v2559_v17  ;;  %v4980_v49 = vpop.eup %4979  ;;  %v3383_v17 = vsub.f32 %v8918_v19, %v3364_v12 }
 0x4de   : > { %v4982_v52 = vpop.eup %4981 }
 0x4df   : > { %v2658_v1 = vpop.permute.xlu1 %2657  ;;  %v4984_v5 = vpop.eup %4983  ;;  %v2614_v59 = vmul.bf16 1069105081, %v2585_v33 }
 0x4e0   : > { %v7332_v46 = vpop.xlane.xlu0 %2508  ;;  %v2697_v60 = vsel %vm8909_vm15, %v2658_v1, 1065369472  ;;  %v4986_v45 = vpop.eup %4985  ;;  %v8911_v1 = vld [vmem:[#allocation47_spill] sm:$0xff] }
 0x4e1   : > { %2036 = vperm.xlu1 %4879, %v4970_v58   ;;  %4677 = vmatpush3.bf16.msra.mxu0 %v2697_v60  ;;  %4993 = vpow.bf16 %v2614_v59  ;;  %v3384_v58 = vsub.f32 %v8911_v1, %v3364_v12  ;;  %v8912_v60 = vld [vmem:[#allocation70_spill] sm:$0xff]  ;;  %v2539_v59 = vmax.f32 %v7332_v46, 0.0 }
 0x4e2   : > { %v3365_v44 = vmax.f32 %v8912_v60, 0.0 }
 0x4e3   : > { %v3412_v7 = vpack.c.bf16 %v3384_v58, %v3382_v47  ;;  %v8923_v47 = vld [vmem:[#allocation28_spill] sm:$0xff] }
 0x4e4   : > { %v3504_v18 = vpop.permute.xlu0 %3503  ;;  %2756 = vmatmul.mubr.bf16.vlgmr.msra.gmra.mrb[32].mxu0 %v4972_v14  ;;  %v3386_v27 = vsub.f32 %v8919_v30, %v3365_v44  ;;  %v8930_v30 = vld [vmem:[#allocation68_spill] sm:$0xff] }
 0x4e5   : > { %v3551_v56 = vsel %vm8910_vm2, %v3504_v18, 1065369472  ;;  %2076 = vperm.xlu1 %4879, %v4976_v62   ;;  %2763 = vmatprep.mubr.bf16.mxu0 %v4974_v8  ;;  %v4988_v29 = vpop.eup %4987  ;;  %v8913_v18 = vld [vmem:[#allocation51_spill] sm:$0xff]  ;;  %v8915_v8 = vld [vmem:[#allocation49_spill] sm:$0xff]  ;;  %v8916_v62 = vld [vmem:[#allocation48_spill] sm:$0xff] }
 0x4e6   : > { %4740 = vmatprep.subr.bf16.mxu1 %v3551_v56  ;;  %v4990_v0 = vpop.eup %4989  ;;  %v3381_v14 = vsub.f32 %v8913_v18, %v3363_v40  ;;  %v3366_v56 = vmax.f32 %v8914_v31, 0.0  ;;  %v8917_v63 = vpack.c.bf16 %v8915_v8, %v8916_v62  ;;  %v3435_v32 = vmul.bf16 1069105081, %v3412_v7  ;;  %v8924_v7 = vld [vmem:[#allocation31_spill] sm:$0xff]  ;;  %v8925_v18 = vld [vmem:[#allocation36_spill] sm:$0xff]  ;;  %v8927_v8 = vld [vmem:[#allocation6_spill] sm:$0xff] }
 0x4e7   : > { %v4992_v28 = vpop.eup %4991  ;;  %v8928_v62 = vld [vmem:[#allocation4_spill] sm:$0xff] }
 0x4e8   : > { %v3426_v10 = vmul.bf16 1069105081, %v8917_v63  ;;  %v3388_v33 = vsub.f32 %v8920_v13, %v3366_v56  ;;  %v3387_v1 = vsub.f32 %v8923_v47, %v3366_v56 }
 0x4e9   : > { %1206 = vperm.xlu1 %4879, %v4978_v39   ;;  %v3411_v39 = vpack.c.bf16 %v3383_v17, %v3381_v14  ;;  %v8926_v14 = vld [vmem:[#allocation37_spill] sm:$0xff] }
 0x4ea   : > { %4995 = vpow.bf16 %v3426_v10  ;;  %v2564_v31 = vsub.f32 %v8926_v14, %v2539_v59 }
 0x4eb   : > { %4997 = vpow.bf16 %v3435_v32 }
 0x4ec   : > { %2764 = vmatmul.mubr.bf16.gmra.mrb[36].mxu0 %v4980_v49  ;;  %v4994_v24 = vpop.eup %4993  ;;  %v3367_v49 = vmax.f32 %v7311_v25, 0.0  ;;  %v2563_v25 = vsub.f32 %v8925_v18, %v2539_v59 }
 0x4ed   : > { %1246 = vperm.xlu1 %4879, %v4984_v5   ;;  %2771 = vmatprep.mubr.bf16.mxu0 %v4982_v52  ;;  %v3414_v52 = vpack.c.bf16 %v3388_v33, %v3386_v27  ;;  %v3368_v5 = vmax.f32 %v7215_v42, 0.0 }
 0x4ee   : > { %v3389_v27 = vsub.f32 %v8930_v30, %v3367_v49  ;;  %v8932_v30 = vld [vmem:[#allocation34_spill] sm:$0xff] }
 0x4ef   : > { %v3441_v58 = vmul.bf16 1069105081, %v3414_v52  ;;  %v3392_v60 = vsub.f32 %v8924_v7, %v3368_v5 }
 0x4f1   : > { %2041 = vperm.xlu1 %4879, %v4986_v45   ;;  %v3432_v45 = vmul.bf16 1069105081, %v3411_v39 }
 0x4f3   : > { %4999 = vpow.bf16 %v3432_v45 }
 0x4f4   : > { %2772 = vmatmul.mubr.bf16.gmra.mrb[40].mxu0 %v4988_v29  ;;  %v8921_v29 = vld [vmem:[#allocation55_spill] sm:$0xff]  ;;  %5001 = vpow.bf16 %v3441_v58 }
 0x4f5   : > { %2081 = vperm.xlu1 %4879, %v4992_v28   ;;  %2779 = vmatprep.mubr.bf16.mxu0 %v4990_v0  ;;  %v3385_v0 = vsub.f32 %v8921_v29, %v3365_v44  ;;  %v4996_v52 = vpop.eup %4995 }
 0x4f6   : > { %v4998_v29 = vpop.eup %4997 }
 0x4f7   : > { %v3413_v44 = vpack.c.bf16 %v3387_v1, %v3385_v0 }
 0x4f9   : > { %v3438_v59 = vmul.bf16 1069105081, %v3413_v44 }
 0x4fc   : > { %2780 = vmatmul.mubr.bf16.gmra.mrb[44].mxu0 %v4994_v24  ;;  %v8922_v24 = vld [vmem:[#allocation69_spill] sm:$0xff] }
 0x4fd   : > { %v3390_v40 = vsub.f32 %v8922_v24, %v3367_v49 }
 0x4ff   : > { %v3416_v19 = vpack.c.bf16 %v3392_v60, %v3390_v40 }
 0x501   : > { %v3447_v45 = vmul.bf16 1069105081, %v3416_v19 }
 0x510   : > { %v2512_v28 = vpop.xlane.xlu1 %2511 }
 0x511   : > { %v2540_v12 = vmax.f32 %v2512_v28, 0.0  ;;  %v8931_v28 = vld [vmem:[#allocation30_spill] sm:$0xff] }
 0x512   : > { %v3391_v24 = vsub.f32 %v8931_v28, %v3368_v5  ;;  %v5000_v5 = vpop.eup %4999 }
 0x513   : > { %v2565_v42 = vsub.f32 %v8927_v8, %v2540_v12  ;;  %v2566_v46 = vsub.f32 %v8928_v62, %v2540_v12  ;;  %v5002_v14 = vpop.eup %5001 }
 0x514   : > { %v3488_v10 = vpop.permute.xlu1 %3487  ;;  %v3415_v40 = vpack.c.bf16 %v3391_v24, %v3389_v27 }
 0x515   : > { %v7368_v63 = vpop.xlane.xlu0 %3338  ;;  %v2587_v17 = vpack.c.bf16 %v2565_v42, %v2563_v25  ;;  %v2588_v32 = vpack.c.bf16 %v2566_v46, %v2564_v31  ;;  %v3527_v56 = vsel %vm8929_vm0, %v3488_v10, 1065369472 }
 0x516   : > { %4741 = vmatpush3.bf16.msra.mxu1 %v3527_v56  ;;  %v3444_v60 = vmul.bf16 1069105081, %v3415_v40  ;;  %v3369_v19 = vmax.f32 %v7368_v63, 0.0 }
 0x517   : > { %v2620_v39 = vmul.bf16 1069105081, %v2587_v17  ;;  %v2623_v13 = vmul.bf16 1069105081, %v2588_v32 }
 0x518   : > { %v3393_v27 = vsub.f32 %v8932_v30, %v3369_v19 }
 0x519   : > { %v2515_v33 = vpop.xlane.xlu0 %2514  ;;  %5003 = vpow.bf16 %v2620_v39  ;;  %3586 = vmatmul.mubr.bf16.vlgmr.msra.gmra.mrb[32].mxu1 %v4996_v52  ;;  %v8933_v39 = vld [vmem:[#allocation35_spill] sm:$0xff] }
 0x51a   : > { %5005 = vpow.bf16 %v2623_v13  ;;  %v2541_v0 = vmax.f32 %v2515_v33, 0.0  ;;  %3593 = vmatprep.mubr.bf16.mxu1 %v4998_v29  ;;  %v3394_v13 = vsub.f32 %v8933_v39, %v3369_v19 }
 0x51b   : > { %5007 = vpow.bf16 %v3438_v59 }
 0x51c   : > { %5009 = vpow.bf16 %v3447_v45  ;;  %v2567_v49 = vsub.f32 %v7126_v6, %v2541_v0  ;;  %v2568_v1 = vsub.f32 %v7130_v37, %v2541_v0 }
 0x51d   : > { %v2518_v12 = vpop.xlane.xlu0 %2517  ;;  %5011 = vpow.bf16 %v3444_v60 }
 0x51e   : > { %v2542_v47 = vmax.f32 %v2518_v12, 0.0 }
 0x520   : > { %v2569_v58 = vsub.f32 %v7140_v36, %v2542_v47  ;;  %v2570_v7 = vsub.f32 %v7144_v61, %v2542_v47 }
 0x521   : > { %3594 = vmatmul.mubr.bf16.gmra.mrb[36].mxu1 %v5000_v5  ;;  %v3348_v44 = vpop.xlane.xlu0 %3347 }
 0x522   : > { %v2589_v18 = vpack.c.bf16 %v2569_v58, %v2567_v49  ;;  %v2590_v25 = vpack.c.bf16 %v2570_v7, %v2568_v1  ;;  %3601 = vmatprep.mubr.bf16.mxu1 %v5002_v14  ;;  %v3372_v56 = vmax.f32 %v3348_v44, 0.0 }
 0x524   : > { %v2626_v31 = vmul.bf16 1069105081, %v2589_v18  ;;  %v2629_v8 = vmul.bf16 1069105081, %v2590_v25  ;;  %v5004_v42 = vpop.eup %5003  ;;  %v3399_v0 = vsub.f32 %v7154_v3, %v3372_v56  ;;  %v3400_v63 = vsub.f32 %v7158_v51, %v3372_v56  ;;  %v8934_v25 = vld [vmem:[#allocation27_spill] sm:$0xff] }
 0x525   : > { %v5006_v62 = vpop.eup %5005  ;;  %v2524_v10 = vpop.xlane.xlu0 %2523 }
 0x526   : > { %5013 = vpow.bf16 %v2626_v31  ;;  %2787 = vmatprep.mubr.bf16.mxu0 %v5006_v62  ;;  %v5008_v6 = vpop.eup %5007  ;;  %v2544_v1 = vmax.f32 %v2524_v10, 0.0 }
 0x527   : > { %5015 = vpow.bf16 %v2629_v8  ;;  %2788 = vmatmul.mubr.bf16.gmra.mrb[48].mxu0 %v5004_v42  ;;  %v5010_v37 = vpop.eup %5009 }
 0x528   : > { %v5012_v36 = vpop.eup %5011  ;;  %v2573_v3 = vsub.f32 %v7164_v21, %v2544_v1  ;;  %v2574_v51 = vsub.f32 %v8934_v25, %v2544_v1  ;;  %v8939_v1 = vld [vmem:[#allocation3_spill] sm:$0xff] }
 0x529   : > { %3602 = vmatmul.mubr.bf16.gmra.mrb[40].mxu1 %v5008_v6  ;;  %v3354_v33 = vpop.xlane.xlu0 %3353 }
 0x52a   : > { %3609 = vmatprep.mubr.bf16.mxu1 %v5010_v37  ;;  %v3374_v60 = vmax.f32 %v3354_v33, 0.0 }
 0x52c   : > { %v3404_v37 = vsub.f32 %v7184_v15, %v3374_v60 }
 0x52d   : > { %v2530_v7 = vpop.xlane.xlu0 %2529 }
 0x52e   : > { %v2546_v42 = vmax.f32 %v2530_v7, 0.0 }
 0x531   : > { %v5014_v61 = vpop.eup %5013  ;;  %3610 = vmatmul.mubr.bf16.gmra.mrb[44].mxu1 %v5012_v36  ;;  %v3360_v36 = vpop.xlane.xlu0 %3359 }
 0x532   : > { %v5016_v46 = vpop.eup %5015  ;;  %v3376_v30 = vmax.f32 %v3360_v36, 0.0 }
 0x533   : > { %2795 = vmatprep.mubr.bf16.mxu0 %v5016_v46 }
 0x534   : > { %2796 = vmatmul.mubr.bf16.gmra.mrb[52].mxu0 %v5014_v61 }
 0x545   : > { %v3342_v17 = vpop.xlane.xlu1 %3341 }
 0x546   : > { %v3370_v32 = vmax.f32 %v3342_v17, 0.0 }
 0x548   : > { %v3395_v52 = vsub.f32 %v7231_v54, %v3370_v32  ;;  %v3396_v59 = vsub.f32 %v7235_v57, %v3370_v32  ;;  %v8936_v32 = vld [vmem:[#allocation38_spill] sm:$0xff] }
 0x549   : > { %v3345_v29 = vpop.xlane.xlu1 %3344  ;;  %v2577_v56 = vsub.f32 %v8936_v32, %v2546_v42 }
 0x54a   : > { %v3417_v28 = vpack.c.bf16 %v3395_v52, %v3393_v27  ;;  %v3418_v24 = vpack.c.bf16 %v3396_v59, %v3394_v13  ;;  %v3371_v45 = vmax.f32 %v3345_v29, 0.0  ;;  %v8937_v13 = vld [vmem:[#allocation39_spill] sm:$0xff] }
 0x54c   : > { %v3450_v40 = vmul.bf16 1069105081, %v3417_v28  ;;  %v3453_v12 = vmul.bf16 1069105081, %v3418_v24  ;;  %v3397_v47 = vsub.f32 %v7245_v23, %v3371_v45  ;;  %v3398_v49 = vsub.f32 %v7251_v11, %v3371_v45  ;;  %v8938_v24 = vld [vmem:[#allocation19_spill] sm:$0xff] }
 0x54d   : > { %v2521_v58 = vpop.xlane.xlu1 %2520  ;;  %v3408_v45 = vsub.f32 %v8938_v24, %v3376_v30 }
 0x54e   : > { %5017 = vpow.bf16 %v3450_v40  ;;  %v3419_v54 = vpack.c.bf16 %v3399_v0, %v3397_v47  ;;  %v3420_v57 = vpack.c.bf16 %v3400_v63, %v3398_v49  ;;  %v2543_v5 = vmax.f32 %v2521_v58, 0.0 }
 0x54f   : > { %5019 = vpow.bf16 %v3453_v12 }
 0x550   : > { %v3459_v18 = vmul.bf16 1069105081, %v3420_v57  ;;  %v2571_v14 = vsub.f32 %v7261_v22, %v2543_v5  ;;  %v2572_v23 = vsub.f32 %v7265_v38, %v2543_v5  ;;  %v3456_v11 = vmul.bf16 1069105081, %v3419_v54  ;;  %v8935_v22 = vld [vmem:[#allocation11_spill] sm:$0xff] }
 0x551   : > { %v3351_v31 = vpop.xlane.xlu1 %3350  ;;  %v3403_v19 = vsub.f32 %v8935_v22, %v3374_v60 }
 0x552   : > { %v3373_v8 = vmax.f32 %v3351_v31, 0.0  ;;  %5021 = vpow.bf16 %v3459_v18  ;;  %v2591_v62 = vpack.c.bf16 %v2573_v3, %v2571_v14  ;;  %v2592_v6 = vpack.c.bf16 %v2574_v51, %v2572_v23 }
 0x553   : > { %5023 = vpow.bf16 %v3456_v11 }
 0x554   : > { %v3401_v61 = vsub.f32 %v7273_v16, %v3373_v8  ;;  %v3402_v21 = vsub.f32 %v7277_v41, %v3373_v8  ;;  %v2632_v46 = vmul.bf16 1069105081, %v2591_v62  ;;  %v2635_v44 = vmul.bf16 1069105081, %v2592_v6 }
 0x555   : > { %v2527_v10 = vpop.xlane.xlu1 %2526  ;;  %v2578_v41 = vsub.f32 %v8937_v13, %v2546_v42 }
 0x556   : > { %v3422_v38 = vpack.c.bf16 %v3404_v37, %v3402_v21  ;;  %v2545_v17 = vmax.f32 %v2527_v10, 0.0  ;;  %5025 = vpow.bf16 %v2632_v46  ;;  %v3421_v27 = vpack.c.bf16 %v3403_v19, %v3401_v61  ;;  %v8940_v37 = vld [vmem:[#allocation2_spill] sm:$0xff] }
 0x557   : > { %5027 = vpow.bf16 %v2635_v44  ;;  %vm1153_vm3 = vcmp.eq.f32.partialorder %v8940_v37, 0.0  ;;  %v8941_v44 = vld [vmem:[#allocation50_spill] sm:$0xff] }
 0x558   : > { %v3465_v15 = vmul.bf16 1069105081, %v3422_v38  ;;  %v2575_v39 = vsub.f32 %v7283_v9, %v2545_v17  ;;  %v2576_v33 = vsub.f32 %v7287_v35, %v2545_v17  ;;  %v3462_v63 = vmul.bf16 1069105081, %v3421_v27 }
 0x559   : > { %v5018_v16 = vpop.eup %5017  ;;  %v3357_v52 = vpop.xlane.xlu1 %3356  ;;  %v3407_v35 = vsub.f32 %v8939_v1, %v3376_v30  ;;  %v1169_v21 = vsel %vm1153_vm3, 1.0, %v8940_v37  ;;  %vm1988_vm4 = vcmp.eq.f32.partialorder %v8941_v44, 0.0 }
 0x55a   : > { %v5020_v59 = vpop.eup %5019  ;;  %v2593_v29 = vpack.c.bf16 %v2577_v56, %v2575_v39  ;;  %v3375_v28 = vmax.f32 %v3357_v52, 0.0  ;;  %5029 = vpow.bf16 %v3465_v15  ;;  %v2594_v0 = vpack.c.bf16 %v2578_v41, %v2576_v33 }
 0x55b   : > { %3617 = vmatprep.mubr.bf16.mxu1 %v5020_v59  ;;  %v2004_v17 = vsel %vm1988_vm4, 1.0, %v8941_v44 }
 0x55c   : > { %v2638_v40 = vmul.bf16 1069105081, %v2593_v29  ;;  %v3405_v12 = vsub.f32 %v7293_v53, %v3375_v28  ;;  %v3406_v9 = vsub.f32 %v7297_v2, %v3375_v28  ;;  %3618 = vmatmul.mubr.bf16.gmra.mrb[48].mxu1 %v5018_v16  ;;  %v2641_v47 = vmul.bf16 1069105081, %v2594_v0 }
 0x55d   : > { %v5022_v49 = vpop.eup %5021 }
 0x55e   : > { %5031 = vpow.bf16 %v2638_v40  ;;  %v3424_v58 = vpack.c.bf16 %v3408_v45, %v3406_v9  ;;  %3625 = vmatprep.mubr.bf16.mxu1 %v5022_v49  ;;  %v3423_v7 = vpack.c.bf16 %v3407_v35, %v3405_v12  ;;  %v5024_v57 = vpop.eup %5023 }
 0x55f   : > { %5033 = vpow.bf16 %v2641_v47  ;;  %v8944_v47 = vld [vmem:[#allocation44_spill] sm:$0xff] }
 0x560   : > { %5035 = vpow.bf16 %v3462_v63  ;;  %v3471_v54 = vmul.bf16 1069105081, %v3424_v58  ;;  %v3468_v18 = vmul.bf16 1069105081, %v3423_v7  ;;  %vm1154_vm7 = vcmp.eq.f32.partialorder %v8944_v47, 0.0  ;;  %v8945_v58 = vld [vmem:[#allocation52_spill] sm:$0xff] }
 0x561   : > { %v5026_v5 = vpop.eup %5025  ;;  %v1170_v35 = vsel %vm1154_vm7, 1.0, %v8944_v47  ;;  %vm1989_vm13 = vcmp.eq.f32.partialorder %v8945_v58, 0.0 }
 0x562   : > { %v5028_v60 = vpop.eup %5027  ;;  %5037 = vpow.bf16 %v3471_v54 }
 0x563   : > { %2803 = vmatprep.mubr.bf16.mxu0 %v5028_v60  ;;  %5039 = vpow.bf16 %v3468_v18  ;;  %v2005_v60 = vsel %vm1989_vm13, 1.0, %v8945_v58 }
 0x564   : > { %3626 = vmatmul.mubr.bf16.gmra.mrb[52].mxu1 %v5024_v57  ;;  %2804 = vmatmul.mubr.bf16.gmra.mrb[56].mxu0 %v5026_v5 }
 0x565   : > { %v5030_v53 = vpop.eup %5029 }
 0x566   : > { %3633 = vmatprep.mubr.bf16.mxu1 %v5030_v53 }
 0x569   : > { %v5032_v2 = vpop.eup %5031 }
 0x56a   : > { %v5034_v3 = vpop.eup %5033 }
 0x56b   : > { %v5036_v25 = vpop.eup %5035  ;;  %2811 = vmatprep.mubr.bf16.mxu0 %v5034_v3 }
 0x56c   : > { %3634 = vmatmul.mubr.bf16.gmra.mrb[56].mxu1 %v5036_v25  ;;  %2812 = vmatmul.mubr.bf16.gmra.mrb[60].mxu0 %v5032_v2 }
 0x56d   : > { %v5038_v51 = vpop.eup %5037 }
 0x56e   : > { %3641 = vmatprep.mubr.bf16.mxu1 %v5038_v51  ;;  %v5040_v14 = vpop.eup %5039 }
 0x574   : > { %3642 = vmatmul.mubr.bf16.gmra.mrb[60].mxu1 %v5040_v14 }
 0x5b7   : > { %v4678_v23 = vpop.f32.mrb[32].mxu0 }
 0x5b8   : > { %v4679_v31 = vpop.f32.mrb[33].mxu0 }
 0x5b9   : > { %v7402_v11 = vadd.f32 %v4679_v31, %v4678_v23  ;;  %v4681_v8 = vpop.f32.mrb[34].mxu0 }
 0x5ba   : > { %v4682_v42 = vpop.f32.mrb[35].mxu0 }
 0x5bb   : > { %vm2820_vm1 = vcmp.eq.f32.partialorder %v7402_v11, 0.0  ;;  %v7405_v62 = vadd.f32 %v4682_v42, %v4681_v8 }
 0x5bc   : > { %v2836_v6 = vsel %vm2820_vm1, 1.0, %v7402_v11 }
 0x5bd   : > { %5041 = vrcp.f32 %v2836_v6  ;;  %vm2821_vm6 = vcmp.eq.f32.partialorder %v7405_v62, 0.0 }
 0x5be   : > { %v2837_v36 = vsel %vm2821_vm6, 1.0, %v7405_v62 }
 0x5bf   : > { %5043 = vrcp.f32 %v2837_v36  ;;  %v4684_v61 = vpop.f32.mrb[36].mxu0 }
 0x5c0   : > { %v4685_v46 = vpop.f32.mrb[37].mxu0  ;;  %5045 = vrcp.f32 %v1169_v21 }
 0x5c1   : > { %v7413_v10 = vadd.f32 %v4685_v46, %v4684_v61  ;;  %v4687_v22 = vpop.f32.mrb[38].mxu0  ;;  %5047 = vrcp.f32 %v2004_v17 }
 0x5c2   : > { %v4688_v19 = vpop.f32.mrb[39].mxu0 }
 0x5c3   : > { %v7415_v38 = vadd.f32 %v4688_v19, %v4687_v22  ;;  %vm2822_vm5 = vcmp.eq.f32.partialorder %v7413_v10, 0.0 }
 0x5c4   : > { %v2838_v21 = vsel %vm2822_vm5, 1.0, %v7413_v10 }
 0x5c5   : > { %vm2823_vm11 = vcmp.eq.f32.partialorder %v7415_v38, 0.0 }
 0x5c7   : > { %v5042_v32 = vpop.eup %5041  ;;  %v4690_v56 = vpop.f32.mrb[40].mxu0 }
 0x5c8   : > { %v4691_v30 = vpop.f32.mrb[41].mxu0  ;;  %2870 = vperm.xlu1 %4879, %v5042_v32  }
 0x5c9   : > { %v5044_v27 = vpop.eup %5043  ;;  %v7418_v15 = vadd.f32 %v4691_v30, %v4690_v56  ;;  %v4693_v39 = vpop.f32.mrb[42].mxu0  ;;  %v8946_v56 = vld [vmem:[#allocation32_spill] sm:$0xff]  ;;  %v2839_v30 = vsel %vm2823_vm11, 1.0, %v7415_v38 }
 0x5ca   : > { %v4694_v16 = vpop.f32.mrb[43].mxu0  ;;  %2875 = vperm.xlu0 %4880, %v5044_v27   ;;  %v5046_v41 = vpop.eup %5045  ;;  %vm1161_vm15 = vcmp.eq.f32.partialorder %v8946_v56, 0.0 }
 0x5cb   : > { %v7420_v13 = vadd.f32 %v4694_v16, %v4693_v39  ;;  %v5048_v59 = vpop.eup %5047  ;;  %v8947_v39 = vld [vmem:[#allocation16_spill] sm:$0xff]  ;;  %vm2824_vm7 = vcmp.eq.f32.partialorder %v7418_v15, 0.0 }
 0x5cc   : > { %vm1155_vm2 = vcmp.eq.f32.partialorder %v8947_v39, 0.0 }
 0x5ce   : > { %1211 = vperm.xlu0 %4880, %v5046_v41   ;;  %v1177_v41 = vsel %vm1161_vm15, 1.0, %v8946_v56 }
 0x5cf   : > { %v4696_v33 = vpop.f32.mrb[44].mxu0 }
 0x5d0   : > { %v4697_v52 = vpop.f32.mrb[45].mxu0 }
 0x5d1   : > { %v7422_v29 = vadd.f32 %v4697_v52, %v4696_v33  ;;  %v4699_v28 = vpop.f32.mrb[46].mxu0 }
 0x5d2   : > { %v4700_v24 = vpop.f32.mrb[47].mxu0  ;;  %2046 = vperm.xlu0 %4880, %v5048_v59   ;;  %v8948_v59 = vld [vmem:[#allocation57_spill] sm:$0xff] }
 0x5d3   : > { %8942 = vst [vmem:[#allocation45_spill] sm:$0xff] %v7422_v29  ;;  %v7424_v45 = vadd.f32 %v4700_v24, %v4699_v28  ;;  %vm1996_vm10 = vcmp.eq.f32.partialorder %v8948_v59, 0.0 }
 0x5d5   : > { %8943 = vst [vmem:[#allocation21_spill] sm:$0xff] %v7424_v45 }
 0x5ec   : > { %v4742_v0 = vpop.f32.mrb[32].mxu1 }
 0x5ed   : > { %v4743_v63 = vpop.f32.mrb[33].mxu1 }
 0x5ee   : > { %v7426_v40 = vadd.f32 %v4743_v63, %v4742_v0  ;;  %v4745_v12 = vpop.f32.mrb[34].mxu1  ;;  %v1171_v63 = vsel %vm1155_vm2, 1.0, %v8947_v39 }
 0x5ef   : > { %v4746_v9 = vpop.f32.mrb[35].mxu1 }
 0x5f0   : > { %vm3650_vm8 = vcmp.eq.f32.partialorder %v7426_v40, 0.0  ;;  %v7430_v49 = vadd.f32 %v4746_v9, %v4745_v12 }
 0x5f1   : > { %v3666_v1 = vsel %vm3650_vm8, 1.0, %v7426_v40  ;;  %vm2825_vm8 = vcmp.eq.f32.partialorder %v7420_v13, 0.0 }
 0x5f2   : > { %5049 = vrcp.f32 %v3666_v1  ;;  %vm3651_vm14 = vcmp.eq.f32.partialorder %v7430_v49, 0.0 }
 0x5f3   : > { %5051 = vrcp.f32 %v1170_v35  ;;  %v3667_v3 = vsel %vm3651_vm14, 1.0, %v7430_v49 }
 0x5f4   : > { %v4748_v7 = vpop.f32.mrb[36].mxu1  ;;  %5053 = vrcp.f32 %v2005_v60  ;;  %v2012_v60 = vsel %vm1996_vm10, 1.0, %v8948_v59 }
 0x5f5   : > { %v4749_v54 = vpop.f32.mrb[37].mxu1  ;;  %5055 = vrcp.f32 %v3667_v3 }
 0x5f6   : > { %v7435_v57 = vadd.f32 %v4749_v54, %v4748_v7  ;;  %v4751_v5 = vpop.f32.mrb[38].mxu1  ;;  %v8951_v7 = vld [vmem:[#allocation53_spill] sm:$0xff] }
 0x5f7   : > { %v4752_v18 = vpop.f32.mrb[39].mxu1  ;;  %vm1990_vm0 = vcmp.eq.f32.partialorder %v8951_v7, 0.0 }
 0x5f8   : > { %v7439_v53 = vadd.f32 %v4752_v18, %v4751_v5  ;;  %v2006_v3 = vsel %vm1990_vm0, 1.0, %v8951_v7  ;;  %vm3652_vm1 = vcmp.eq.f32.partialorder %v7435_v57, 0.0 }
 0x5fa   : > { %v4702_v2 = vpop.f32.mrb[48].mxu0  ;;  %vm3653_vm4 = vcmp.eq.f32.partialorder %v7439_v53, 0.0 }
 0x5fb   : > { %v4703_v25 = vpop.f32.mrb[49].mxu0 }
 0x5fc   : > { %v5050_v51 = vpop.eup %5049  ;;  %v7443_v14 = vadd.f32 %v4703_v25, %v4702_v2  ;;  %v4705_v23 = vpop.f32.mrb[50].mxu0 }
 0x5fd   : > { %v4754_v31 = vpop.f32.mrb[40].mxu1  ;;  %v4706_v8 = vpop.f32.mrb[51].mxu0  ;;  %3700 = vperm.xlu0 %4880, %v5050_v51  }
 0x5fe   : > { %v4755_v42 = vpop.f32.mrb[41].mxu1  ;;  %vm2828_vm9 = vcmp.eq.f32.partialorder %v7443_v14, 0.0  ;;  %v7446_v6 = vadd.f32 %v4706_v8, %v4705_v23  ;;  %v5052_v19 = vpop.eup %5051  ;;  %v3668_v23 = vsel %vm3652_vm1, 1.0, %v7435_v57  ;;  %v8954_v8 = vld [vmem:[#allocation23_spill] sm:$0xff]  ;;  %vm2826_vm1 = vcmp.eq.f32.partialorder %v7422_v29, 0.0 }
 0x5ff   : > { %v7448_v36 = vadd.f32 %v4755_v42, %v4754_v31  ;;  %v4757_v61 = vpop.f32.mrb[42].mxu1  ;;  %v2844_v46 = vsel %vm2828_vm9, 1.0, %v7443_v14  ;;  %v5054_v27 = vpop.eup %5053  ;;  %vm1156_vm3 = vcmp.eq.f32.partialorder %v8954_v8, 0.0 }
 0x600   : > { %v4758_v22 = vpop.f32.mrb[43].mxu1  ;;  %5057 = vrcp.f32 %v2844_v46  ;;  %vm2829_vm12 = vcmp.eq.f32.partialorder %v7446_v6, 0.0  ;;  %v5056_v35 = vpop.eup %5055  ;;  %v8955_v46 = vld [vmem:[#allocation54_spill] sm:$0xff] }
 0x601   : > { %v7454_v17 = vadd.f32 %v4758_v22, %v4757_v61  ;;  %v2845_v32 = vsel %vm2829_vm12, 1.0, %v7446_v6  ;;  %1216 = vperm.xlu0 %4880, %v5052_v19   ;;  %5059 = vrcp.f32 %v2838_v21  ;;  %v1172_v61 = vsel %vm1156_vm3, 1.0, %v8954_v8 }
 0x602   : > { %5061 = vrcp.f32 %v2845_v32  ;;  %vm1991_vm6 = vcmp.eq.f32.partialorder %v8955_v46, 0.0  ;;  %vm3654_vm5 = vcmp.eq.f32.partialorder %v7448_v36, 0.0 }
 0x603   : > { %5063 = vrcp.f32 %v2839_v30  ;;  %v2007_v19 = vsel %vm1991_vm6, 1.0, %v8955_v46  ;;  %v3669_v30 = vsel %vm3653_vm4, 1.0, %v7439_v53  ;;  %vm3655_vm10 = vcmp.eq.f32.partialorder %v7454_v17, 0.0 }
 0x604   : > { %v4760_v16 = vpop.f32.mrb[44].mxu1  ;;  %5065 = vrcp.f32 %v1177_v41  ;;  %vm2827_vm6 = vcmp.eq.f32.partialorder %v7424_v45, 0.0 }
 0x605   : > { %v4761_v33 = vpop.f32.mrb[45].mxu1  ;;  %2051 = vperm.xlu0 %4880, %v5054_v27   ;;  %5067 = vrcp.f32 %v1171_v63 }
 0x606   : > { %v7462_v28 = vadd.f32 %v4761_v33, %v4760_v16  ;;  %v4763_v24 = vpop.f32.mrb[46].mxu1  ;;  %5069 = vrcp.f32 %v2012_v60  ;;  %v2840_v16 = vsel %vm2824_vm7, 1.0, %v7418_v15  ;;  %v2841_v33 = vsel %vm2825_vm8, 1.0, %v7420_v13 }
 0x607   : > { %v4708_v52 = vpop.f32.mrb[52].mxu0  ;;  %v4764_v9 = vpop.f32.mrb[47].mxu1  ;;  %5071 = vrcp.f32 %v2006_v3  ;;  %v8958_v3 = vld [vmem:[#allocation9_spill] sm:$0xff] }
 0x608   : > { %8949 = vst [vmem:[#allocation14_spill] sm:$0xff] %v7462_v28  ;;  %v4709_v0 = vpop.f32.mrb[53].mxu0  ;;  %v7468_v54 = vadd.f32 %v4764_v9, %v4763_v24  ;;  %5073 = vrcp.f32 %v3668_v23  ;;  %v8956_v24 = vld [vmem:[#allocation43_spill] sm:$0xff]  ;;  %v8957_v9 = vld [vmem:[#allocation17_spill] sm:$0xff]  ;;  %vm1158_vm9 = vcmp.eq.f32.partialorder %v8958_v3, 0.0  ;;  %vm3656_vm7 = vcmp.eq.f32.partialorder %v7462_v28, 0.0 }
 0x609   : > { %v7465_v12 = vadd.f32 %v4709_v0, %v4708_v52  ;;  %v4711_v1 = vpop.f32.mrb[54].mxu0  ;;  %3705 = vperm.xlu0 %4880, %v5056_v35   ;;  %5075 = vrcp.f32 %v1172_v61  ;;  %vm1157_vm13 = vcmp.eq.f32.partialorder %v8956_v24, 0.0  ;;  %vm1992_vm14 = vcmp.eq.f32.partialorder %v8957_v9, 0.0  ;;  %v8959_v61 = vld [vmem:[#allocation33_spill] sm:$0xff] }
 0x60a   : > { %8952 = vst [vmem:[#allocation24_spill] sm:$0xff] %v7468_v54  ;;  %v4712_v5 = vpop.f32.mrb[55].mxu0  ;;  %v5058_v2 = vpop.eup %5057  ;;  %5077 = vrcp.f32 %v2007_v19  ;;  %v1173_v0 = vsel %vm1157_vm13, 1.0, %v8956_v24  ;;  %vm1162_vm11 = vcmp.eq.f32.partialorder %v8959_v61, 0.0  ;;  %v8961_v19 = vld [vmem:[#allocation18_spill] sm:$0xff]  ;;  %vm3657_vm13 = vcmp.eq.f32.partialorder %v7468_v54, 0.0 }
 0x60b   : > { %8950 = vst [vmem:[#allocation15_spill] sm:$0xff] %v7465_v12  ;;  %v7471_v18 = vadd.f32 %v4712_v5, %v4711_v1  ;;  %2910 = vperm.xlu1 %4879, %v5058_v2   ;;  %v5060_v25 = vpop.eup %5059  ;;  %5079 = vrcp.f32 %v3669_v30  ;;  %v2008_v1 = vsel %vm1992_vm14, 1.0, %v8957_v9  ;;  %v3670_v5 = vsel %vm3654_vm5, 1.0, %v7448_v36 }
 0x60c   : > { %v5062_v51 = vpop.eup %5061  ;;  %5081 = vrcp.f32 %v2840_v16  ;;  %vm1993_vm15 = vcmp.eq.f32.partialorder %v8961_v19, 0.0  ;;  %v1178_v30 = vsel %vm1162_vm11, 1.0, %v8959_v61  ;;  %v8962_v16 = vld [vmem:[#allocation58_spill] sm:$0xff]  ;;  %vm2830_vm3 = vcmp.eq.f32.partialorder %v7465_v12, 0.0 }
 0x60d   : > { %8953 = vst [vmem:[#allocation25_spill] sm:$0xff] %v7471_v18  ;;  %2880 = vperm.xlu0 %4880, %v5060_v25   ;;  %v5064_v31 = vpop.eup %5063  ;;  %5083 = vrcp.f32 %v2841_v33  ;;  %vm1997_vm2 = vcmp.eq.f32.partialorder %v8962_v16, 0.0  ;;  %v3954_v33 = vld [vmem:[%s8398_s5] sm:$0xff]  ;;  %vm2831_vm4 = vcmp.eq.f32.partialorder %v7471_v18, 0.0 }
 0x60e   : > { %v5066_v42 = vpop.eup %5065  ;;  %5085 = vrcp.f32 %v1173_v0 }
 0x60f   : > { %2915 = vperm.xlu1 %4879, %v5062_v51   ;;  %v5068_v21 = vpop.eup %5067  ;;  %5087 = vrcp.f32 %v2008_v1 }
 0x610   : > { %v5070_v22 = vpop.eup %5069  ;;  %5089 = vrcp.f32 %v3670_v5 }
 0x611   : > { %2885 = vperm.xlu0 %4880, %v5064_v31   ;;  %v5072_v32 = vpop.eup %5071 }
 0x612   : > { %v5074_v27 = vpop.eup %5073 }
 0x613   : > { %1251 = vperm.xlu1 %4879, %v5066_v42   ;;  %v5076_v41 = vpop.eup %5075  ;;  %v1174_v42 = vsel %vm1158_vm9, 1.0, %v8958_v3 }
 0x614   : > { %v5078_v52 = vpop.eup %5077 }
 0x615   : > { %1221 = vperm.xlu0 %4880, %v5068_v21   ;;  %v5080_v63 = vpop.eup %5079 }
 0x616   : > { %v5082_v35 = vpop.eup %5081 }
 0x617   : > { %2086 = vperm.xlu1 %4879, %v5070_v22   ;;  %v5084_v2 = vpop.eup %5083 }
 0x618   : > { %v5086_v22 = vpop.eup %5085 }
 0x619   : > { %2056 = vperm.xlu0 %4880, %v5072_v32   ;;  %v5088_v0 = vpop.eup %5087 }
 0x61d   : > { %3710 = vperm.xlu0 %4880, %v5074_v27   ;;  %v2009_v27 = vsel %vm1993_vm15, 1.0, %v8961_v19 }
 0x621   : > { %1226 = vperm.xlu0 %4880, %v5076_v41  }
 0x625   : > { %2061 = vperm.xlu0 %4880, %v5078_v52   ;;  %v3955_v52 = vld [vmem:[%s8398_s5 + $0x8] sm:$0xff] }
 0x629   : > { %3715 = vperm.xlu0 %4880, %v5080_v63  }
 0x62d   : > { %2890 = vperm.xlu0 %4880, %v5082_v35   ;;  %v4836_v35 = vpack.c.bf16 %v3955_v52, %v3954_v33 }
 0x62f   : > { %v4766_v60 = vpop.f32.mrb[48].mxu1  ;;  %4837 = vmatprep.subr.bf16.mxu0 %v4836_v35  ;;  %4840 = vmatprep.subr.bf16.mxu1 %v4836_v35 }
 0x630   : > { %v4767_v25 = vpop.f32.mrb[49].mxu1  ;;  %4839 = vmatpush3.bf16.msra.mxu0 %v4836_v35  ;;  %4841 = vmatpush3.bf16.msra.mxu1 %v4836_v35 }
 0x631   : > { %v7493_v51 = vadd.f32 %v4767_v25, %v4766_v60  ;;  %v4769_v23 = vpop.f32.mrb[50].mxu1  ;;  %2895 = vperm.xlu0 %4880, %v5084_v2   ;;  %v2013_v25 = vsel %vm1997_vm2, 1.0, %v8962_v16 }
 0x632   : > { %v4770_v31 = vpop.f32.mrb[51].mxu1 }
 0x633   : > { %vm3658_vm12 = vcmp.eq.f32.partialorder %v7493_v51, 0.0  ;;  %v7498_v21 = vadd.f32 %v4770_v31, %v4769_v23 }
 0x634   : > { %v3674_v32 = vsel %vm3658_vm12, 1.0, %v7493_v51 }
 0x635   : > { %8960 = vst [vmem:[#allocation26_spill] sm:$0xff] %v7498_v21  ;;  %5091 = vrcp.f32 %v3674_v32  ;;  %1231 = vperm.xlu0 %4880, %v5086_v22   ;;  %v3671_v22 = vsel %vm3655_vm10, 1.0, %v7454_v17  ;;  %vm3659_vm0 = vcmp.eq.f32.partialorder %v7498_v21, 0.0 }
 0x636   : > { %5093 = vrcp.f32 %v1174_v42  ;;  %v3675_v33 = vsel %vm3659_vm0, 1.0, %v7498_v21 }
 0x637   : > { %v4772_v41 = vpop.f32.mrb[52].mxu1  ;;  %v4714_v63 = vpop.f32.mrb[56].mxu0  ;;  %5095 = vrcp.f32 %v1178_v30 }
 0x638   : > { %v4773_v1 = vpop.f32.mrb[53].mxu1  ;;  %v4715_v5 = vpop.f32.mrb[57].mxu0  ;;  %5097 = vrcp.f32 %v2009_v27 }
 0x639   : > { %v7512_v60 = vadd.f32 %v4773_v1, %v4772_v41  ;;  %v4775_v2 = vpop.f32.mrb[54].mxu1  ;;  %2066 = vperm.xlu0 %4880, %v5088_v0   ;;  %v7515_v23 = vadd.f32 %v4715_v5, %v4714_v63  ;;  %v4717_v31 = vpop.f32.mrb[58].mxu0  ;;  %5099 = vrcp.f32 %v2013_v25  ;;  %v2842_v63 = vsel %vm2826_vm1, 1.0, %v7422_v29 }
 0x63a   : > { %v4776_v42 = vpop.f32.mrb[55].mxu1  ;;  %v4718_v32 = vpop.f32.mrb[59].mxu0  ;;  %5101 = vrcp.f32 %v3671_v22  ;;  %v2846_v22 = vsel %vm2830_vm3, 1.0, %v7465_v12  ;;  %v2843_v29 = vsel %vm2827_vm6, 1.0, %v7424_v45 }
 0x63b   : > { %8963 = vst [vmem:[#allocation7_spill] sm:$0xff] %v7512_v60  ;;  %8964 = vst [vmem:[#allocation22_spill] sm:$0xff] %v7515_v23  ;;  %v7521_v30 = vadd.f32 %v4776_v42, %v4775_v2  ;;  %v5090_v27 = vpop.eup %5089  ;;  %v7524_v41 = vadd.f32 %v4718_v32, %v4717_v31  ;;  %v7527_v0 = vpop.permute.xlu1 %1201  ;;  %5103 = vrcp.f32 %v3675_v33  ;;  %vm3660_vm5 = vcmp.eq.f32.partialorder %v7512_v60, 0.0 }
 0x63c   : > { %5105 = vrcp.f32 %v2842_v63  ;;  %v2847_v63 = vsel %vm2831_vm4, 1.0, %v7471_v18  ;;  %v8972_v18 = vld [vmem:[#allocation62_spill] sm:$0xff]  ;;  %vm2832_vm15 = vcmp.eq.f32.partialorder %v7515_v23, 0.0 }
 0x63d   : > { %8965 = vst [vmem:[#allocation46_spill] sm:$0xff] %v7521_v30  ;;  %8966 = vst [vmem:[#allocation20_spill] sm:$0xff] %v7524_v41  ;;  %3720 = vperm.xlu0 %4880, %v5090_v27   ;;  %5107 = vrcp.f32 %v2846_v22  ;;  %vm1998_vm14 = vcmp.eq.f32.partialorder %v8972_v18, 0.0  ;;  %vm3661_vm12 = vcmp.eq.f32.partialorder %v7521_v30, 0.0  ;;  %vm2833_vm2 = vcmp.eq.f32.partialorder %v7524_v41, 0.0 }
 0x63e   : > { %5109 = vrcp.f32 %v2843_v29 }
 0x63f   : > { %v5092_v52 = vpop.eup %5091  ;;  %v4778_v1 = vpop.f32.mrb[56].mxu1  ;;  %5111 = vrcp.f32 %v2847_v63  ;;  %v2014_v63 = vsel %vm1998_vm14, 1.0, %v8972_v18 }
 0x640   : > { %v5094_v5 = vpop.eup %5093  ;;  %v4720_v35 = vpop.f32.mrb[60].mxu0  ;;  %3740 = vperm.xlu1 %4879, %v5092_v52  }
 0x641   : > { %v4779_v2 = vpop.f32.mrb[57].mxu1  ;;  %v4721_v25 = vpop.f32.mrb[61].mxu0  ;;  %1236 = vperm.xlu0 %4880, %v5094_v5  }
 0x642   : > { %v7532_v31 = vadd.f32 %v4779_v2, %v4778_v1  ;;  %v4781_v42 = vpop.f32.mrb[58].mxu1  ;;  %v7535_v32 = vadd.f32 %v4721_v25, %v4720_v35  ;;  %v4723_v27 = vpop.f32.mrb[62].mxu0  ;;  %v8971_v35 = vld [vmem:[#allocation59_spill] sm:$0xff]  ;;  %v3672_v25 = vsel %vm3656_vm7, 1.0, %v7462_v28  ;;  %v3673_v28 = vsel %vm3657_vm13, 1.0, %v7468_v54 }
 0x643   : > { %v4782_v16 = vpop.f32.mrb[59].mxu1  ;;  %v5096_v61 = vpop.eup %5095  ;;  %vm1163_vm8 = vcmp.eq.f32.partialorder %v8971_v35, 0.0  ;;  %5113 = vrcp.f32 %v3672_v25 }
 0x644   : > { %8967 = vst [vmem:[#allocation13_spill] sm:$0xff] %v7532_v31  ;;  %8968 = vst [vmem:[#allocation40_spill] sm:$0xff] %v7535_v32  ;;  %v4724_v52 = vpop.f32.mrb[63].mxu0  ;;  %v7539_v21 = vadd.f32 %v4782_v16, %v4781_v42  ;;  %v5098_v33 = vpop.eup %5097  ;;  %1256 = vperm.xlu1 %4879, %v5096_v61   ;;  %v1179_v29 = vsel %vm1163_vm8, 1.0, %v8971_v35  ;;  %vm3662_vm1 = vcmp.eq.f32.partialorder %v7532_v31, 0.0  ;;  %vm2834_vm7 = vcmp.eq.f32.partialorder %v7535_v32, 0.0 }
 0x645   : > { %v7542_v1 = vadd.f32 %v4724_v52, %v4723_v27  ;;  %2071 = vperm.xlu0 %4880, %v5098_v33   ;;  %v5100_v5 = vpop.eup %5099  ;;  %v7546_v2 = vpop.permute.xlu1 %2036  ;;  %5115 = vrcp.f32 %v1179_v29 }
 0x646   : > { %8969 = vst [vmem:[#allocation42_spill] sm:$0xff] %v7539_v21  ;;  %v5102_v42 = vpop.eup %5101  ;;  %5117 = vrcp.f32 %v3673_v28  ;;  %vm3663_vm4 = vcmp.eq.f32.partialorder %v7539_v21, 0.0 }
 0x647   : > { %8970 = vst [vmem:[#allocation5_spill] sm:$0xff] %v7542_v1  ;;  %v4784_v16 = vpop.f32.mrb[60].mxu1  ;;  %v5104_v33 = vpop.eup %5103  ;;  %5119 = vrcp.f32 %v2014_v63  ;;  %vm2835_vm8 = vcmp.eq.f32.partialorder %v7542_v1, 0.0 }
 0x648   : > { %2091 = vperm.xlu1 %4879, %v5100_v5   ;;  %v4785_v27 = vpop.f32.mrb[61].mxu1  ;;  %v5106_v45 = vpop.eup %5105 }
 0x649   : > { %v7550_v61 = vadd.f32 %v4785_v27, %v4784_v16  ;;  %v4787_v22 = vpop.f32.mrb[62].mxu1  ;;  %3725 = vperm.xlu0 %4880, %v5102_v42   ;;  %v7557_v5 = vpop.permute.xlu1 %2076  ;;  %v3676_v42 = vsel %vm3660_vm5, 1.0, %v7512_v60 }
 0x64a   : > { %v4788_v52 = vpop.f32.mrb[63].mxu1  ;;  %v5108_v16 = vpop.eup %5107  ;;  %5121 = vrcp.f32 %v3676_v42  ;;  %v3677_v42 = vsel %vm3661_vm12, 1.0, %v7521_v30 }
 0x64b   : > { %v7555_v12 = vadd.f32 %v4788_v52, %v4787_v22  ;;  %v5110_v25 = vpop.eup %5109  ;;  %v8973_v22 = vld [vmem:[#allocation60_spill] sm:$0xff]  ;;  %v1242_v30 = vpop.permute.xlu0 %1241  ;;  %vm3664_vm14 = vcmp.eq.f32.partialorder %v7550_v61, 0.0 }
 0x64c   : > { %3745 = vperm.xlu1 %4879, %v5104_v33   ;;  %v5112_v27 = vpop.eup %5111  ;;  %vm1164_vm9 = vcmp.eq.f32.partialorder %v8973_v22, 0.0  ;;  %v8974_v33 = vld [vmem:[#allocation64_spill] sm:$0xff] }
 0x64d   : > { %2900 = vperm.xlu0 %4880, %v5106_v45   ;;  %v7563_v52 = vpop.permute.xlu1 %1206  ;;  %v5114_v29 = vpop.eup %5113  ;;  %v1180_v45 = vsel %vm1164_vm9, 1.0, %v8973_v22  ;;  %vm1999_vm11 = vcmp.eq.f32.partialorder %v8974_v33, 0.0  ;;  %v1279_v22 = vmul.f32 %v8900_v48, %v7527_v0  ;;  %v8976_v0 = vld [vmem:[#allocation66_spill] sm:$0xff]  ;;  %vm3665_vm9 = vcmp.eq.f32.partialorder %v7555_v12, 0.0 }
 0x64e   : > { %5123 = vrcp.f32 %v1180_v45  ;;  %v2848_v45 = vsel %vm2832_vm15, 1.0, %v7515_v23  ;;  %vm2000_vm0 = vcmp.eq.f32.partialorder %v8976_v0, 0.0 }
 0x64f   : > { %v5116_v28 = vpop.eup %5115 }
 0x650   : > { %2920 = vperm.xlu1 %4879, %v5108_v16   ;;  %v5118_v35 = vpop.eup %5117  ;;  %v2015_v16 = vsel %vm1999_vm11, 1.0, %v8974_v33  ;;  %v8975_v33 = vld [vmem:[#allocation61_spill] sm:$0xff] }
 0x651   : > { %2905 = vperm.xlu0 %4880, %v5110_v25   ;;  %v7567_v63 = vpop.permute.xlu1 %1246  ;;  %v5120_v25 = vpop.eup %5119  ;;  %5125 = vrcp.f32 %v2015_v16  ;;  %vm1165_vm10 = vcmp.eq.f32.partialorder %v8975_v33, 0.0 }
 0x652   : > { %5127 = vrcp.f32 %v3677_v42  ;;  %v2114_v42 = vmul.f32 %v6772_v34, %v7546_v2 }
 0x653   : > { %5129 = vrcp.f32 %v2848_v45 }
 0x654   : > { %2925 = vperm.xlu1 %4879, %v5112_v27   ;;  %v5122_v27 = vpop.eup %5121 }
 0x655   : > { %3730 = vperm.xlu0 %4880, %v5114_v29   ;;  %v2042_v29 = vpop.permute.xlu1 %2041 }
 0x658   : > { %1261 = vperm.xlu1 %4879, %v5116_v28   ;;  %v5124_v28 = vpop.eup %5123 }
 0x659   : > { %3735 = vperm.xlu0 %4880, %v5118_v35   ;;  %v7575_v35 = vpop.permute.xlu1 %2081 }
 0x65b   : > { %v5126_v16 = vpop.eup %5125 }
 0x65c   : > { %2096 = vperm.xlu1 %4879, %v5120_v25   ;;  %v2849_v25 = vsel %vm2833_vm2, 1.0, %v7524_v41  ;;  %v7592_v41 = vld [vmem:[%s8397_s4] ss:$0 sm:$0xff]  ;;  %v5128_v48 = vpop.eup %5127 }
 0x65d   : > { %5131 = vrcp.f32 %v2849_v25  ;;  %v2871_v45 = vpop.permute.xlu1 %2870  ;;  %v7596_v34 = vadd.f32 %v7592_v41, %v1279_v22  ;;  %v2876_v25 = vpop.permute.xlu0 %2875 }
 0x65e   : > { %v5130_v23 = vpop.eup %5129 }
 0x65f   : > { %v1331_v18 = vmul.f32 1.442695, %v7596_v34  ;;  %vm1315_vm13 = vcmp.gt.f32.partialorder %v7596_v34, 0.0 }
 0x660   : > { %3750 = vperm.xlu1 %4879, %v5122_v27   ;;  %v7586_v27 = vld [vmem:[%s8397_s4 + $0x1] ss:$0 sm:$0xff] }
 0x661   : > { %v7599_v2 = vadd.f32 %v7586_v27, %v2114_v42  ;;  %v3678_v42 = vsel %vm3662_vm1, 1.0, %v7532_v31  ;;  %v8978_v31 = vld [vmem:[#allocation67_spill] sm:$0xff] }
 0x662   : > { %vm2001_vm6 = vcmp.eq.f32.partialorder %v8978_v31, 0.0 }
 0x663   : > { %v2166_v60 = vmul.f32 1.442695, %v7599_v2  ;;  %vm2150_vm5 = vcmp.gt.f32.partialorder %v7599_v2, 0.0 }
 0x664   : > { %1266 = vperm.xlu1 %4879, %v5124_v28   ;;  %v1181_v28 = vsel %vm1165_vm10, 1.0, %v8975_v33  ;;  %v2016_v33 = vsel %vm2000_vm0, 1.0, %v8976_v0  ;;  %v2115_v0 = vmul.f32 %v6782_v43, %v2042_v29  ;;  %v2017_v43 = vsel %vm2001_vm6, 1.0, %v8978_v31 }
 0x665   : > { %5133 = vrcp.f32 %v1181_v28  ;;  %v8977_v28 = vld [vmem:[#allocation63_spill] sm:$0xff]  ;;  %vm8979_vm0 = vcmask 130048  }
 0x666   : > { %5135 = vrcp.f32 %v2016_v33  ;;  %vm1166_vm3 = vcmp.eq.f32.partialorder %v8977_v28, 0.0  ;;  %v2949_v33 = vmul.f32 %v7405_v62, %v2876_v25 }
 0x667   : > { %5137 = vpow2.f32 %v1331_v18  ;;  %v7624_v18 = vadd.f32 %v7586_v27, %v2115_v0 }
 0x668   : > { %2101 = vperm.xlu1 %4879, %v5126_v16   ;;  %v2948_v16 = vmul.f32 %v7402_v11, %v2871_v45  ;;  %v7610_v11 = vpop.permute.xlu0 %1211  ;;  %v5132_v45 = vpop.eup %5131  ;;  %5139 = vpow2.f32 %v2166_v60  ;;  %v7630_v60 = vadd.f32 %v7592_v41, %v2949_v33 }
 0x669   : > { %5141 = vrcp.f32 %v3678_v42  ;;  %v2168_v29 = vmul.f32 1.442695, %v7624_v18  ;;  %vm2151_vm15 = vcmp.gt.f32.partialorder %v7624_v18, 0.0 }
 0x66a   : > { %v7607_v22 = vadd.f32 %v7592_v41, %v2948_v16  ;;  %vm2981_vm10 = vcmp.gt.f32.partialorder %v7630_v60, 0.0 }
 0x66c   : > { %3755 = vperm.xlu1 %4879, %v5128_v48   ;;  %v1280_v48 = vmul.f32 %v8906_v26, %v7563_v52  ;;  %v2996_v54 = vmul.f32 1.442695, %v7607_v22  ;;  %v7626_v26 = vpop.permute.xlu0 %2046  ;;  %vm2980_vm11 = vcmp.gt.f32.partialorder %v7607_v22, 0.0 }
 0x66e   : > { %v7621_v3 = vadd.f32 %v7592_v41, %v1280_v48  ;;  %5143 = vpow2.f32 %v2996_v54  ;;  %v3679_v48 = vsel %vm3663_vm4, 1.0, %v7539_v21  ;;  %vm8980_vm4 = vmmov %vm8979_vm0 }
 0x66f   : > { %v5134_v16 = vpop.eup %5133 }
 0x670   : > { %2930 = vperm.xlu1 %4879, %v5130_v23   ;;  %v1182_v23 = vsel %vm1166_vm3, 1.0, %v8977_v28  ;;  %v5136_v62 = vpop.eup %5135  ;;  %v1333_v52 = vmul.f32 1.442695, %v7621_v3  ;;  %vm1316_vm2 = vcmp.gt.f32.partialorder %v7621_v3, 0.0 }
 0x671   : > { %5145 = vrcp.f32 %v1182_v23  ;;  %v5138_v25 = vpop.eup %5137  ;;  %v2998_v23 = vmul.f32 1.442695, %v7630_v60 }
 0x672   : > { %5147 = vrcp.f32 %v2017_v43  ;;  %v5140_v42 = vpop.eup %5139 }
 0x673   : > { %v5142_v33 = vpop.eup %5141  ;;  %5149 = vpow2.f32 %v1333_v52  ;;  %v2850_v52 = vsel %vm2834_vm7, 1.0, %v7535_v32 }
 0x674   : > { %2935 = vperm.xlu1 %4879, %v5132_v45   ;;  %v1287_v45 = vmul.f32 %v6804_v20, %v1242_v30  ;;  %5151 = vpow2.f32 %v2168_v29 }
 0x675   : > { %5153 = vrcp.f32 %v3679_v48 }
 0x676   : > { %5155 = vpow2.f32 %v2998_v23 }
 0x678   : > { %1271 = vperm.xlu1 %4879, %v5134_v16   ;;  %v5144_v30 = vpop.eup %5143 }
 0x679   : > { %v4481_v48 = vadd.f32 -1.0, %v5144_v30 }
 0x67b   : > { %v5146_v21 = vpop.eup %5145 }
 0x67c   : > { %2106 = vperm.xlu1 %4879, %v5136_v62   ;;  %v3701_v0 = vpop.permute.xlu0 %3700  ;;  %v4446_v62 = vadd.f32 -1.0, %v5138_v25  ;;  %v5148_v32 = vpop.eup %5147 }
 0x67d   : > { %v3778_v54 = vmul.f32 %v7426_v40, %v3701_v0  ;;  %v4464_v40 = vadd.f32 -1.0, %v5140_v42  ;;  %v7647_v0 = vadd.f32 %v7592_v41, %v1287_v45 }
 0x67e   : > { %v1379_v29 = vmul.f32 1.6732632, %v4446_v62 }
 0x67f   : > { %v7641_v16 = vadd.f32 %v7586_v27, %v3778_v54  ;;  %v2122_v54 = vmul.f32 %v6872_v55, %v7557_v5  ;;  %v2214_v42 = vmul.f32 1.6732632, %v4464_v40  ;;  %v1347_v45 = vmul.f32 1.442695, %v7647_v0  ;;  %v5150_v5 = vpop.eup %5149 }
 0x680   : > { %3760 = vperm.xlu1 %4879, %v5142_v33   ;;  %v7643_v43 = vpop.permute.xlu0 %1216  ;;  %v2851_v33 = vsel %vm2835_vm8, 1.0, %v7542_v1  ;;  %v1395_v55 = vsel %vm1315_vm13, %v7596_v34, %v1379_v29  ;;  %v3044_v40 = vmul.f32 1.6732632, %v4481_v48  ;;  %v5152_v30 = vpop.eup %5151  ;;  %v1288_v48 = vmul.f32 %v6806_v4, %v7567_v63 }
 0x681   : > { %v3826_v20 = vmul.f32 1.442695, %v7641_v16  ;;  %v7659_v23 = vadd.f32 %v7586_v27, %v2122_v54  ;;  %v2230_v62 = vsel %vm2150_vm5, %v7599_v2, %v2214_v42  ;;  %v1281_v54 = vmul.f32 %v8940_v37, %v7610_v11  ;;  %v5154_v1 = vpop.eup %5153 }
 0x682   : > { %v5156_v29 = vpop.eup %5155  ;;  %v2246_v42 = vmul.f32 1.050701, %v2230_v62  ;;  %v4447_v63 = vadd.f32 -1.0, %v5150_v5  ;;  %vm3810_vm12 = vcmp.gt.f32.partialorder %v7641_v16, 0.0  ;;  %vm1323_vm3 = vcmp.gt.f32.partialorder %v7647_v0, 0.0 }
 0x683   : > { %5157 = vpow2.f32 %v3826_v20  ;;  %v2182_v34 = vmul.f32 1.442695, %v7659_v23  ;;  %vm2158_vm6 = vcmp.gt.f32.partialorder %v7659_v23, 0.0 }
 0x684   : > { %1276 = vperm.xlu1 %4879, %v5146_v21   ;;  %v7653_v25 = vpop.permute.xlu0 %2051  ;;  %5159 = vrcp.f32 %v2850_v52  ;;  %v3680_v52 = vsel %vm3664_vm14, 1.0, %v7550_v61 }
 0x685   : > { %5161 = vrcp.f32 %v2851_v33  ;;  %v3060_v33 = vsel %vm2980_vm11, %v7607_v22, %v3044_v40  ;;  %v4482_v40 = vadd.f32 -1.0, %v5156_v29 }
 0x686   : > { %5163 = vpow2.f32 %v1347_v45  ;;  %v4465_v45 = vadd.f32 -1.0, %v5152_v30  ;;  %v3076_v22 = vmul.f32 1.050701, %v3060_v33 }
 0x687   : > { %5165 = vrcp.f32 %v3680_v52 }
 0x688   : > { %2111 = vperm.xlu1 %4879, %v5148_v32   ;;  %v3706_v21 = vpop.permute.xlu0 %3705  ;;  %v2116_v32 = vmul.f32 %v8941_v44, %v7626_v26  ;;  %v3681_v26 = vsel %vm3665_vm9, 1.0, %v7555_v12 }
 0x689   : > { %v3779_v20 = vmul.f32 %v7430_v49, %v3706_v21  ;;  %v1411_v49 = vmul.f32 1.050701, %v1395_v55  ;;  %v7683_v21 = vadd.f32 %v7592_v41, %v1281_v54  ;;  %v7692_v54 = vadd.f32 %v7592_v41, %v1288_v48 }
 0x68b   : > { %v7674_v2 = vadd.f32 %v7586_v27, %v3779_v20  ;;  %v7689_v20 = vadd.f32 %v7586_v27, %v2116_v32  ;;  %v1380_v32 = vmul.f32 1.6732632, %v4447_v63  ;;  %vm1324_vm7 = vcmp.gt.f32.partialorder %v7692_v54, 0.0 }
 0x68c   : > { %3765 = vperm.xlu1 %4879, %v5154_v1   ;;  %v2881_v37 = vpop.permute.xlu0 %2880  ;;  %v2123_v1 = vmul.f32 %v6874_v50, %v7575_v35  ;;  %v1335_v50 = vmul.f32 1.442695, %v7683_v21  ;;  %vm1317_vm13 = vcmp.gt.f32.partialorder %v7683_v21, 0.0 }
 0x68d   : > { %v5158_v11 = vpop.eup %5157  ;;  %v3828_v44 = vmul.f32 1.442695, %v7674_v2  ;;  %v2950_v62 = vmul.f32 %v7413_v10, %v2881_v37  ;;  %v2262_v10 = vadd.f32 %v2246_v42, %v1411_v49  ;;  %v2170_v48 = vmul.f32 1.442695, %v7689_v20 }
 0x68e   : > { %v4498_v55 = vadd.f32 -1.0, %v5158_v11  ;;  %v5160_v4 = vpop.eup %5159  ;;  %v2215_v11 = vmul.f32 1.6732632, %v4465_v45  ;;  %v7701_v29 = vadd.f32 %v7586_v27, %v2123_v1  ;;  %v3045_v49 = vmul.f32 1.6732632, %v4482_v40 }
 0x68f   : > { %5167 = vpow2.f32 %v3828_v44  ;;  %v7698_v5 = vadd.f32 %v7592_v41, %v2950_v62  ;;  %v3092_v33 = vadd.f32 %v3076_v22, %v2262_v10  ;;  %v2117_v42 = vmul.f32 %v8945_v58, %v7653_v25 }
 0x690   : > { %5169 = vpow2.f32 %v2182_v34  ;;  %v3874_v30 = vmul.f32 1.6732632, %v4498_v55  ;;  %2940 = vperm.xlu1 %4879, %v5160_v4   ;;  %v2886_v52 = vpop.permute.xlu0 %2885  ;;  %v5162_v34 = vpop.eup %5161  ;;  %v1349_v44 = vmul.f32 1.442695, %v7692_v54  ;;  %v1282_v62 = vmul.f32 %v8944_v47, %v7643_v43 }
 0x691   : > { %5171 = vrcp.f32 %v3681_v26  ;;  %v5164_v45 = vpop.eup %5163  ;;  %v2231_v26 = vsel %vm2151_vm15, %v7624_v18, %v2215_v11  ;;  %v2911_v55 = vpop.permute.xlu1 %2910  ;;  %v3000_v4 = vmul.f32 1.442695, %v7698_v5  ;;  %v1396_v58 = vsel %vm1316_vm2, %v7621_v3, %v1380_v32 }
 0x692   : > { %v3890_v35 = vsel %vm3810_vm12, %v7641_v16, %v3874_v30  ;;  %5173 = vpow2.f32 %v1335_v50  ;;  %v5166_v1 = vpop.eup %5165  ;;  %v2184_v25 = vmul.f32 1.442695, %v7701_v29  ;;  %v3061_v22 = vsel %vm2981_vm10, %v7630_v60, %v3045_v49  ;;  %vm8981_vm10 = vmmov %vm8979_vm0 }
 0x693   : > { %v3906_v37 = vmul.f32 1.050701, %v3890_v35  ;;  %5175 = vpow2.f32 %v2170_v48  ;;  %v7720_v18 = vadd.f32 %v7586_v27, %v2117_v42  ;;  %v2951_v40 = vmul.f32 %v7415_v38, %v2886_v52 }
 0x694   : > { %2945 = vperm.xlu1 %4879, %v5162_v34   ;;  %v7707_v16 = vpop.permute.xlu0 %1221  ;;  %5177 = vpow2.f32 %v1349_v44  ;;  %v2247_v11 = vmul.f32 1.050701, %v2231_v26  ;;  %v7726_v10 = vadd.f32 %v7592_v41, %v1282_v62  ;;  %v1412_v35 = vmul.f32 1.050701, %v1396_v58 }
 0x695   : > { %v3922_v63 = vadd.f32 %v3906_v37, %v3092_v33  ;;  %5179 = vpow2.f32 %v3000_v4  ;;  %v3077_v34 = vmul.f32 1.050701, %v3061_v22  ;;  %v2916_v32 = vpop.permute.xlu1 %2915  ;;  %v2172_v38 = vmul.f32 1.442695, %v7720_v18 }
 0x696   : > { %5181 = vpow2.f32 %v2184_v25  ;;  %v7731_v48 = vadd.f32 %v7592_v41, %v2951_v40  ;;  %v2263_v33 = vadd.f32 %v2247_v11, %v1412_v35  ;;  %vm3811_vm1 = vcmp.gt.f32.partialorder %v7674_v2, 0.0 }
 0x697   : > { %v3938_v43 = vmul.f32 0.25, %v3922_v63  ;;  %v4454_v49 = vadd.f32 -1.0, %v5164_v45  ;;  %v1337_v44 = vmul.f32 1.442695, %v7726_v10  ;;  %v2956_v63 = vmul.f32 %v7443_v14, %v2911_v55 }
 0x698   : > { %3770 = vperm.xlu1 %4879, %v5166_v1   ;;  %v7723_v47 = vpop.permute.xlu0 %2056  ;;  %v3093_v62 = vadd.f32 %v3077_v34, %v2263_v33  ;;  %5183 = vpow2.f32 %v2172_v38  ;;  %v2957_v25 = vmul.f32 %v7446_v6, %v2916_v32  ;;  %v3002_v22 = vmul.f32 1.442695, %v7731_v48 }
 0x699   : > { %v5168_v30 = vpop.eup %5167  ;;  %4812 = vmatprep.mubr.msk.f32.mxu0 %vm8979_vm0, %v3938_v43  ;;  %5185 = vpow2.f32 %v1337_v44  ;;  %v1387_v14 = vmul.f32 1.6732632, %v4454_v49  ;;  %v1283_v49 = vmul.f32 %v8947_v39, %v7707_v16  ;;  %vm2159_vm8 = vcmp.gt.f32.partialorder %v7701_v29, 0.0 }
 0x69a   : > { %v5170_v3 = vpop.eup %5169  ;;  %v4499_v50 = vadd.f32 -1.0, %v5168_v30  ;;  %v1252_v30 = vpop.permute.xlu1 %1251  ;;  %5187 = vpow2.f32 %v3002_v22  ;;  %vm2152_vm14 = vcmp.gt.f32.partialorder %v7689_v20, 0.0  ;;  %vm2982_vm5 = vcmp.gt.f32.partialorder %v7698_v5, 0.0 }
 0x69b   : > { %v5172_v60 = vpop.eup %5171  ;;  %v4472_v42 = vadd.f32 -1.0, %v5170_v3  ;;  %v1289_v38 = vmul.f32 %v8946_v56, %v1252_v30  ;;  %v7776_v22 = vadd.f32 %v7592_v41, %v1283_v49  ;;  %vm2153_vm9 = vcmp.gt.f32.partialorder %v7720_v18, 0.0 }
 0x69c   : > { %v3875_v52 = vmul.f32 1.6732632, %v4499_v50  ;;  %3775 = vperm.xlu1 %4879, %v5172_v60   ;;  %v3711_v37 = vpop.permute.xlu0 %3710  ;;  %v5174_v58 = vpop.eup %5173  ;;  %v7749_v60 = vadd.f32 %v7592_v41, %v2957_v25  ;;  %vm1318_vm12 = vcmp.gt.f32.partialorder %v7726_v10, 0.0  ;;  %vm2983_vm15 = vcmp.gt.f32.partialorder %v7731_v48, 0.0 }
 0x69d   : > { %v3780_v1 = vmul.f32 %v7435_v57, %v3711_v37  ;;  %v5176_v45 = vpop.eup %5175  ;;  %v7746_v57 = vadd.f32 %v7592_v41, %v2956_v63  ;;  %v4448_v32 = vadd.f32 -1.0, %v5174_v58  ;;  %v7773_v16 = vadd.f32 %v7592_v41, %v1289_v38 }
 0x69e   : > { %v3891_v26 = vsel %vm3811_vm1, %v7674_v2, %v3875_v52  ;;  %v2222_v2 = vmul.f32 1.6732632, %v4472_v42  ;;  %v5178_v3 = vpop.eup %5177  ;;  %v4466_v6 = vadd.f32 -1.0, %v5176_v45  ;;  %v7762_v42 = vsel %vm1323_vm3, %v7647_v0, %v1387_v14 }
 0x69f   : > { %v3907_v4 = vmul.f32 1.050701, %v3891_v26  ;;  %v7743_v11 = vadd.f32 %v7586_v27, %v3780_v1  ;;  %v5180_v50 = vpop.eup %5179  ;;  %v4455_v33 = vadd.f32 -1.0, %v5178_v3  ;;  %v3012_v44 = vmul.f32 1.442695, %v7746_v57 }
 0x6a0   : > { %v7740_v40 = vpop.permute.xlu0 %1226  ;;  %v5182_v52 = vpop.eup %5181  ;;  %v2238_v37 = vsel %vm2158_vm6, %v7659_v23, %v2222_v2  ;;  %v4483_v26 = vadd.f32 -1.0, %v5180_v50  ;;  %v2216_v56 = vmul.f32 1.6732632, %v4466_v6  ;;  %v2118_v23 = vmul.f32 %v8951_v7, %v7723_v47 }
 0x6a1   : > { %v3923_v43 = vadd.f32 %v3907_v4, %v3093_v62  ;;  %v3830_v35 = vmul.f32 1.442695, %v7743_v11  ;;  %v2087_v62 = vpop.permute.xlu1 %2086  ;;  %v3014_v4 = vmul.f32 1.442695, %v7749_v60  ;;  %v7769_v1 = vmul.f32 1.050701, %v2238_v37 }
 0x6a2   : > { %v4473_v39 = vadd.f32 -1.0, %v5182_v52  ;;  %v1381_v0 = vmul.f32 1.6732632, %v4448_v32  ;;  %v5184_v58 = vpop.eup %5183  ;;  %v1388_v25 = vmul.f32 1.6732632, %v4455_v33  ;;  %v2124_v45 = vmul.f32 %v8948_v59, %v2087_v62 }
 0x6a3   : > { %v3939_v55 = vmul.f32 0.25, %v3923_v43  ;;  %5189 = vpow2.f32 %v3830_v35  ;;  %v3046_v7 = vmul.f32 1.6732632, %v4483_v26  ;;  %v5186_v47 = vpop.eup %5185  ;;  %v2232_v30 = vsel %vm2152_vm14, %v7689_v20, %v2216_v56 }
 0x6a4   : > { %v7752_v34 = vpop.permute.xlu0 %2061  ;;  %5191 = vpow2.f32 %v3012_v44  ;;  %v7784_v2 = vadd.f32 %v7586_v27, %v2118_v23  ;;  %v2223_v59 = vmul.f32 1.6732632, %v4473_v39  ;;  %v1351_v50 = vmul.f32 1.442695, %v7773_v16  ;;  %v5188_v6 = vpop.eup %5187 }
 0x6a5   : > { %4813 = vmatmul.mubr.msk.f32.vlgmr.msra.gmra.mrb[64].mxu0 %vm8980_vm4, %v3939_v55  ;;  %5193 = vpow2.f32 %v3014_v4  ;;  %v4467_v55 = vadd.f32 -1.0, %v5184_v58  ;;  %v1339_v35 = vmul.f32 1.442695, %v7776_v22  ;;  %v7794_v20 = vadd.f32 %v7586_v27, %v2124_v45 }
 0x6a6   : > { %v1404_v38 = vsel %vm1324_vm7, %v7692_v54, %v1388_v25  ;;  %v2248_v52 = vmul.f32 1.050701, %v2232_v30  ;;  %v4449_v37 = vadd.f32 -1.0, %v5186_v47  ;;  %v2174_v44 = vmul.f32 1.442695, %v7784_v2 }
 0x6a7   : > { %v1284_v26 = vmul.f32 %v8954_v8, %v7740_v40  ;;  %v2217_v56 = vmul.f32 1.6732632, %v4467_v55  ;;  %v4484_v4 = vadd.f32 -1.0, %v5188_v6  ;;  %v2239_v54 = vsel %vm2159_vm8, %v7701_v29, %v2223_v59  ;;  %vm8982_vm8 = vmmov %vm8981_vm10 }
 0x6a8   : > { %v3716_v63 = vpop.permute.xlu0 %3715  ;;  %vm3812_vm11 = vcmp.gt.f32.partialorder %v7743_v11, 0.0  ;;  %v1419_v59 = vmul.f32 1.050701, %v7762_v42  ;;  %vm2988_vm2 = vcmp.gt.f32.partialorder %v7746_v57, 0.0  ;;  %vm2989_vm1 = vcmp.gt.f32.partialorder %v7749_v60, 0.0 }
 0x6a9   : > { %v3781_v43 = vmul.f32 %v7439_v53, %v3716_v63  ;;  %v1397_v53 = vsel %vm1317_vm13, %v7683_v21, %v1381_v0  ;;  %v3062_v21 = vsel %vm2982_vm5, %v7698_v5, %v3046_v7  ;;  %v2186_v5 = vmul.f32 1.442695, %v7794_v20 }
 0x6aa   : > { %v1413_v49 = vmul.f32 1.050701, %v1397_v53  ;;  %v3078_v63 = vmul.f32 1.050701, %v3062_v21  ;;  %v1382_v0 = vmul.f32 1.6732632, %v4449_v37  ;;  %v7812_v8 = vadd.f32 %v7592_v41, %v1284_v26 }
 0x6ab   : > { %v7787_v3 = vadd.f32 %v7586_v27, %v3781_v43  ;;  %v2233_v29 = vsel %vm2153_vm9, %v7720_v18, %v2217_v56  ;;  %v3047_v43 = vmul.f32 1.6732632, %v4484_v4  ;;  %v2255_v53 = vmul.f32 1.050701, %v2239_v54 }
 0x6ac   : > { %v2891_v14 = vpop.permute.xlu0 %2890  ;;  %v2264_v39 = vadd.f32 %v2248_v52, %v1413_v49  ;;  %v1398_v55 = vsel %vm1318_vm12, %v7726_v10, %v1382_v0  ;;  %v2249_v6 = vmul.f32 1.050701, %v2233_v29  ;;  %v1341_v18 = vmul.f32 1.442695, %v7812_v8 }
 0x6ad   : > { %v3832_v32 = vmul.f32 1.442695, %v7787_v3  ;;  %v5190_v33 = vpop.eup %5189  ;;  %v2952_v25 = vmul.f32 %v7418_v15, %v2891_v14  ;;  %v2119_v14 = vmul.f32 %v8955_v46, %v7752_v34  ;;  %v3063_v46 = vsel %vm2983_vm15, %v7731_v48, %v3047_v43 }
 0x6ae   : > { %v4500_v23 = vadd.f32 -1.0, %v5190_v33  ;;  %v5192_v45 = vpop.eup %5191  ;;  %v3094_v30 = vadd.f32 %v3078_v63, %v2264_v39  ;;  %v7828_v42 = vadd.f32 %v7769_v1, %v1419_v59  ;;  %v1414_v10 = vmul.f32 1.050701, %v1398_v55 }
 0x6af   : > { %5195 = vpow2.f32 %v3832_v32  ;;  %v5194_v47 = vpop.eup %5193  ;;  %v1420_v32 = vmul.f32 1.050701, %v1404_v38  ;;  %v4489_v52 = vadd.f32 -1.0, %v5192_v45  ;;  %v7831_v21 = vadd.f32 %v7586_v27, %v2119_v14 }
 0x6b0   : > { %v2896_v62 = vpop.permute.xlu0 %2895  ;;  %5197 = vpow2.f32 %v1351_v50  ;;  %v3876_v58 = vmul.f32 1.6732632, %v4500_v23  ;;  %v7822_v50 = vadd.f32 %v7592_v41, %v2952_v25  ;;  %v4490_v37 = vadd.f32 -1.0, %v5194_v47 }
 0x6b1   : > { %5199 = vpow2.f32 %v1339_v35  ;;  %v2265_v4 = vadd.f32 %v2249_v6, %v1414_v10  ;;  %v3079_v48 = vmul.f32 1.050701, %v3063_v46  ;;  %v2953_v1 = vmul.f32 %v7420_v13, %v2896_v62 }
 0x6b2   : > { %5201 = vpow2.f32 %v2174_v44  ;;  %v3892_v7 = vsel %vm3812_vm11, %v7743_v11, %v3876_v58  ;;  %v7833_v44 = vadd.f32 %v2255_v53, %v1420_v32  ;;  %v3004_v38 = vmul.f32 1.442695, %v7822_v50 }
 0x6b3   : > { %5203 = vpow2.f32 %v2186_v5  ;;  %v3908_v15 = vmul.f32 1.050701, %v3892_v7  ;;  %v3052_v54 = vmul.f32 1.6732632, %v4489_v52  ;;  %v3053_v63 = vmul.f32 1.6732632, %v4490_v37 }
 0x6b4   : > { %v1232_v40 = vpop.permute.xlu0 %1231  ;;  %5205 = vpow2.f32 %v1341_v18  ;;  %v2176_v25 = vmul.f32 1.442695, %v7831_v21  ;;  %vm3813_vm0 = vcmp.gt.f32.partialorder %v7787_v3, 0.0  ;;  %v3095_v47 = vadd.f32 %v3079_v48, %v2265_v4 }
 0x6b5   : > { %v3924_v35 = vadd.f32 %v3908_v15, %v3094_v30  ;;  %v1285_v45 = vmul.f32 %v8956_v24, %v1232_v40  ;;  %5207 = vpow2.f32 %v3004_v38  ;;  %vm1325_vm3 = vcmp.gt.f32.partialorder %v7773_v16, 0.0 }
 0x6b6   : > { %5209 = vpow2.f32 %v2176_v25  ;;  %vm1319_vm6 = vcmp.gt.f32.partialorder %v7776_v22, 0.0  ;;  %vm2160_vm4 = vcmp.gt.f32.partialorder %v7794_v20, 0.0  ;;  %vm2154_vm7 = vcmp.gt.f32.partialorder %v7784_v2, 0.0 }
 0x6b7   : > { %v3940_v33 = vmul.f32 0.25, %v3924_v35  ;;  %v7855_v59 = vadd.f32 %v7592_v41, %v1285_v45  ;;  %vm1320_vm13 = vcmp.gt.f32.partialorder %v7812_v8, 0.0  ;;  %vm2155_vm14 = vcmp.gt.f32.partialorder %v7831_v21, 0.0 }
 0x6b8   : > { %v2067_v11 = vpop.permute.xlu0 %2066  ;;  %vm2984_vm5 = vcmp.gt.f32.partialorder %v7822_v50, 0.0 }
 0x6b9   : > { %v5196_v34 = vpop.eup %5195  ;;  %4815 = vmatprep.mubr.msk.f32.mxu0 %vm8981_vm10, %v3940_v33  ;;  %v2120_v40 = vmul.f32 %v8957_v9, %v2067_v11  ;;  %v3069_v9 = vsel %vm2989_vm1, %v7749_v60, %v3053_v63  ;;  %v1343_v33 = vmul.f32 1.442695, %v7855_v59  ;;  %vm1321_vm12 = vcmp.gt.f32.partialorder %v7855_v59, 0.0  ;;  %vm8993_vm1 = vmmov %vm8982_vm8 }
 0x6ba   : > { %v5198_v49 = vpop.eup %5197  ;;  %v4501_v26 = vadd.f32 -1.0, %v5196_v34 }
 0x6bb   : > { %v5200_v56 = vpop.eup %5199  ;;  %v4456_v58 = vadd.f32 -1.0, %v5198_v49  ;;  %v3085_v49 = vmul.f32 1.050701, %v3069_v9 }
 0x6bc   : > { %v3721_v23 = vpop.permute.xlu0 %3720  ;;  %v3877_v5 = vmul.f32 1.6732632, %v4501_v26  ;;  %v5202_v0 = vpop.eup %5201  ;;  %v4450_v29 = vadd.f32 -1.0, %v5200_v56 }
 0x6bd   : > { %v3782_v39 = vmul.f32 %v7448_v36, %v3721_v23  ;;  %v5204_v7 = vpop.eup %5203  ;;  %v7848_v36 = vadd.f32 %v7592_v41, %v2953_v1  ;;  %v4468_v24 = vadd.f32 -1.0, %v5202_v0  ;;  %v1389_v6 = vmul.f32 1.6732632, %v4456_v58 }
 0x6be   : > { %v3893_v43 = vsel %vm3813_vm0, %v7787_v3, %v3877_v5  ;;  %v4474_v18 = vadd.f32 -1.0, %v5204_v7  ;;  %v1383_v11 = vmul.f32 1.6732632, %v4450_v29  ;;  %v5206_v34 = vpop.eup %5205 }
 0x6bf   : > { %v7845_v13 = vadd.f32 %v7586_v27, %v3782_v39  ;;  %v3741_v62 = vpop.permute.xlu1 %3740  ;;  %v3909_v30 = vmul.f32 1.050701, %v3893_v43  ;;  %v3006_v32 = vmul.f32 1.442695, %v7848_v36  ;;  %v2218_v46 = vmul.f32 1.6732632, %v4468_v24  ;;  %v5208_v23 = vpop.eup %5207 }
 0x6c0   : > { %v3786_v15 = vmul.f32 %v7493_v51, %v3741_v62  ;;  %v1237_v14 = vpop.permute.xlu0 %1236  ;;  %v3068_v51 = vsel %vm2988_vm2, %v7746_v57, %v3052_v54  ;;  %v7871_v57 = vadd.f32 %v7586_v27, %v2120_v40  ;;  %v2224_v26 = vmul.f32 1.6732632, %v4474_v18 }
 0x6c1   : > { %v3834_v3 = vmul.f32 1.442695, %v7845_v13  ;;  %v3925_v55 = vadd.f32 %v3909_v30, %v3095_v47  ;;  %v3084_v10 = vmul.f32 1.050701, %v3068_v51  ;;  %v1405_v56 = vsel %vm1325_vm3, %v7773_v16, %v1389_v6  ;;  %v8983_v16 = vld [vmem:[#allocation9_spill] sm:$0xff]  ;;  %vm8995_vm3 = vmmov %vm8993_vm1 }
 0x6c2   : > { %v7858_v53 = vadd.f32 %v7586_v27, %v3786_v15  ;;  %v1399_v4 = vsel %vm1319_vm6, %v7776_v22, %v1383_v11  ;;  %v2234_v54 = vsel %vm2154_vm7, %v7784_v2, %v2218_v46  ;;  %v4451_v63 = vadd.f32 -1.0, %v5206_v34  ;;  %v8984_v15 = vld [vmem:[#allocation26_spill] sm:$0xff] }
 0x6c3   : > { %5211 = vpow2.f32 %v3834_v3  ;;  %v7863_v35 = vpop.permute.xlu1 %1256  ;;  %v3941_v60 = vmul.f32 0.25, %v3925_v55  ;;  %v2178_v5 = vmul.f32 1.442695, %v7871_v57  ;;  %v7886_v0 = vadd.f32 %v3084_v10, %v7828_v42  ;;  %v5210_v42 = vpop.eup %5209  ;;  %v8985_v3 = vld [vmem:[#allocation45_spill] sm:$0xff] }
 0x6c4   : > { %v3842_v52 = vmul.f32 1.442695, %v7858_v53  ;;  %v2072_v37 = vpop.permute.xlu0 %2071  ;;  %v1286_v22 = vmul.f32 %v8983_v16, %v1237_v14  ;;  %v7893_v58 = vmul.f32 1.050701, %v1405_v56  ;;  %v2240_v2 = vsel %vm2160_vm4, %v7794_v20, %v2224_v26 }
 0x6c5   : > { %v2121_v48 = vmul.f32 %v8961_v19, %v2072_v37  ;;  %4816 = vmatmul.mubr.msk.f32.gmra.mrb[66].mxu0 %vm8982_vm8, %v3941_v60  ;;  %v7891_v19 = vadd.f32 %v3085_v49, %v7833_v44  ;;  %v1415_v45 = vmul.f32 1.050701, %v1399_v4  ;;  %v2250_v29 = vmul.f32 1.050701, %v2234_v54  ;;  %v8987_v49 = vld [vmem:[#allocation21_spill] sm:$0xff]  ;;  %vm8996_vm8 = vmmov %vm8993_vm1 }
 0x6c6   : > { %5213 = vpow2.f32 %v3842_v52  ;;  %v4485_v43 = vadd.f32 -1.0, %v5208_v23  ;;  %v1384_v47 = vmul.f32 1.6732632, %v4451_v63  ;;  %v7906_v20 = vmul.f32 1.050701, %v2240_v2 }
 0x6c7   : > { %v7876_v38 = vpop.permute.xlu1 %2091  ;;  %5215 = vpow2.f32 %v3006_v32  ;;  %v7902_v62 = vadd.f32 %v7586_v27, %v2121_v48  ;;  %v7909_v40 = vadd.f32 %v7592_v41, %v1286_v22  ;;  %v4469_v51 = vadd.f32 -1.0, %v5210_v42  ;;  %v8986_v32 = vld [vmem:[#allocation33_spill] sm:$0xff]  ;;  %v8989_v42 = vld [vmem:[#allocation58_spill] sm:$0xff] }
 0x6c8   : > { %v3726_v1 = vpop.permute.xlu0 %3725  ;;  %5217 = vpow2.f32 %v1343_v33  ;;  %v3048_v11 = vmul.f32 1.6732632, %v4485_v43  ;;  %v1290_v52 = vmul.f32 %v8986_v32, %v7863_v35  ;;  %v2266_v10 = vadd.f32 %v2250_v29, %v1415_v45  ;;  %v8990_v29 = vld [vmem:[#allocation14_spill] sm:$0xff] }
 0x6c9   : > { %v3783_v39 = vmul.f32 %v7454_v17, %v3726_v1  ;;  %5219 = vpow2.f32 %v2178_v5  ;;  %v2180_v37 = vmul.f32 1.442695, %v7902_v62  ;;  %v1400_v33 = vsel %vm1320_vm13, %v7812_v8, %v1384_v47  ;;  %v8988_v1 = vld [vmem:[#allocation15_spill] sm:$0xff] }
 0x6ca   : > { %v1345_v35 = vmul.f32 1.442695, %v7909_v40  ;;  %v2219_v54 = vmul.f32 1.6732632, %v4469_v51  ;;  %vm3814_vm9 = vcmp.gt.f32.partialorder %v7845_v13, 0.0  ;;  %v3064_v8 = vsel %vm2984_vm5, %v7822_v50, %v3048_v11 }
 0x6cb   : > { %v7899_v25 = vadd.f32 %v7586_v27, %v3783_v39  ;;  %v3746_v17 = vpop.permute.xlu1 %3745  ;;  %v7936_v16 = vadd.f32 %v7592_v41, %v1290_v52  ;;  %vm2985_vm11 = vcmp.gt.f32.partialorder %v7848_v36, 0.0  ;;  %v2125_v45 = vmul.f32 %v8989_v42, %v7876_v38 }
 0x6cc   : > { %v2901_v7 = vpop.permute.xlu0 %2900  ;;  %v3787_v14 = vmul.f32 %v8984_v15, %v3746_v17  ;;  %v3080_v15 = vmul.f32 1.050701, %v3064_v8  ;;  %v2235_v38 = vsel %vm2155_vm14, %v7831_v21, %v2219_v54  ;;  %vm3818_vm15 = vcmp.gt.f32.partialorder %v7858_v53, 0.0 }
 0x6cd   : > { %v5212_v44 = vpop.eup %5211  ;;  %v3836_v30 = vmul.f32 1.442695, %v7899_v25  ;;  %v2954_v55 = vmul.f32 %v8985_v3, %v2901_v7  ;;  %v7964_v11 = vadd.f32 %v7586_v27, %v2125_v45  ;;  %vm2156_vm2 = vcmp.gt.f32.partialorder %v7871_v57, 0.0 }
 0x6ce   : > { %v4502_v24 = vadd.f32 -1.0, %v5212_v44  ;;  %v7915_v6 = vadd.f32 %v7586_v27, %v3787_v14  ;;  %vm3815_vm10 = vcmp.gt.f32.partialorder %v7899_v25, 0.0  ;;  %vm1322_vm4 = vcmp.gt.f32.partialorder %v7909_v40, 0.0 }
 0x6cf   : > { %5221 = vpow2.f32 %v3836_v30  ;;  %v2921_v18 = vpop.permute.xlu1 %2920  ;;  %v7921_v46 = vadd.f32 %v7592_v41, %v2954_v55  ;;  %v7949_v30 = vmul.f32 1.050701, %v1400_v33  ;;  %v3096_v33 = vadd.f32 %v3080_v15, %v2266_v10 }
 0x6d0   : > { %v5214_v9 = vpop.eup %5213  ;;  %v2906_v34 = vpop.permute.xlu0 %2905  ;;  %v3844_v60 = vmul.f32 1.442695, %v7915_v6  ;;  %v3878_v4 = vmul.f32 1.6732632, %v4502_v24  ;;  %v2958_v23 = vmul.f32 %v8988_v1, %v2921_v18  ;;  %v8992_v1 = vld [vmem:[#allocation24_spill] sm:$0xff]  ;;  %vm3819_vm0 = vcmp.gt.f32.partialorder %v7915_v6, 0.0 }
 0x6d1   : > { %v2955_v26 = vmul.f32 %v8987_v49, %v2906_v34  ;;  %v5216_v56 = vpop.eup %5215  ;;  %v4506_v48 = vadd.f32 -1.0, %v5214_v9  ;;  %v3008_v63 = vmul.f32 1.442695, %v7921_v46  ;;  %v2251_v34 = vmul.f32 1.050701, %v2235_v38  ;;  %v8991_v49 = vld [vmem:[#allocation25_spill] sm:$0xff] }
 0x6d2   : > { %5223 = vpow2.f32 %v3844_v60  ;;  %v5218_v39 = vpop.eup %5217  ;;  %v4486_v17 = vadd.f32 -1.0, %v5216_v56  ;;  %v3894_v7 = vsel %vm3814_vm9, %v7845_v13, %v3878_v4  ;;  %v7947_v44 = vadd.f32 %v7592_v41, %v2958_v23  ;;  %vm9000_vm9 = vmmov %vm8993_vm1 }
 0x6d3   : > { %v2926_v5 = vpop.permute.xlu1 %2925  ;;  %5225 = vpow2.f32 %v2180_v37  ;;  %v7939_v22 = vadd.f32 %v7592_v41, %v2955_v26  ;;  %v3882_v50 = vmul.f32 1.6732632, %v4506_v48  ;;  %v5220_v47 = vpop.eup %5219  ;;  %v4452_v14 = vadd.f32 -1.0, %v5218_v39 }
 0x6d4   : > { %v3731_v2 = vpop.permute.xlu0 %3730  ;;  %5227 = vpow2.f32 %v3008_v63  ;;  %v1353_v13 = vmul.f32 1.442695, %v7936_v16  ;;  %v3049_v18 = vmul.f32 1.6732632, %v4486_v17  ;;  %v3910_v9 = vmul.f32 1.050701, %v3894_v7 }
 0x6d5   : > { %v3784_v43 = vmul.f32 %v8990_v29, %v3731_v2  ;;  %5229 = vpow2.f32 %v1345_v35  ;;  %v3010_v3 = vmul.f32 1.442695, %v7939_v22  ;;  %v4470_v32 = vadd.f32 -1.0, %v5220_v47 }
 0x6d6   : > { %v3898_v52 = vsel %vm3818_vm15, %v7858_v53, %v3882_v50  ;;  %v3016_v21 = vmul.f32 1.442695, %v7947_v44  ;;  %v1385_v60 = vmul.f32 1.6732632, %v4452_v14  ;;  %v2959_v26 = vmul.f32 %v8991_v49, %v2926_v5 }
 0x6d7   : > { %v7952_v24 = vpop.permute.xlu1 %1261  ;;  %v7960_v55 = vadd.f32 %v7586_v27, %v3784_v43  ;;  %5231 = vpow2.f32 %v3010_v3  ;;  %v3914_v35 = vmul.f32 1.050701, %v3898_v52  ;;  %v2188_v53 = vmul.f32 1.442695, %v7964_v11  ;;  %v8994_v52 = vld [vmem:[#allocation7_spill] sm:$0xff] }
 0x6d8   : > { %v3736_v37 = vpop.permute.xlu0 %3735  ;;  %5233 = vpow2.f32 %v1353_v13  ;;  %v3926_v54 = vadd.f32 %v3910_v9, %v3096_v33  ;;  %v3065_v10 = vsel %vm2985_vm11, %v7848_v36, %v3049_v18  ;;  %v2220_v5 = vmul.f32 1.6732632, %v4470_v32  ;;  %v7988_v36 = vld [vmem:[%s8397_s4 + $0x1] ss:$0 sm:$0xff] }
 0x6d9   : > { %v5222_v51 = vpop.eup %5221  ;;  %v3838_v27 = vmul.f32 1.442695, %v7960_v55  ;;  %v3785_v23 = vmul.f32 %v8992_v1, %v3736_v37  ;;  %5235 = vpow2.f32 %v3016_v21  ;;  %v1401_v2 = vsel %vm1321_vm12, %v7855_v59, %v1385_v60  ;;  %vm9002_vm12 = vmmov %vm8993_vm1 }
 0x6da   : > { %v4503_v4 = vadd.f32 -1.0, %v5222_v51  ;;  %v7983_v17 = vadd.f32 %v7592_v41, %v2959_v26  ;;  %v3942_v59 = vmul.f32 0.25, %v3926_v54  ;;  %v3930_v41 = vadd.f32 %v3914_v35, %v7886_v0 }
 0x6db   : > { %v7969_v56 = vpop.permute.xlu1 %2096  ;;  %5237 = vpow2.f32 %v3838_v27  ;;  %v7991_v50 = vadd.f32 %v7988_v36, %v3785_v23  ;;  %v2236_v47 = vsel %vm2156_vm2, %v7871_v57, %v2220_v5  ;;  %v3081_v21 = vmul.f32 1.050701, %v3065_v10 }
 0x6dc   : > { %v5224_v48 = vpop.eup %5223  ;;  %v3879_v29 = vmul.f32 1.6732632, %v4503_v4  ;;  %5239 = vpow2.f32 %v2188_v53  ;;  %v3018_v51 = vmul.f32 1.442695, %v7983_v17  ;;  %4818 = vmatprep.mubr.msk.f32.mxu0 %vm8993_vm1, %v3942_v59  ;;  %v3946_v18 = vmul.f32 0.25, %v3930_v41 }
 0x6dd   : > { %v5226_v63 = vpop.eup %5225  ;;  %v4507_v39 = vadd.f32 -1.0, %v5224_v48  ;;  %v3840_v38 = vmul.f32 1.442695, %v7991_v50  ;;  %v2252_v37 = vmul.f32 1.050701, %v2236_v47  ;;  %v2267_v26 = vadd.f32 %v2251_v34, %v7949_v30 }
 0x6de   : > { %v5228_v8 = vpop.eup %5227  ;;  %v4471_v15 = vadd.f32 -1.0, %v5226_v63  ;;  %v3895_v0 = vsel %vm3815_vm10, %v7899_v25, %v3879_v29  ;;  %4824 = vmatprep.mubr.msk.f32.mxu1 %vm8995_vm3, %v3946_v18  ;;  %v1417_v4 = vmul.f32 1.050701, %v1401_v2  ;;  %vm2986_vm6 = vcmp.gt.f32.partialorder %v7921_v46, 0.0  ;;  %v8997_v2 = vld [vmem:[#allocation62_spill] sm:$0xff] }
 0x6df   : > { %v3751_v42 = vpop.permute.xlu1 %3750  ;;  %v5230_v45 = vpop.eup %5229  ;;  %v3883_v43 = vmul.f32 1.6732632, %v4507_v39  ;;  %v4487_v7 = vadd.f32 -1.0, %v5228_v8  ;;  %5241 = vpow2.f32 %v3840_v38  ;;  %v3911_v25 = vmul.f32 1.050701, %v3895_v0 }
 0x6e0   : > { %v4453_v13 = vadd.f32 -1.0, %v5230_v45  ;;  %v2221_v27 = vmul.f32 1.6732632, %v4471_v15  ;;  %5243 = vpow2.f32 %v3018_v51  ;;  %vm2157_vm7 = vcmp.gt.f32.partialorder %v7902_v62, 0.0 }
 0x6e1   : > { %v3899_v14 = vsel %vm3819_vm0, %v7915_v6, %v3883_v43  ;;  %v5232_v32 = vpop.eup %5231  ;;  %v3050_v57 = vmul.f32 1.6732632, %v4487_v7  ;;  %v3788_v6 = vmul.f32 %v8994_v52, %v3751_v42  ;;  %v3097_v23 = vadd.f32 %v3081_v21, %v2267_v26  ;;  %v9001_v21 = vld [vmem:[#allocation22_spill] sm:$0xff]  ;;  %vm9006_vm0 = vmmov %vm8993_vm1 }
 0x6e2   : > { %v3915_v3 = vmul.f32 1.050701, %v3899_v14  ;;  %v4488_v60 = vadd.f32 -1.0, %v5232_v32  ;;  %v5234_v49 = vpop.eup %5233  ;;  %v2268_v54 = vadd.f32 %v2252_v37, %v1417_v4  ;;  %v2237_v39 = vsel %vm2157_vm7, %v7902_v62, %v2221_v27 }
 0x6e3   : > { %v8002_v9 = vpop.permute.xlu1 %1266  ;;  %v8012_v48 = vadd.f32 %v7988_v36, %v3788_v6  ;;  %v5236_v1 = vpop.eup %5235  ;;  %v3066_v30 = vsel %vm2986_vm6, %v7921_v46, %v3050_v57  ;;  %v4457_v5 = vadd.f32 -1.0, %v5234_v49  ;;  %v2126_v42 = vmul.f32 %v8997_v2, %v7969_v56  ;;  %v8998_v56 = vld [vmem:[#allocation59_spill] sm:$0xff]  ;;  %vm9008_vm6 = vmmov %vm9006_vm0 }
 0x6e4   : > { %v3931_v33 = vadd.f32 %v3915_v3, %v7891_v19  ;;  %v1386_v19 = vmul.f32 1.6732632, %v4453_v13  ;;  %v3051_v63 = vmul.f32 1.6732632, %v4488_v60  ;;  %v3082_v29 = vmul.f32 1.050701, %v3066_v30 }
 0x6e5   : > { %v5238_v34 = vpop.eup %5237  ;;  %v3846_v10 = vmul.f32 1.442695, %v8012_v48  ;;  %v4491_v43 = vadd.f32 -1.0, %v5236_v1  ;;  %v3927_v46 = vadd.f32 %v3911_v25, %v3097_v23  ;;  %vm2990_vm13 = vcmp.gt.f32.partialorder %v7947_v44, 0.0  ;;  %v8047_v60 = vld [vmem:[%s8397_s4] ss:$0 sm:$0xff] }
 0x6e6   : > { %v3947_v35 = vmul.f32 0.25, %v3931_v33  ;;  %v4504_v8 = vadd.f32 -1.0, %v5238_v34  ;;  %v5240_v45 = vpop.eup %5239  ;;  %v1402_v59 = vsel %vm1322_vm4, %v7909_v40, %v1386_v19  ;;  %vm2987_vm14 = vcmp.gt.f32.partialorder %v7939_v22, 0.0  ;;  %v8999_v40 = vld [vmem:[#allocation46_spill] sm:$0xff]  ;;  %vm9011_vm4 = vmmov %vm9006_vm0 }
 0x6e7   : > { %v8015_v53 = vpop.permute.xlu1 %2101  ;;  %5245 = vpow2.f32 %v3846_v10  ;;  %v3067_v62 = vsel %vm2987_vm14, %v7939_v22, %v3051_v63  ;;  %vm3816_vm5 = vcmp.gt.f32.partialorder %v7960_v55, 0.0  ;;  %v1291_v47 = vmul.f32 %v8998_v56, %v7952_v24  ;;  %v9005_v56 = vld [vmem:[#allocation20_spill] sm:$0xff] }
 0x6e8   : > { %4825 = vmatmul.mubr.msk.f32.vlgmr.msra.gmra.mrb[64].mxu1 %vm8996_vm8, %v3947_v35  ;;  %v3880_v41 = vmul.f32 1.6732632, %v4504_v8  ;;  %v3943_v15 = vmul.f32 0.25, %v3927_v46  ;;  %v2253_v38 = vmul.f32 1.050701, %v2237_v39  ;;  %v8036_v3 = vadd.f32 %v7988_v36, %v2126_v42 }
 0x6e9   : > { %v5242_v14 = vpop.eup %5241  ;;  %v3098_v18 = vadd.f32 %v3082_v29, %v2268_v54  ;;  %v3054_v32 = vmul.f32 1.6732632, %v4491_v43  ;;  %v1418_v52 = vmul.f32 1.050701, %v1402_v59  ;;  %v3083_v6 = vmul.f32 1.050701, %v3067_v62 }
 0x6ea   : > { %v3896_v13 = vsel %vm3816_vm5, %v7960_v55, %v3880_v41  ;;  %v4505_v57 = vadd.f32 -1.0, %v5242_v14  ;;  %4819 = vmatmul.mubr.msk.f32.gmra.mrb[68].mxu0 %vm9000_vm9, %v3943_v15  ;;  %v5244_v55 = vpop.eup %5243  ;;  %v4475_v33 = vadd.f32 -1.0, %v5240_v45  ;;  %v8050_v49 = vadd.f32 %v8047_v60, %v1291_v47  ;;  %v9003_v43 = vld [vmem:[#allocation60_spill] sm:$0xff] }
 0x6eb   : > { %v3756_v7 = vpop.permute.xlu1 %3755  ;;  %v3912_v0 = vmul.f32 1.050701, %v3896_v13  ;;  %v2269_v27 = vadd.f32 %v2253_v38, %v1418_v52  ;;  %vm3817_vm11 = vcmp.gt.f32.partialorder %v7991_v50, 0.0  ;;  %v2190_v25 = vmul.f32 1.442695, %v8036_v3 }
 0x6ec   : > { %v3789_v51 = vmul.f32 %v8999_v40, %v3756_v7  ;;  %v3881_v26 = vmul.f32 1.6732632, %v4505_v57  ;;  %v3070_v1 = vsel %vm2990_vm13, %v7947_v44, %v3054_v32  ;;  %v4492_v63 = vadd.f32 -1.0, %v5244_v55  ;;  %v9007_v55 = vld [vmem:[#allocation13_spill] sm:$0xff] }
 0x6ed   : > { %v3928_v4 = vadd.f32 %v3912_v0, %v3098_v18  ;;  %v3099_v54 = vadd.f32 %v3083_v6, %v2269_v27  ;;  %v2272_v8 = vadd.f32 %v7906_v20, %v7893_v58  ;;  %v1390_v2 = vmul.f32 1.6732632, %v4457_v5  ;;  %v9004_v58 = vld [vmem:[#allocation64_spill] sm:$0xff] }
 0x6ee   : > { %v8041_v24 = vadd.f32 %v7988_v36, %v3789_v51  ;;  %v3897_v19 = vsel %vm3817_vm11, %v7991_v50, %v3881_v26  ;;  %v2225_v42 = vmul.f32 1.6732632, %v4475_v33  ;;  %v1355_v44 = vmul.f32 1.442695, %v8050_v49 }
 0x6ef   : > { %v2931_v22 = vpop.permute.xlu1 %2930  ;;  %v3944_v34 = vmul.f32 0.25, %v3928_v4  ;;  %v3913_v10 = vmul.f32 1.050701, %v3897_v19  ;;  %v3086_v29 = vmul.f32 1.050701, %v3070_v1  ;;  %v1292_v46 = vmul.f32 %v9003_v43, %v8002_v9  ;;  %v9009_v19 = vld [vmem:[#allocation66_spill] sm:$0xff] }
 0x6f0   : > { %v2960_v37 = vmul.f32 %v9001_v21, %v2931_v22  ;;  %v3848_v35 = vmul.f32 1.442695, %v8041_v24  ;;  %v3055_v41 = vmul.f32 1.6732632, %v4492_v63  ;;  %v2127_v20 = vmul.f32 %v9004_v58, %v8015_v53 }
 0x6f1   : > { %v5246_v39 = vpop.eup %5245  ;;  %4821 = vmatprep.mubr.msk.f32.mxu0 %vm9002_vm12, %v3944_v34  ;;  %v3929_v45 = vadd.f32 %v3913_v10, %v3099_v54  ;;  %vm1326_vm15 = vcmp.gt.f32.partialorder %v7936_v16, 0.0  ;;  %vm2161_vm2 = vcmp.gt.f32.partialorder %v7964_v11, 0.0  ;;  %vm3820_vm10 = vcmp.gt.f32.partialorder %v8012_v48, 0.0  ;;  %vm9015_vm12 = vmmov %vm9006_vm0 }
 0x6f2   : > { %v8060_v30 = vadd.f32 %v8047_v60, %v2960_v37  ;;  %5247 = vpow2.f32 %v3848_v35  ;;  %v4508_v50 = vadd.f32 -1.0, %v5246_v39  ;;  %v1406_v15 = vsel %vm1326_vm15, %v7936_v16, %v1390_v2  ;;  %v9010_v2 = vld [vmem:[#allocation61_spill] sm:$0xff] }
 0x6f3   : > { %v2936_v23 = vpop.permute.xlu1 %2935  ;;  %5249 = vpow2.f32 %v2190_v25  ;;  %v3945_v5 = vmul.f32 0.25, %v3929_v45  ;;  %v2241_v9 = vsel %vm2161_vm2, %v7964_v11, %v2225_v42  ;;  %vm2991_vm1 = vcmp.gt.f32.partialorder %v7983_v17, 0.0 }
 0x6f4   : > { %v3020_v7 = vmul.f32 1.442695, %v8060_v30  ;;  %v3884_v62 = vmul.f32 1.6732632, %v4508_v50  ;;  %v2961_v47 = vmul.f32 %v9005_v56, %v2936_v23  ;;  %5251 = vpow2.f32 %v1355_v44 }
 0x6f5   : > { %4822 = vmatmul.mubr.msk.f32.gmra.mrb[70].mxu0 %vm9006_vm0, %v3945_v5  ;;  %v8081_v38 = vadd.f32 %v8047_v60, %v1292_v46  ;;  %v3102_v40 = vadd.f32 %v3086_v29, %v2272_v8  ;;  %v3071_v51 = vsel %vm2991_vm1, %v7983_v17, %v3055_v41  ;;  %v8085_v16 = vadd.f32 %v7988_v36, %v2127_v20 }
 0x6f6   : > { %v3900_v14 = vsel %vm3820_vm10, %v8012_v48, %v3884_v62  ;;  %5253 = vpow2.f32 %v3020_v7  ;;  %v2257_v11 = vmul.f32 1.050701, %v2241_v9  ;;  %v8088_v18 = vadd.f32 %v8047_v60, %v2961_v47 }
 0x6f7   : > { %v1272_v59 = vpop.permute.xlu1 %1271  ;;  %v3916_v53 = vmul.f32 1.050701, %v3900_v14  ;;  %v1422_v32 = vmul.f32 1.050701, %v1406_v15  ;;  %v3087_v57 = vmul.f32 1.050701, %v3071_v51 }
 0x6f8   : > { %v1357_v22 = vmul.f32 1.442695, %v8081_v38  ;;  %v2192_v21 = vmul.f32 1.442695, %v8085_v16  ;;  %v3022_v27 = vmul.f32 1.442695, %v8088_v18  ;;  %v1293_v42 = vmul.f32 %v9010_v2, %v1272_v59 }
 0x6f9   : > { %v3932_v0 = vadd.f32 %v3916_v53, %v3102_v40  ;;  %v2273_v26 = vadd.f32 %v2257_v11, %v1422_v32  ;;  %vm3821_vm3 = vcmp.gt.f32.partialorder %v8041_v24, 0.0  ;;  %vm2162_vm7 = vcmp.gt.f32.partialorder %v8036_v3, 0.0 }
 0x6fa   : > { %5255 = vpow2.f32 %v1357_v22  ;;  %v8108_v41 = vadd.f32 %v8047_v60, %v1293_v42  ;;  %vm1327_vm8 = vcmp.gt.f32.partialorder %v8050_v49, 0.0  ;;  %vm2992_vm13 = vcmp.gt.f32.partialorder %v8060_v30, 0.0  ;;  %v9013_v22 = vld [vmem:[#allocation40_spill] sm:$0xff] }
 0x6fb   : > { %v2107_v13 = vpop.permute.xlu1 %2106  ;;  %v3948_v37 = vmul.f32 0.25, %v3932_v0  ;;  %v3103_v35 = vadd.f32 %v3087_v57, %v2273_v26  ;;  %5257 = vpow2.f32 %v2192_v21  ;;  %vm2163_vm5 = vcmp.gt.f32.partialorder %v8085_v16, 0.0 }
 0x6fc   : > { %v5248_v48 = vpop.eup %5247  ;;  %v2128_v34 = vmul.f32 %v9009_v19, %v2107_v13  ;;  %5259 = vpow2.f32 %v3022_v27  ;;  %v1359_v14 = vmul.f32 1.442695, %v8108_v41  ;;  %vm1328_vm9 = vcmp.gt.f32.partialorder %v8081_v38, 0.0 }
 0x6fd   : > { %v4509_v52 = vadd.f32 -1.0, %v5248_v48  ;;  %v5250_v33 = vpop.eup %5249  ;;  %4827 = vmatprep.mubr.msk.f32.mxu1 %vm9008_vm6, %v3948_v37  ;;  %vm2993_vm11 = vcmp.gt.f32.partialorder %v8088_v18, 0.0  ;;  %vm1329_vm10 = vcmp.gt.f32.partialorder %v8108_v41, 0.0 }
 0x6fe   : > { %v5252_v54 = vpop.eup %5251  ;;  %v4476_v63 = vadd.f32 -1.0, %v5250_v33  ;;  %v8104_v45 = vadd.f32 %v7988_v36, %v2128_v34 }
 0x6ff   : > { %v3761_v6 = vpop.permute.xlu1 %3760  ;;  %v3885_v4 = vmul.f32 1.6732632, %v4509_v52  ;;  %v4458_v50 = vadd.f32 -1.0, %v5252_v54 }
 0x700   : > { %v3790_v17 = vmul.f32 %v9007_v55, %v3761_v6  ;;  %v5254_v8 = vpop.eup %5253  ;;  %v2226_v29 = vmul.f32 1.6732632, %v4476_v63  ;;  %v2194_v58 = vmul.f32 1.442695, %v8104_v45  ;;  %vm2164_vm2 = vcmp.gt.f32.partialorder %v8104_v45, 0.0 }
 0x701   : > { %v3901_v1 = vsel %vm3821_vm3, %v8041_v24, %v3885_v4  ;;  %v4493_v43 = vadd.f32 -1.0, %v5254_v8  ;;  %v1391_v59 = vmul.f32 1.6732632, %v4458_v50  ;;  %vm9016_vm3 = vmmov %vm9011_vm4 }
 0x702   : > { %v8097_v25 = vadd.f32 %v7988_v36, %v3790_v17  ;;  %v3917_v10 = vmul.f32 1.050701, %v3901_v1  ;;  %v2242_v5 = vsel %vm2162_vm7, %v8036_v3, %v2226_v29 }
 0x703   : > { %v1277_v23 = vpop.permute.xlu1 %1276  ;;  %v3056_v56 = vmul.f32 1.6732632, %v4493_v43  ;;  %v1407_v3 = vsel %vm1327_vm8, %v8050_v49, %v1391_v59  ;;  %v2258_v51 = vmul.f32 1.050701, %v2242_v5 }
 0x704   : > { %v3850_v39 = vmul.f32 1.442695, %v8097_v25  ;;  %v3933_v44 = vadd.f32 %v3917_v10, %v3103_v35  ;;  %v1294_v62 = vmul.f32 %v8977_v28, %v1277_v23  ;;  %v5256_v9 = vpop.eup %5255  ;;  %v1423_v49 = vmul.f32 1.050701, %v1407_v3  ;;  %v9014_v35 = vld [vmem:[#allocation5_spill] sm:$0xff] }
 0x705   : > { %v5258_v53 = vpop.eup %5257  ;;  %v3072_v32 = vsel %vm2992_vm13, %v8060_v30, %v3056_v56  ;;  %v4459_v17 = vadd.f32 -1.0, %v5256_v9  ;;  %vm3822_vm14 = vcmp.gt.f32.partialorder %v8097_v25, 0.0  ;;  %vm9017_vm13 = vmmov %vm9016_vm3 }
 0x706   : > { %5261 = vpow2.f32 %v3850_v39  ;;  %v3949_v7 = vmul.f32 0.25, %v3933_v44  ;;  %v8121_v28 = vadd.f32 %v8047_v60, %v1294_v62  ;;  %v5260_v40 = vpop.eup %5259  ;;  %v4477_v6 = vadd.f32 -1.0, %v5258_v53 }
 0x707   : > { %v2112_v24 = vpop.permute.xlu1 %2111  ;;  %5263 = vpow2.f32 %v2194_v58  ;;  %v3088_v33 = vmul.f32 1.050701, %v3072_v32  ;;  %v4494_v26 = vadd.f32 -1.0, %v5260_v40  ;;  %v2274_v19 = vadd.f32 %v2258_v51, %v1423_v49 }
 0x708   : > { %v2129_v46 = vmul.f32 %v8978_v31, %v2112_v24  ;;  %4828 = vmatmul.mubr.msk.f32.gmra.mrb[66].mxu1 %vm9011_vm4, %v3949_v7  ;;  %v9012_v31 = vld [vmem:[#allocation42_spill] sm:$0xff]  ;;  %5265 = vpow2.f32 %v1359_v14  ;;  %v1361_v37 = vmul.f32 1.442695, %v8121_v28  ;;  %v2227_v34 = vmul.f32 1.6732632, %v4477_v6 }
 0x709   : > { %v1392_v10 = vmul.f32 1.6732632, %v4459_v17  ;;  %v3104_v39 = vadd.f32 %v3088_v33, %v2274_v19  ;;  %v3057_v8 = vmul.f32 1.6732632, %v4494_v26  ;;  %vm1330_vm6 = vcmp.gt.f32.partialorder %v8121_v28, 0.0 }
 0x70a   : > { %v8116_v47 = vadd.f32 %v7988_v36, %v2129_v46  ;;  %v2243_v24 = vsel %vm2163_vm5, %v8085_v16, %v2227_v34  ;;  %vm4156_vm5 = vcmask 31744  }
 0x70b   : > { %v3766_v20 = vpop.permute.xlu1 %3765  ;;  %v1408_v43 = vsel %vm1328_vm9, %v8081_v38, %v1392_v10  ;;  %v3073_v46 = vsel %vm2993_vm11, %v8088_v18, %v3057_v8  ;;  %v2259_v59 = vmul.f32 1.050701, %v2243_v24 }
 0x70c   : > { %v3791_v15 = vmul.f32 %v9012_v31, %v3766_v20  ;;  %v2196_v0 = vmul.f32 1.442695, %v8116_v47  ;;  %v1424_v31 = vmul.f32 1.050701, %v1408_v43  ;;  %vm2165_vm1 = vcmp.gt.f32.partialorder %v8116_v47, 0.0 }
 0x70e   : > { %v8125_v13 = vadd.f32 %v7988_v36, %v3791_v15  ;;  %v3089_v15 = vmul.f32 1.050701, %v3073_v46  ;;  %v2275_v40 = vadd.f32 %v2259_v59, %v1424_v31 }
 0x70f   : > { %v2941_v11 = vpop.permute.xlu1 %2940 }
 0x710   : > { %v5262_v48 = vpop.eup %5261  ;;  %v3852_v57 = vmul.f32 1.442695, %v8125_v13  ;;  %v2962_v52 = vmul.f32 %v9013_v22, %v2941_v11  ;;  %vm3823_vm15 = vcmp.gt.f32.partialorder %v8125_v13, 0.0  ;;  %v3105_v32 = vadd.f32 %v3089_v15, %v2275_v40 }
 0x711   : > { %v4510_v21 = vadd.f32 -1.0, %v5262_v48  ;;  %v5264_v50 = vpop.eup %5263 }
 0x712   : > { %5267 = vpow2.f32 %v3852_v57  ;;  %v8135_v55 = vadd.f32 %v8047_v60, %v2962_v52  ;;  %v5266_v29 = vpop.eup %5265  ;;  %v4478_v20 = vadd.f32 -1.0, %v5264_v50 }
 0x713   : > { %v3886_v30 = vmul.f32 1.6732632, %v4510_v21  ;;  %v2946_v4 = vpop.permute.xlu1 %2945  ;;  %5269 = vpow2.f32 %v2196_v0  ;;  %v4460_v18 = vadd.f32 -1.0, %v5266_v29 }
 0x714   : > { %v3024_v27 = vmul.f32 1.442695, %v8135_v55  ;;  %v2963_v1 = vmul.f32 %v9014_v35, %v2946_v4  ;;  %5271 = vpow2.f32 %v1361_v37  ;;  %v2228_v51 = vmul.f32 1.6732632, %v4478_v20 }
 0x715   : > { %v3902_v23 = vsel %vm3822_vm14, %v8097_v25, %v3886_v30  ;;  %v1393_v57 = vmul.f32 1.6732632, %v4460_v18  ;;  %vm2994_vm0 = vcmp.gt.f32.partialorder %v8135_v55, 0.0  ;;  %vm9018_vm14 = vmmov %vm9016_vm3 }
 0x716   : > { %v3918_v54 = vmul.f32 1.050701, %v3902_v23  ;;  %5273 = vpow2.f32 %v3024_v27  ;;  %v8142_v63 = vadd.f32 %v8047_v60, %v2963_v1  ;;  %v2244_v21 = vsel %vm2164_vm2, %v8104_v45, %v2228_v51 }
 0x717   : > { %v3771_v2 = vpop.permute.xlu1 %3770  ;;  %v1409_v17 = vsel %vm1329_vm10, %v8108_v41, %v1393_v57  ;;  %v2260_v27 = vmul.f32 1.050701, %v2244_v21 }
 0x718   : > { %v3026_v42 = vmul.f32 1.442695, %v8142_v63  ;;  %v3792_v44 = vmul.f32 %v7550_v61, %v3771_v2  ;;  %v3934_v25 = vadd.f32 %v3918_v54, %v3104_v39  ;;  %v1425_v1 = vmul.f32 1.050701, %v1409_v17 }
 0x719   : > { %vm2995_vm4 = vcmp.gt.f32.partialorder %v8142_v63, 0.0 }
 0x71a   : > { %5275 = vpow2.f32 %v3026_v42  ;;  %v8151_v60 = vadd.f32 %v7988_v36, %v3792_v44  ;;  %v3950_v62 = vmul.f32 0.25, %v3934_v25  ;;  %v2276_v54 = vadd.f32 %v2260_v27, %v1425_v1 }
 0x71b   : > { %v3776_v7 = vpop.permute.xlu1 %3775 }
 0x71c   : > { %v5268_v61 = vpop.eup %5267  ;;  %v3854_v16 = vmul.f32 1.442695, %v8151_v60  ;;  %v3793_v58 = vmul.f32 %v7555_v12, %v3776_v7  ;;  %4830 = vmatprep.mubr.msk.f32.mxu1 %vm9015_vm12, %v3950_v62  ;;  %vm3824_vm7 = vcmp.gt.f32.partialorder %v8151_v60, 0.0 }
 0x71d   : > { %v4511_v5 = vadd.f32 -1.0, %v5268_v61  ;;  %v5270_v56 = vpop.eup %5269 }
 0x71e   : > { %5277 = vpow2.f32 %v3854_v16  ;;  %v3809_v38 = vadd.f32 %v7988_v36, %v3793_v58  ;;  %v5272_v9 = vpop.eup %5271  ;;  %v4479_v12 = vadd.f32 -1.0, %v5270_v56 }
 0x71f   : > { %v3887_v14 = vmul.f32 1.6732632, %v4511_v5  ;;  %v4461_v22 = vadd.f32 -1.0, %v5272_v9 }
 0x720   : > { %v5274_v53 = vpop.eup %5273  ;;  %v3856_v3 = vmul.f32 1.442695, %v3809_v38  ;;  %v2229_v37 = vmul.f32 1.6732632, %v4479_v12  ;;  %vm3825_vm8 = vcmp.gt.f32.partialorder %v3809_v38, 0.0 }
 0x721   : > { %v3903_v11 = vsel %vm3823_vm15, %v8125_v13, %v3887_v14  ;;  %v4495_v48 = vadd.f32 -1.0, %v5274_v53  ;;  %v1394_v33 = vmul.f32 1.6732632, %v4461_v22 }
 0x722   : > { %v3919_v0 = vmul.f32 1.050701, %v3903_v11  ;;  %5279 = vpow2.f32 %v3856_v3  ;;  %v2245_v45 = vsel %vm2165_vm1, %v8116_v47, %v2229_v37 }
 0x723   : > { %v3058_v52 = vmul.f32 1.6732632, %v4495_v48  ;;  %v1410_v41 = vsel %vm1330_vm6, %v8121_v28, %v1394_v33  ;;  %v2261_v10 = vmul.f32 1.050701, %v2245_v45 }
 0x724   : > { %v5276_v36 = vpop.eup %5275  ;;  %v3935_v6 = vadd.f32 %v3919_v0, %v3105_v32  ;;  %v1426_v8 = vmul.f32 1.050701, %v1410_v41 }
 0x725   : > { %v4496_v49 = vadd.f32 -1.0, %v5276_v36  ;;  %v3074_v26 = vsel %vm2994_vm0, %v8135_v55, %v3058_v52 }
 0x726   : > { %v3951_v13 = vmul.f32 0.25, %v3935_v6  ;;  %v3090_v19 = vmul.f32 1.050701, %v3074_v26  ;;  %v2277_v24 = vadd.f32 %v2261_v10, %v1426_v8 }
 0x727   : > { %v3059_v30 = vmul.f32 1.6732632, %v4496_v49 }
 0x728   : > { %v5278_v4 = vpop.eup %5277  ;;  %4831 = vmatmul.mubr.msk.f32.gmra.mrb[68].mxu1 %vm9016_vm3, %v3951_v13  ;;  %v3106_v2 = vadd.f32 %v3090_v19, %v2276_v54 }
 0x729   : > { %v4512_v35 = vadd.f32 -1.0, %v5278_v4  ;;  %v3075_v55 = vsel %vm2995_vm4, %v8142_v63, %v3059_v30 }
 0x72a   : > { %v3091_v42 = vmul.f32 1.050701, %v3075_v55 }
 0x72b   : > { %v3888_v34 = vmul.f32 1.6732632, %v4512_v35 }
 0x72c   : > { %v5280_v23 = vpop.eup %5279  ;;  %v3107_v29 = vadd.f32 %v3091_v42, %v2277_v24 }
 0x72d   : > { %v3904_v39 = vsel %vm3824_vm7, %v8151_v60, %v3888_v34  ;;  %v4513_v47 = vadd.f32 -1.0, %v5280_v23  ;;  %v8181_v60 = vld [vmem:[%s8399_s6] ss:$0 sm:$0xff] }
 0x72e   : > { %v3920_v44 = vmul.f32 1.050701, %v3904_v39 }
 0x72f   : > { %v3889_v50 = vmul.f32 1.6732632, %v4513_v47 }
 0x730   : > { %v3936_v25 = vadd.f32 %v3920_v44, %v3106_v2 }
 0x731   : > { %v3905_v28 = vsel %vm3825_vm8, %v3809_v38, %v3889_v50 }
 0x732   : > { %v3921_v63 = vmul.f32 1.050701, %v3905_v28  ;;  %v3952_v43 = vmul.f32 0.25, %v3936_v25 }
 0x734   : > { %4833 = vmatprep.mubr.msk.f32.mxu1 %vm9017_vm13, %v3952_v43  ;;  %v3937_v46 = vadd.f32 %v3921_v63, %v3107_v29 }
 0x736   : > { %v3953_v7 = vmul.f32 0.25, %v3937_v46 }
 0x738   : > { %4834 = vmatmul.mubr.msk.f32.gmra.mrb[70].mxu1 %vm9018_vm14, %v3953_v7 }
 0x778   : > { %v4814_v62 = vpop.f32.mrb[64].mxu0 }
 0x779   : > { %v4083_v61 = vadd.f32 %v4814_v62, %v8181_v60  ;;  %v4077_v59 = vpop.f32.mrb[65].mxu0 }
 0x77a   : > { %v4078_v16 = vadd.f32 %v8181_v60, %v4077_v59 }
 0x77b   : > { %v4160_v58 = vsel %vm4156_vm5, %v4083_v61, -inf }
 0x77c   : > { %4161 = vmax.xlane.f32.xlu1 %v4160_v58  ;;  %v4157_v20 = vsel %vm4156_vm5, %v4078_v16, -inf }
 0x77d   : > { %4158 = vmax.xlane.f32.xlu0 %v4157_v20 }
 0x798   : > { %v4817_v5 = vpop.f32.mrb[66].mxu0 }
 0x799   : > { %v4087_v56 = vpop.f32.mrb[67].mxu0  ;;  %v8191_v15 = vadd.f32 %v4817_v5, %v8181_v60 }
 0x79a   : > { %v8188_v31 = vadd.f32 %v8181_v60, %v4087_v56 }
 0x79b   : > { %v4166_v9 = vsel %vm4156_vm5, %v8191_v15, -inf }
 0x79c   : > { %v4163_v38 = vsel %vm4156_vm5, %v8188_v31, -inf }
 0x79d   : > { %4164 = vmax.xlane.f32.xlu0 %v4163_v38 }
 0x7a1   : > { %4167 = vmax.xlane.f32.xlu0 %v4166_v9 }
 0x7bb   : > { %v4826_v18 = vpop.f32.mrb[64].mxu1 }
 0x7bc   : > { %v4117_v14 = vpop.f32.mrb[65].mxu1  ;;  %v8214_v22 = vadd.f32 %v4826_v18, %v8181_v60 }
 0x7bd   : > { %v4820_v53 = vpop.f32.mrb[68].mxu0  ;;  %v8219_v36 = vadd.f32 %v8181_v60, %v4117_v14 }
 0x7be   : > { %v8198_v40 = vadd.f32 %v4820_v53, %v8181_v60  ;;  %v4097_v3 = vpop.f32.mrb[69].mxu0  ;;  %v4184_v21 = vsel %vm4156_vm5, %v8214_v22, -inf }
 0x7bf   : > { %v8201_v51 = vadd.f32 %v8181_v60, %v4097_v3  ;;  %v4181_v37 = vsel %vm4156_vm5, %v8219_v36, -inf }
 0x7c0   : > { %v4172_v12 = vsel %vm4156_vm5, %v8198_v40, -inf }
 0x7c1   : > { %4173 = vmax.xlane.f32.xlu0 %v4172_v12  ;;  %v4169_v11 = vsel %vm4156_vm5, %v8201_v51, -inf }
 0x7c2   : > { %4170 = vmax.xlane.f32.xlu1 %v4169_v11 }
 0x7c8   : > { %v4823_v48 = vpop.f32.mrb[70].mxu0 }
 0x7c9   : > { %v8208_v32 = vadd.f32 %v4823_v48, %v8181_v60  ;;  %v4107_v0 = vpop.f32.mrb[71].mxu0 }
 0x7ca   : > { %v8211_v57 = vadd.f32 %v8181_v60, %v4107_v0 }
 0x7cb   : > { %v4178_v52 = vsel %vm4156_vm5, %v8208_v32, -inf }
 0x7cc   : > { %4179 = vmax.xlane.f32.xlu0 %v4178_v52  ;;  %v4175_v6 = vsel %vm4156_vm5, %v8211_v57, -inf }
 0x7cd   : > { %4176 = vmax.xlane.f32.xlu1 %v4175_v6 }
 0x7d0   : > { %4185 = vmax.xlane.f32.xlu0 %v4184_v21 }
 0x7d1   : > { %4182 = vmax.xlane.f32.xlu1 %v4181_v37 }
 0x7db   : > { %v4829_v49 = vpop.f32.mrb[66].mxu1 }
 0x7dc   : > { %v8228_v13 = vadd.f32 %v4829_v49, %v8181_v60  ;;  %v4127_v17 = vpop.f32.mrb[67].mxu1 }
 0x7dd   : > { %v8231_v33 = vadd.f32 %v8181_v60, %v4127_v17 }
 0x7de   : > { %v4190_v26 = vsel %vm4156_vm5, %v8228_v13, -inf }
 0x7df   : > { %4191 = vmax.xlane.f32.xlu0 %v4190_v26  ;;  %v4187_v30 = vsel %vm4156_vm5, %v8231_v33, -inf }
 0x7e0   : > { %4188 = vmax.xlane.f32.xlu1 %v4187_v30 }
 0x7fb   : > { %v4832_v4 = vpop.f32.mrb[68].mxu1 }
 0x7fc   : > { %v8238_v27 = vadd.f32 %v4832_v4, %v8181_v60  ;;  %v4137_v45 = vpop.f32.mrb[69].mxu1 }
 0x7fd   : > { %v8241_v35 = vadd.f32 %v8181_v60, %v4137_v45 }
 0x7fe   : > { %v4196_v1 = vsel %vm4156_vm5, %v8238_v27, -inf }
 0x7ff   : > { %4197 = vmax.xlane.f32.xlu0 %v4196_v1  ;;  %v4193_v19 = vsel %vm4156_vm5, %v8241_v35, -inf }
 0x800   : > { %4194 = vmax.xlane.f32.xlu1 %v4193_v19 }
 0x809   : > { %v4162_v41 = vpop.xlane.xlu1 %4161 }
 0x80a   : > { %v4206_v55 = vsub.f32 %v4083_v61, %v4162_v41  ;;  %v4159_v34 = vpop.xlane.xlu0 %4158 }
 0x80b   : > { %v4835_v23 = vpop.f32.mrb[70].mxu1  ;;  %v4205_v54 = vsub.f32 %v4078_v16, %v4159_v34 }
 0x80c   : > { %v4223_v10 = vmul.f32 1.442695, %v4206_v55  ;;  %v8248_v39 = vadd.f32 %v4835_v23, %v8181_v60  ;;  %v4147_v47 = vpop.f32.mrb[71].mxu1 }
 0x80d   : > { %v4221_v8 = vmul.f32 1.442695, %v4205_v54  ;;  %v8251_v2 = vadd.f32 %v8181_v60, %v4147_v47 }
 0x80e   : > { %5281 = vpow2.f32 %v4223_v10  ;;  %v4202_v42 = vsel %vm4156_vm5, %v8248_v39, -inf }
 0x80f   : > { %5283 = vpow2.f32 %v4221_v8  ;;  %4203 = vmax.xlane.f32.xlu0 %v4202_v42  ;;  %v4199_v44 = vsel %vm4156_vm5, %v8251_v2, -inf }
 0x810   : > { %4200 = vmax.xlane.f32.xlu1 %v4199_v44 }
 0x818   : > { %v8257_v50 = vpop.eup %5281 }
 0x819   : > { %v8259_v24 = vpop.eup %5283  ;;  %v4256_v25 = vsel %vm4156_vm5, %v8257_v50, 0.0 }
 0x81a   : > { %4257 = vadd.xlane.f32.xlu0 %v4256_v25  ;;  %v4253_v28 = vsel %vm4156_vm5, %v8259_v24, 0.0 }
 0x81b   : > { %4254 = vadd.xlane.f32.xlu1 %v4253_v28 }
 0x82a   : > { %v4165_v29 = vpop.xlane.xlu0 %4164 }
 0x82b   : > { %v4207_v63 = vsub.f32 %v8188_v31, %v4165_v29 }
 0x82d   : > { %v4225_v43 = vmul.f32 1.442695, %v4207_v63 }
 0x82e   : > { %v4168_v46 = vpop.xlane.xlu0 %4167 }
 0x82f   : > { %5285 = vpow2.f32 %v4225_v43  ;;  %v4208_v7 = vsub.f32 %v8191_v15, %v4168_v46 }
 0x831   : > { %v4227_v60 = vmul.f32 1.442695, %v4208_v7 }
 0x833   : > { %5287 = vpow2.f32 %v4227_v60 }
 0x839   : > { %v8267_v62 = vpop.eup %5285 }
 0x83a   : > { %v4259_v61 = vsel %vm4156_vm5, %v8267_v62, 0.0 }
 0x83b   : > { %4260 = vadd.xlane.f32.xlu1 %v4259_v61 }
 0x83d   : > { %v8271_v59 = vpop.eup %5287 }
 0x83e   : > { %v4262_v16 = vsel %vm4156_vm5, %v8271_v59, 0.0 }
 0x83f   : > { %4263 = vadd.xlane.f32.xlu0 %v4262_v16 }
 0x84e   : > { %v4174_v58 = vpop.xlane.xlu0 %4173 }
 0x84f   : > { %v4210_v20 = vsub.f32 %v8198_v40, %v4174_v58  ;;  %v4171_v5 = vpop.xlane.xlu1 %4170 }
 0x850   : > { %v4209_v56 = vsub.f32 %v8201_v51, %v4171_v5 }
 0x851   : > { %v4231_v31 = vmul.f32 1.442695, %v4210_v20 }
 0x852   : > { %v4229_v15 = vmul.f32 1.442695, %v4209_v56 }
 0x853   : > { %5289 = vpow2.f32 %v4231_v31 }
 0x854   : > { %5291 = vpow2.f32 %v4229_v15 }
 0x859   : > { %v4180_v38 = vpop.xlane.xlu0 %4179 }
 0x85a   : > { %v4212_v9 = vsub.f32 %v8208_v32, %v4180_v38  ;;  %v4177_v18 = vpop.xlane.xlu1 %4176 }
 0x85b   : > { %v4211_v14 = vsub.f32 %v8211_v57, %v4177_v18 }
 0x85c   : > { %v4235_v53 = vmul.f32 1.442695, %v4212_v9 }
 0x85d   : > { %v8279_v3 = vpop.eup %5289  ;;  %v4233_v12 = vmul.f32 1.442695, %v4211_v14  ;;  %v4186_v11 = vpop.xlane.xlu0 %4185 }
 0x85e   : > { %v8281_v48 = vpop.eup %5291  ;;  %5293 = vpow2.f32 %v4235_v53  ;;  %v4268_v40 = vsel %vm4156_vm5, %v8279_v3, 0.0  ;;  %v4214_v51 = vsub.f32 %v8214_v22, %v4186_v11  ;;  %v4183_v0 = vpop.xlane.xlu1 %4182 }
 0x85f   : > { %5295 = vpow2.f32 %v4233_v12  ;;  %4269 = vadd.xlane.f32.xlu0 %v4268_v40  ;;  %v4265_v32 = vsel %vm4156_vm5, %v8281_v48, 0.0  ;;  %v4213_v57 = vsub.f32 %v8219_v36, %v4183_v0 }
 0x860   : > { %4266 = vadd.xlane.f32.xlu1 %v4265_v32  ;;  %v4239_v52 = vmul.f32 1.442695, %v4214_v51 }
 0x861   : > { %v4237_v6 = vmul.f32 1.442695, %v4213_v57 }
 0x862   : > { %5297 = vpow2.f32 %v4239_v52 }
 0x863   : > { %5299 = vpow2.f32 %v4237_v6 }
 0x868   : > { %v8289_v21 = vpop.eup %5293 }
 0x869   : > { %v8291_v37 = vpop.eup %5295  ;;  %v4274_v22 = vsel %vm4156_vm5, %v8289_v21, 0.0 }
 0x86a   : > { %4275 = vadd.xlane.f32.xlu0 %v4274_v22  ;;  %v4271_v17 = vsel %vm4156_vm5, %v8291_v37, 0.0 }
 0x86b   : > { %4272 = vadd.xlane.f32.xlu1 %v4271_v17 }
 0x86c   : > { %v4192_v49 = vpop.xlane.xlu0 %4191  ;;  %v8299_v4 = vpop.eup %5297 }
 0x86d   : > { %v4216_v26 = vsub.f32 %v8228_v13, %v4192_v49  ;;  %v4189_v36 = vpop.xlane.xlu1 %4188  ;;  %v8301_v1 = vpop.eup %5299  ;;  %v4280_v41 = vsel %vm4156_vm5, %v8299_v4, 0.0 }
 0x86e   : > { %v4215_v30 = vsub.f32 %v8231_v33, %v4189_v36  ;;  %4281 = vadd.xlane.f32.xlu0 %v4280_v41  ;;  %v4277_v55 = vsel %vm4156_vm5, %v8301_v1, 0.0 }
 0x86f   : > { %v4243_v45 = vmul.f32 1.442695, %v4216_v26  ;;  %4278 = vadd.xlane.f32.xlu1 %v4277_v55 }
 0x870   : > { %v4241_v19 = vmul.f32 1.442695, %v4215_v30 }
 0x871   : > { %5301 = vpow2.f32 %v4243_v45 }
 0x872   : > { %5303 = vpow2.f32 %v4241_v19 }
 0x87b   : > { %v8307_v13 = vpop.eup %5301 }
 0x87c   : > { %v8309_v34 = vpop.eup %5303  ;;  %v4286_v33 = vsel %vm4156_vm5, %v8307_v13, 0.0 }
 0x87d   : > { %4287 = vadd.xlane.f32.xlu0 %v4286_v33  ;;  %v4283_v23 = vsel %vm4156_vm5, %v8309_v34, 0.0 }
 0x87e   : > { %4284 = vadd.xlane.f32.xlu1 %v4283_v23 }
 0x88c   : > { %v4198_v54 = vpop.xlane.xlu0 %4197 }
 0x88d   : > { %v4218_v10 = vsub.f32 %v8238_v27, %v4198_v54  ;;  %v4195_v47 = vpop.xlane.xlu1 %4194 }
 0x88e   : > { %v4217_v8 = vsub.f32 %v8241_v35, %v4195_v47 }
 0x88f   : > { %v4247_v42 = vmul.f32 1.442695, %v4218_v10 }
 0x890   : > { %v4245_v44 = vmul.f32 1.442695, %v4217_v8 }
 0x891   : > { %5305 = vpow2.f32 %v4247_v42 }
 0x892   : > { %5307 = vpow2.f32 %v4245_v44 }
 0x89b   : > { %v8317_v25 = vpop.eup %5305 }
 0x89c   : > { %v8319_v28 = vpop.eup %5307  ;;  %v4204_v29 = vpop.xlane.xlu0 %4203  ;;  %v4292_v63 = vsel %vm4156_vm5, %v8317_v25, 0.0 }
 0x89d   : > { %v4220_v43 = vsub.f32 %v8248_v39, %v4204_v29  ;;  %v4201_v46 = vpop.xlane.xlu1 %4200  ;;  %4293 = vadd.xlane.f32.xlu0 %v4292_v63  ;;  %v4289_v27 = vsel %vm4156_vm5, %v8319_v28, 0.0 }
 0x89e   : > { %v4219_v35 = vsub.f32 %v8251_v2, %v4201_v46  ;;  %4290 = vadd.xlane.f32.xlu1 %v4289_v27 }
 0x89f   : > { %v4251_v7 = vmul.f32 1.442695, %v4220_v43 }
 0x8a0   : > { %v4249_v60 = vmul.f32 1.442695, %v4219_v35 }
 0x8a1   : > { %5309 = vpow2.f32 %v4251_v7 }
 0x8a2   : > { %5311 = vpow2.f32 %v4249_v60 }
 0x8a7   : > { %v4258_v61 = vpop.xlane.xlu0 %4257 }
 0x8a8   : > { %5313 = vrcp.f32 %v4258_v61  ;;  %v4255_v16 = vpop.xlane.xlu1 %4254 }
 0x8a9   : > { %5315 = vrcp.f32 %v4255_v16 }
 0x8ab   : > { %v8327_v58 = vpop.eup %5309 }
 0x8ac   : > { %v8329_v39 = vpop.eup %5311  ;;  %v4298_v20 = vsel %vm4156_vm5, %v8327_v58, 0.0 }
 0x8ad   : > { %4299 = vadd.xlane.f32.xlu0 %v4298_v20  ;;  %v4295_v2 = vsel %vm4156_vm5, %v8329_v39, 0.0 }
 0x8ae   : > { %4296 = vadd.xlane.f32.xlu1 %v4295_v2 }
 0x8b2   : > { %v5314_v5 = vpop.eup %5313 }
 0x8b3   : > { %v5316_v56 = vpop.eup %5315  ;;  %v4304_v31 = vmul.f32 %v5314_v5, %v8257_v50 }
 0x8b4   : > { %v4302_v15 = vmul.f32 %v5316_v56, %v8259_v24 }
 0x8b5   : > { %4334 = vst.msk [vmem:[%s8340_s9 + $0x8] sm:$0xff] %vm4156_vm5, %v4304_v31 }
 0x8b6   : > { %4333 = vst.msk [vmem:[%s8340_s9] sm:$0xff] %vm4156_vm5, %v4302_v15 }
 0x8c8   : > { %v4261_v38 = vpop.xlane.xlu1 %4260 }
 0x8c9   : > { %5317 = vrcp.f32 %v4261_v38 }
 0x8cc   : > { %v4264_v9 = vpop.xlane.xlu0 %4263 }
 0x8cd   : > { %5319 = vrcp.f32 %v4264_v9 }
 0x8d3   : > { %v5318_v18 = vpop.eup %5317 }
 0x8d4   : > { %v4306_v14 = vmul.f32 %v5318_v18, %v8267_v62 }
 0x8d6   : > { %4335 = vst.msk [vmem:[%s8340_s9 + $0x10] sm:$0xff] %vm4156_vm5, %v4306_v14 }
 0x8d7   : > { %v5320_v53 = vpop.eup %5319 }
 0x8d8   : > { %v4308_v50 = vmul.f32 %v5320_v53, %v8271_v59 }
 0x8da   : > { %4336 = vst.msk [vmem:[%s8340_s9 + $0x18] sm:$0xff] %vm4156_vm5, %v4308_v50 }
 0x8ec   : > { %v4270_v24 = vpop.xlane.xlu0 %4269 }
 0x8ed   : > { %5321 = vrcp.f32 %v4270_v24  ;;  %v4267_v12 = vpop.xlane.xlu1 %4266 }
 0x8ee   : > { %5323 = vrcp.f32 %v4267_v12 }
 0x8f7   : > { %v5322_v11 = vpop.eup %5321  ;;  %v4276_v40 = vpop.xlane.xlu0 %4275 }
 0x8f8   : > { %v5324_v51 = vpop.eup %5323  ;;  %v4312_v0 = vmul.f32 %v5322_v11, %v8279_v3  ;;  %5325 = vrcp.f32 %v4276_v40  ;;  %v4273_v62 = vpop.xlane.xlu1 %4272 }
 0x8f9   : > { %v4310_v32 = vmul.f32 %v5324_v51, %v8281_v48  ;;  %5327 = vrcp.f32 %v4273_v62 }
 0x8fa   : > { %4338 = vst.msk [vmem:[%s8340_s9 + $0x28] sm:$0xff] %vm4156_vm5, %v4312_v0 }
 0x8fb   : > { %4337 = vst.msk [vmem:[%s8340_s9 + $0x20] sm:$0xff] %vm4156_vm5, %v4310_v32  ;;  %v4282_v59 = vpop.xlane.xlu0 %4281 }
 0x8fc   : > { %5329 = vrcp.f32 %v4282_v59  ;;  %v4279_v57 = vpop.xlane.xlu1 %4278 }
 0x8fd   : > { %5331 = vrcp.f32 %v4279_v57 }
 0x902   : > { %v5326_v52 = vpop.eup %5325 }
 0x903   : > { %v5328_v6 = vpop.eup %5327  ;;  %v4316_v3 = vmul.f32 %v5326_v52, %v8289_v21 }
 0x904   : > { %v4314_v22 = vmul.f32 %v5328_v6, %v8291_v37 }
 0x905   : > { %4340 = vst.msk [vmem:[%s8340_s9 + $0x38] sm:$0xff] %vm4156_vm5, %v4316_v3 }
 0x906   : > { %v5330_v48 = vpop.eup %5329  ;;  %4339 = vst.msk [vmem:[%s8340_s9 + $0x30] sm:$0xff] %vm4156_vm5, %v4314_v22 }
 0x907   : > { %v5332_v49 = vpop.eup %5331  ;;  %v4320_v17 = vmul.f32 %v5330_v48, %v8299_v4 }
 0x908   : > { %v4318_v36 = vmul.f32 %v5332_v49, %v8301_v1 }
 0x909   : > { %4342 = vst.msk [vmem:[%s8340_s9 + $0x48] sm:$0xff] %vm4156_vm5, %v4320_v17 }
 0x90a   : > { %v4288_v26 = vpop.xlane.xlu0 %4287  ;;  %4341 = vst.msk [vmem:[%s8340_s9 + $0x40] sm:$0xff] %vm4156_vm5, %v4318_v36 }
 0x90b   : > { %5333 = vrcp.f32 %v4288_v26  ;;  %v4285_v30 = vpop.xlane.xlu1 %4284 }
 0x90c   : > { %5335 = vrcp.f32 %v4285_v30 }
 0x915   : > { %v5334_v21 = vpop.eup %5333 }
 0x916   : > { %v5336_v37 = vpop.eup %5335  ;;  %v4324_v45 = vmul.f32 %v5334_v21, %v8307_v13 }
 0x917   : > { %v4322_v19 = vmul.f32 %v5336_v37, %v8309_v34 }
 0x918   : > { %4344 = vst.msk [vmem:[%s8340_s9 + $0x58] sm:$0xff] %vm4156_vm5, %v4324_v45 }
 0x919   : > { %4343 = vst.msk [vmem:[%s8340_s9 + $0x50] sm:$0xff] %vm4156_vm5, %v4322_v19 }
 0x92a   : > { %v4294_v4 = vpop.xlane.xlu0 %4293 }
 0x92b   : > { %5337 = vrcp.f32 %v4294_v4  ;;  %v4291_v1 = vpop.xlane.xlu1 %4290 }
 0x92c   : > { %5339 = vrcp.f32 %v4291_v1 }
 0x935   : > { %v5338_v41 = vpop.eup %5337 }
 0x936   : > { %v5340_v55 = vpop.eup %5339  ;;  %v4328_v33 = vmul.f32 %v5338_v41, %v8317_v25 }
 0x937   : > { %v4326_v23 = vmul.f32 %v5340_v55, %v8319_v28 }
 0x938   : > { %4346 = vst.msk [vmem:[%s8340_s9 + $0x68] sm:$0xff] %vm4156_vm5, %v4328_v33 }
 0x939   : > { %4345 = vst.msk [vmem:[%s8340_s9 + $0x60] sm:$0xff] %vm4156_vm5, %v4326_v23 }
 0x93a   : > { %v4300_v13 = vpop.xlane.xlu0 %4299 }
 0x93b   : > { %5341 = vrcp.f32 %v4300_v13  ;;  %v4297_v34 = vpop.xlane.xlu1 %4296 }
 0x93c   : > { %5343 = vrcp.f32 %v4297_v34 }
 0x945   : > { %v5342_v54 = vpop.eup %5341 }
 0x946   : > { %v5344_v10 = vpop.eup %5343  ;;  %v4332_v47 = vmul.f32 %v5342_v54, %v8327_v58 }
 0x947   : > { %v4330_v8 = vmul.f32 %v5344_v10, %v8329_v39 }
 0x948   : > { %4348 = vst.msk [vmem:[%s8340_s9 + $0x78] sm:$0xff] %vm4156_vm5, %v4332_v47 }
 0x949   : > { %4347 = vst.msk [vmem:[%s8340_s9 + $0x70] sm:$0xff] %vm4156_vm5, %v4330_v8 }
 0x94a PF: > { %s17_s24 = sadd.s32 1, %s5385_s24  }
 0x94b   : > { %p14_p5 = scmp.ge.s32.totalorder %s17_s24, 4  }
 0x94d   :  { %16 = sbr.rel (!%p14_p5) target bundleno = 1 (0x1), region = 84 }

</bundles_post_ra>
